<compile_context>
chip_gen: v5e
topology: v5e:2x2
jax: 0.10.0
libtpu: 0.0.40
codegen_flags: <defaults>
</compile_context>

<pallas_src>
import functools

import jax
import jax.numpy as jnp
from jax.experimental import pallas as pl
from jax.experimental.pallas import tpu as pltpu

# Encoder + decoder layer widths (PyTorch nn.Linear in/out features).
LAYER_DIMS = [784, 256, 128, 64, 32, 16, 8, 4, 2, 4, 8, 16, 32, 64, 128, 256, 784]
NUM_LAYERS = len(LAYER_DIMS) - 1            # 16
BOTTLENECK_LAYER = 8                        # z is taken after enc8 (loop index 7)
LATENT_DIM = LAYER_DIMS[BOTTLENECK_LAYER]   # 2
IN_DIM = LAYER_DIMS[0]                      # 784
OUT_DIM = LAYER_DIMS[-1]                    # 784

# Lane-dense padded widths used *inside* the kernel:
#   enc8 out / dec1 in : 2   -> 128  (unmasked z store; zero-padded weights)
#   dec8 out           : 784 -> 896  (896 = 7*128 -> unmasked 128-lane stores)
Z_PAD = 128
OUT_PAD = 896
PADDED_DIMS = list(LAYER_DIMS)
PADDED_DIMS[BOTTLENECK_LAYER] = Z_PAD
PADDED_DIMS[-1] = OUT_PAD
BIAS_PAD = OUT_PAD                          # fused bias slab: [16, 896] f32

TARGET_B_TILE = 1024                        # big tile hides MXU push/drain latency
B_ALIGN = 256                               # bf16-sublane & MXU-M aligned row granule


def _round_up(x, m):
    return (x + m - 1) // m * m


def _choose_tiling(batch, target_tile=TARGET_B_TILE, align=B_ALIGN):
    """Pick (padded_batch, b_tile): big tiles for throughput, >=2 grid steps when
    possible so dimension_semantics=("parallel",) can use both v7x TensorCores."""
    padded = _round_up(max(batch, 1), align)
    b_tile = min(target_tile, padded)
    padded = _round_up(padded, b_tile)
    if padded // b_tile == 1 and b_tile >= 2 * align:
        b_tile //= 2                        # split one oversized block across 2 TCs
    return padded, b_tile


def autoencoder_kernel(*refs):
    """refs = (x_ref, w1..w16, bias_cat_ref, out_ref, z_ref)."""
    x_ref = refs[0]
    w_refs = refs[1:1 + NUM_LAYERS]
    bias_ref = refs[1 + NUM_LAYERS]
    out_ref = refs[2 + NUM_LAYERS]
    z_ref = refs[3 + NUM_LAYERS]

    h = x_ref[...]                                       # bf16 [b_tile, 784]
    acc = None
    for i in range(NUM_LAYERS):                          # statically unrolled
        out_dim = PADDED_DIMS[i + 1]
        w = w_refs[i][...]                               # bf16 [in_pad, out_pad]
        b = bias_ref[i:i + 1, :out_dim]                  # f32  [1, out_pad] (zero-padded)
        acc = jnp.dot(h, w, preferred_element_type=jnp.float32) + b
        acc = jnp.maximum(acc, 0.0)                      # F.relu
        if i == BOTTLENECK_LAYER - 1:
            z_ref[...] = acc                             # lane-dense [b_tile, 128]; lanes >=2 are 0
        h = acc.astype(jnp.bfloat16)                     # bf16 feed for next MXU pass
    out_ref[...] = acc.astype(out_ref.dtype)             # lane-dense [b_tile, 896]; ReLU on dec8 per spec


def prepare_params(params):
    """One-time packing (hoisted out of the hot path, per perf review):
    zero-padded bf16 [in, out] weights + one fused lane-dense f32 bias slab."""
    w_list = []
    for i, (w, _) in enumerate(params):
        wp = jnp.zeros((PADDED_DIMS[i], PADDED_DIMS[i + 1]), jnp.bfloat16)
        wp = wp.at[:LAYER_DIMS[i], :LAYER_DIMS[i + 1]].set(w.astype(jnp.bfloat16))
        w_list.append(wp)
    bias_cat = jnp.zeros((NUM_LAYERS, BIAS_PAD), jnp.float32)
    for i, (_, b) in enumerate(params):
        bias_cat = bias_cat.at[i, :LAYER_DIMS[i + 1]].set(b.reshape(-1))
    return tuple(w_list), bias_cat


@functools.partial(jax.jit, static_argnames=("out_dtype",))
def autoencoder_forward(x, w_list, bias_cat, *, out_dtype=jnp.float32):
    """x: [B, 784] f32; (w_list, bias_cat) from prepare_params().
    out_dtype=jnp.bfloat16 optionally halves reconstruction writeback (v7x)."""
    batch = x.shape[0]
    padded, b_tile = _choose_tiling(batch)

    x_bf = x.astype(jnp.bfloat16)
    if padded != batch:
        x_bf = jnp.pad(x_bf, ((0, padded - batch), (0, 0)))

    grid = (padded // b_tile,)

    in_specs = [pl.BlockSpec((b_tile, IN_DIM), lambda i: (i, 0))]
    for li in range(NUM_LAYERS):
        # Constant block index: weights DMA'd once, VMEM-resident across the grid.
        in_specs.append(
            pl.BlockSpec((PADDED_DIMS[li], PADDED_DIMS[li + 1]), lambda i: (0, 0)))
    in_specs.append(pl.BlockSpec((NUM_LAYERS, BIAS_PAD), lambda i: (0, 0)))

    out_specs = (
        pl.BlockSpec((b_tile, OUT_PAD), lambda i: (i, 0)),
        pl.BlockSpec((b_tile, Z_PAD), lambda i: (i, 0)),
    )
    out_shapes = (
        jax.ShapeDtypeStruct((padded, OUT_PAD), out_dtype),        # reconstruction (padded lanes)
        jax.ShapeDtypeStruct((padded, Z_PAD), jnp.float32),        # latent z (padded lanes)
    )

    total_mac = sum(PADDED_DIMS[i] * PADDED_DIMS[i + 1] for i in range(NUM_LAYERS))
    out_bytes = jnp.dtype(out_dtype).itemsize
    bytes_accessed = (
        padded * IN_DIM * 2
        + padded * OUT_PAD * out_bytes
        + padded * Z_PAD * 4
        + sum(int(w.size) for w in w_list) * 2
        + int(bias_cat.size) * 4
    )
    cost = pl.CostEstimate(
        flops=2 * padded * total_mac,
        transcendentals=0,
        bytes_accessed=int(bytes_accessed),
    )

    out, z = pl.pallas_call(
        autoencoder_kernel,
        out_shape=out_shapes,
        grid=grid,
        in_specs=in_specs,
        out_specs=out_specs,
        compiler_params=pltpu.CompilerParams(
            dimension_semantics=("parallel",),     # dual-TC sharding on v7x
            vmem_limit_bytes=48 << 20,             # fits v7x's 64 MiB VMEM with headroom
        ),
        cost_estimate=cost,
    )(x_bf, *w_list, bias_cat)

    return out[:batch, :OUT_DIM], z[:batch, :LATENT_DIM]


def init_params(key):
    """Deterministic init mimicking PyTorch nn.Linear default (U(-k, k), k=1/sqrt(fan_in)).
    Weights are stored pre-transposed relative to PyTorch: [in, out]."""
    params = []
    for i in range(NUM_LAYERS):
        fan_in, fan_out = LAYER_DIMS[i], LAYER_DIMS[i + 1]
        key, kw, kb = jax.random.split(key, 3)
        bound = 1.0 / jnp.sqrt(jnp.float32(fan_in))
        w = jax.random.uniform(kw, (fan_in, fan_out), jnp.float32, -bound, bound)
        b = jax.random.uniform(kb, (1, fan_out), jnp.float32, -bound, bound)
        params.append((w, b))
    return params


def reference_forward(x, params):
    """Plain-JAX reference mirroring the kernel's bf16-inputs / f32-accumulation math
    on the *unpadded* layer widths (zero-padding in the kernel is math-neutral)."""
    h = x.astype(jnp.bfloat16)
    z = None
    acc = None
    for i, (w, b) in enumerate(params):
        acc = jnp.dot(h, w.astype(jnp.bfloat16), preferred_element_type=jnp.float32) + b
        acc = jnp.maximum(acc, 0.0)
        if i == BOTTLENECK_LAYER - 1:
            z = acc
        h = acc.astype(jnp.bfloat16)
    return acc, z


if __name__ == "__main__":
    key = jax.random.PRNGKey(0)
    key, kx = jax.random.split(key)

    # Non-multiple-of-tile batch: exercises padding, the adaptive tile picker
    # (300 -> padded 512, b_tile 256) and a 2-step "parallel" grid.
    batch = 300
    x = jax.random.uniform(kx, (batch, IN_DIM), jnp.float32)  # flattened 28x28 images
    params = init_params(key)

    w_list, bias_cat = prepare_params(params)                 # one-time packing
    out, z = jax.block_until_ready(autoencoder_forward(x, w_list, bias_cat))

    ref_out, ref_z = reference_forward(x, params)
    assert out.shape == (batch, OUT_DIM) and z.shape == (batch, LATENT_DIM)
    assert jnp.allclose(out, ref_out, atol=1e-2, rtol=1e-2), float(jnp.max(jnp.abs(out - ref_out)))
    assert jnp.allclose(z, ref_z, atol=1e-2, rtol=1e-2), float(jnp.max(jnp.abs(z - ref_z)))

    print("KERNEL_OK")
</pallas_src>

<mosaic_0001>
module attributes {stable_mosaic.version = 11 : i64} {
  func.func @autoencoder_kernel(%arg0: i32, %arg1: memref<256x784xbf16, #tpu.memory_space<vmem>>, %arg2: memref<784x256xbf16, #tpu.memory_space<vmem>>, %arg3: memref<256x128xbf16, #tpu.memory_space<vmem>>, %arg4: memref<128x64xbf16, #tpu.memory_space<vmem>>, %arg5: memref<64x32xbf16, #tpu.memory_space<vmem>>, %arg6: memref<32x16xbf16, #tpu.memory_space<vmem>>, %arg7: memref<16x8xbf16, #tpu.memory_space<vmem>>, %arg8: memref<8x4xbf16, #tpu.memory_space<vmem>>, %arg9: memref<4x128xbf16, #tpu.memory_space<vmem>>, %arg10: memref<128x4xbf16, #tpu.memory_space<vmem>>, %arg11: memref<4x8xbf16, #tpu.memory_space<vmem>>, %arg12: memref<8x16xbf16, #tpu.memory_space<vmem>>, %arg13: memref<16x32xbf16, #tpu.memory_space<vmem>>, %arg14: memref<32x64xbf16, #tpu.memory_space<vmem>>, %arg15: memref<64x128xbf16, #tpu.memory_space<vmem>>, %arg16: memref<128x256xbf16, #tpu.memory_space<vmem>>, %arg17: memref<256x896xbf16, #tpu.memory_space<vmem>>, %arg18: memref<16x896xf32, #tpu.memory_space<vmem>>, %arg19: memref<256x896xf32, #tpu.memory_space<vmem>>, %arg20: memref<256x128xf32, #tpu.memory_space<vmem>>) attributes {dimension_semantics = [#tpu.dimension_semantics<parallel>], iteration_bounds = array<i64: 2>, scalar_prefetch = 0 : i64, scratch_operands = 0 : i64, tpu.core_type = #tpu.core_type<tc>, window_params = [{transform_indices = @transform_0, window_bounds = array<i64: 256, 784>}, {pipeline_mode = #tpu.pipeline_mode<synchronous>, transform_indices = @transform_1, window_bounds = array<i64: 784, 256>}, {pipeline_mode = #tpu.pipeline_mode<synchronous>, transform_indices = @transform_2, window_bounds = array<i64: 256, 128>}, {pipeline_mode = #tpu.pipeline_mode<synchronous>, transform_indices = @transform_3, window_bounds = array<i64: 128, 64>}, {pipeline_mode = #tpu.pipeline_mode<synchronous>, transform_indices = @transform_4, window_bounds = array<i64: 64, 32>}, {pipeline_mode = #tpu.pipeline_mode<synchronous>, transform_indices = @transform_5, window_bounds = array<i64: 32, 16>}, {pipeline_mode = #tpu.pipeline_mode<synchronous>, transform_indices = @transform_6, window_bounds = array<i64: 16, 8>}, {pipeline_mode = #tpu.pipeline_mode<synchronous>, transform_indices = @transform_7, window_bounds = array<i64: 8, 4>}, {pipeline_mode = #tpu.pipeline_mode<synchronous>, transform_indices = @transform_8, window_bounds = array<i64: 4, 128>}, {pipeline_mode = #tpu.pipeline_mode<synchronous>, transform_indices = @transform_9, window_bounds = array<i64: 128, 4>}, {pipeline_mode = #tpu.pipeline_mode<synchronous>, transform_indices = @transform_10, window_bounds = array<i64: 4, 8>}, {pipeline_mode = #tpu.pipeline_mode<synchronous>, transform_indices = @transform_11, window_bounds = array<i64: 8, 16>}, {pipeline_mode = #tpu.pipeline_mode<synchronous>, transform_indices = @transform_12, window_bounds = array<i64: 16, 32>}, {pipeline_mode = #tpu.pipeline_mode<synchronous>, transform_indices = @transform_13, window_bounds = array<i64: 32, 64>}, {pipeline_mode = #tpu.pipeline_mode<synchronous>, transform_indices = @transform_14, window_bounds = array<i64: 64, 128>}, {pipeline_mode = #tpu.pipeline_mode<synchronous>, transform_indices = @transform_15, window_bounds = array<i64: 128, 256>}, {pipeline_mode = #tpu.pipeline_mode<synchronous>, transform_indices = @transform_16, window_bounds = array<i64: 256, 896>}, {pipeline_mode = #tpu.pipeline_mode<synchronous>, transform_indices = @transform_17, window_bounds = array<i64: 16, 896>}, {transform_indices = @transform_18, window_bounds = array<i64: 256, 896>}, {transform_indices = @transform_19, window_bounds = array<i64: 256, 128>}]} {
    %c0 = arith.constant 0 : index
    %c0_0 = arith.constant 0 : index
    %0 = vector.load %arg1[%c0, %c0_0] : memref<256x784xbf16, #tpu.memory_space<vmem>>, vector<256x784xbf16>
    %c0_1 = arith.constant 0 : index
    %c0_2 = arith.constant 0 : index
    %1 = vector.load %arg2[%c0_1, %c0_2] : memref<784x256xbf16, #tpu.memory_space<vmem>>, vector<784x256xbf16>
    %c0_3 = arith.constant 0 : index
    %c0_4 = arith.constant 0 : index
    %2 = vector.load %arg18[%c0_3, %c0_4] : memref<16x896xf32, #tpu.memory_space<vmem>>, vector<1x256xf32>
    %cst = arith.constant dense<0.000000e+00> : vector<256x256xf32>
    %3 = tpu.matmul %0, %1, %cst {dimension_numbers = #tpu.dot_dimension_numbers<[1], [0], [0], [1], [0, 0, 1, 1], [], []>} : vector<256x784xbf16>, vector<784x256xbf16>, vector<256x256xf32> -> vector<256x256xf32>
    %4 = vector.broadcast %2 : vector<1x256xf32> to vector<256x256xf32>
    %5 = arith.addf %3, %4 : vector<256x256xf32>
    %cst_5 = arith.constant 0.000000e+00 : f32
    %6 = vector.broadcast %cst_5 : f32 to vector<256x256xf32>
    %7 = arith.maximumf %5, %6 : vector<256x256xf32>
    %8 = arith.truncf %7 : vector<256x256xf32> to vector<256x256xbf16>
    %c0_6 = arith.constant 0 : index
    %c0_7 = arith.constant 0 : index
    %9 = vector.load %arg3[%c0_6, %c0_7] : memref<256x128xbf16, #tpu.memory_space<vmem>>, vector<256x128xbf16>
    %c1 = arith.constant 1 : index
    %c0_8 = arith.constant 0 : index
    %10 = vector.load %arg18[%c1, %c0_8] : memref<16x896xf32, #tpu.memory_space<vmem>>, vector<1x128xf32>
    %cst_9 = arith.constant dense<0.000000e+00> : vector<256x128xf32>
    %11 = tpu.matmul %8, %9, %cst_9 {dimension_numbers = #tpu.dot_dimension_numbers<[1], [0], [0], [1], [0, 0, 1, 1], [], []>} : vector<256x256xbf16>, vector<256x128xbf16>, vector<256x128xf32> -> vector<256x128xf32>
    %12 = vector.broadcast %10 : vector<1x128xf32> to vector<256x128xf32>
    %13 = arith.addf %11, %12 : vector<256x128xf32>
    %cst_10 = arith.constant 0.000000e+00 : f32
    %14 = vector.broadcast %cst_10 : f32 to vector<256x128xf32>
    %15 = arith.maximumf %13, %14 : vector<256x128xf32>
    %16 = arith.truncf %15 : vector<256x128xf32> to vector<256x128xbf16>
    %c0_11 = arith.constant 0 : index
    %c0_12 = arith.constant 0 : index
    %17 = vector.load %arg4[%c0_11, %c0_12] : memref<128x64xbf16, #tpu.memory_space<vmem>>, vector<128x64xbf16>
    %c2 = arith.constant 2 : index
    %c0_13 = arith.constant 0 : index
    %18 = vector.load %arg18[%c2, %c0_13] : memref<16x896xf32, #tpu.memory_space<vmem>>, vector<1x64xf32>
    %cst_14 = arith.constant dense<0.000000e+00> : vector<256x64xf32>
    %19 = tpu.matmul %16, %17, %cst_14 {dimension_numbers = #tpu.dot_dimension_numbers<[1], [0], [0], [1], [0, 0, 1, 1], [], []>} : vector<256x128xbf16>, vector<128x64xbf16>, vector<256x64xf32> -> vector<256x64xf32>
    %20 = vector.broadcast %18 : vector<1x64xf32> to vector<256x64xf32>
    %21 = arith.addf %19, %20 : vector<256x64xf32>
    %cst_15 = arith.constant 0.000000e+00 : f32
    %22 = vector.broadcast %cst_15 : f32 to vector<256x64xf32>
    %23 = arith.maximumf %21, %22 : vector<256x64xf32>
    %24 = arith.truncf %23 : vector<256x64xf32> to vector<256x64xbf16>
    %c0_16 = arith.constant 0 : index
    %c0_17 = arith.constant 0 : index
    %25 = vector.load %arg5[%c0_16, %c0_17] : memref<64x32xbf16, #tpu.memory_space<vmem>>, vector<64x32xbf16>
    %c3 = arith.constant 3 : index
    %c0_18 = arith.constant 0 : index
    %26 = vector.load %arg18[%c3, %c0_18] : memref<16x896xf32, #tpu.memory_space<vmem>>, vector<1x32xf32>
    %cst_19 = arith.constant dense<0.000000e+00> : vector<256x32xf32>
    %27 = tpu.matmul %24, %25, %cst_19 {dimension_numbers = #tpu.dot_dimension_numbers<[1], [0], [0], [1], [0, 0, 1, 1], [], []>} : vector<256x64xbf16>, vector<64x32xbf16>, vector<256x32xf32> -> vector<256x32xf32>
    %28 = vector.broadcast %26 : vector<1x32xf32> to vector<256x32xf32>
    %29 = arith.addf %27, %28 : vector<256x32xf32>
    %cst_20 = arith.constant 0.000000e+00 : f32
    %30 = vector.broadcast %cst_20 : f32 to vector<256x32xf32>
    %31 = arith.maximumf %29, %30 : vector<256x32xf32>
    %32 = arith.truncf %31 : vector<256x32xf32> to vector<256x32xbf16>
    %c0_21 = arith.constant 0 : index
    %c0_22 = arith.constant 0 : index
    %33 = vector.load %arg6[%c0_21, %c0_22] : memref<32x16xbf16, #tpu.memory_space<vmem>>, vector<32x16xbf16>
    %c4 = arith.constant 4 : index
    %c0_23 = arith.constant 0 : index
    %34 = vector.load %arg18[%c4, %c0_23] : memref<16x896xf32, #tpu.memory_space<vmem>>, vector<1x16xf32>
    %cst_24 = arith.constant dense<0.000000e+00> : vector<256x16xf32>
    %35 = tpu.matmul %32, %33, %cst_24 {dimension_numbers = #tpu.dot_dimension_numbers<[1], [0], [0], [1], [0, 0, 1, 1], [], []>} : vector<256x32xbf16>, vector<32x16xbf16>, vector<256x16xf32> -> vector<256x16xf32>
    %36 = vector.broadcast %34 : vector<1x16xf32> to vector<256x16xf32>
    %37 = arith.addf %35, %36 : vector<256x16xf32>
    %cst_25 = arith.constant 0.000000e+00 : f32
    %38 = vector.broadcast %cst_25 : f32 to vector<256x16xf32>
    %39 = arith.maximumf %37, %38 : vector<256x16xf32>
    %40 = arith.truncf %39 : vector<256x16xf32> to vector<256x16xbf16>
    %c0_26 = arith.constant 0 : index
    %c0_27 = arith.constant 0 : index
    %41 = vector.load %arg7[%c0_26, %c0_27] : memref<16x8xbf16, #tpu.memory_space<vmem>>, vector<16x8xbf16>
    %c5 = arith.constant 5 : index
    %c0_28 = arith.constant 0 : index
    %42 = vector.load %arg18[%c5, %c0_28] : memref<16x896xf32, #tpu.memory_space<vmem>>, vector<1x8xf32>
    %cst_29 = arith.constant dense<0.000000e+00> : vector<256x8xf32>
    %43 = tpu.matmul %40, %41, %cst_29 {dimension_numbers = #tpu.dot_dimension_numbers<[1], [0], [0], [1], [0, 0, 1, 1], [], []>} : vector<256x16xbf16>, vector<16x8xbf16>, vector<256x8xf32> -> vector<256x8xf32>
    %44 = vector.broadcast %42 : vector<1x8xf32> to vector<256x8xf32>
    %45 = arith.addf %43, %44 : vector<256x8xf32>
    %cst_30 = arith.constant 0.000000e+00 : f32
    %46 = vector.broadcast %cst_30 : f32 to vector<256x8xf32>
    %47 = arith.maximumf %45, %46 : vector<256x8xf32>
    %48 = arith.truncf %47 : vector<256x8xf32> to vector<256x8xbf16>
    %c0_31 = arith.constant 0 : index
    %c0_32 = arith.constant 0 : index
    %49 = vector.load %arg8[%c0_31, %c0_32] : memref<8x4xbf16, #tpu.memory_space<vmem>>, vector<8x4xbf16>
    %c6 = arith.constant 6 : index
    %c0_33 = arith.constant 0 : index
    %50 = vector.load %arg18[%c6, %c0_33] : memref<16x896xf32, #tpu.memory_space<vmem>>, vector<1x4xf32>
    %cst_34 = arith.constant dense<0.000000e+00> : vector<256x4xf32>
    %51 = tpu.matmul %48, %49, %cst_34 {dimension_numbers = #tpu.dot_dimension_numbers<[1], [0], [0], [1], [0, 0, 1, 1], [], []>} : vector<256x8xbf16>, vector<8x4xbf16>, vector<256x4xf32> -> vector<256x4xf32>
    %52 = vector.broadcast %50 : vector<1x4xf32> to vector<256x4xf32>
    %53 = arith.addf %51, %52 : vector<256x4xf32>
    %cst_35 = arith.constant 0.000000e+00 : f32
    %54 = vector.broadcast %cst_35 : f32 to vector<256x4xf32>
    %55 = arith.maximumf %53, %54 : vector<256x4xf32>
    %56 = arith.truncf %55 : vector<256x4xf32> to vector<256x4xbf16>
    %c0_36 = arith.constant 0 : index
    %c0_37 = arith.constant 0 : index
    %57 = vector.load %arg9[%c0_36, %c0_37] : memref<4x128xbf16, #tpu.memory_space<vmem>>, vector<4x128xbf16>
    %c7 = arith.constant 7 : index
    %c0_38 = arith.constant 0 : index
    %58 = vector.load %arg18[%c7, %c0_38] : memref<16x896xf32, #tpu.memory_space<vmem>>, vector<1x128xf32>
    %cst_39 = arith.constant dense<0.000000e+00> : vector<256x128xf32>
    %59 = tpu.matmul %56, %57, %cst_39 {dimension_numbers = #tpu.dot_dimension_numbers<[1], [0], [0], [1], [0, 0, 1, 1], [], []>} : vector<256x4xbf16>, vector<4x128xbf16>, vector<256x128xf32> -> vector<256x128xf32>
    %60 = vector.broadcast %58 : vector<1x128xf32> to vector<256x128xf32>
    %61 = arith.addf %59, %60 : vector<256x128xf32>
    %cst_40 = arith.constant 0.000000e+00 : f32
    %62 = vector.broadcast %cst_40 : f32 to vector<256x128xf32>
    %63 = arith.maximumf %61, %62 : vector<256x128xf32>
    %c0_41 = arith.constant 0 : index
    %c0_42 = arith.constant 0 : index
    %64 = vector.load %arg20[%c0_41, %c0_42] : memref<256x128xf32, #tpu.memory_space<vmem>>, vector<256x128xf32>
    tpu.vector_store %arg20[%c0_41, %c0_42], %63 {strides = array<i32>} : memref<256x128xf32, #tpu.memory_space<vmem>>, vector<256x128xf32>,
    %65 = arith.truncf %63 : vector<256x128xf32> to vector<256x128xbf16>
    %c0_43 = arith.constant 0 : index
    %c0_44 = arith.constant 0 : index
    %66 = vector.load %arg10[%c0_43, %c0_44] : memref<128x4xbf16, #tpu.memory_space<vmem>>, vector<128x4xbf16>
    %c8 = arith.constant 8 : index
    %c0_45 = arith.constant 0 : index
    %67 = vector.load %arg18[%c8, %c0_45] : memref<16x896xf32, #tpu.memory_space<vmem>>, vector<1x4xf32>
    %cst_46 = arith.constant dense<0.000000e+00> : vector<256x4xf32>
    %68 = tpu.matmul %65, %66, %cst_46 {dimension_numbers = #tpu.dot_dimension_numbers<[1], [0], [0], [1], [0, 0, 1, 1], [], []>} : vector<256x128xbf16>, vector<128x4xbf16>, vector<256x4xf32> -> vector<256x4xf32>
    %69 = vector.broadcast %67 : vector<1x4xf32> to vector<256x4xf32>
    %70 = arith.addf %68, %69 : vector<256x4xf32>
    %cst_47 = arith.constant 0.000000e+00 : f32
    %71 = vector.broadcast %cst_47 : f32 to vector<256x4xf32>
    %72 = arith.maximumf %70, %71 : vector<256x4xf32>
    %73 = arith.truncf %72 : vector<256x4xf32> to vector<256x4xbf16>
    %c0_48 = arith.constant 0 : index
    %c0_49 = arith.constant 0 : index
    %74 = vector.load %arg11[%c0_48, %c0_49] : memref<4x8xbf16, #tpu.memory_space<vmem>>, vector<4x8xbf16>
    %c9 = arith.constant 9 : index
    %c0_50 = arith.constant 0 : index
    %75 = vector.load %arg18[%c9, %c0_50] : memref<16x896xf32, #tpu.memory_space<vmem>>, vector<1x8xf32>
    %cst_51 = arith.constant dense<0.000000e+00> : vector<256x8xf32>
    %76 = tpu.matmul %73, %74, %cst_51 {dimension_numbers = #tpu.dot_dimension_numbers<[1], [0], [0], [1], [0, 0, 1, 1], [], []>} : vector<256x4xbf16>, vector<4x8xbf16>, vector<256x8xf32> -> vector<256x8xf32>
    %77 = vector.broadcast %75 : vector<1x8xf32> to vector<256x8xf32>
    %78 = arith.addf %76, %77 : vector<256x8xf32>
    %cst_52 = arith.constant 0.000000e+00 : f32
    %79 = vector.broadcast %cst_52 : f32 to vector<256x8xf32>
    %80 = arith.maximumf %78, %79 : vector<256x8xf32>
    %81 = arith.truncf %80 : vector<256x8xf32> to vector<256x8xbf16>
    %c0_53 = arith.constant 0 : index
    %c0_54 = arith.constant 0 : index
    %82 = vector.load %arg12[%c0_53, %c0_54] : memref<8x16xbf16, #tpu.memory_space<vmem>>, vector<8x16xbf16>
    %c10 = arith.constant 10 : index
    %c0_55 = arith.constant 0 : index
    %83 = vector.load %arg18[%c10, %c0_55] : memref<16x896xf32, #tpu.memory_space<vmem>>, vector<1x16xf32>
    %cst_56 = arith.constant dense<0.000000e+00> : vector<256x16xf32>
    %84 = tpu.matmul %81, %82, %cst_56 {dimension_numbers = #tpu.dot_dimension_numbers<[1], [0], [0], [1], [0, 0, 1, 1], [], []>} : vector<256x8xbf16>, vector<8x16xbf16>, vector<256x16xf32> -> vector<256x16xf32>
    %85 = vector.broadcast %83 : vector<1x16xf32> to vector<256x16xf32>
    %86 = arith.addf %84, %85 : vector<256x16xf32>
    %cst_57 = arith.constant 0.000000e+00 : f32
    %87 = vector.broadcast %cst_57 : f32 to vector<256x16xf32>
    %88 = arith.maximumf %86, %87 : vector<256x16xf32>
    %89 = arith.truncf %88 : vector<256x16xf32> to vector<256x16xbf16>
    %c0_58 = arith.constant 0 : index
    %c0_59 = arith.constant 0 : index
    %90 = vector.load %arg13[%c0_58, %c0_59] : memref<16x32xbf16, #tpu.memory_space<vmem>>, vector<16x32xbf16>
    %c11 = arith.constant 11 : index
    %c0_60 = arith.constant 0 : index
    %91 = vector.load %arg18[%c11, %c0_60] : memref<16x896xf32, #tpu.memory_space<vmem>>, vector<1x32xf32>
    %cst_61 = arith.constant dense<0.000000e+00> : vector<256x32xf32>
    %92 = tpu.matmul %89, %90, %cst_61 {dimension_numbers = #tpu.dot_dimension_numbers<[1], [0], [0], [1], [0, 0, 1, 1], [], []>} : vector<256x16xbf16>, vector<16x32xbf16>, vector<256x32xf32> -> vector<256x32xf32>
    %93 = vector.broadcast %91 : vector<1x32xf32> to vector<256x32xf32>
    %94 = arith.addf %92, %93 : vector<256x32xf32>
    %cst_62 = arith.constant 0.000000e+00 : f32
    %95 = vector.broadcast %cst_62 : f32 to vector<256x32xf32>
    %96 = arith.maximumf %94, %95 : vector<256x32xf32>
    %97 = arith.truncf %96 : vector<256x32xf32> to vector<256x32xbf16>
    %c0_63 = arith.constant 0 : index
    %c0_64 = arith.constant 0 : index
    %98 = vector.load %arg14[%c0_63, %c0_64] : memref<32x64xbf16, #tpu.memory_space<vmem>>, vector<32x64xbf16>
    %c12 = arith.constant 12 : index
    %c0_65 = arith.constant 0 : index
    %99 = vector.load %arg18[%c12, %c0_65] : memref<16x896xf32, #tpu.memory_space<vmem>>, vector<1x64xf32>
    %cst_66 = arith.constant dense<0.000000e+00> : vector<256x64xf32>
    %100 = tpu.matmul %97, %98, %cst_66 {dimension_numbers = #tpu.dot_dimension_numbers<[1], [0], [0], [1], [0, 0, 1, 1], [], []>} : vector<256x32xbf16>, vector<32x64xbf16>, vector<256x64xf32> -> vector<256x64xf32>
    %101 = vector.broadcast %99 : vector<1x64xf32> to vector<256x64xf32>
    %102 = arith.addf %100, %101 : vector<256x64xf32>
    %cst_67 = arith.constant 0.000000e+00 : f32
    %103 = vector.broadcast %cst_67 : f32 to vector<256x64xf32>
    %104 = arith.maximumf %102, %103 : vector<256x64xf32>
    %105 = arith.truncf %104 : vector<256x64xf32> to vector<256x64xbf16>
    %c0_68 = arith.constant 0 : index
    %c0_69 = arith.constant 0 : index
    %106 = vector.load %arg15[%c0_68, %c0_69] : memref<64x128xbf16, #tpu.memory_space<vmem>>, vector<64x128xbf16>
    %c13 = arith.constant 13 : index
    %c0_70 = arith.constant 0 : index
    %107 = vector.load %arg18[%c13, %c0_70] : memref<16x896xf32, #tpu.memory_space<vmem>>, vector<1x128xf32>
    %cst_71 = arith.constant dense<0.000000e+00> : vector<256x128xf32>
    %108 = tpu.matmul %105, %106, %cst_71 {dimension_numbers = #tpu.dot_dimension_numbers<[1], [0], [0], [1], [0, 0, 1, 1], [], []>} : vector<256x64xbf16>, vector<64x128xbf16>, vector<256x128xf32> -> vector<256x128xf32>
    %109 = vector.broadcast %107 : vector<1x128xf32> to vector<256x128xf32>
    %110 = arith.addf %108, %109 : vector<256x128xf32>
    %cst_72 = arith.constant 0.000000e+00 : f32
    %111 = vector.broadcast %cst_72 : f32 to vector<256x128xf32>
    %112 = arith.maximumf %110, %111 : vector<256x128xf32>
    %113 = arith.truncf %112 : vector<256x128xf32> to vector<256x128xbf16>
    %c0_73 = arith.constant 0 : index
    %c0_74 = arith.constant 0 : index
    %114 = vector.load %arg16[%c0_73, %c0_74] : memref<128x256xbf16, #tpu.memory_space<vmem>>, vector<128x256xbf16>
    %c14 = arith.constant 14 : index
    %c0_75 = arith.constant 0 : index
    %115 = vector.load %arg18[%c14, %c0_75] : memref<16x896xf32, #tpu.memory_space<vmem>>, vector<1x256xf32>
    %cst_76 = arith.constant dense<0.000000e+00> : vector<256x256xf32>
    %116 = tpu.matmul %113, %114, %cst_76 {dimension_numbers = #tpu.dot_dimension_numbers<[1], [0], [0], [1], [0, 0, 1, 1], [], []>} : vector<256x128xbf16>, vector<128x256xbf16>, vector<256x256xf32> -> vector<256x256xf32>
    %117 = vector.broadcast %115 : vector<1x256xf32> to vector<256x256xf32>
    %118 = arith.addf %116, %117 : vector<256x256xf32>
    %cst_77 = arith.constant 0.000000e+00 : f32
    %119 = vector.broadcast %cst_77 : f32 to vector<256x256xf32>
    %120 = arith.maximumf %118, %119 : vector<256x256xf32>
    %121 = arith.truncf %120 : vector<256x256xf32> to vector<256x256xbf16>
    %c0_78 = arith.constant 0 : index
    %c0_79 = arith.constant 0 : index
    %122 = vector.load %arg17[%c0_78, %c0_79] : memref<256x896xbf16, #tpu.memory_space<vmem>>, vector<256x896xbf16>
    %c15 = arith.constant 15 : index
    %c0_80 = arith.constant 0 : index
    %123 = vector.load %arg18[%c15, %c0_80] : memref<16x896xf32, #tpu.memory_space<vmem>>, vector<1x896xf32>
    %cst_81 = arith.constant dense<0.000000e+00> : vector<256x896xf32>
    %124 = tpu.matmul %121, %122, %cst_81 {dimension_numbers = #tpu.dot_dimension_numbers<[1], [0], [0], [1], [0, 0, 1, 1], [], []>} : vector<256x256xbf16>, vector<256x896xbf16>, vector<256x896xf32> -> vector<256x896xf32>
    %125 = vector.broadcast %123 : vector<1x896xf32> to vector<256x896xf32>
    %126 = arith.addf %124, %125 : vector<256x896xf32>
    %cst_82 = arith.constant 0.000000e+00 : f32
    %127 = vector.broadcast %cst_82 : f32 to vector<256x896xf32>
    %128 = arith.maximumf %126, %127 : vector<256x896xf32>
    %c0_83 = arith.constant 0 : index
    %c0_84 = arith.constant 0 : index
    %129 = vector.load %arg19[%c0_83, %c0_84] : memref<256x896xf32, #tpu.memory_space<vmem>>, vector<256x896xf32>
    tpu.vector_store %arg19[%c0_83, %c0_84], %128 {strides = array<i32>} : memref<256x896xf32, #tpu.memory_space<vmem>>, vector<256x896xf32>,
    return
  }
  func.func @transform_0(%arg0: i32) -> (i32, i32) {
    %c0_i32 = arith.constant 0 : i32
    %c0_i32_0 = arith.constant 0 : i32
    return %arg0, %c0_i32 : i32, i32
  }
  func.func @transform_1(%arg0: i32) -> (i32, i32) {
    %c0_i32 = arith.constant 0 : i32
    %c0_i32_0 = arith.constant 0 : i32
    %c0_i32_1 = arith.constant 0 : i32
    return %c0_i32, %c0_i32_0 : i32, i32
  }
  func.func @transform_2(%arg0: i32) -> (i32, i32) {
    %c0_i32 = arith.constant 0 : i32
    %c0_i32_0 = arith.constant 0 : i32
    %c0_i32_1 = arith.constant 0 : i32
    return %c0_i32, %c0_i32_0 : i32, i32
  }
  func.func @transform_3(%arg0: i32) -> (i32, i32) {
    %c0_i32 = arith.constant 0 : i32
    %c0_i32_0 = arith.constant 0 : i32
    %c0_i32_1 = arith.constant 0 : i32
    return %c0_i32, %c0_i32_0 : i32, i32
  }
  func.func @transform_4(%arg0: i32) -> (i32, i32) {
    %c0_i32 = arith.constant 0 : i32
    %c0_i32_0 = arith.constant 0 : i32
    %c0_i32_1 = arith.constant 0 : i32
    return %c0_i32, %c0_i32_0 : i32, i32
  }
  func.func @transform_5(%arg0: i32) -> (i32, i32) {
    %c0_i32 = arith.constant 0 : i32
    %c0_i32_0 = arith.constant 0 : i32
    %c0_i32_1 = arith.constant 0 : i32
    return %c0_i32, %c0_i32_0 : i32, i32
  }
  func.func @transform_6(%arg0: i32) -> (i32, i32) {
    %c0_i32 = arith.constant 0 : i32
    %c0_i32_0 = arith.constant 0 : i32
    %c0_i32_1 = arith.constant 0 : i32
    return %c0_i32, %c0_i32_0 : i32, i32
  }
  func.func @transform_7(%arg0: i32) -> (i32, i32) {
    %c0_i32 = arith.constant 0 : i32
    %c0_i32_0 = arith.constant 0 : i32
    %c0_i32_1 = arith.constant 0 : i32
    return %c0_i32, %c0_i32_0 : i32, i32
  }
  func.func @transform_8(%arg0: i32) -> (i32, i32) {
    %c0_i32 = arith.constant 0 : i32
    %c0_i32_0 = arith.constant 0 : i32
    %c0_i32_1 = arith.constant 0 : i32
    return %c0_i32, %c0_i32_0 : i32, i32
  }
  func.func @transform_9(%arg0: i32) -> (i32, i32) {
    %c0_i32 = arith.constant 0 : i32
    %c0_i32_0 = arith.constant 0 : i32
    %c0_i32_1 = arith.constant 0 : i32
    return %c0_i32, %c0_i32_0 : i32, i32
  }
  func.func @transform_10(%arg0: i32) -> (i32, i32) {
    %c0_i32 = arith.constant 0 : i32
    %c0_i32_0 = arith.constant 0 : i32
    %c0_i32_1 = arith.constant 0 : i32
    return %c0_i32, %c0_i32_0 : i32, i32
  }
  func.func @transform_11(%arg0: i32) -> (i32, i32) {
    %c0_i32 = arith.constant 0 : i32
    %c0_i32_0 = arith.constant 0 : i32
    %c0_i32_1 = arith.constant 0 : i32
    return %c0_i32, %c0_i32_0 : i32, i32
  }
  func.func @transform_12(%arg0: i32) -> (i32, i32) {
    %c0_i32 = arith.constant 0 : i32
    %c0_i32_0 = arith.constant 0 : i32
    %c0_i32_1 = arith.constant 0 : i32
    return %c0_i32, %c0_i32_0 : i32, i32
  }
  func.func @transform_13(%arg0: i32) -> (i32, i32) {
    %c0_i32 = arith.constant 0 : i32
    %c0_i32_0 = arith.constant 0 : i32
    %c0_i32_1 = arith.constant 0 : i32
    return %c0_i32, %c0_i32_0 : i32, i32
  }
  func.func @transform_14(%arg0: i32) -> (i32, i32) {
    %c0_i32 = arith.constant 0 : i32
    %c0_i32_0 = arith.constant 0 : i32
    %c0_i32_1 = arith.constant 0 : i32
    return %c0_i32, %c0_i32_0 : i32, i32
  }
  func.func @transform_15(%arg0: i32) -> (i32, i32) {
    %c0_i32 = arith.constant 0 : i32
    %c0_i32_0 = arith.constant 0 : i32
    %c0_i32_1 = arith.constant 0 : i32
    return %c0_i32, %c0_i32_0 : i32, i32
  }
  func.func @transform_16(%arg0: i32) -> (i32, i32) {
    %c0_i32 = arith.constant 0 : i32
    %c0_i32_0 = arith.constant 0 : i32
    %c0_i32_1 = arith.constant 0 : i32
    return %c0_i32, %c0_i32_0 : i32, i32
  }
  func.func @transform_17(%arg0: i32) -> (i32, i32) {
    %c0_i32 = arith.constant 0 : i32
    %c0_i32_0 = arith.constant 0 : i32
    %c0_i32_1 = arith.constant 0 : i32
    return %c0_i32, %c0_i32_0 : i32, i32
  }
  func.func @transform_18(%arg0: i32) -> (i32, i32) {
    %c0_i32 = arith.constant 0 : i32
    %c0_i32_0 = arith.constant 0 : i32
    return %arg0, %c0_i32 : i32, i32
  }
  func.func @transform_19(%arg0: i32) -> (i32, i32) {
    %c0_i32 = arith.constant 0 : i32
    %c0_i32_0 = arith.constant 0 : i32
    return %arg0, %c0_i32 : i32, i32
  }
}

</mosaic_0001>

<bundles_post_ra>
// kernel: autoencoder_forward.1
= control target key start
LH: loop header
LB: loop body
LE: loop exit
PB: predicated region body
PF: predicated region fallthrough
CT: control target
= control target key end

     0   :  { %s15458_s0 = inlined_call_operand.vmem [shape: bf16[512,784], index: 0, kind: input, shape index: {}]   ;;  %s15459_s1 = inlined_call_operand.vmem [shape: bf16[784,256], index: 1, kind: input, shape index: {}]   ;;  %s15460_s2 = inlined_call_operand.vmem [shape: bf16[256,128], index: 2, kind: input, shape index: {}]   ;;  %s15461_s3 = inlined_call_operand.vmem [shape: bf16[128,64], index: 3, kind: input, shape index: {}]   ;;  %s15462_s4 = inlined_call_operand.vmem [shape: bf16[64,32], index: 4, kind: input, shape index: {}]   ;;  %s15463_s5 = inlined_call_operand.vmem [shape: bf16[32,16], index: 5, kind: input, shape index: {}]   ;;  %s15464_s6 = inlined_call_operand.vmem [shape: bf16[16,8], index: 6, kind: input, shape index: {}]   ;;  %s15465_s7 = inlined_call_operand.vmem [shape: bf16[8,4], index: 7, kind: input, shape index: {}]   ;;  %s15466_s8 = inlined_call_operand.vmem [shape: bf16[4,128], index: 8, kind: input, shape index: {}]   ;;  %s15467_s9 = inlined_call_operand.vmem [shape: bf16[128,4], index: 9, kind: input, shape index: {}]   ;;  %s15468_s10 = inlined_call_operand.vmem [shape: bf16[4,8], index: 10, kind: input, shape index: {}]   ;;  %s15469_s11 = inlined_call_operand.vmem [shape: bf16[8,16], index: 11, kind: input, shape index: {}]   ;;  %s15470_s12 = inlined_call_operand.vmem [shape: bf16[16,32], index: 12, kind: input, shape index: {}]   ;;  %s15471_s13 = inlined_call_operand.vmem [shape: bf16[32,64], index: 13, kind: input, shape index: {}]   ;;  %s15472_s14 = inlined_call_operand.vmem [shape: bf16[64,128], index: 14, kind: input, shape index: {}]   ;;  %s15473_s15 = inlined_call_operand.vmem [shape: bf16[128,256], index: 15, kind: input, shape index: {}]   ;;  %s15474_s16 = inlined_call_operand.vmem [shape: bf16[256,896], index: 16, kind: input, shape index: {}]   ;;  %s15475_s17 = inlined_call_operand.vmem [shape: f32[16,896], index: 17, kind: input, shape index: {}]   ;;  %s15476_s18 = inlined_call_operand.vmem [shape: f32[512,896], index: 18, kind: output, shape index: {0}]   ;;  %s15477_s19 = inlined_call_operand.vmem [shape: f32[512,128], index: 19, kind: output, shape index: {1}]  }
   0x1   :  { %15560 = sst [smem:[#allocation91_spill]] %s15458_s0  ;;  %s11217_s0 = smov 0  }
   0x2   :  { %15561 = sst [smem:[#allocation92_spill]] %s15459_s1 }
   0x3   :  { %15562 = sst [smem:[#allocation93_spill]] %s15460_s2 }
   0x4   :  { %15563 = sst [smem:[#allocation94_spill]] %s15461_s3 }
   0x5 LB: > { %s8970_s30 = sadd.s32 4294967295, %s11115_s0   ;;  %p8974_p0 = scmp.ge.s32.totalorder %s11115_s0, 1  ;;  %s11115_s0 = sphi %s11217_s0, %s30_s0  }
   0x6   : > { %p542_p1 = scmp.lt.s32.totalorder %s11115_s0, 3 }
   0x8   : > { %p543_p2 = pnand %p8974_p0, %p542_p1 }
   0xa   : > { %546 = sbr.rel (%p543_p2) target bundleno = 4122 (0x101a), region = 92 }
   0xf   : > { %s15564_s1 = sld [smem:[#allocation92_spill]]  ;;  %s8975_s20 = sshll.u32 %s8970_s30, 5  ;;  %vm1908_vm0 = vcmask 130048   ;;  %vm3889_vm1 = vcmask 523264   ;;  %vm4092_vm2 = vcmask 261120   ;;  %vm4523_vm3 = vcmask 1043456  }
  0x10   : > { %p606_p3 = scmp.lt.s32.totalorder %s8975_s20, 63  ;;  %s15565_s26 = sld [smem:[#allocation91_spill]]  ;;  %vm4715_vm4 = vcmask 1041408   ;;  %vm4474_vm5 = vcmask 64512   ;;  %vm4666_vm6 = vcmask 31744  }
  0x11   : > { %s15679_s22 = sld [smem:[#allocation93_spill]] }
  0x12   : > { %s15755_s20 = smov (!%p606_p3, %s8975_s20), 63 }
  0x13   : > { %s11098_s30 = smul.u32 28, %s15755_s20  ;;  %s8980_s28 = sshll.u32 %s15755_s20, 3 }
  0x14   : > { %s13431_s2 = scalar_lea.vmem %s15477_s19, %s8980_s28  ;;  %s11099_s23 = smul.u32 56, %s15755_s20 }
  0x15   : > { %v9487_v0 = vld [vmem:[%s15564_s1 + $0x70] sm:$0xf]  ;;  %v10841_v1 = vld [vmem:[%s15564_s1 + $0x74] sm:$0xf0]  ;;  %v9479_v11 = vld [vmem:[%s15564_s1 + $0x60] sm:$0xf] }
  0x16   : > { %v9551_v2 = vld [vmem:[%s15564_s1 + $0xf0] sm:$0xf]  ;;  %v9488_v3 = vor.u32 %v10841_v1, %v9487_v0  ;;  %v10857_v4 = vld [vmem:[%s15564_s1 + $0xf4] sm:$0xf0]  ;;  %v10839_v13 = vld [vmem:[%s15564_s1 + $0x64] sm:$0xf0]  ;;  %s11437_s27 = scalar_lea.vmem %s15565_s26, %s11098_s30  ;;  %s14323_s28 = scalar_lea.vmem %s15476_s18, %s11099_s23 }
  0x17   : > { %v9615_v5 = vld [vmem:[%s15564_s1 + $0x170] sm:$0xf]  ;;  %v10873_v6 = vld [vmem:[%s15564_s1 + $0x174] sm:$0xf0]  ;;  %v9552_v7 = vor.u32 %v10857_v4, %v9551_v2  ;;  %v9543_v14 = vld [vmem:[%s15564_s1 + $0xe0] sm:$0xf]  ;;  %v9480_v16 = vor.u32 %v10839_v13, %v9479_v11 }
  0x18   : > { %v9616_v8 = vor.u32 %v10873_v6, %v9615_v5  ;;  %v9679_v9 = vld [vmem:[%s15564_s1 + $0x1f0] sm:$0xf]  ;;  %v10889_v10 = vld [vmem:[%s15564_s1 + $0x1f4] sm:$0xf0]  ;;  %1957 = vmatpush.bf16.msra.mxu0 %v9488_v3  ;;  %v10855_v15 = vld [vmem:[%s15564_s1 + $0xe4] sm:$0xf0] }
  0x19   : > { %v9680_v12 = vor.u32 %v10889_v10, %v9679_v9  ;;  %2046 = vmatpush.bf16.msra.mxu1 %v9552_v7  ;;  %v9544_v17 = vor.u32 %v10855_v15, %v9543_v14  ;;  %v9607_v18 = vld [vmem:[%s15564_s1 + $0x160] sm:$0xf]  ;;  %v10871_v19 = vld [vmem:[%s15564_s1 + $0x164] sm:$0xf0]  ;;  %v9471_v23 = vld [vmem:[%s15564_s1 + $0x50] sm:$0xf] }
  0x1a   : > { %2135 = vmatpush.bf16.msra.mxu2 %v9616_v8  ;;  %v9671_v20 = vld [vmem:[%s15564_s1 + $0x1e0] sm:$0xf]  ;;  %v9608_v21 = vor.u32 %v10871_v19, %v9607_v18  ;;  %v10887_v22 = vld [vmem:[%s15564_s1 + $0x1e4] sm:$0xf0]  ;;  %v10837_v24 = vld [vmem:[%s15564_s1 + $0x54] sm:$0xf0] }
  0x1b   : > { %2224 = vmatpush.bf16.msra.mxu3 %v9680_v12  ;;  %v9672_v25 = vor.u32 %v10887_v22, %v9671_v20  ;;  %v9535_v26 = vld [vmem:[%s15564_s1 + $0xd0] sm:$0xf]  ;;  %v10853_v27 = vld [vmem:[%s15564_s1 + $0xd4] sm:$0xf0]  ;;  %v9472_v29 = vor.u32 %v10837_v24, %v9471_v23  ;;  %v9463_v35 = vld [vmem:[%s15564_s1 + $0x40] sm:$0xf] }
  0x1c   : > { %v9599_v28 = vld [vmem:[%s15564_s1 + $0x150] sm:$0xf]  ;;  %1958 = vmatpush.bf16.msra.mxu0 %v9480_v16  ;;  %v10869_v30 = vld [vmem:[%s15564_s1 + $0x154] sm:$0xf0]  ;;  %v9536_v33 = vor.u32 %v10853_v27, %v9535_v26  ;;  %v10835_v36 = vld [vmem:[%s15564_s1 + $0x44] sm:$0xf0] }
  0x1d   : > { %v9663_v31 = vld [vmem:[%s15564_s1 + $0x1d0] sm:$0xf]  ;;  %v10885_v32 = vld [vmem:[%s15564_s1 + $0x1d4] sm:$0xf0]  ;;  %2047 = vmatpush.bf16.msra.mxu1 %v9544_v17  ;;  %v9600_v34 = vor.u32 %v10869_v30, %v9599_v28  ;;  %v9527_v37 = vld [vmem:[%s15564_s1 + $0xc0] sm:$0xf]  ;;  %v9464_v44 = vor.u32 %v10835_v36, %v9463_v35 }
  0x1e   : > { %2136 = vmatpush.bf16.msra.mxu2 %v9608_v21  ;;  %v9664_v38 = vor.u32 %v10885_v32, %v9663_v31  ;;  %v10851_v39 = vld [vmem:[%s15564_s1 + $0xc4] sm:$0xf0]  ;;  %v9591_v40 = vld [vmem:[%s15564_s1 + $0x140] sm:$0xf]  ;;  %v9455_v47 = vld [vmem:[%s15564_s1 + $0x30] sm:$0xf] }
  0x1f   : > { %2225 = vmatpush.bf16.msra.mxu3 %v9672_v25  ;;  %v10867_v41 = vld [vmem:[%s15564_s1 + $0x144] sm:$0xf0]  ;;  %v9655_v42 = vld [vmem:[%s15564_s1 + $0x1c0] sm:$0xf]  ;;  %v9528_v45 = vor.u32 %v10851_v39, %v9527_v37  ;;  %v10833_v48 = vld [vmem:[%s15564_s1 + $0x34] sm:$0xf0] }
  0x20   : > { %v10883_v43 = vld [vmem:[%s15564_s1 + $0x1c4] sm:$0xf0]  ;;  %1959 = vmatpush.bf16.msra.mxu0 %v9472_v29  ;;  %v9592_v46 = vor.u32 %v10867_v41, %v9591_v40  ;;  %v9519_v49 = vld [vmem:[%s15564_s1 + $0xb0] sm:$0xf]  ;;  %v10849_v51 = vld [vmem:[%s15564_s1 + $0xb4] sm:$0xf0]  ;;  %v9456_v56 = vor.u32 %v10833_v48, %v9455_v47 }
  0x21   : > { %2048 = vmatpush.bf16.msra.mxu1 %v9536_v33  ;;  %v9656_v50 = vor.u32 %v10883_v43, %v9655_v42  ;;  %v9583_v52 = vld [vmem:[%s15564_s1 + $0x130] sm:$0xf]  ;;  %v10865_v53 = vld [vmem:[%s15564_s1 + $0x134] sm:$0xf0]  ;;  %v9520_v57 = vor.u32 %v10849_v51, %v9519_v49  ;;  %v9447_v59 = vld [vmem:[%s15564_s1 + $0x20] sm:$0xf] }
  0x22   : > { %2137 = vmatpush.bf16.msra.mxu2 %v9600_v34  ;;  %v9647_v54 = vld [vmem:[%s15564_s1 + $0x1b0] sm:$0xf]  ;;  %v10881_v55 = vld [vmem:[%s15564_s1 + $0x1b4] sm:$0xf0]  ;;  %v9584_v58 = vor.u32 %v10865_v53, %v9583_v52  ;;  %v10831_v60 = vld [vmem:[%s15564_s1 + $0x24] sm:$0xf0] }
  0x23   : > { %2226 = vmatpush.bf16.msra.mxu3 %v9664_v38  ;;  %v9511_v61 = vld [vmem:[%s15564_s1 + $0xa0] sm:$0xf]  ;;  %v9648_v62 = vor.u32 %v10881_v55, %v9647_v54  ;;  %v10847_v63 = vld [vmem:[%s15564_s1 + $0xa4] sm:$0xf0]  ;;  %v9448_v4 = vor.u32 %v10831_v60, %v9447_v59  ;;  %v9439_v5 = vld [vmem:[%s15564_s1 + $0x10] sm:$0xf] }
  0x24   : > { %1960 = vmatpush.bf16.msra.mxu0 %v9464_v44  ;;  %v9575_v0 = vld [vmem:[%s15564_s1 + $0x120] sm:$0xf]  ;;  %v10863_v1 = vld [vmem:[%s15564_s1 + $0x124] sm:$0xf0]  ;;  %v9512_v6 = vor.u32 %v10847_v63, %v9511_v61  ;;  %v10829_v8 = vld [vmem:[%s15564_s1 + $0x14] sm:$0xf0] }
  0x25   : > { %2049 = vmatpush.bf16.msra.mxu1 %v9528_v45  ;;  %v9639_v2 = vld [vmem:[%s15564_s1 + $0x1a0] sm:$0xf]  ;;  %v10879_v3 = vld [vmem:[%s15564_s1 + $0x1a4] sm:$0xf0]  ;;  %v9576_v7 = vor.u32 %v10863_v1, %v9575_v0  ;;  %v9503_v9 = vld [vmem:[%s15564_s1 + $0x90] sm:$0xf]  ;;  %v9440_v16 = vor.u32 %v10829_v8, %v9439_v5 }
  0x26   : > { %2138 = vmatpush.bf16.msra.mxu2 %v9592_v46  ;;  %v10845_v10 = vld [vmem:[%s15564_s1 + $0x94] sm:$0xf0]  ;;  %v9640_v11 = vor.u32 %v10879_v3, %v9639_v2  ;;  %v9567_v12 = vld [vmem:[%s15564_s1 + $0x110] sm:$0xf]  ;;  %v9431_v17 = vld [vmem:[%s15564_s1] sm:$0xf] }
  0x27   : > { %2227 = vmatpush.bf16.msra.mxu3 %v9656_v50  ;;  %v10861_v13 = vld [vmem:[%s15564_s1 + $0x114] sm:$0xf0]  ;;  %v9631_v14 = vld [vmem:[%s15564_s1 + $0x190] sm:$0xf]  ;;  %v10827_v18 = vld [vmem:[%s15564_s1 + $0x4] sm:$0xf0]  ;;  %v9504_v20 = vor.u32 %v10845_v10, %v9503_v9 }
  0x28   : > { %1961 = vmatpush.bf16.msra.mxu0 %v9456_v56  ;;  %v10877_v15 = vld [vmem:[%s15564_s1 + $0x194] sm:$0xf0]  ;;  %v9495_v19 = vld [vmem:[%s15564_s1 + $0x80] sm:$0xf]  ;;  %v9568_v21 = vor.u32 %v10861_v13, %v9567_v12  ;;  %v10843_v22 = vld [vmem:[%s15564_s1 + $0x84] sm:$0xf0]  ;;  %v9432_v30 = vor.u32 %v10827_v18, %v9431_v17 }
  0x29   : > { %2050 = vmatpush.bf16.msra.mxu1 %v9520_v57  ;;  %v9559_v23 = vld [vmem:[%s15564_s1 + $0x100] sm:$0xf]  ;;  %v9632_v24 = vor.u32 %v10877_v15, %v9631_v14  ;;  %v10859_v25 = vld [vmem:[%s15564_s1 + $0x104] sm:$0xf0]  ;;  %v9743_v28 = vld [vmem:[%s15564_s1 + $0x270] sm:$0xf]  ;;  %v9496_v33 = vor.u32 %v10843_v22, %v9495_v19 }
  0x2a   : > { %2139 = vmatpush.bf16.msra.mxu2 %v9584_v58  ;;  %v9623_v26 = vld [vmem:[%s15564_s1 + $0x180] sm:$0xf]  ;;  %v10875_v27 = vld [vmem:[%s15564_s1 + $0x184] sm:$0xf0]  ;;  %v10905_v29 = vld [vmem:[%s15564_s1 + $0x274] sm:$0xf0]  ;;  %v9560_v34 = vor.u32 %v10859_v25, %v9559_v23 }
  0x2b   : > { %2228 = vmatpush.bf16.msra.mxu3 %v9648_v62  ;;  %v9807_v31 = vld [vmem:[%s15564_s1 + $0x2f0] sm:$0xf]  ;;  %v10921_v32 = vld [vmem:[%s15564_s1 + $0x2f4] sm:$0xf0]  ;;  %v9624_v35 = vor.u32 %v10875_v27, %v9623_v26  ;;  %v8983_v36 = vld [vmem:[%s11437_s27] sm:$0xf]  ;;  %v9744_v39 = vor.u32 %v10905_v29, %v9743_v28 }
  0x2c   : > { %1962 = vmatpush.bf16.msra.mxu0 %v9448_v4  ;;  %v10717_v37 = vld [vmem:[%s11437_s27 + $0x18] sm:$0xf0]  ;;  %v10714_v38 = vld [vmem:[%s11437_s27 + $0x4] sm:$0xf]  ;;  %v8985_v41 = vld [vmem:[%s11437_s27 + $0x1c] sm:$0xf0]  ;;  %v9808_v44 = vor.u32 %v10921_v32, %v9807_v31 }
  0x2d   : > { %2051 = vmatpush.bf16.msra.mxu1 %v9512_v6  ;;  %v11442_v40 = vor.u32 %v10717_v37, %v8983_v36  ;;  %v8991_v42 = vld [vmem:[%s11437_s27 + $0x8] sm:$0xf]  ;;  %v10718_v43 = vld [vmem:[%s11437_s27 + $0x20] sm:$0xf0]  ;;  %v11447_v45 = vor.u32 %v10714_v38, %v8985_v41  ;;  %v10715_v47 = vld [vmem:[%s11437_s27 + $0xc] sm:$0xf] }
  0x2e   : > { %2140 = vmatpush.bf16.msra.mxu2 %v9576_v7  ;;  %v11449_v46 = vor.u32 %v10718_v43, %v8991_v42  ;;  %v8993_v48 = vld [vmem:[%s11437_s27 + $0x24] sm:$0xf0]  ;;  %v9735_v50 = vld [vmem:[%s15564_s1 + $0x260] sm:$0xf]  ;;  %v9011_v56 = vld [vmem:[%s11437_s27 + $0x38] sm:$0xf] }
  0x2f   : > { %2229 = vmatpush.bf16.msra.mxu3 %v9640_v11  ;;  %v11453_v49 = vor.u32 %v10715_v47, %v8993_v48  ;;  %v10903_v51 = vld [vmem:[%s15564_s1 + $0x264] sm:$0xf0]  ;;  %v9799_v53 = vld [vmem:[%s15564_s1 + $0x2e0] sm:$0xf]  ;;  %v10724_v57 = vld [vmem:[%s11437_s27 + $0x50] sm:$0xf0] }
  0x30   : > { %1963 = vmatpush.bf16.msra.mxu0 %v9440_v16  ;;  %v9736_v52 = vor.u32 %v10903_v51, %v9735_v50  ;;  %v10919_v54 = vld [vmem:[%s15564_s1 + $0x2e4] sm:$0xf0]  ;;  %v10721_v58 = vld [vmem:[%s11437_s27 + $0x3c] sm:$0xf]  ;;  %v9013_v59 = vld [vmem:[%s11437_s27 + $0x54] sm:$0xf0]  ;;  %v11479_v0 = vor.u32 %v10724_v57, %v9011_v56 }
  0x31   : > { %2052 = vmatpush.bf16.msra.mxu1 %v9504_v20  ;;  %v9800_v55 = vor.u32 %v10919_v54, %v9799_v53  ;;  %v9019_v60 = vld [vmem:[%s11437_s27 + $0x40] sm:$0xf]  ;;  %v10725_v61 = vld [vmem:[%s11437_s27 + $0x58] sm:$0xf0]  ;;  %v10722_v62 = vld [vmem:[%s11437_s27 + $0x44] sm:$0xf]  ;;  %v11481_v1 = vor.u32 %v10721_v58, %v9013_v59 }
  0x32   : > { %2141 = vmatpush.bf16.msra.mxu2 %v9568_v21  ;;  %v9021_v63 = vld [vmem:[%s11437_s27 + $0x5c] sm:$0xf0]  ;;  %v11483_v2 = vor.u32 %v10725_v61, %v9019_v60  ;;  %v9039_v4 = vld [vmem:[%s11437_s27 + $0x70] sm:$0xf]  ;;  %v10731_v5 = vld [vmem:[%s11437_s27 + $0x88] sm:$0xf0] }
  0x33   : > { %2230 = vmatpush.bf16.msra.mxu3 %v9632_v24  ;;  %v11485_v3 = vor.u32 %v10722_v62, %v9021_v63  ;;  %v10728_v6 = vld [vmem:[%s11437_s27 + $0x74] sm:$0xf]  ;;  %v9041_v7 = vld [vmem:[%s11437_s27 + $0x8c] sm:$0xf0]  ;;  %v9047_v8 = vld [vmem:[%s11437_s27 + $0x78] sm:$0xf]  ;;  %v11499_v12 = vor.u32 %v10731_v5, %v9039_v4 }
  0x34   : > { %1964 = vmatpush.bf16.msra.mxu0 %v9432_v30  ;;  %v10732_v9 = vld [vmem:[%s11437_s27 + $0x90] sm:$0xf0]  ;;  %v10729_v10 = vld [vmem:[%s11437_s27 + $0x7c] sm:$0xf]  ;;  %v9049_v11 = vld [vmem:[%s11437_s27 + $0x94] sm:$0xf0]  ;;  %v11501_v13 = vor.u32 %v10728_v6, %v9041_v7 }
  0x35   : > { %2053 = vmatpush.bf16.msra.mxu1 %v9496_v33  ;;  %v11503_v14 = vor.u32 %v10732_v9, %v9047_v8  ;;  %v11505_v15 = vor.u32 %v10729_v10, %v9049_v11  ;;  %v9727_v16 = vld [vmem:[%s15564_s1 + $0x250] sm:$0xf]  ;;  %v10901_v17 = vld [vmem:[%s15564_s1 + $0x254] sm:$0xf0]  ;;  %v9067_v22 = vld [vmem:[%s11437_s27 + $0xa8] sm:$0xf] }
  0x36   : > { %2142 = vmatpush.bf16.msra.mxu2 %v9560_v34  ;;  %v9728_v18 = vor.u32 %v10901_v17, %v9727_v16  ;;  %v9791_v19 = vld [vmem:[%s15564_s1 + $0x2d0] sm:$0xf]  ;;  %v10917_v20 = vld [vmem:[%s15564_s1 + $0x2d4] sm:$0xf0]  ;;  %v10738_v23 = vld [vmem:[%s11437_s27 + $0xc0] sm:$0xf0] }
  0x37   : > { %2231 = vmatpush.bf16.msra.mxu3 %v9624_v35  ;;  %1965 = vmatmul.bf16.vlgmr.msra.gmra.mxu0 %v11442_v40  ;;  %15566 = vst [vmem:[#allocation2_spill] sm:$0xff] %v11505_v15  ;;  %v9792_v21 = vor.u32 %v10917_v20, %v9791_v19  ;;  %v10735_v24 = vld [vmem:[%s11437_s27 + $0xac] sm:$0xf]  ;;  %v9069_v25 = vld [vmem:[%s11437_s27 + $0xc4] sm:$0xf0]  ;;  %v11531_v30 = vor.u32 %v10738_v23, %v9067_v22  ;;  %s15713_s30 = sld [smem:[#allocation94_spill]] }
  0x38   : > { %2313 = vmatpush.bf16.msrb.mxu0 %v9744_v39  ;;  %2054 = vmatmul.bf16.vlgmr.msra.gmra.mxu1 %v11447_v45  ;;  %v9075_v26 = vld [vmem:[%s11437_s27 + $0xb0] sm:$0xf]  ;;  %v10739_v27 = vld [vmem:[%s11437_s27 + $0xc8] sm:$0xf0]  ;;  %v10736_v28 = vld [vmem:[%s11437_s27 + $0xb4] sm:$0xf]  ;;  %v11533_v31 = vor.u32 %v10735_v24, %v9069_v25 }
  0x39   : > { %2402 = vmatpush.bf16.msrb.mxu1 %v9808_v44  ;;  %2143 = vmatmul.bf16.vlgmr.msra.gmra.mxu2 %v11449_v46  ;;  %v9077_v29 = vld [vmem:[%s11437_s27 + $0xcc] sm:$0xf0]  ;;  %v11535_v32 = vor.u32 %v10739_v27, %v9075_v26  ;;  %v9095_v34 = vld [vmem:[%s11437_s27 + $0xe0] sm:$0xf]  ;;  %v10745_v35 = vld [vmem:[%s11437_s27 + $0xf8] sm:$0xf0] }
  0x3a   : > { %2232 = vmatmul.bf16.vlgmr.msra.gmra.mxu3 %v11453_v49  ;;  %15567 = vst [vmem:[#allocation3_spill] sm:$0xff] %v11533_v31  ;;  %v11537_v33 = vor.u32 %v10736_v28, %v9077_v29  ;;  %v10742_v36 = vld [vmem:[%s11437_s27 + $0xe4] sm:$0xf]  ;;  %v9097_v37 = vld [vmem:[%s11437_s27 + $0xfc] sm:$0xf0]  ;;  %v11551_v43 = vor.u32 %v10745_v35, %v9095_v34 }
  0x3b   : > { %15568 = vst [vmem:[#allocation4_spill] sm:$0xff] %v11535_v32  ;;  %v9103_v38 = vld [vmem:[%s11437_s27 + $0xe8] sm:$0xf]  ;;  %v10746_v39 = vld [vmem:[%s11437_s27 + $0x100] sm:$0xf0]  ;;  %v11553_v44 = vor.u32 %v10742_v36, %v9097_v37 }
  0x3c   : > { %2314 = vmatpush.bf16.msrb.mxu0 %v9736_v52  ;;  %15569 = vst [vmem:[#allocation5_spill] sm:$0xff] %v11537_v33  ;;  %v10743_v41 = vld [vmem:[%s11437_s27 + $0xec] sm:$0xf]  ;;  %v9105_v42 = vld [vmem:[%s11437_s27 + $0x104] sm:$0xf0]  ;;  %v11555_v47 = vor.u32 %v10746_v39, %v9103_v38 }
  0x3d   : > { %2403 = vmatpush.bf16.msrb.mxu1 %v9800_v55  ;;  %15570 = vst [vmem:[#allocation6_spill] sm:$0xff] %v11553_v44  ;;  %v11557_v48 = vor.u32 %v10743_v41, %v9105_v42  ;;  %v9719_v50 = vld [vmem:[%s15564_s1 + $0x240] sm:$0xf]  ;;  %v10899_v51 = vld [vmem:[%s15564_s1 + $0x244] sm:$0xf0] }
  0x3e   : > { %15571 = vst [vmem:[#allocation7_spill] sm:$0xff] %v11555_v47  ;;  %v9720_v52 = vor.u32 %v10899_v51, %v9719_v50  ;;  %v9783_v53 = vld [vmem:[%s15564_s1 + $0x2c0] sm:$0xf]  ;;  %v10915_v54 = vld [vmem:[%s15564_s1 + $0x2c4] sm:$0xf0] }
  0x3f   : > { %15572 = vst [vmem:[#allocation8_spill] sm:$0xff] %v11557_v48  ;;  %v9784_v55 = vor.u32 %v10915_v54, %v9783_v53  ;;  %v9123_v56 = vld [vmem:[%s11437_s27 + $0x118] sm:$0xf]  ;;  %v10752_v57 = vld [vmem:[%s11437_s27 + $0x130] sm:$0xf0] }
  0x40   : > { %2315 = vmatpush.bf16.msrb.mxu0 %v9728_v18  ;;  %v10749_v58 = vld [vmem:[%s11437_s27 + $0x11c] sm:$0xf]  ;;  %v9125_v59 = vld [vmem:[%s11437_s27 + $0x134] sm:$0xf0]  ;;  %v9131_v60 = vld [vmem:[%s11437_s27 + $0x120] sm:$0xf]  ;;  %v11583_v4 = vor.u32 %v10752_v57, %v9123_v56 }
  0x41   : > { %2404 = vmatpush.bf16.msrb.mxu1 %v9792_v21  ;;  %v10753_v61 = vld [vmem:[%s11437_s27 + $0x138] sm:$0xf0]  ;;  %v10750_v62 = vld [vmem:[%s11437_s27 + $0x124] sm:$0xf]  ;;  %v9133_v63 = vld [vmem:[%s11437_s27 + $0x13c] sm:$0xf0]  ;;  %v11585_v5 = vor.u32 %v10749_v58, %v9125_v59 }
  0x42   : > { %v11587_v6 = vor.u32 %v10753_v61, %v9131_v60  ;;  %v11589_v7 = vor.u32 %v10750_v62, %v9133_v63  ;;  %v9151_v8 = vld [vmem:[%s11437_s27 + $0x150] sm:$0xf]  ;;  %v10759_v9 = vld [vmem:[%s11437_s27 + $0x168] sm:$0xf0]  ;;  %v10756_v10 = vld [vmem:[%s11437_s27 + $0x154] sm:$0xf] }
  0x43   : > { %15573 = vst [vmem:[#allocation9_spill] sm:$0xff] %v11585_v5  ;;  %v9153_v11 = vld [vmem:[%s11437_s27 + $0x16c] sm:$0xf0]  ;;  %v9159_v16 = vld [vmem:[%s11437_s27 + $0x158] sm:$0xf]  ;;  %v11603_v20 = vor.u32 %v10759_v9, %v9151_v8 }
  0x44   : > { %2316 = vmatpush.bf16.msrb.mxu0 %v9720_v52  ;;  %15574 = vst [vmem:[#allocation10_spill] sm:$0xff] %v11587_v6  ;;  %v10760_v17 = vld [vmem:[%s11437_s27 + $0x170] sm:$0xf0]  ;;  %v10757_v18 = vld [vmem:[%s11437_s27 + $0x15c] sm:$0xf]  ;;  %v11605_v21 = vor.u32 %v10756_v10, %v9153_v11 }
  0x45   : > { %2405 = vmatpush.bf16.msrb.mxu1 %v9784_v55  ;;  %15575 = vst [vmem:[#allocation11_spill] sm:$0xff] %v11589_v7  ;;  %v9161_v19 = vld [vmem:[%s11437_s27 + $0x174] sm:$0xf0]  ;;  %v11607_v22 = vor.u32 %v10760_v17, %v9159_v16  ;;  %v9711_v24 = vld [vmem:[%s15564_s1 + $0x230] sm:$0xf] }
  0x46   : > { %15576 = vst [vmem:[#allocation12_spill] sm:$0xff] %v11605_v21  ;;  %v11609_v23 = vor.u32 %v10757_v18, %v9161_v19  ;;  %v10897_v25 = vld [vmem:[%s15564_s1 + $0x234] sm:$0xf0]  ;;  %v9775_v27 = vld [vmem:[%s15564_s1 + $0x2b0] sm:$0xf] }
  0x47   : > { %1970 = vmatmul.bf16.gmra.mxu0 %v11479_v0  ;;  %15577 = vst [vmem:[#allocation13_spill] sm:$0xff] %v11607_v22  ;;  %v9712_v26 = vor.u32 %v10897_v25, %v9711_v24  ;;  %v10913_v28 = vld [vmem:[%s15564_s1 + $0x2b4] sm:$0xf0]  ;;  %v9179_v34 = vld [vmem:[%s11437_s27 + $0x188] sm:$0xf] }
  0x48   : > { %2059 = vmatmul.bf16.gmra.mxu1 %v11481_v1  ;;  %15578 = vst [vmem:[#allocation14_spill] sm:$0xff] %v11609_v23  ;;  %v9776_v29 = vor.u32 %v10913_v28, %v9775_v27  ;;  %v10766_v35 = vld [vmem:[%s11437_s27 + $0x1a0] sm:$0xf0]  ;;  %v10763_v36 = vld [vmem:[%s11437_s27 + $0x18c] sm:$0xf] }
  0x49   : > { %2148 = vmatmul.bf16.gmra.mxu2 %v11483_v2  ;;  %2317 = vmatpush.bf16.msrb.mxu0 %v9712_v26  ;;  %v9181_v37 = vld [vmem:[%s11437_s27 + $0x1a4] sm:$0xf0]  ;;  %v9187_v38 = vld [vmem:[%s11437_s27 + $0x190] sm:$0xf]  ;;  %v10767_v39 = vld [vmem:[%s11437_s27 + $0x1a8] sm:$0xf0]  ;;  %v11635_v50 = vor.u32 %v10766_v35, %v9179_v34 }
  0x4a   : > { %2237 = vmatmul.bf16.gmra.mxu3 %v11485_v3  ;;  %2406 = vmatpush.bf16.msrb.mxu1 %v9776_v29  ;;  %v10764_v41 = vld [vmem:[%s11437_s27 + $0x194] sm:$0xf]  ;;  %v9189_v42 = vld [vmem:[%s11437_s27 + $0x1ac] sm:$0xf0]  ;;  %v11637_v51 = vor.u32 %v10763_v36, %v9181_v37  ;;  %v11639_v52 = vor.u32 %v10767_v39, %v9187_v38  ;;  %v9815_v53 = vld [vmem:[%s15564_s1 + $0x300] sm:$0xf] }
  0x4b   : > { %v10923_v54 = vld [vmem:[%s15564_s1 + $0x304] sm:$0xf0]  ;;  %v11647_v55 = vor.u32 %v10764_v41, %v9189_v42  ;;  %v10840_v57 = vld [vmem:[%s15564_s1 + $0x74] sm:$0xf]  ;;  %v9489_v58 = vld [vmem:[%s15564_s1 + $0x78] sm:$0xf0] }
  0x4c   : > { %15579 = vst [vmem:[#allocation15_spill] sm:$0xff] %v11637_v51  ;;  %v9816_v56 = vor.u32 %v10923_v54, %v9815_v53  ;;  %v9492_v59 = vor.u32 %v10840_v57, %v9489_v58  ;;  %v852_v60 = vld [vmem:[%s15475_s17] ss:$8 sm:$0x3]  ;;  %v10773_v63 = vld [vmem:[%s11437_s27 + $0x1d8] sm:$0xf0] }
  0x4d   : > { %15580 = vst [vmem:[#allocation16_spill] sm:$0xff] %v11639_v52  ;;  %v11662_v61 = vperm.slane %v852_v60, 0  ;;  %v9207_v62 = vld [vmem:[%s11437_s27 + $0x1c0] sm:$0xf]  ;;  %v10770_v8 = vld [vmem:[%s11437_s27 + $0x1c4] sm:$0xf] }
  0x4e   : > { %15581 = vst [vmem:[#allocation17_spill] sm:$0xff] %v11647_v55  ;;  %2498 = vmatpush.bf16.msrb.mxu2 %v9816_v56  ;;  %2580 = vmatpush.bf16.msrb.mxu3 %v9492_v59  ;;  %v9209_v9 = vld [vmem:[%s11437_s27 + $0x1dc] sm:$0xf0]  ;;  %v9215_v10 = vld [vmem:[%s11437_s27 + $0x1c8] sm:$0xf]  ;;  %v11672_v18 = vor.u32 %v10773_v63, %v9207_v62 }
  0x4f   : > { %v10774_v11 = vld [vmem:[%s11437_s27 + $0x1e0] sm:$0xf0]  ;;  %v10771_v16 = vld [vmem:[%s11437_s27 + $0x1cc] sm:$0xf]  ;;  %v9217_v17 = vld [vmem:[%s11437_s27 + $0x1e4] sm:$0xf0]  ;;  %v11674_v24 = vor.u32 %v10770_v8, %v9209_v9 }
  0x50   : > { %v11676_v25 = vor.u32 %v10774_v11, %v9215_v10  ;;  %v11679_v28 = vor.u32 %v10771_v16, %v9217_v17  ;;  %v9703_v34 = vld [vmem:[%s15564_s1 + $0x220] sm:$0xf]  ;;  %v10895_v35 = vld [vmem:[%s15564_s1 + $0x224] sm:$0xf0]  ;;  %v9235_v60 = vld [vmem:[%s11437_s27 + $0x1f8] sm:$0xf] }
  0x51   : > { %15582 = vst [vmem:[#allocation18_spill] sm:$0xff] %v11674_v24  ;;  %v9704_v36 = vor.u32 %v10895_v35, %v9703_v34  ;;  %v9767_v37 = vld [vmem:[%s15564_s1 + $0x2a0] sm:$0xf]  ;;  %v10911_v38 = vld [vmem:[%s15564_s1 + $0x2a4] sm:$0xf0] }
  0x52   : > { %15583 = vst [vmem:[#allocation19_spill] sm:$0xff] %v11676_v25  ;;  %v9768_v39 = vor.u32 %v10911_v38, %v9767_v37  ;;  %v10780_v62 = vld [vmem:[%s11437_s27 + $0x210] sm:$0xf0]  ;;  %v10777_v63 = vld [vmem:[%s11437_s27 + $0x1fc] sm:$0xf] }
  0x53   : > { %15584 = vst [vmem:[#allocation20_spill] sm:$0xff] %v11679_v28  ;;  %2318 = vmatpush.bf16.msrb.mxu0 %v9704_v36  ;;  %v9237_v8 = vld [vmem:[%s11437_s27 + $0x214] sm:$0xf0]  ;;  %v9243_v9 = vld [vmem:[%s11437_s27 + $0x200] sm:$0xf] }
  0x54   : > { %2407 = vmatpush.bf16.msrb.mxu1 %v9768_v39  ;;  %v10781_v10 = vld [vmem:[%s11437_s27 + $0x218] sm:$0xf0]  ;;  %v10778_v11 = vld [vmem:[%s11437_s27 + $0x204] sm:$0xf]  ;;  %v9245_v16 = vld [vmem:[%s11437_s27 + $0x21c] sm:$0xf0]  ;;  %v11710_v34 = vor.u32 %v10777_v63, %v9237_v8 }
  0x55   : > { %v11712_v35 = vor.u32 %v10781_v10, %v9243_v9  ;;  %v11715_v38 = vor.u32 %v10778_v11, %v9245_v16  ;;  %v9263_v10 = vld [vmem:[%s11437_s27 + $0x230] sm:$0xf]  ;;  %v10787_v11 = vld [vmem:[%s11437_s27 + $0x248] sm:$0xf0]  ;;  %v10784_v16 = vld [vmem:[%s11437_s27 + $0x234] sm:$0xf] }
  0x56   : > { %15585 = vst [vmem:[#allocation21_spill] sm:$0xff] %v11710_v34 }
  0x57   : > { %1975 = vmatmul.bf16.gmra.mxu0 %v11499_v12  ;;  %15586 = vst [vmem:[#allocation22_spill] sm:$0xff] %v11712_v35 }
  0x58   : > { %2064 = vmatmul.bf16.gmra.mxu1 %v11501_v13  ;;  %15587 = vst [vmem:[#allocation23_spill] sm:$0xff] %v11715_v38 }
  0x59   : > { %2153 = vmatmul.bf16.gmra.mxu2 %v11503_v14 }
  0x5a   : > { %2242 = vmatmul.bf16.gmra.mxu3 %v11505_v15 }
  0x67   : > { %1980 = vmatmul.bf16.gmra.mxu0 %v11531_v30 }
  0x68   : > { %2069 = vmatmul.bf16.gmra.mxu1 %v11533_v31 }
  0x69   : > { %2158 = vmatmul.bf16.gmra.mxu2 %v11535_v32 }
  0x6a   : > { %2247 = vmatmul.bf16.gmra.mxu3 %v11537_v33 }
  0x77   : > { %1985 = vmatmul.bf16.gmra.mxu0 %v11551_v43 }
  0x78   : > { %2074 = vmatmul.bf16.gmra.mxu1 %v11553_v44  ;;  %v10727_v44 = vld [vmem:[%s11437_s27 + $0x68] sm:$0xf0] }
  0x79   : > { %2163 = vmatmul.bf16.gmra.mxu2 %v11555_v47 }
  0x7a   : > { %2252 = vmatmul.bf16.gmra.mxu3 %v11557_v48 }
  0x87   : > { %1990 = vmatmul.bf16.gmra.mxu0 %v11583_v4 }
  0x88   : > { %2079 = vmatmul.bf16.gmra.mxu1 %v11585_v5 }
  0x89   : > { %2168 = vmatmul.bf16.gmra.mxu2 %v11587_v6 }
  0x8a   : > { %2257 = vmatmul.bf16.gmra.mxu3 %v11589_v7  ;;  %v9413_v7 = vld [vmem:[%s11437_s27 + $0x36c] sm:$0xf0] }
  0x97   : > { %1995 = vmatmul.bf16.gmra.mxu0 %v11603_v20 }
  0x98   : > { %2084 = vmatmul.bf16.gmra.mxu1 %v11605_v21  ;;  %v10826_v21 = vld [vmem:[%s15564_s1 + $0x4] sm:$0xf] }
  0x99   : > { %2173 = vmatmul.bf16.gmra.mxu2 %v11607_v22 }
  0x9a   : > { %2262 = vmatmul.bf16.gmra.mxu3 %v11609_v23 }
  0xa7   : > { %2000 = vmatmul.bf16.gmra.mxu0 %v11635_v50 }
  0xa8   : > { %2089 = vmatmul.bf16.gmra.mxu1 %v11637_v51 }
  0xa9   : > { %2178 = vmatmul.bf16.gmra.mxu2 %v11639_v52 }
  0xaa   : > { %2267 = vmatmul.bf16.gmra.mxu3 %v11647_v55 }
  0xb4   : > { %v1966_v19 = vpop.f32.mrf.mxu0 }
  0xb5   : > { %v1967_v26 = vadd.f32 %v1966_v19, %v11662_v61  ;;  %v2055_v27 = vpop.f32.mrf.mxu1  ;;  %v11708_v19 = vor.u32 %v10780_v62, %v9235_v60 }
  0xb7   : > { %v2056_v29 = vadd.f32 %v2055_v27, %v1967_v26  ;;  %2005 = vmatmul.bf16.gmra.mxu0 %v11672_v18 }
  0xb8   : > { %2094 = vmatmul.bf16.gmra.mxu1 %v11674_v24 }
  0xb9   : > { %2183 = vmatmul.bf16.gmra.mxu2 %v11676_v25 }
  0xba   : > { %2272 = vmatmul.bf16.gmra.mxu3 %v11679_v28 }
  0xbc   : > { %v2144_v41 = vpop.f32.mrf.mxu2  ;;  %v1968_v53 = vpop.f32.mrf.mxu0 }
  0xbd   : > { %v2145_v42 = vadd.f32 %v2144_v41, %v2056_v29  ;;  %v2233_v54 = vpop.f32.mrf.mxu3  ;;  %v1969_v56 = vadd.f32 %v1968_v53, %v11662_v61  ;;  %v2057_v57 = vpop.f32.mrf.mxu1  ;;  %v9481_v53 = vld [vmem:[%s15564_s1 + $0x68] sm:$0xf0] }
  0xbf   : > { %v11698_v58 = vadd.f32 %v2233_v54, %v2145_v42  ;;  %v2058_v59 = vadd.f32 %v2057_v57, %v1969_v56  ;;  %v10838_v42 = vld [vmem:[%s15564_s1 + $0x64] sm:$0xf] }
  0xc0   : > { %v9484_v54 = vor.u32 %v10838_v42, %v9481_v53  ;;  %v11740_v42 = vor.u32 %v10787_v11, %v9263_v10  ;;  %v10893_v10 = vld [vmem:[%s15564_s1 + $0x214] sm:$0xf0] }
  0xc2   : > { %2581 = vmatpush.bf16.msrb.mxu3 %v9484_v54 }
  0xc4   : > { %v2146_v17 = vpop.f32.mrf.mxu2  ;;  %v1971_v27 = vpop.f32.mrf.mxu0 }
  0xc5   : > { %v2147_v26 = vadd.f32 %v2146_v17, %v2058_v59  ;;  %v2235_v29 = vpop.f32.mrf.mxu3  ;;  %v1972_v36 = vadd.f32 %v1971_v27, %v11662_v61  ;;  %v2060_v37 = vpop.f32.mrf.mxu1  ;;  %v9265_v17 = vld [vmem:[%s11437_s27 + $0x24c] sm:$0xf0]  ;;  %v10788_v27 = vld [vmem:[%s11437_s27 + $0x250] sm:$0xf0] }
  0xc7   : > { %v11717_v39 = vadd.f32 %v2235_v29, %v2147_v26  ;;  %v2061_v41 = vadd.f32 %v2060_v37, %v1972_v36  ;;  %2010 = vmatmul.bf16.gmra.mxu0 %v11708_v19  ;;  %v9271_v26 = vld [vmem:[%s11437_s27 + $0x238] sm:$0xf]  ;;  %v10785_v29 = vld [vmem:[%s11437_s27 + $0x23c] sm:$0xf] }
  0xc8   : > { %2099 = vmatmul.bf16.gmra.mxu1 %v11710_v34  ;;  %v9273_v36 = vld [vmem:[%s11437_s27 + $0x254] sm:$0xf0] }
  0xc9   : > { %2188 = vmatmul.bf16.gmra.mxu2 %v11712_v35 }
  0xca   : > { %2277 = vmatmul.bf16.gmra.mxu3 %v11715_v38 }
  0xcc   : > { %v2149_v56 = vpop.f32.mrf.mxu2  ;;  %v1973_v59 = vpop.f32.mrf.mxu0 }
  0xcd   : > { %v2150_v57 = vadd.f32 %v2149_v56, %v2061_v41  ;;  %v2238_v60 = vpop.f32.mrf.mxu3  ;;  %v1974_v62 = vadd.f32 %v1973_v59, %v11662_v61  ;;  %v2062_v63 = vpop.f32.mrf.mxu1  ;;  %v11742_v56 = vor.u32 %v10784_v16, %v9265_v17  ;;  %v11744_v59 = vor.u32 %v10788_v27, %v9271_v26  ;;  %v9759_v16 = vld [vmem:[%s15564_s1 + $0x290] sm:$0xf]  ;;  %v10909_v17 = vld [vmem:[%s15564_s1 + $0x294] sm:$0xf0] }
  0xce   : > { %v9760_v26 = vor.u32 %v10909_v17, %v9759_v16  ;;  %v9299_v16 = vld [vmem:[%s11437_s27 + $0x270] sm:$0xf]  ;;  %v10795_v17 = vld [vmem:[%s11437_s27 + $0x288] sm:$0xf0] }
  0xcf   : > { %v11730_v8 = vadd.f32 %v2238_v60, %v2150_v57  ;;  %v2063_v9 = vadd.f32 %v2062_v63, %v1974_v62  ;;  %15588 = vst [vmem:[#allocation24_spill] sm:$0xff] %v11742_v56  ;;  %v11747_v62 = vor.u32 %v10785_v29, %v9273_v36 }
  0xd0   : > { %15589 = vst [vmem:[#allocation25_spill] sm:$0xff] %v11744_v59  ;;  %2408 = vmatpush.bf16.msrb.mxu1 %v9760_v26 }
  0xd1   : > { %15590 = vst [vmem:[#allocation26_spill] sm:$0xff] %v11747_v62 }
  0xd4   : > { %v2151_v37 = vpop.f32.mrf.mxu2  ;;  %v1976_v53 = vpop.f32.mrf.mxu0 }
  0xd5   : > { %v2152_v41 = vadd.f32 %v2151_v37, %v2063_v9  ;;  %v2240_v54 = vpop.f32.mrf.mxu3  ;;  %v1977_v57 = vadd.f32 %v1976_v53, %v11662_v61  ;;  %v2065_v60 = vpop.f32.mrf.mxu1  ;;  %v9695_v9 = vld [vmem:[%s15564_s1 + $0x210] sm:$0xf] }
  0xd6   : > { %v9696_v11 = vor.u32 %v10893_v10, %v9695_v9  ;;  %v10794_v9 = vld [vmem:[%s11437_s27 + $0x280] sm:$0xf0]  ;;  %v10791_v10 = vld [vmem:[%s11437_s27 + $0x26c] sm:$0xf] }
  0xd7   : > { %v11749_v63 = vadd.f32 %v2240_v54, %v2152_v41  ;;  %v2066_v38 = vadd.f32 %v2065_v60, %v1977_v57  ;;  %2015 = vmatmul.bf16.gmra.mxu0 %v11740_v42  ;;  %v9291_v60 = vld [vmem:[%s11437_s27 + $0x268] sm:$0xf] }
  0xd8   : > { %2104 = vmatmul.bf16.gmra.mxu1 %v11742_v56  ;;  %2319 = vmatpush.bf16.msrb.mxu0 %v9696_v11  ;;  %v9301_v56 = vld [vmem:[%s11437_s27 + $0x28c] sm:$0xf0]  ;;  %v11778_v35 = vor.u32 %v10794_v9, %v9291_v60 }
  0xd9   : > { %2193 = vmatmul.bf16.gmra.mxu2 %v11744_v59  ;;  %v10792_v59 = vld [vmem:[%s11437_s27 + $0x274] sm:$0xf] }
  0xda   : > { %2282 = vmatmul.bf16.gmra.mxu3 %v11747_v62  ;;  %v9293_v62 = vld [vmem:[%s11437_s27 + $0x284] sm:$0xf0] }
  0xdb   : > { %v11780_v34 = vor.u32 %v10791_v10, %v9293_v62  ;;  %v9473_v62 = vld [vmem:[%s15564_s1 + $0x58] sm:$0xf0] }
  0xdc   : > { %v2154_v27 = vpop.f32.mrf.mxu2  ;;  %v1978_v36 = vpop.f32.mrf.mxu0 }
  0xdd   : > { %v2155_v29 = vadd.f32 %v2154_v27, %v2066_v38  ;;  %v2243_v37 = vpop.f32.mrf.mxu3  ;;  %v1979_v41 = vadd.f32 %v1978_v36, %v11662_v61  ;;  %v2067_v53 = vpop.f32.mrf.mxu1  ;;  %15591 = vst [vmem:[#allocation27_spill] sm:$0xff] %v11780_v34  ;;  %v11782_v36 = vor.u32 %v10795_v17, %v9299_v16 }
  0xdf   : > { %v11768_v54 = vadd.f32 %v2243_v37, %v2155_v29  ;;  %v2068_v57 = vadd.f32 %v2067_v53, %v1979_v41  ;;  %15592 = vst [vmem:[#allocation28_spill] sm:$0xff] %v11782_v36  ;;  %v11785_v41 = vor.u32 %v10792_v59, %v9301_v56 }
  0xe1   : > { %15593 = vst [vmem:[#allocation29_spill] sm:$0xff] %v11785_v41 }
  0xe4   : > { %v2156_v11 = vpop.f32.mrf.mxu2  ;;  %v1981_v27 = vpop.f32.mrf.mxu0 }
  0xe5   : > { %v2157_v38 = vadd.f32 %v2156_v11, %v2068_v57  ;;  %v2245_v26 = vpop.f32.mrf.mxu3  ;;  %v1982_v29 = vadd.f32 %v1981_v27, %v11662_v61  ;;  %v2070_v37 = vpop.f32.mrf.mxu1  ;;  %v10836_v57 = vld [vmem:[%s15564_s1 + $0x54] sm:$0xf]  ;;  %v9319_v27 = vld [vmem:[%s11437_s27 + $0x2a0] sm:$0xf] }
  0xe6   : > { %v9476_v56 = vor.u32 %v10836_v57, %v9473_v62  ;;  %v9327_v57 = vld [vmem:[%s11437_s27 + $0x2a8] sm:$0xf]  ;;  %v10802_v62 = vld [vmem:[%s11437_s27 + $0x2c0] sm:$0xf0] }
  0xe7   : > { %v11787_v53 = vadd.f32 %v2245_v26, %v2157_v38  ;;  %v2071_v28 = vadd.f32 %v2070_v37, %v1982_v29  ;;  %2020 = vmatmul.bf16.gmra.mxu0 %v11778_v35  ;;  %v10801_v26 = vld [vmem:[%s11437_s27 + $0x2b8] sm:$0xf0]  ;;  %v10798_v29 = vld [vmem:[%s11437_s27 + $0x2a4] sm:$0xf]  ;;  %v9321_v37 = vld [vmem:[%s11437_s27 + $0x2bc] sm:$0xf0] }
  0xe8   : > { %2109 = vmatmul.bf16.gmra.mxu1 %v11780_v34  ;;  %2582 = vmatpush.bf16.msrb.mxu3 %v9476_v56  ;;  %v11810_v34 = vor.u32 %v10801_v26, %v9319_v27  ;;  %v11812_v24 = vor.u32 %v10798_v29, %v9321_v37  ;;  %v10891_v27 = vld [vmem:[%s15564_s1 + $0x204] sm:$0xf0] }
  0xe9   : > { %2198 = vmatmul.bf16.gmra.mxu2 %v11782_v36  ;;  %v9329_v36 = vld [vmem:[%s11437_s27 + $0x2c4] sm:$0xf0] }
  0xea   : > { %2287 = vmatmul.bf16.gmra.mxu3 %v11785_v41  ;;  %v10799_v41 = vld [vmem:[%s11437_s27 + $0x2ac] sm:$0xf]  ;;  %15594 = vst [vmem:[#allocation30_spill] sm:$0xff] %v11812_v24 }
  0xec   : > { %v2159_v59 = vpop.f32.mrf.mxu2  ;;  %v1983_v9 = vpop.f32.mrf.mxu0 }
  0xed   : > { %v2160_v60 = vadd.f32 %v2159_v59, %v2071_v28  ;;  %v2248_v10 = vpop.f32.mrf.mxu3  ;;  %v1984_v16 = vadd.f32 %v1983_v9, %v11662_v61  ;;  %v2072_v17 = vpop.f32.mrf.mxu1  ;;  %v11814_v9 = vor.u32 %v10802_v62, %v9327_v57 }
  0xef   : > { %v11800_v11 = vadd.f32 %v2248_v10, %v2160_v60  ;;  %v2073_v38 = vadd.f32 %v2072_v17, %v1984_v16  ;;  %15595 = vst [vmem:[#allocation31_spill] sm:$0xff] %v11814_v9  ;;  %v11817_v16 = vor.u32 %v10799_v41, %v9329_v36  ;;  %v9751_v36 = vld [vmem:[%s15564_s1 + $0x280] sm:$0xf]  ;;  %v10907_v41 = vld [vmem:[%s15564_s1 + $0x284] sm:$0xf0] }
  0xf0   : > { %v9752_v26 = vor.u32 %v10907_v41, %v9751_v36  ;;  %v9355_v36 = vld [vmem:[%s11437_s27 + $0x2e0] sm:$0xf]  ;;  %v10809_v41 = vld [vmem:[%s11437_s27 + $0x2f8] sm:$0xf0] }
  0xf1   : > { %15596 = vst [vmem:[#allocation32_spill] sm:$0xff] %v11817_v16 }
  0xf2   : > { %2409 = vmatpush.bf16.msrb.mxu1 %v9752_v26 }
  0xf4   : > { %v2161_v56 = vpop.f32.mrf.mxu2  ;;  %v1986_v59 = vpop.f32.mrf.mxu0 }
  0xf5   : > { %v2162_v28 = vadd.f32 %v2161_v56, %v2073_v38  ;;  %v2250_v25 = vpop.f32.mrf.mxu3  ;;  %v1987_v60 = vadd.f32 %v1986_v59, %v11662_v61  ;;  %v2075_v10 = vpop.f32.mrf.mxu1  ;;  %v9687_v38 = vld [vmem:[%s15564_s1 + $0x200] sm:$0xf] }
  0xf7   : > { %v11819_v17 = vadd.f32 %v2250_v25, %v2162_v28  ;;  %v2076_v55 = vadd.f32 %v2075_v10, %v1987_v60  ;;  %2025 = vmatmul.bf16.gmra.mxu0 %v11810_v34  ;;  %v9688_v25 = vor.u32 %v10891_v27, %v9687_v38  ;;  %v9347_v10 = vld [vmem:[%s11437_s27 + $0x2d8] sm:$0xf]  ;;  %v10808_v38 = vld [vmem:[%s11437_s27 + $0x2f0] sm:$0xf0]  ;;  %v10805_v27 = vld [vmem:[%s11437_s27 + $0x2dc] sm:$0xf] }
  0xf8   : > { %2114 = vmatmul.bf16.gmra.mxu1 %v11812_v24  ;;  %v9357_v24 = vld [vmem:[%s11437_s27 + $0x2fc] sm:$0xf0]  ;;  %v11848_v52 = vor.u32 %v10808_v38, %v9347_v10 }
  0xf9   : > { %2203 = vmatmul.bf16.gmra.mxu2 %v11814_v9  ;;  %2320 = vmatpush.bf16.msrb.mxu0 %v9688_v25  ;;  %v10806_v9 = vld [vmem:[%s11437_s27 + $0x2e4] sm:$0xf] }
  0xfa   : > { %2292 = vmatmul.bf16.gmra.mxu3 %v11817_v16  ;;  %v9349_v16 = vld [vmem:[%s11437_s27 + $0x2f4] sm:$0xf0]  ;;  %v11861_v10 = vor.u32 %v10806_v9, %v9357_v24  ;;  %v9457_v24 = vld [vmem:[%s15564_s1 + $0x38] sm:$0xf0] }
  0xfb   : > { %v11850_v51 = vor.u32 %v10805_v27, %v9349_v16  ;;  %v10832_v27 = vld [vmem:[%s15564_s1 + $0x34] sm:$0xf] }
  0xfc   : > { %v2164_v29 = vpop.f32.mrf.mxu2  ;;  %v1988_v57 = vpop.f32.mrf.mxu0  ;;  %15599 = vst [vmem:[#allocation35_spill] sm:$0xff] %v11861_v10  ;;  %v9460_v9 = vor.u32 %v10832_v27, %v9457_v24  ;;  %v10815_v27 = vld [vmem:[%s11437_s27 + $0x328] sm:$0xf0]  ;;  %v10812_v24 = vld [vmem:[%s11437_s27 + $0x314] sm:$0xf] }
  0xfd   : > { %v2165_v37 = vadd.f32 %v2164_v29, %v2076_v55  ;;  %v2253_v62 = vpop.f32.mrf.mxu3  ;;  %v1989_v56 = vadd.f32 %v1988_v57, %v11662_v61  ;;  %v2077_v28 = vpop.f32.mrf.mxu1  ;;  %15597 = vst [vmem:[#allocation33_spill] sm:$0xff] %v11850_v51  ;;  %v11852_v57 = vor.u32 %v10809_v41, %v9355_v36 }
  0xff   : > { %v11838_v59 = vadd.f32 %v2253_v62, %v2165_v37  ;;  %v2078_v60 = vadd.f32 %v2077_v28, %v1989_v56  ;;  %15598 = vst [vmem:[#allocation34_spill] sm:$0xff] %v11852_v57  ;;  %v10834_v37 = vld [vmem:[%s15564_s1 + $0x44] sm:$0xf]  ;;  %v9465_v62 = vld [vmem:[%s15564_s1 + $0x48] sm:$0xf0] }
 0x104   : > { %v2166_v25 = vpop.f32.mrf.mxu2  ;;  %v1991_v29 = vpop.f32.mrf.mxu0 }
 0x105   : > { %v2167_v55 = vadd.f32 %v2166_v25, %v2078_v60  ;;  %v2255_v26 = vpop.f32.mrf.mxu3  ;;  %v1992_v56 = vadd.f32 %v1991_v29, %v11662_v61  ;;  %v2080_v28 = vpop.f32.mrf.mxu1  ;;  %v9468_v60 = vor.u32 %v10834_v37, %v9465_v62  ;;  %v10830_v29 = vld [vmem:[%s15564_s1 + $0x24] sm:$0xf] }
 0x107   : > { %v11863_v38 = vadd.f32 %v2255_v26, %v2167_v55  ;;  %v2081_v16 = vadd.f32 %v2080_v28, %v1992_v56  ;;  %2030 = vmatmul.bf16.gmra.mxu0 %v11848_v52  ;;  %2583 = vmatpush.bf16.msrb.mxu3 %v9468_v60  ;;  %v9449_v26 = vld [vmem:[%s15564_s1 + $0x28] sm:$0xf0] }
 0x108   : > { %2119 = vmatmul.bf16.gmra.mxu1 %v11850_v51  ;;  %v9452_v56 = vor.u32 %v10830_v29, %v9449_v26  ;;  %v10813_v29 = vld [vmem:[%s11437_s27 + $0x31c] sm:$0xf] }
 0x109   : > { %2208 = vmatmul.bf16.gmra.mxu2 %v11852_v57  ;;  %v10816_v57 = vld [vmem:[%s11437_s27 + $0x330] sm:$0xf0] }
 0x10a   : > { %2297 = vmatmul.bf16.gmra.mxu3 %v11861_v10  ;;  %v9377_v10 = vld [vmem:[%s11437_s27 + $0x32c] sm:$0xf0] }
 0x10b   : > { %2584 = vmatpush.bf16.msrb.mxu3 %v9460_v9  ;;  %v10828_v9 = vld [vmem:[%s15564_s1 + $0x14] sm:$0xf]  ;;  %v11900_v23 = vor.u32 %v10812_v24, %v9377_v10  ;;  %v9553_v24 = vld [vmem:[%s15564_s1 + $0xf8] sm:$0xf0] }
 0x10c   : > { %v2169_v36 = vpop.f32.mrf.mxu2  ;;  %v1993_v25 = vpop.f32.mrf.mxu0 }
 0x10d   : > { %v2170_v41 = vadd.f32 %v2169_v36, %v2081_v16  ;;  %v2258_v55 = vpop.f32.mrf.mxu3  ;;  %v1994_v37 = vadd.f32 %v1993_v25, %v11662_v61  ;;  %v2082_v62 = vpop.f32.mrf.mxu1  ;;  %v9375_v16 = vld [vmem:[%s11437_s27 + $0x310] sm:$0xf]  ;;  %v9441_v36 = vld [vmem:[%s15564_s1 + $0x18] sm:$0xf0]  ;;  %v9383_v25 = vld [vmem:[%s11437_s27 + $0x318] sm:$0xf] }
 0x10e   : > { %v9444_v51 = vor.u32 %v10828_v9, %v9441_v36  ;;  %v11898_v26 = vor.u32 %v10815_v27, %v9375_v16  ;;  %15600 = vst [vmem:[#allocation36_spill] sm:$0xff] %v11900_v23  ;;  %v11902_v22 = vor.u32 %v10816_v57, %v9383_v25  ;;  %v9433_v9 = vld [vmem:[%s15564_s1 + $0x8] sm:$0xf0]  ;;  %v10856_v57 = vld [vmem:[%s15564_s1 + $0xf4] sm:$0xf] }
 0x10f   : > { %v11882_v28 = vadd.f32 %v2258_v55, %v2170_v41  ;;  %v2083_v60 = vadd.f32 %v2082_v62, %v1994_v37  ;;  %2585 = vmatpush.bf16.msrb.mxu3 %v9452_v56  ;;  %v9385_v41 = vld [vmem:[%s11437_s27 + $0x334] sm:$0xf0]  ;;  %v10872_v25 = vld [vmem:[%s15564_s1 + $0x174] sm:$0xf] }
 0x110   : > { %15601 = vst [vmem:[#allocation37_spill] sm:$0xff] %v11902_v22  ;;  %v11911_v27 = vor.u32 %v10813_v29, %v9385_v41  ;;  %v9617_v29 = vld [vmem:[%s15564_s1 + $0x178] sm:$0xf0] }
 0x111   : > { %v9620_v41 = vor.u32 %v10872_v25, %v9617_v29  ;;  %v9411_v25 = vld [vmem:[%s11437_s27 + $0x350] sm:$0xf]  ;;  %v10823_v29 = vld [vmem:[%s11437_s27 + $0x368] sm:$0xf0] }
 0x112   : > { %15602 = vst [vmem:[#allocation38_spill] sm:$0xff] %v11911_v27 }
 0x113   : > { %2586 = vmatpush.bf16.msrb.mxu3 %v9444_v51  ;;  %v9436_v51 = vor.u32 %v10826_v21, %v9433_v9  ;;  %v9556_v21 = vor.u32 %v10856_v57, %v9553_v24  ;;  %2758 = vmatpush.bf16.msra.mxu1 %v9620_v41  ;;  %v9403_v57 = vld [vmem:[%s11437_s27 + $0x348] sm:$0xf]  ;;  %v10822_v24 = vld [vmem:[%s11437_s27 + $0x360] sm:$0xf0] }
 0x114   : > { %v2171_v55 = vpop.f32.mrf.mxu2  ;;  %v1996_v62 = vpop.f32.mrf.mxu0  ;;  %v11942_v6 = vor.u32 %v10822_v24, %v9403_v57 }
 0x115   : > { %v2172_v37 = vadd.f32 %v2171_v55, %v2083_v60  ;;  %v2260_v56 = vpop.f32.mrf.mxu3  ;;  %v1997_v36 = vadd.f32 %v1996_v62, %v11662_v61  ;;  %v2085_v16 = vpop.f32.mrf.mxu1  ;;  %2669 = vmatpush.bf16.msra.mxu0 %v9556_v21 }
 0x117   : > { %v11913_v60 = vadd.f32 %v2260_v56, %v2172_v37  ;;  %v2086_v10 = vadd.f32 %v2085_v16, %v1997_v36  ;;  %2035 = vmatmul.bf16.gmra.mxu0 %v11898_v26  ;;  %2587 = vmatpush.bf16.msrb.mxu3 %v9436_v51 }
 0x118   : > { %2124 = vmatmul.bf16.gmra.mxu1 %v11900_v23  ;;  %v10820_v23 = vld [vmem:[%s11437_s27 + $0x354] sm:$0xf] }
 0x119   : > { %2213 = vmatmul.bf16.gmra.mxu2 %v11902_v22  ;;  %v9405_v22 = vld [vmem:[%s11437_s27 + $0x364] sm:$0xf0] }
 0x11a   : > { %2302 = vmatmul.bf16.gmra.mxu3 %v11911_v27  ;;  %v10819_v27 = vld [vmem:[%s11437_s27 + $0x34c] sm:$0xf] }
 0x11b   : > { %v11944_v5 = vor.u32 %v10819_v27, %v9405_v22 }
 0x11c   : > { %v2174_v55 = vpop.f32.mrf.mxu2  ;;  %v1998_v62 = vpop.f32.mrf.mxu0 }
 0x11d   : > { %v2175_v37 = vadd.f32 %v2174_v55, %v2086_v10  ;;  %v2263_v56 = vpop.f32.mrf.mxu3  ;;  %v1999_v9 = vadd.f32 %v1998_v62, %v11662_v61  ;;  %v2087_v36 = vpop.f32.mrf.mxu1  ;;  %15603 = vst [vmem:[#allocation39_spill] sm:$0xff] %v11944_v5  ;;  %v11946_v62 = vor.u32 %v10823_v29, %v9411_v25  ;;  %v8999_v29 = vld [vmem:[%s11437_s27 + $0x10] sm:$0xf] }
 0x11f   : > { %v11932_v16 = vadd.f32 %v2263_v56, %v2175_v37  ;;  %v2088_v51 = vadd.f32 %v2087_v36, %v1999_v9  ;;  %15604 = vst [vmem:[#allocation40_spill] sm:$0xff] %v11946_v62  ;;  %v11949_v9 = vor.u32 %v10820_v23, %v9413_v7 }
 0x121   : > { %15605 = vst [vmem:[#allocation41_spill] sm:$0xff] %v11949_v9 }
 0x124   : > { %v2176_v21 = vpop.f32.mrf.mxu2  ;;  %v2001_v55 = vpop.f32.mrf.mxu0 }
 0x125   : > { %v2177_v10 = vadd.f32 %v2176_v21, %v2088_v51  ;;  %v2265_v41 = vpop.f32.mrf.mxu3  ;;  %v2002_v37 = vadd.f32 %v2001_v55, %v11662_v61  ;;  %v2090_v56 = vpop.f32.mrf.mxu1  ;;  %v10719_v21 = vld [vmem:[%s11437_s27 + $0x28] sm:$0xf0]  ;;  %v9001_v55 = vld [vmem:[%s11437_s27 + $0x2c] sm:$0xf0] }
 0x127   : > { %v11951_v36 = vadd.f32 %v2265_v41, %v2177_v10  ;;  %v2091_v48 = vadd.f32 %v2090_v56, %v2002_v37  ;;  %2040 = vmatmul.bf16.gmra.mxu0 %v11942_v6  ;;  %v10716_v10 = vld [vmem:[%s11437_s27 + $0x14] sm:$0xf]  ;;  %v9007_v41 = vld [vmem:[%s11437_s27 + $0x18] sm:$0xf] }
 0x128   : > { %2129 = vmatmul.bf16.gmra.mxu1 %v11944_v5  ;;  %v10720_v37 = vld [vmem:[%s11437_s27 + $0x30] sm:$0xf0] }
 0x129   : > { %2218 = vmatmul.bf16.gmra.mxu2 %v11946_v62  ;;  %v11966_v62 = vor.u32 %v10719_v21, %v8999_v29  ;;  %v11970_v47 = vor.u32 %v10720_v37, %v9007_v41  ;;  %v9609_v29 = vld [vmem:[%s15564_s1 + $0x168] sm:$0xf0] }
 0x12a   : > { %2307 = vmatmul.bf16.gmra.mxu3 %v11949_v9 }
 0x12b   : > { %15607 = vst [vmem:[#allocation43_spill] sm:$0xff] %v11970_v47 }
 0x12c   : > { %v2179_v22 = vpop.f32.mrf.mxu2  ;;  %v2003_v7 = vpop.f32.mrf.mxu0 }
 0x12d   : > { %v2180_v27 = vadd.f32 %v2179_v22, %v2091_v48  ;;  %v2268_v23 = vpop.f32.mrf.mxu3  ;;  %v2004_v51 = vadd.f32 %v2003_v7, %v11662_v61  ;;  %v2092_v57 = vpop.f32.mrf.mxu1  ;;  %v11968_v22 = vor.u32 %v10716_v10, %v9001_v55 }
 0x12f   : > { %v11958_v24 = vadd.f32 %v2268_v23, %v2180_v27  ;;  %v2093_v25 = vadd.f32 %v2092_v57, %v2004_v51  ;;  %15606 = vst [vmem:[#allocation42_spill] sm:$0xff] %v11968_v22  ;;  %v10854_v57 = vld [vmem:[%s15564_s1 + $0xe4] sm:$0xf] }
 0x134   : > { %v2181_v56 = vpop.f32.mrf.mxu2  ;;  %v2006_v5 = vpop.f32.mrf.mxu0 }
 0x135   : > { %v2182_v9 = vadd.f32 %v2181_v56, %v2093_v25  ;;  %v2270_v48 = vpop.f32.mrf.mxu3  ;;  %v2007_v27 = vadd.f32 %v2006_v5, %v11662_v61  ;;  %v2095_v7 = vpop.f32.mrf.mxu1  ;;  %v9545_v5 = vld [vmem:[%s15564_s1 + $0xe8] sm:$0xf0]  ;;  %v10870_v25 = vld [vmem:[%s15564_s1 + $0x164] sm:$0xf] }
 0x136   : > { %v9612_v21 = vor.u32 %v10870_v25, %v9609_v29 }
 0x137   : > { %v11973_v23 = vadd.f32 %v2270_v48, %v2182_v9  ;;  %v2096_v51 = vadd.f32 %v2095_v7, %v2007_v27  ;;  %2321 = vmatmul.bf16.vlgmr.msrb.gmra.mxu0 %v11966_v62  ;;  %v9548_v9 = vor.u32 %v10854_v57, %v9545_v5  ;;  %v9027_v7 = vld [vmem:[%s11437_s27 + $0x48] sm:$0xf]  ;;  %v10726_v57 = vld [vmem:[%s11437_s27 + $0x60] sm:$0xf0]  ;;  %v10723_v5 = vld [vmem:[%s11437_s27 + $0x4c] sm:$0xf] }
 0x138   : > { %2410 = vmatmul.bf16.vlgmr.msrb.gmra.mxu1 %v11968_v22  ;;  %v9035_v22 = vld [vmem:[%s11437_s27 + $0x50] sm:$0xf]  ;;  %v12001_v29 = vor.u32 %v10726_v57, %v9027_v7 }
 0x139   : > { %9821 = vmatmul.msk.bf16.vlgmr.msrb.gmra.mxu2 %vm1908_vm0, %v11970_v47  ;;  %2670 = vmatpush.bf16.msra.mxu0 %v9548_v9  ;;  %v9029_v47 = vld [vmem:[%s11437_s27 + $0x64] sm:$0xf0] }
 0x13a   : > { %2588 = vmatmul.bf16.vlgmr.msrb.gmra.mxu3 %v11442_v40  ;;  %2759 = vmatpush.bf16.msra.mxu1 %v9612_v21  ;;  %v12003_v33 = vor.u32 %v10723_v5, %v9029_v47  ;;  %v12005_v21 = vor.u32 %v10727_v44, %v9035_v22 }
 0x13c   : > { %v2184_v10 = vpop.f32.mrf.mxu2  ;;  %v2008_v41 = vpop.f32.mrf.mxu0  ;;  %15608 = vst [vmem:[#allocation44_spill] sm:$0xff] %v12003_v33 }
 0x13d   : > { %v2185_v55 = vadd.f32 %v2184_v10, %v2096_v51  ;;  %v2273_v40 = vpop.f32.mrf.mxu3  ;;  %v2009_v37 = vadd.f32 %v2008_v41, %v11662_v61  ;;  %v2097_v56 = vpop.f32.mrf.mxu1  ;;  %15609 = vst [vmem:[#allocation45_spill] sm:$0xff] %v12005_v21 }
 0x13f   : > { %v11993_v48 = vadd.f32 %v2273_v40, %v2185_v55  ;;  %v2098_v27 = vadd.f32 %v2097_v56, %v2009_v37 }
 0x144   : > { %v2186_v25 = vpop.f32.mrf.mxu2  ;;  %v2011_v51 = vpop.f32.mrf.mxu0 }
 0x145   : > { %v2187_v9 = vadd.f32 %v2186_v25, %v2098_v27  ;;  %v2275_v10 = vpop.f32.mrf.mxu3  ;;  %v2012_v55 = vadd.f32 %v2011_v51, %v11662_v61  ;;  %v2100_v41 = vpop.f32.mrf.mxu1  ;;  %v9055_v25 = vld [vmem:[%s11437_s27 + $0x80] sm:$0xf]  ;;  %v10730_v51 = vld [vmem:[%s11437_s27 + $0x84] sm:$0xf] }
 0x147   : > { %v12008_v40 = vadd.f32 %v2275_v10, %v2187_v9  ;;  %v2101_v37 = vadd.f32 %v2100_v41, %v2012_v55  ;;  %2326 = vmatmul.bf16.gmra.mxu0 %v12001_v29  ;;  %v10733_v9 = vld [vmem:[%s11437_s27 + $0x98] sm:$0xf0]  ;;  %v9057_v10 = vld [vmem:[%s11437_s27 + $0x9c] sm:$0xf0]  ;;  %v9063_v55 = vld [vmem:[%s11437_s27 + $0x88] sm:$0xf] }
 0x148   : > { %2415 = vmatmul.bf16.gmra.mxu1 %v12003_v33  ;;  %v10734_v41 = vld [vmem:[%s11437_s27 + $0xa0] sm:$0xf0] }
 0x149   : > { %9822 = vmatmul.msk.bf16.gmra.mxu2 %vm1908_vm0, %v12005_v21  ;;  %v12024_v21 = vor.u32 %v10733_v9, %v9055_v25  ;;  %v12028_v31 = vor.u32 %v10734_v41, %v9063_v55  ;;  %v9601_v25 = vld [vmem:[%s15564_s1 + $0x158] sm:$0xf0] }
 0x14a   : > { %2593 = vmatmul.bf16.gmra.mxu3 %v11479_v0 }
 0x14b   : > { %15610 = vst [vmem:[#allocation46_spill] sm:$0xff] %v12024_v21 }
 0x14c   : > { %v2189_v44 = vpop.f32.mrf.mxu2  ;;  %v2013_v22 = vpop.f32.mrf.mxu0  ;;  %15612 = vst [vmem:[#allocation48_spill] sm:$0xff] %v12028_v31 }
 0x14d   : > { %v2190_v47 = vadd.f32 %v2189_v44, %v2101_v37  ;;  %v2278_v56 = vpop.f32.mrf.mxu3  ;;  %v2014_v27 = vadd.f32 %v2013_v22, %v11662_v61  ;;  %v2102_v7 = vpop.f32.mrf.mxu1  ;;  %v12026_v44 = vor.u32 %v10730_v51, %v9057_v10 }
 0x14f   : > { %v12016_v57 = vadd.f32 %v2278_v56, %v2190_v47  ;;  %v2103_v5 = vadd.f32 %v2102_v7, %v2014_v27  ;;  %15611 = vst [vmem:[#allocation47_spill] sm:$0xff] %v12026_v44  ;;  %v9537_v7 = vld [vmem:[%s15564_s1 + $0xd8] sm:$0xf0] }
 0x154   : > { %v2191_v33 = vpop.f32.mrf.mxu2  ;;  %v2016_v32 = vpop.f32.mrf.mxu0 }
 0x155   : > { %v2192_v0 = vadd.f32 %v2191_v33, %v2103_v5  ;;  %v2280_v37 = vpop.f32.mrf.mxu3  ;;  %v2017_v47 = vadd.f32 %v2016_v32, %v11662_v61  ;;  %v2105_v22 = vpop.f32.mrf.mxu1  ;;  %v10852_v33 = vld [vmem:[%s15564_s1 + $0xd4] sm:$0xf] }
 0x156   : > { %v9540_v32 = vor.u32 %v10852_v33, %v9537_v7  ;;  %v10868_v5 = vld [vmem:[%s15564_s1 + $0x154] sm:$0xf]  ;;  %v10737_v7 = vld [vmem:[%s11437_s27 + $0xbc] sm:$0xf] }
 0x157   : > { %v12031_v56 = vadd.f32 %v2280_v37, %v2192_v0  ;;  %v2106_v27 = vadd.f32 %v2105_v22, %v2017_v47  ;;  %2331 = vmatmul.bf16.gmra.mxu0 %v12024_v21  ;;  %v9604_v9 = vor.u32 %v10868_v5, %v9601_v25  ;;  %v9083_v22 = vld [vmem:[%s11437_s27 + $0xb8] sm:$0xf]  ;;  %v10740_v33 = vld [vmem:[%s11437_s27 + $0xd0] sm:$0xf0]  ;;  %v10741_v21 = vld [vmem:[%s11437_s27 + $0xd8] sm:$0xf0] }
 0x158   : > { %2420 = vmatmul.bf16.gmra.mxu1 %v12026_v44  ;;  %2671 = vmatpush.bf16.msra.mxu0 %v9540_v32  ;;  %v9091_v44 = vld [vmem:[%s11437_s27 + $0xc0] sm:$0xf]  ;;  %v12059_v25 = vor.u32 %v10740_v33, %v9083_v22 }
 0x159   : > { %9823 = vmatmul.msk.bf16.gmra.mxu2 %vm1908_vm0, %v12028_v31  ;;  %2760 = vmatpush.bf16.msra.mxu1 %v9604_v9  ;;  %v9085_v31 = vld [vmem:[%s11437_s27 + $0xd4] sm:$0xf0]  ;;  %v12063_v9 = vor.u32 %v10741_v21, %v9091_v44 }
 0x15a   : > { %2598 = vmatmul.bf16.gmra.mxu3 %v11499_v12  ;;  %15613 = vst [vmem:[#allocation49_spill] sm:$0xff] %v12059_v25  ;;  %v12061_v15 = vor.u32 %v10737_v7, %v9085_v31 }
 0x15b   : > { %15615 = vst [vmem:[#allocation51_spill] sm:$0xff] %v12063_v9 }
 0x15c   : > { %v2194_v51 = vpop.f32.mrf.mxu2  ;;  %v2018_v55 = vpop.f32.mrf.mxu0  ;;  %15614 = vst [vmem:[#allocation50_spill] sm:$0xff] %v12061_v15 }
 0x15d   : > { %v2195_v10 = vadd.f32 %v2194_v51, %v2106_v27  ;;  %v2283_v12 = vpop.f32.mrf.mxu3  ;;  %v2019_v41 = vadd.f32 %v2018_v55, %v11662_v61  ;;  %v2107_v0 = vpop.f32.mrf.mxu1 }
 0x15f   : > { %v12051_v37 = vadd.f32 %v2283_v12, %v2195_v10  ;;  %v2108_v47 = vadd.f32 %v2107_v0, %v2019_v41 }
 0x164   : > { %v2196_v5 = vpop.f32.mrf.mxu2  ;;  %v2021_v27 = vpop.f32.mrf.mxu0 }
 0x165   : > { %v2197_v32 = vadd.f32 %v2196_v5, %v2108_v47  ;;  %v2285_v51 = vpop.f32.mrf.mxu3  ;;  %v2022_v10 = vadd.f32 %v2021_v27, %v11662_v61  ;;  %v2110_v55 = vpop.f32.mrf.mxu1  ;;  %v9111_v5 = vld [vmem:[%s11437_s27 + $0xf0] sm:$0xf]  ;;  %v10744_v27 = vld [vmem:[%s11437_s27 + $0xf4] sm:$0xf] }
 0x167   : > { %v12066_v12 = vadd.f32 %v2285_v51, %v2197_v32  ;;  %v2111_v41 = vadd.f32 %v2110_v55, %v2022_v10  ;;  %2336 = vmatmul.bf16.gmra.mxu0 %v12059_v25  ;;  %v10747_v32 = vld [vmem:[%s11437_s27 + $0x108] sm:$0xf0]  ;;  %v9113_v51 = vld [vmem:[%s11437_s27 + $0x10c] sm:$0xf0]  ;;  %v9119_v10 = vld [vmem:[%s11437_s27 + $0xf8] sm:$0xf] }
 0x168   : > { %2425 = vmatmul.bf16.gmra.mxu1 %v12061_v15  ;;  %v10748_v55 = vld [vmem:[%s11437_s27 + $0x110] sm:$0xf0] }
 0x169   : > { %15616 = vst [vmem:[#allocation52_spill] sm:$0xff] %v12066_v12  ;;  %9824 = vmatmul.msk.bf16.gmra.mxu2 %vm1908_vm0, %v12063_v9  ;;  %v12082_v9 = vor.u32 %v10747_v32, %v9111_v5  ;;  %v12086_v12 = vor.u32 %v10748_v55, %v9119_v10  ;;  %v9593_v5 = vld [vmem:[%s15564_s1 + $0x148] sm:$0xf0] }
 0x16a   : > { %2603 = vmatmul.bf16.gmra.mxu3 %v11531_v30 }
 0x16b   : > { %15617 = vst [vmem:[#allocation53_spill] sm:$0xff] %v12082_v9 }
 0x16c   : > { %v2199_v31 = vpop.f32.mrf.mxu2  ;;  %v2023_v44 = vpop.f32.mrf.mxu0  ;;  %15619 = vst [vmem:[#allocation55_spill] sm:$0xff] %v12086_v12 }
 0x16d   : > { %v2200_v21 = vadd.f32 %v2199_v31, %v2111_v41  ;;  %v2288_v0 = vpop.f32.mrf.mxu3  ;;  %v2024_v47 = vadd.f32 %v2023_v44, %v11662_v61  ;;  %v2112_v22 = vpop.f32.mrf.mxu1  ;;  %v12084_v31 = vor.u32 %v10744_v27, %v9113_v51 }
 0x16f   : > { %v12074_v33 = vadd.f32 %v2288_v0, %v2200_v21  ;;  %v2113_v7 = vadd.f32 %v2112_v22, %v2024_v47  ;;  %15618 = vst [vmem:[#allocation54_spill] sm:$0xff] %v12084_v31  ;;  %v9529_v22 = vld [vmem:[%s15564_s1 + $0xc8] sm:$0xf0] }
 0x174   : > { %v2201_v15 = vpop.f32.mrf.mxu2  ;;  %v2026_v25 = vpop.f32.mrf.mxu0 }
 0x175   : > { %v2202_v30 = vadd.f32 %v2201_v15, %v2113_v7  ;;  %v2290_v41 = vpop.f32.mrf.mxu3  ;;  %v2027_v21 = vadd.f32 %v2026_v25, %v11662_v61  ;;  %v2115_v44 = vpop.f32.mrf.mxu1  ;;  %v10850_v15 = vld [vmem:[%s15564_s1 + $0xc4] sm:$0xf] }
 0x176   : > { %v9532_v25 = vor.u32 %v10850_v15, %v9529_v22  ;;  %v10866_v7 = vld [vmem:[%s15564_s1 + $0x144] sm:$0xf]  ;;  %v10751_v22 = vld [vmem:[%s11437_s27 + $0x12c] sm:$0xf] }
 0x177   : > { %v12089_v0 = vadd.f32 %v2290_v41, %v2202_v30  ;;  %v2116_v47 = vadd.f32 %v2115_v44, %v2027_v21  ;;  %2341 = vmatmul.bf16.gmra.mxu0 %v12082_v9  ;;  %v9596_v32 = vor.u32 %v10866_v7, %v9593_v5  ;;  %v9139_v44 = vld [vmem:[%s11437_s27 + $0x128] sm:$0xf]  ;;  %v10754_v15 = vld [vmem:[%s11437_s27 + $0x140] sm:$0xf0]  ;;  %v10755_v9 = vld [vmem:[%s11437_s27 + $0x148] sm:$0xf0] }
 0x178   : > { %2430 = vmatmul.bf16.gmra.mxu1 %v12084_v31  ;;  %2672 = vmatpush.bf16.msra.mxu0 %v9532_v25  ;;  %v9147_v31 = vld [vmem:[%s11437_s27 + $0x130] sm:$0xf]  ;;  %v12117_v5 = vor.u32 %v10754_v15, %v9139_v44 }
 0x179   : > { %15620 = vst [vmem:[#allocation56_spill] sm:$0xff] %v12089_v0  ;;  %9825 = vmatmul.msk.bf16.gmra.mxu2 %vm1908_vm0, %v12086_v12  ;;  %2761 = vmatpush.bf16.msra.mxu1 %v9596_v32  ;;  %v9141_v12 = vld [vmem:[%s11437_s27 + $0x144] sm:$0xf0]  ;;  %v12121_v32 = vor.u32 %v10755_v9, %v9147_v31 }
 0x17a   : > { %2608 = vmatmul.bf16.gmra.mxu3 %v11551_v43  ;;  %15621 = vst [vmem:[#allocation57_spill] sm:$0xff] %v12117_v5  ;;  %v12119_v0 = vor.u32 %v10751_v22, %v9141_v12 }
 0x17b   : > { %15623 = vst [vmem:[#allocation59_spill] sm:$0xff] %v12121_v32 }
 0x17c   : > { %v2204_v27 = vpop.f32.mrf.mxu2  ;;  %v2028_v10 = vpop.f32.mrf.mxu0  ;;  %15622 = vst [vmem:[#allocation58_spill] sm:$0xff] %v12119_v0 }
 0x17d   : > { %v2205_v51 = vadd.f32 %v2204_v27, %v2116_v47  ;;  %v2293_v43 = vpop.f32.mrf.mxu3  ;;  %v2029_v55 = vadd.f32 %v2028_v10, %v11662_v61  ;;  %v2117_v30 = vpop.f32.mrf.mxu1 }
 0x17f   : > { %v12109_v41 = vadd.f32 %v2293_v43, %v2205_v51  ;;  %v2118_v21 = vadd.f32 %v2117_v30, %v2029_v55 }
 0x184   : > { %v2206_v7 = vpop.f32.mrf.mxu2  ;;  %v2031_v47 = vpop.f32.mrf.mxu0 }
 0x185   : > { %v2207_v25 = vadd.f32 %v2206_v7, %v2118_v21  ;;  %v2295_v27 = vpop.f32.mrf.mxu3  ;;  %v2032_v51 = vadd.f32 %v2031_v47, %v11662_v61  ;;  %v2120_v10 = vpop.f32.mrf.mxu1  ;;  %v9167_v7 = vld [vmem:[%s11437_s27 + $0x160] sm:$0xf]  ;;  %v10758_v47 = vld [vmem:[%s11437_s27 + $0x164] sm:$0xf] }
 0x187   : > { %v12124_v43 = vadd.f32 %v2295_v27, %v2207_v25  ;;  %v2121_v55 = vadd.f32 %v2120_v10, %v2032_v51  ;;  %2346 = vmatmul.bf16.gmra.mxu0 %v12117_v5  ;;  %v10761_v25 = vld [vmem:[%s11437_s27 + $0x178] sm:$0xf0]  ;;  %v9169_v27 = vld [vmem:[%s11437_s27 + $0x17c] sm:$0xf0]  ;;  %v9175_v51 = vld [vmem:[%s11437_s27 + $0x168] sm:$0xf] }
 0x188   : > { %2435 = vmatmul.bf16.gmra.mxu1 %v12119_v0  ;;  %v10762_v10 = vld [vmem:[%s11437_s27 + $0x180] sm:$0xf0] }
 0x189   : > { %15624 = vst [vmem:[#allocation60_spill] sm:$0xff] %v12124_v43  ;;  %9826 = vmatmul.msk.bf16.gmra.mxu2 %vm1908_vm0, %v12121_v32  ;;  %v12140_v32 = vor.u32 %v10761_v25, %v9167_v7  ;;  %v12144_v43 = vor.u32 %v10762_v10, %v9175_v51  ;;  %v9585_v7 = vld [vmem:[%s15564_s1 + $0x138] sm:$0xf0] }
 0x18a   : > { %2613 = vmatmul.bf16.gmra.mxu3 %v11583_v4 }
 0x18b   : > { %15625 = vst [vmem:[#allocation61_spill] sm:$0xff] %v12140_v32 }
 0x18c   : > { %v2209_v9 = vpop.f32.mrf.mxu2  ;;  %v2033_v31 = vpop.f32.mrf.mxu0  ;;  %15627 = vst [vmem:[#allocation63_spill] sm:$0xff] %v12144_v43 }
 0x18d   : > { %v2210_v12 = vadd.f32 %v2209_v9, %v2121_v55  ;;  %v2298_v30 = vpop.f32.mrf.mxu3  ;;  %v2034_v21 = vadd.f32 %v2033_v31, %v11662_v61  ;;  %v2122_v44 = vpop.f32.mrf.mxu1  ;;  %v12142_v9 = vor.u32 %v10758_v47, %v9169_v27 }
 0x18f   : > { %v12132_v15 = vadd.f32 %v2298_v30, %v2210_v12  ;;  %v2123_v22 = vadd.f32 %v2122_v44, %v2034_v21  ;;  %15626 = vst [vmem:[#allocation62_spill] sm:$0xff] %v12142_v9  ;;  %v9521_v44 = vld [vmem:[%s15564_s1 + $0xb8] sm:$0xf0] }
 0x194   : > { %v2211_v0 = vpop.f32.mrf.mxu2  ;;  %v2036_v5 = vpop.f32.mrf.mxu0 }
 0x195   : > { %v2212_v4 = vadd.f32 %v2211_v0, %v2123_v22  ;;  %v2300_v55 = vpop.f32.mrf.mxu3  ;;  %v2037_v12 = vadd.f32 %v2036_v5, %v11662_v61  ;;  %v2125_v31 = vpop.f32.mrf.mxu1  ;;  %v10848_v0 = vld [vmem:[%s15564_s1 + $0xb4] sm:$0xf] }
 0x196   : > { %v9524_v5 = vor.u32 %v10848_v0, %v9521_v44  ;;  %v10864_v22 = vld [vmem:[%s15564_s1 + $0x134] sm:$0xf]  ;;  %v10765_v44 = vld [vmem:[%s11437_s27 + $0x19c] sm:$0xf] }
 0x197   : > { %v12147_v30 = vadd.f32 %v2300_v55, %v2212_v4  ;;  %v2126_v21 = vadd.f32 %v2125_v31, %v2037_v12  ;;  %2351 = vmatmul.bf16.gmra.mxu0 %v12140_v32  ;;  %v9588_v25 = vor.u32 %v10864_v22, %v9585_v7  ;;  %v9195_v31 = vld [vmem:[%s11437_s27 + $0x198] sm:$0xf]  ;;  %v10768_v0 = vld [vmem:[%s11437_s27 + $0x1b0] sm:$0xf0]  ;;  %v10769_v32 = vld [vmem:[%s11437_s27 + $0x1b8] sm:$0xf0] }
 0x198   : > { %2440 = vmatmul.bf16.gmra.mxu1 %v12142_v9  ;;  %2673 = vmatpush.bf16.msra.mxu0 %v9524_v5  ;;  %v9203_v9 = vld [vmem:[%s11437_s27 + $0x1a0] sm:$0xf]  ;;  %v12175_v7 = vor.u32 %v10768_v0, %v9195_v31 }
 0x199   : > { %15628 = vst [vmem:[#allocation64_spill] sm:$0xff] %v12147_v30  ;;  %9827 = vmatmul.msk.bf16.gmra.mxu2 %vm1908_vm0, %v12144_v43  ;;  %2762 = vmatpush.bf16.msra.mxu1 %v9588_v25  ;;  %v9197_v43 = vld [vmem:[%s11437_s27 + $0x1b4] sm:$0xf0]  ;;  %v12179_v25 = vor.u32 %v10769_v32, %v9203_v9  ;;  %v9681_v32 = vld [vmem:[%s15564_s1 + $0x1f8] sm:$0xf0] }
 0x19a   : > { %2618 = vmatmul.bf16.gmra.mxu3 %v11603_v20  ;;  %15629 = vst [vmem:[#allocation65_spill] sm:$0xff] %v12175_v7  ;;  %v12177_v30 = vor.u32 %v10765_v44, %v9197_v43  ;;  %v10888_v43 = vld [vmem:[%s15564_s1 + $0x1f4] sm:$0xf] }
 0x19b   : > { %15631 = vst [vmem:[#allocation67_spill] sm:$0xff] %v12179_v25  ;;  %v10904_v9 = vld [vmem:[%s15564_s1 + $0x274] sm:$0xf] }
 0x19c   : > { %v2214_v47 = vpop.f32.mrf.mxu2  ;;  %v2038_v51 = vpop.f32.mrf.mxu0  ;;  %15630 = vst [vmem:[#allocation66_spill] sm:$0xff] %v12177_v30 }
 0x19d   : > { %v2215_v27 = vadd.f32 %v2214_v47, %v2126_v21  ;;  %v2303_v20 = vpop.f32.mrf.mxu3  ;;  %v2039_v10 = vadd.f32 %v2038_v51, %v11662_v61  ;;  %v2127_v4 = vpop.f32.mrf.mxu1 }
 0x19f   : > { %v12167_v55 = vadd.f32 %v2303_v20, %v2215_v27  ;;  %v2128_v12 = vadd.f32 %v2127_v4, %v2039_v10  ;;  %v9684_v4 = vor.u32 %v10888_v43, %v9681_v32  ;;  %v10775_v43 = vld [vmem:[%s11437_s27 + $0x1e8] sm:$0xf0]  ;;  %v10772_v32 = vld [vmem:[%s11437_s27 + $0x1d4] sm:$0xf] }
 0x1a1   : > { %2847 = vmatpush.bf16.msra.mxu2 %v9684_v4 }
 0x1a4   : > { %v2216_v22 = vpop.f32.mrf.mxu2  ;;  %v2041_v21 = vpop.f32.mrf.mxu0 }
 0x1a5   : > { %v2217_v5 = vadd.f32 %v2216_v22, %v2128_v12  ;;  %v2305_v47 = vpop.f32.mrf.mxu3  ;;  %v2042_v27 = vadd.f32 %v2041_v21, %v11662_v61  ;;  %v2130_v51 = vpop.f32.mrf.mxu1  ;;  %v9745_v12 = vld [vmem:[%s15564_s1 + $0x278] sm:$0xf0] }
 0x1a6   : > { %v9748_v31 = vor.u32 %v10904_v9, %v9745_v12 }
 0x1a7   : > { %v12182_v20 = vadd.f32 %v2305_v47, %v2217_v5  ;;  %v2131_v10 = vadd.f32 %v2130_v51, %v2042_v27  ;;  %2356 = vmatmul.bf16.gmra.mxu0 %v12175_v7  ;;  %v9223_v51 = vld [vmem:[%s11437_s27 + $0x1d0] sm:$0xf]  ;;  %v10776_v7 = vld [vmem:[%s11437_s27 + $0x1f0] sm:$0xf0] }
 0x1a8   : > { %2445 = vmatmul.bf16.gmra.mxu1 %v12177_v30  ;;  %2936 = vmatpush.bf16.msra.mxu3 %v9748_v31  ;;  %v9231_v30 = vld [vmem:[%s11437_s27 + $0x1d8] sm:$0xf]  ;;  %v12210_v12 = vor.u32 %v10775_v43, %v9223_v51 }
 0x1a9   : > { %15632 = vst [vmem:[#allocation68_spill] sm:$0xff] %v12182_v20  ;;  %9828 = vmatmul.msk.bf16.gmra.mxu2 %vm1908_vm0, %v12179_v25  ;;  %v9225_v25 = vld [vmem:[%s11437_s27 + $0x1ec] sm:$0xf0]  ;;  %v12214_v31 = vor.u32 %v10776_v7, %v9231_v30  ;;  %v10862_v7 = vld [vmem:[%s15564_s1 + $0x124] sm:$0xf] }
 0x1aa   : > { %2623 = vmatmul.bf16.gmra.mxu3 %v11635_v50  ;;  %v12212_v20 = vor.u32 %v10772_v32, %v9225_v25  ;;  %v10846_v25 = vld [vmem:[%s15564_s1 + $0xa4] sm:$0xf] }
 0x1ab   : > { %15634 = vst [vmem:[#allocation70_spill] sm:$0xff] %v12214_v31 }
 0x1ac   : > { %v2219_v0 = vpop.f32.mrf.mxu2  ;;  %v2043_v22 = vpop.f32.mrf.mxu0  ;;  %15633 = vst [vmem:[#allocation69_spill] sm:$0xff] %v12212_v20 }
 0x1ad   : > { %v2220_v44 = vadd.f32 %v2219_v0, %v2131_v10  ;;  %v2308_v5 = vpop.f32.mrf.mxu3  ;;  %v2044_v21 = vadd.f32 %v2043_v22, %v11662_v61  ;;  %v2132_v47 = vpop.f32.mrf.mxu1 }
 0x1af   : > { %v12202_v50 = vadd.f32 %v2308_v5, %v2220_v44  ;;  %v2133_v27 = vadd.f32 %v2132_v47, %v2044_v21  ;;  %v9577_v21 = vld [vmem:[%s15564_s1 + $0x128] sm:$0xf0] }
 0x1b0   : > { %v9580_v47 = vor.u32 %v10862_v7, %v9577_v21 }
 0x1b2   : > { %2763 = vmatpush.bf16.msra.mxu1 %v9580_v47 }
 0x1b4   : > { %v2221_v9 = vpop.f32.mrf.mxu2  ;;  %v2322_v0 = vpop.f32.mrf.mxu0 }
 0x1b5   : > { %v2222_v4 = vadd.f32 %v2221_v9, %v2133_v27  ;;  %v2310_v10 = vpop.f32.mrf.mxu3  ;;  %v2323_v61 = vadd.f32 %v2322_v0, %v11698_v58  ;;  %v2411_v44 = vpop.f32.mrf.mxu1  ;;  %v9513_v58 = vld [vmem:[%s15564_s1 + $0xa8] sm:$0xf0]  ;;  %v10782_v0 = vld [vmem:[%s11437_s27 + $0x220] sm:$0xf0] }
 0x1b6   : > { %v9516_v30 = vor.u32 %v10846_v25, %v9513_v58  ;;  %v9259_v25 = vld [vmem:[%s11437_s27 + $0x210] sm:$0xf]  ;;  %v10783_v58 = vld [vmem:[%s11437_s27 + $0x228] sm:$0xf0] }
 0x1b7   : > { %v12217_v22 = vadd.f32 %v2310_v10, %v2222_v4  ;;  %v2412_v5 = vadd.f32 %v2411_v44, %v2323_v61  ;;  %2361 = vmatmul.bf16.gmra.mxu0 %v12210_v12  ;;  %v9251_v10 = vld [vmem:[%s11437_s27 + $0x208] sm:$0xf]  ;;  %v10779_v61 = vld [vmem:[%s11437_s27 + $0x20c] sm:$0xf]  ;;  %v12251_v47 = vor.u32 %v10783_v58, %v9259_v25 }
 0x1b8   : > { %2450 = vmatmul.bf16.gmra.mxu1 %v12212_v20  ;;  %2674 = vmatpush.bf16.msra.mxu0 %v9516_v30  ;;  %v9253_v44 = vld [vmem:[%s11437_s27 + $0x224] sm:$0xf0]  ;;  %v12245_v20 = vor.u32 %v10782_v0, %v9251_v10  ;;  %v10902_v0 = vld [vmem:[%s15564_s1 + $0x264] sm:$0xf] }
 0x1b9   : > { %9829 = vmatmul.msk.bf16.gmra.mxu2 %vm1908_vm0, %v12214_v31  ;;  %v12249_v21 = vor.u32 %v10779_v61, %v9253_v44  ;;  %15636 = vst [vmem:[#allocation72_spill] sm:$0xff] %v12251_v47 }
 0x1ba   : > { %2628 = vmatmul.bf16.gmra.mxu3 %v11672_v18 }
 0x1bb   : > { %15635 = vst [vmem:[#allocation71_spill] sm:$0xff] %v12249_v21 }
 0x1bc   : > { %v2500_v27 = vpop.f32.mrf.mxu2  ;;  %v2324_v43 = vpop.f32.mrf.mxu0 }
 0x1bd   : > { %v2501_v51 = vadd.f32 %v2500_v27, %v2412_v5  ;;  %v12236_v32 = vpop.f32.mrf.mxu3  ;;  %v2325_v18 = vadd.f32 %v2324_v43, %v11717_v39  ;;  %v2413_v9 = vpop.f32.mrf.mxu1 }
 0x1bf   : > { %v2414_v4 = vadd.f32 %v2413_v9, %v2325_v18  ;;  %v3203_v43 = vmax.f32 %v2501_v51, 0.0  ;;  %v10886_v9 = vld [vmem:[%s15564_s1 + $0x1e4] sm:$0xf] }
 0x1c4   : > { %v2502_v31 = vpop.f32.mrf.mxu2  ;;  %v2327_v30 = vpop.f32.mrf.mxu0 }
 0x1c5   : > { %v2503_v7 = vadd.f32 %v2502_v31, %v2414_v4  ;;  %v12247_v5 = vpop.f32.mrf.mxu3  ;;  %v2328_v39 = vadd.f32 %v2327_v30, %v11730_v8  ;;  %v2416_v27 = vpop.f32.mrf.mxu1  ;;  %v9673_v31 = vld [vmem:[%s15564_s1 + $0x1e8] sm:$0xf0] }
 0x1c6   : > { %v9676_v10 = vor.u32 %v10886_v9, %v9673_v31  ;;  %v9737_v8 = vld [vmem:[%s15564_s1 + $0x268] sm:$0xf0]  ;;  %v10786_v9 = vld [vmem:[%s11437_s27 + $0x244] sm:$0xf]  ;;  %v9281_v31 = vld [vmem:[%s11437_s27 + $0x25c] sm:$0xf0] }
 0x1c7   : > { %v3205_v18 = vmax.f32 %v2503_v7, 0.0  ;;  %v2417_v4 = vadd.f32 %v2416_v27, %v2328_v39  ;;  %2366 = vmatmul.bf16.gmra.mxu0 %v12245_v20  ;;  %v9740_v61 = vor.u32 %v10902_v0, %v9737_v8  ;;  %v10790_v0 = vld [vmem:[%s11437_s27 + $0x260] sm:$0xf0] }
 0x1c8   : > { %2455 = vmatmul.bf16.gmra.mxu1 %v12249_v21  ;;  %2848 = vmatpush.bf16.msra.mxu2 %v9676_v10 }
 0x1c9   : > { %v12267_v51 = vpack.c.bf16 %v3205_v18, %v3203_v43  ;;  %9830 = vmatmul.msk.bf16.gmra.mxu2 %vm1908_vm0, %v12251_v47  ;;  %2937 = vmatpush.bf16.msra.mxu3 %v9740_v61  ;;  %v9279_v43 = vld [vmem:[%s11437_s27 + $0x240] sm:$0xf]  ;;  %v10789_v18 = vld [vmem:[%s11437_s27 + $0x258] sm:$0xf0]  ;;  %v9287_v47 = vld [vmem:[%s11437_s27 + $0x248] sm:$0xf] }
 0x1ca   : > { %2633 = vmatmul.bf16.gmra.mxu3 %v11708_v19  ;;  %v12282_v21 = vor.u32 %v10789_v18, %v9279_v43  ;;  %v10860_v43 = vld [vmem:[%s15564_s1 + $0x114] sm:$0xf]  ;;  %v9569_v18 = vld [vmem:[%s15564_s1 + $0x118] sm:$0xf0] }
 0x1cb   : > { %15637 = vst [vmem:[#allocation73_spill] sm:$0xff] %v12267_v51 }
 0x1cc   : > { %v2505_v44 = vpop.f32.mrf.mxu2  ;;  %v2329_v58 = vpop.f32.mrf.mxu0 }
 0x1cd   : > { %v2506_v25 = vadd.f32 %v2505_v44, %v2417_v4  ;;  %v12273_v7 = vpop.f32.mrf.mxu3  ;;  %v2330_v30 = vadd.f32 %v2329_v58, %v11749_v63  ;;  %v2418_v39 = vpop.f32.mrf.mxu1  ;;  %v12286_v4 = vor.u32 %v10786_v9, %v9281_v31  ;;  %v12288_v44 = vor.u32 %v10790_v0, %v9287_v47  ;;  %v9505_v47 = vld [vmem:[%s15564_s1 + $0x98] sm:$0xf0] }
 0x1ce   : > { %v9572_v9 = vor.u32 %v10860_v43, %v9569_v18 }
 0x1cf   : > { %v2419_v27 = vadd.f32 %v2418_v39, %v2330_v30  ;;  %15638 = vst [vmem:[#allocation74_spill] sm:$0xff] %v12286_v4  ;;  %v3207_v30 = vmax.f32 %v2506_v25, 0.0 }
 0x1d0   : > { %15639 = vst [vmem:[#allocation75_spill] sm:$0xff] %v12288_v44  ;;  %2764 = vmatpush.bf16.msra.mxu1 %v9572_v9 }
 0x1d4   : > { %v2507_v8 = vpop.f32.mrf.mxu2  ;;  %v2332_v10 = vpop.f32.mrf.mxu0 }
 0x1d5   : > { %v2508_v19 = vadd.f32 %v2507_v8, %v2419_v27  ;;  %v12284_v61 = vpop.f32.mrf.mxu3  ;;  %v2333_v63 = vadd.f32 %v2332_v10, %v11768_v54  ;;  %v2421_v58 = vpop.f32.mrf.mxu1  ;;  %v10844_v27 = vld [vmem:[%s15564_s1 + $0x94] sm:$0xf] }
 0x1d6   : > { %v9508_v25 = vor.u32 %v10844_v27, %v9505_v47  ;;  %v9309_v27 = vld [vmem:[%s11437_s27 + $0x294] sm:$0xf0]  ;;  %v9315_v47 = vld [vmem:[%s11437_s27 + $0x280] sm:$0xf] }
 0x1d7   : > { %v3209_v39 = vmax.f32 %v2508_v19, 0.0  ;;  %v2422_v51 = vadd.f32 %v2421_v58, %v2333_v63  ;;  %2371 = vmatmul.bf16.gmra.mxu0 %v12282_v21  ;;  %v9307_v58 = vld [vmem:[%s11437_s27 + $0x278] sm:$0xf] }
 0x1d8   : > { %2460 = vmatmul.bf16.gmra.mxu1 %v12286_v4  ;;  %2675 = vmatpush.bf16.msra.mxu0 %v9508_v25 }
 0x1d9   : > { %9831 = vmatmul.msk.bf16.gmra.mxu2 %vm1908_vm0, %v12288_v44  ;;  %v12301_v54 = vpack.c.bf16 %v3209_v39, %v3207_v30  ;;  %v10796_v30 = vld [vmem:[%s11437_s27 + $0x290] sm:$0xf0]  ;;  %v10793_v39 = vld [vmem:[%s11437_s27 + $0x27c] sm:$0xf] }
 0x1da   : > { %2638 = vmatmul.bf16.gmra.mxu3 %v11740_v42  ;;  %v10797_v44 = vld [vmem:[%s11437_s27 + $0x298] sm:$0xf0]  ;;  %v12323_v18 = vor.u32 %v10793_v39, %v9309_v27 }
 0x1db   : > { %15640 = vst [vmem:[#allocation76_spill] sm:$0xff] %v12301_v54  ;;  %v12319_v54 = vor.u32 %v10796_v30, %v9307_v58  ;;  %v12325_v9 = vor.u32 %v10797_v44, %v9315_v47  ;;  %v10900_v44 = vld [vmem:[%s15564_s1 + $0x254] sm:$0xf] }
 0x1dc   : > { %v2510_v31 = vpop.f32.mrf.mxu2  ;;  %v2334_v8 = vpop.f32.mrf.mxu0  ;;  %15641 = vst [vmem:[#allocation77_spill] sm:$0xff] %v12323_v18 }
 0x1dd   : > { %v2511_v0 = vadd.f32 %v2510_v31, %v2422_v51  ;;  %v12310_v19 = vpop.f32.mrf.mxu3  ;;  %v2335_v42 = vadd.f32 %v2334_v8, %v11787_v53  ;;  %v2423_v10 = vpop.f32.mrf.mxu1  ;;  %15642 = vst [vmem:[#allocation78_spill] sm:$0xff] %v12325_v9 }
 0x1df   : > { %v2424_v63 = vadd.f32 %v2423_v10, %v2335_v42  ;;  %v3211_v8 = vmax.f32 %v2511_v0, 0.0  ;;  %v10884_v10 = vld [vmem:[%s15564_s1 + $0x1d4] sm:$0xf] }
 0x1e4   : > { %v2512_v4 = vpop.f32.mrf.mxu2  ;;  %v2337_v25 = vpop.f32.mrf.mxu0 }
 0x1e5   : > { %v2513_v43 = vadd.f32 %v2512_v4, %v2424_v63  ;;  %v12321_v51 = vpop.f32.mrf.mxu3  ;;  %v2338_v53 = vadd.f32 %v2337_v25, %v11800_v11  ;;  %v2426_v31 = vpop.f32.mrf.mxu1  ;;  %v9665_v4 = vld [vmem:[%s15564_s1 + $0x1d8] sm:$0xf0] }
 0x1e6   : > { %v9668_v58 = vor.u32 %v10884_v10, %v9665_v4  ;;  %v9729_v11 = vld [vmem:[%s15564_s1 + $0x258] sm:$0xf0]  ;;  %v9335_v10 = vld [vmem:[%s11437_s27 + $0x2b0] sm:$0xf]  ;;  %v10803_v4 = vld [vmem:[%s11437_s27 + $0x2c8] sm:$0xf0] }
 0x1e7   : > { %v3213_v42 = vmax.f32 %v2513_v43, 0.0  ;;  %v2427_v63 = vadd.f32 %v2426_v31, %v2338_v53  ;;  %2376 = vmatmul.bf16.gmra.mxu0 %v12319_v54  ;;  %v9732_v0 = vor.u32 %v10900_v44, %v9729_v11  ;;  %v10800_v44 = vld [vmem:[%s11437_s27 + $0x2b4] sm:$0xf]  ;;  %v9337_v11 = vld [vmem:[%s11437_s27 + $0x2cc] sm:$0xf0] }
 0x1e8   : > { %2465 = vmatmul.bf16.gmra.mxu1 %v12323_v18  ;;  %2849 = vmatpush.bf16.msra.mxu2 %v9668_v58  ;;  %v12356_v18 = vor.u32 %v10803_v4, %v9335_v10  ;;  %v10858_v10 = vld [vmem:[%s15564_s1 + $0x104] sm:$0xf]  ;;  %v9561_v4 = vld [vmem:[%s15564_s1 + $0x108] sm:$0xf0] }
 0x1e9   : > { %9832 = vmatmul.msk.bf16.gmra.mxu2 %vm1908_vm0, %v12325_v9  ;;  %v12344_v30 = vpack.c.bf16 %v3213_v42, %v3211_v8  ;;  %2938 = vmatpush.bf16.msra.mxu3 %v9732_v0  ;;  %v9343_v8 = vld [vmem:[%s11437_s27 + $0x2b8] sm:$0xf]  ;;  %v10804_v42 = vld [vmem:[%s11437_s27 + $0x2d0] sm:$0xf0] }
 0x1ea   : > { %2643 = vmatmul.bf16.gmra.mxu3 %v11778_v35 }
 0x1eb   : > { %15643 = vst [vmem:[#allocation79_spill] sm:$0xff] %v12344_v30 }
 0x1ec   : > { %v2515_v39 = vpop.f32.mrf.mxu2  ;;  %v2339_v47 = vpop.f32.mrf.mxu0 }
 0x1ed   : > { %v2516_v27 = vadd.f32 %v2515_v39, %v2427_v63  ;;  %v12347_v43 = vpop.f32.mrf.mxu3  ;;  %v2340_v25 = vadd.f32 %v2339_v47, %v11819_v17  ;;  %v2428_v53 = vpop.f32.mrf.mxu1  ;;  %v12360_v63 = vor.u32 %v10800_v44, %v9337_v11  ;;  %v12362_v39 = vor.u32 %v10804_v42, %v9343_v8 }
 0x1ee   : > { %v9564_v44 = vor.u32 %v10858_v10, %v9561_v4  ;;  %v10882_v10 = vld [vmem:[%s15564_s1 + $0x1c4] sm:$0xf] }
 0x1ef   : > { %v2429_v31 = vadd.f32 %v2428_v53, %v2340_v25  ;;  %15644 = vst [vmem:[#allocation80_spill] sm:$0xff] %v12360_v63  ;;  %v3215_v25 = vmax.f32 %v2516_v27, 0.0 }
 0x1f0   : > { %15645 = vst [vmem:[#allocation81_spill] sm:$0xff] %v12362_v39  ;;  %2765 = vmatpush.bf16.msra.mxu1 %v9564_v44 }
 0x1f4   : > { %v2517_v9 = vpop.f32.mrf.mxu2  ;;  %v2342_v58 = vpop.f32.mrf.mxu0 }
 0x1f5   : > { %v2518_v35 = vadd.f32 %v2517_v9, %v2429_v31  ;;  %v12358_v0 = vpop.f32.mrf.mxu3  ;;  %v2343_v17 = vadd.f32 %v2342_v58, %v11838_v59  ;;  %v2431_v47 = vpop.f32.mrf.mxu1  ;;  %v10842_v9 = vld [vmem:[%s15564_s1 + $0x84] sm:$0xf]  ;;  %v9497_v31 = vld [vmem:[%s15564_s1 + $0x88] sm:$0xf0] }
 0x1f6   : > { %v9500_v27 = vor.u32 %v10842_v9, %v9497_v31  ;;  %v9365_v9 = vld [vmem:[%s11437_s27 + $0x304] sm:$0xf0]  ;;  %v9371_v31 = vld [vmem:[%s11437_s27 + $0x2f0] sm:$0xf] }
 0x1f7   : > { %v3217_v53 = vmax.f32 %v2518_v35, 0.0  ;;  %v2432_v30 = vadd.f32 %v2431_v47, %v2343_v17  ;;  %2381 = vmatmul.bf16.gmra.mxu0 %v12356_v18  ;;  %v9363_v47 = vld [vmem:[%s11437_s27 + $0x2e8] sm:$0xf] }
 0x1f8   : > { %2470 = vmatmul.bf16.gmra.mxu1 %v12360_v63  ;;  %2676 = vmatpush.bf16.msra.mxu0 %v9500_v27  ;;  %v10898_v63 = vld [vmem:[%s15564_s1 + $0x244] sm:$0xf] }
 0x1f9   : > { %9833 = vmatmul.msk.bf16.gmra.mxu2 %vm1908_vm0, %v12362_v39  ;;  %v12375_v59 = vpack.c.bf16 %v3217_v53, %v3215_v25  ;;  %v10810_v25 = vld [vmem:[%s11437_s27 + $0x300] sm:$0xf0]  ;;  %v10807_v53 = vld [vmem:[%s11437_s27 + $0x2ec] sm:$0xf] }
 0x1fa   : > { %2648 = vmatmul.bf16.gmra.mxu3 %v11810_v34  ;;  %v10811_v39 = vld [vmem:[%s11437_s27 + $0x308] sm:$0xf0]  ;;  %v12399_v4 = vor.u32 %v10810_v25, %v9363_v47 }
 0x1fb   : > { %15646 = vst [vmem:[#allocation82_spill] sm:$0xff] %v12375_v59  ;;  %v9721_v59 = vld [vmem:[%s15564_s1 + $0x248] sm:$0xf0] }
 0x1fc   : > { %v2520_v11 = vpop.f32.mrf.mxu2  ;;  %v2344_v42 = vpop.f32.mrf.mxu0  ;;  %15647 = vst [vmem:[#allocation83_spill] sm:$0xff] %v12399_v4 }
 0x1fd   : > { %v2521_v8 = vadd.f32 %v2520_v11, %v2432_v30  ;;  %v12384_v35 = vpop.f32.mrf.mxu3  ;;  %v2345_v34 = vadd.f32 %v2344_v42, %v11863_v38  ;;  %v2433_v58 = vpop.f32.mrf.mxu1  ;;  %v9657_v30 = vld [vmem:[%s15564_s1 + $0x1c8] sm:$0xf0] }
 0x1fe   : > { %v9660_v38 = vor.u32 %v10882_v10, %v9657_v30 }
 0x1ff   : > { %v2434_v17 = vadd.f32 %v2433_v58, %v2345_v34  ;;  %v12403_v34 = vor.u32 %v10807_v53, %v9365_v9  ;;  %v12405_v58 = vor.u32 %v10811_v39, %v9371_v31  ;;  %v3219_v10 = vmax.f32 %v2521_v8, 0.0  ;;  %v10880_v39 = vld [vmem:[%s15564_s1 + $0x1b4] sm:$0xf]  ;;  %v9649_v53 = vld [vmem:[%s15564_s1 + $0x1b8] sm:$0xf0] }
 0x200   : > { %2850 = vmatpush.bf16.msra.mxu2 %v9660_v38  ;;  %v10878_v31 = vld [vmem:[%s15564_s1 + $0x1a4] sm:$0xf]  ;;  %v9641_v38 = vld [vmem:[%s15564_s1 + $0x1a8] sm:$0xf0] }
 0x201   : > { %15648 = vst [vmem:[#allocation84_spill] sm:$0xff] %v12403_v34 }
 0x202   : > { %15649 = vst [vmem:[#allocation85_spill] sm:$0xff] %v12405_v58 }
 0x204   : > { %v2522_v27 = vpop.f32.mrf.mxu2  ;;  %v2347_v11 = vpop.f32.mrf.mxu0 }
 0x205   : > { %v2523_v44 = vadd.f32 %v2522_v27, %v2434_v17  ;;  %v12401_v42 = vpop.f32.mrf.mxu3  ;;  %v2348_v47 = vadd.f32 %v2347_v11, %v11882_v28  ;;  %v2436_v25 = vpop.f32.mrf.mxu1  ;;  %v9724_v17 = vor.u32 %v10898_v63, %v9721_v59  ;;  %v9652_v28 = vor.u32 %v10880_v39, %v9649_v53  ;;  %v10896_v63 = vld [vmem:[%s15564_s1 + $0x234] sm:$0xf]  ;;  %v9713_v59 = vld [vmem:[%s15564_s1 + $0x238] sm:$0xf0] }
 0x206   : > { %v9716_v9 = vor.u32 %v10896_v63, %v9713_v59  ;;  %v9644_v11 = vor.u32 %v10878_v31, %v9641_v38  ;;  %v9391_v59 = vld [vmem:[%s11437_s27 + $0x320] sm:$0xf]  ;;  %v10814_v38 = vld [vmem:[%s11437_s27 + $0x324] sm:$0xf] }
 0x207   : > { %v3221_v30 = vmax.f32 %v2523_v44, 0.0  ;;  %v2437_v27 = vadd.f32 %v2436_v25, %v2348_v47  ;;  %2386 = vmatmul.bf16.gmra.mxu0 %v12399_v4  ;;  %2939 = vmatpush.bf16.msra.mxu3 %v9724_v17 }
 0x208   : > { %2475 = vmatmul.bf16.gmra.mxu1 %v12403_v34  ;;  %2851 = vmatpush.bf16.msra.mxu2 %v9652_v28  ;;  %v9633_v28 = vld [vmem:[%s15564_s1 + $0x198] sm:$0xf0] }
 0x209   : > { %9834 = vmatmul.msk.bf16.gmra.mxu2 %vm1908_vm0, %v12405_v58  ;;  %v12430_v8 = vpack.c.bf16 %v3221_v30, %v3219_v10  ;;  %v9705_v10 = vld [vmem:[%s15564_s1 + $0x228] sm:$0xf0] }
 0x20a   : > { %2653 = vmatmul.bf16.gmra.mxu3 %v11848_v52  ;;  %v10894_v52 = vld [vmem:[%s15564_s1 + $0x224] sm:$0xf] }
 0x20b   : > { %15650 = vst [vmem:[#allocation86_spill] sm:$0xff] %v12430_v8  ;;  %2940 = vmatpush.bf16.msra.mxu3 %v9716_v9  ;;  %v9708_v53 = vor.u32 %v10894_v52, %v9705_v10  ;;  %v10817_v9 = vld [vmem:[%s11437_s27 + $0x338] sm:$0xf0]  ;;  %v10818_v52 = vld [vmem:[%s11437_s27 + $0x340] sm:$0xf0] }
 0x20c   : > { %v2525_v44 = vpop.f32.mrf.mxu2  ;;  %v2349_v25 = vpop.f32.mrf.mxu0  ;;  %2852 = vmatpush.bf16.msra.mxu2 %v9644_v11  ;;  %v9393_v11 = vld [vmem:[%s11437_s27 + $0x33c] sm:$0xf0] }
 0x20d   : > { %v2526_v47 = vadd.f32 %v2525_v44, %v2437_v27  ;;  %v12439_v17 = vpop.f32.mrf.mxu3  ;;  %v2350_v30 = vadd.f32 %v2349_v25, %v11913_v60  ;;  %v2438_v39 = vpop.f32.mrf.mxu1  ;;  %v10876_v27 = vld [vmem:[%s15564_s1 + $0x194] sm:$0xf]  ;;  %v9697_v44 = vld [vmem:[%s15564_s1 + $0x218] sm:$0xf0]  ;;  %v9399_v25 = vld [vmem:[%s11437_s27 + $0x328] sm:$0xf]  ;;  %v12476_v4 = vor.u32 %v10814_v38, %v9393_v11 }
 0x20e   : > { %v9636_v31 = vor.u32 %v10876_v27, %v9633_v28  ;;  %v10892_v60 = vld [vmem:[%s15564_s1 + $0x214] sm:$0xf]  ;;  %v12472_v27 = vor.u32 %v10817_v9, %v9391_v59  ;;  %v9817_v11 = vld [vmem:[%s15564_s1 + $0x308] sm:$0xf0] }
 0x20f   : > { %v2439_v63 = vadd.f32 %v2438_v39, %v2350_v30  ;;  %2941 = vmatpush.bf16.msra.mxu3 %v9708_v53  ;;  %v9700_v10 = vor.u32 %v10892_v60, %v9697_v44  ;;  %v10874_v30 = vld [vmem:[%s15564_s1 + $0x184] sm:$0xf]  ;;  %v9625_v39 = vld [vmem:[%s15564_s1 + $0x188] sm:$0xf0]  ;;  %15651 = vst [vmem:[#allocation87_spill] sm:$0xff] %v12476_v4 }
 0x210   : > { %2853 = vmatpush.bf16.msra.mxu2 %v9636_v31  ;;  %v9628_v28 = vor.u32 %v10874_v30, %v9625_v39  ;;  %v12478_v31 = vor.u32 %v10818_v52, %v9399_v25  ;;  %v10890_v60 = vld [vmem:[%s15564_s1 + $0x204] sm:$0xf]  ;;  %v9689_v44 = vld [vmem:[%s15564_s1 + $0x208] sm:$0xf0]  ;;  %v10920_v38 = vld [vmem:[%s15564_s1 + $0x2f4] sm:$0xf] }
 0x212   : > { %15652 = vst [vmem:[#allocation88_spill] sm:$0xff] %v12478_v31 }
 0x213   : > { %2942 = vmatpush.bf16.msra.mxu3 %v9700_v10  ;;  %v9692_v10 = vor.u32 %v10890_v60, %v9689_v44 }
 0x214   : > { %v2527_v53 = vpop.f32.mrf.mxu2  ;;  %v2352_v34 = vpop.f32.mrf.mxu0  ;;  %2854 = vmatpush.bf16.msra.mxu2 %v9628_v28 }
 0x215   : > { %v2528_v58 = vadd.f32 %v2527_v53, %v2439_v63  ;;  %v12474_v8 = vpop.f32.mrf.mxu3  ;;  %v2353_v59 = vadd.f32 %v2352_v34, %v11932_v16  ;;  %v2441_v9 = vpop.f32.mrf.mxu1  ;;  %v3223_v63 = vmax.f32 %v2526_v47, 0.0  ;;  %v9809_v16 = vld [vmem:[%s15564_s1 + $0x2f8] sm:$0xf0]  ;;  %v10922_v47 = vld [vmem:[%s15564_s1 + $0x304] sm:$0xf] }
 0x216   : > { %v9820_v25 = vor.u32 %v10922_v47, %v9817_v11 }
 0x217   : > { %v3225_v30 = vmax.f32 %v2528_v58, 0.0  ;;  %v2442_v39 = vadd.f32 %v2441_v9, %v2353_v59  ;;  %2391 = vmatmul.bf16.gmra.mxu0 %v12472_v27  ;;  %2943 = vmatpush.bf16.msra.mxu3 %v9692_v10  ;;  %v9812_v58 = vor.u32 %v10920_v38, %v9809_v16  ;;  %v9419_v9 = vld [vmem:[%s11437_s27 + $0x358] sm:$0xf]  ;;  %v10824_v10 = vld [vmem:[%s11437_s27 + $0x370] sm:$0xf0] }
 0x218   : > { %2480 = vmatmul.bf16.gmra.mxu1 %v12476_v4  ;;  %v9427_v38 = vld [vmem:[%s11437_s27 + $0x360] sm:$0xf]  ;;  %v10825_v16 = vld [vmem:[%s11437_s27 + $0x378] sm:$0xf0]  ;;  %v12515_v4 = vor.u32 %v10824_v10, %v9419_v9 }
 0x219   : > { %9835 = vmatmul.msk.bf16.gmra.mxu2 %vm1908_vm0, %v12478_v31  ;;  %v12497_v34 = vpack.c.bf16 %v3225_v30, %v3223_v63  ;;  %3025 = vmatpush.bf16.msrb.mxu0 %v9812_v58  ;;  %v10821_v63 = vld [vmem:[%s11437_s27 + $0x35c] sm:$0xf]  ;;  %v9421_v30 = vld [vmem:[%s11437_s27 + $0x374] sm:$0xf0] }
 0x21a   : > { %2658 = vmatmul.bf16.gmra.mxu3 %v11898_v26  ;;  %3121 = vmatpush.bf16.msrb.mxu1 %v9820_v25  ;;  %v12519_v11 = vor.u32 %v10821_v63, %v9421_v30  ;;  %v12521_v25 = vor.u32 %v10825_v16, %v9427_v38 }
 0x21c   : > { %v2530_v52 = vpop.f32.mrf.mxu2  ;;  %v2354_v28 = vpop.f32.mrf.mxu0  ;;  %15653 = vst [vmem:[#allocation89_spill] sm:$0xff] %v12519_v11 }
 0x21d   : > { %v2531_v53 = vadd.f32 %v2530_v52, %v2442_v39  ;;  %v12506_v60 = vpop.f32.mrf.mxu3  ;;  %v2355_v26 = vadd.f32 %v2354_v28, %v11951_v36  ;;  %v2443_v44 = vpop.f32.mrf.mxu1  ;;  %15654 = vst [vmem:[#allocation90_spill] sm:$0xff] %v12521_v25 }
 0x21f   : > { %v2444_v59 = vadd.f32 %v2443_v44, %v2355_v26  ;;  %v3227_v28 = vmax.f32 %v2531_v53, 0.0 }
 0x224   : > { %v2532_v31 = vpop.f32.mrf.mxu2  ;;  %v2357_v58 = vpop.f32.mrf.mxu0 }
 0x225   : > { %v2533_v47 = vadd.f32 %v2532_v31, %v2444_v59  ;;  %v12517_v39 = vpop.f32.mrf.mxu3  ;;  %v2358_v36 = vadd.f32 %v2357_v58, %v11958_v24  ;;  %v2446_v52 = vpop.f32.mrf.mxu1 }
 0x227   : > { %v3229_v26 = vmax.f32 %v2533_v47, 0.0  ;;  %v2447_v44 = vadd.f32 %v2446_v52, %v2358_v36  ;;  %2396 = vmatmul.bf16.gmra.mxu0 %v12515_v4 }
 0x228   : > { %2485 = vmatmul.bf16.gmra.mxu1 %v12519_v11 }
 0x229   : > { %9836 = vmatmul.msk.bf16.gmra.mxu2 %vm1908_vm0, %v12521_v25  ;;  %v12528_v31 = vpack.c.bf16 %v3229_v26, %v3227_v28  ;;  %v15674_v25 = vld [vmem:[#allocation12_spill] sm:$0xff] }
 0x22a   : > { %2663 = vmatmul.bf16.gmra.mxu3 %v11942_v6 }
 0x22c   : > { %v2535_v59 = vpop.f32.mrf.mxu2  ;;  %v2359_v10 = vpop.f32.mrf.mxu0 }
 0x22d   : > { %v2536_v9 = vadd.f32 %v2535_v59, %v2447_v44  ;;  %v12531_v63 = vpop.f32.mrf.mxu3  ;;  %v2360_v24 = vadd.f32 %v2359_v10, %v11973_v23  ;;  %v2448_v53 = vpop.f32.mrf.mxu1  ;;  %v10918_v23 = vld [vmem:[%s15564_s1 + $0x2e4] sm:$0xf]  ;;  %v9801_v44 = vld [vmem:[%s15564_s1 + $0x2e8] sm:$0xf0] }
 0x22f   : > { %v2449_v30 = vadd.f32 %v2448_v53, %v2360_v24  ;;  %v3231_v28 = vmax.f32 %v2536_v9, 0.0 }
 0x234   : > { %v2537_v38 = vpop.f32.mrf.mxu2  ;;  %v2362_v47 = vpop.f32.mrf.mxu0 }
 0x235   : > { %v2538_v16 = vadd.f32 %v2537_v38, %v2449_v30  ;;  %v12534_v58 = vpop.f32.mrf.mxu3  ;;  %v2363_v36 = vadd.f32 %v2362_v47, %v11993_v48  ;;  %v2451_v52 = vpop.f32.mrf.mxu1  ;;  %v9804_v48 = vor.u32 %v10918_v23, %v9801_v44 }
 0x237   : > { %v3233_v26 = vmax.f32 %v2538_v16, 0.0  ;;  %v2452_v6 = vadd.f32 %v2451_v52, %v2363_v36  ;;  %2677 = vmatmul.bf16.vlgmr.msra.gmra.mxu0 %v11447_v45 }
 0x238   : > { %2766 = vmatmul.bf16.vlgmr.msra.gmra.mxu1 %v11449_v46  ;;  %3026 = vmatpush.bf16.msrb.mxu0 %v9804_v48 }
 0x239   : > { %2855 = vmatmul.bf16.vlgmr.msra.gmra.mxu2 %v11453_v49  ;;  %v12546_v59 = vpack.c.bf16 %v3233_v26, %v3231_v28 }
 0x23a   : > { %2944 = vmatmul.bf16.vlgmr.msra.gmra.mxu3 %v11966_v62 }
 0x23c   : > { %v2540_v9 = vpop.f32.mrf.mxu2  ;;  %v2364_v10 = vpop.f32.mrf.mxu0 }
 0x23d   : > { %v2541_v45 = vadd.f32 %v2540_v9, %v2452_v6  ;;  %v12549_v46 = vpop.f32.mrf.mxu3  ;;  %v2365_v49 = vadd.f32 %v2364_v10, %v12008_v40  ;;  %v2453_v24 = vpop.f32.mrf.mxu1 }
 0x23f   : > { %v2454_v53 = vadd.f32 %v2453_v24, %v2365_v49  ;;  %v3235_v62 = vmax.f32 %v2541_v45, 0.0 }
 0x244   : > { %v2542_v30 = vpop.f32.mrf.mxu2  ;;  %v2367_v16 = vpop.f32.mrf.mxu0 }
 0x245   : > { %v2543_v38 = vadd.f32 %v2542_v30, %v2454_v53  ;;  %v12552_v47 = vpop.f32.mrf.mxu3  ;;  %v2368_v36 = vadd.f32 %v2367_v16, %v12016_v57  ;;  %v2456_v52 = vpop.f32.mrf.mxu1  ;;  %v9793_v16 = vld [vmem:[%s15564_s1 + $0x2d8] sm:$0xf0] }
 0x247   : > { %v3237_v28 = vmax.f32 %v2543_v38, 0.0  ;;  %v2457_v26 = vadd.f32 %v2456_v52, %v2368_v36  ;;  %2682 = vmatmul.bf16.gmra.mxu0 %v11481_v1  ;;  %v15655_v38 = vld [vmem:[#allocation2_spill] sm:$0xff] }
 0x248   : > { %2771 = vmatmul.bf16.gmra.mxu1 %v11483_v2 }
 0x249   : > { %2860 = vmatmul.bf16.gmra.mxu2 %v11485_v3  ;;  %v12558_v40 = vpack.c.bf16 %v3237_v28, %v3235_v62 }
 0x24a   : > { %2949 = vmatmul.bf16.gmra.mxu3 %v12001_v29 }
 0x24c   : > { %v2545_v6 = vpop.f32.mrf.mxu2  ;;  %v2369_v44 = vpop.f32.mrf.mxu0 }
 0x24d   : > { %v2546_v23 = vadd.f32 %v2545_v6, %v2457_v26  ;;  %v12561_v48 = vpop.f32.mrf.mxu3  ;;  %v2370_v57 = vadd.f32 %v2369_v44, %v12031_v56  ;;  %v2458_v9 = vpop.f32.mrf.mxu1  ;;  %v10916_v56 = vld [vmem:[%s15564_s1 + $0x2d4] sm:$0xf] }
 0x24e   : > { %v9796_v52 = vor.u32 %v10916_v56, %v9793_v16  ;;  %v15657_v26 = vld [vmem:[#allocation52_spill] sm:$0xff]  ;;  %v15661_v16 = vld [vmem:[#allocation49_spill] sm:$0xff] }
 0x24f   : > { %v2459_v45 = vadd.f32 %v2458_v9, %v2370_v57  ;;  %v3239_v53 = vmax.f32 %v2546_v23, 0.0 }
 0x250   : > { %3027 = vmatpush.bf16.msrb.mxu0 %v9796_v52 }
 0x254   : > { %v2547_v10 = vpop.f32.mrf.mxu2  ;;  %v2372_v1 = vpop.f32.mrf.mxu0 }
 0x255   : > { %v2548_v49 = vadd.f32 %v2547_v10, %v2459_v45  ;;  %v12564_v24 = vpop.f32.mrf.mxu3  ;;  %v2373_v2 = vadd.f32 %v2372_v1, %v12051_v37  ;;  %v2461_v3 = vpop.f32.mrf.mxu1  ;;  %v15656_v37 = vld [vmem:[#allocation46_spill] sm:$0xff] }
 0x257   : > { %v3241_v30 = vmax.f32 %v2548_v49, 0.0  ;;  %v2462_v29 = vadd.f32 %v2461_v3, %v2373_v2  ;;  %2687 = vmatmul.bf16.gmra.mxu0 %v11501_v13 }
 0x258   : > { %2776 = vmatmul.bf16.gmra.mxu1 %v11503_v14 }
 0x259   : > { %2865 = vmatmul.bf16.gmra.mxu2 %v15655_v38  ;;  %v12576_v36 = vpack.c.bf16 %v3241_v30, %v3239_v53  ;;  %v15658_v30 = vld [vmem:[#allocation3_spill] sm:$0xff]  ;;  %v15660_v38 = vld [vmem:[#allocation5_spill] sm:$0xff] }
 0x25a   : > { %2954 = vmatmul.bf16.gmra.mxu3 %v15656_v37 }
 0x25c   : > { %v2550_v62 = vpop.f32.mrf.mxu2  ;;  %v2374_v28 = vpop.f32.mrf.mxu0 }
 0x25d   : > { %v2551_v13 = vadd.f32 %v2550_v62, %v2462_v29  ;;  %v12579_v14 = vpop.f32.mrf.mxu3  ;;  %v2375_v6 = vadd.f32 %v2374_v28, %v15657_v26  ;;  %v2463_v23 = vpop.f32.mrf.mxu1  ;;  %v15659_v29 = vld [vmem:[#allocation4_spill] sm:$0xff] }
 0x25f   : > { %v2464_v44 = vadd.f32 %v2463_v23, %v2375_v6  ;;  %v3243_v2 = vmax.f32 %v2551_v13, 0.0 }
 0x264   : > { %v2552_v57 = vpop.f32.mrf.mxu2  ;;  %v2377_v45 = vpop.f32.mrf.mxu0 }
 0x265   : > { %v2553_v9 = vadd.f32 %v2552_v57, %v2464_v44  ;;  %v12582_v10 = vpop.f32.mrf.mxu3  ;;  %v2378_v49 = vadd.f32 %v2377_v45, %v12074_v33  ;;  %v2466_v1 = vpop.f32.mrf.mxu1  ;;  %v15662_v33 = vld [vmem:[#allocation56_spill] sm:$0xff] }
 0x267   : > { %v3245_v3 = vmax.f32 %v2553_v9, 0.0  ;;  %v2467_v53 = vadd.f32 %v2466_v1, %v2378_v49  ;;  %2692 = vmatmul.bf16.gmra.mxu0 %v15658_v30  ;;  %v15663_v30 = vld [vmem:[#allocation6_spill] sm:$0xff] }
 0x268   : > { %2781 = vmatmul.bf16.gmra.mxu1 %v15659_v29  ;;  %v15665_v29 = vld [vmem:[#allocation8_spill] sm:$0xff] }
 0x269   : > { %2870 = vmatmul.bf16.gmra.mxu2 %v15660_v38  ;;  %v12588_v56 = vpack.c.bf16 %v3245_v3, %v3243_v2  ;;  %v10914_v38 = vld [vmem:[%s15564_s1 + $0x2c4] sm:$0xf] }
 0x26a   : > { %2959 = vmatmul.bf16.gmra.mxu3 %v15661_v16  ;;  %v9785_v16 = vld [vmem:[%s15564_s1 + $0x2c8] sm:$0xf0] }
 0x26c   : > { %v2555_v37 = vpop.f32.mrf.mxu2  ;;  %v2379_v62 = vpop.f32.mrf.mxu0 }
 0x26d   : > { %v2556_v52 = vadd.f32 %v2555_v37, %v2467_v53  ;;  %v12591_v28 = vpop.f32.mrf.mxu3  ;;  %v2380_v26 = vadd.f32 %v2379_v62, %v15662_v33  ;;  %v2468_v13 = vpop.f32.mrf.mxu1  ;;  %v15664_v53 = vld [vmem:[#allocation7_spill] sm:$0xff] }
 0x26f   : > { %v2469_v6 = vadd.f32 %v2468_v13, %v2380_v26  ;;  %v3247_v1 = vmax.f32 %v2556_v52, 0.0  ;;  %v9788_v52 = vor.u32 %v10914_v38, %v9785_v16 }
 0x271   : > { %3028 = vmatpush.bf16.msrb.mxu0 %v9788_v52  ;;  %v15670_v52 = vld [vmem:[#allocation11_spill] sm:$0xff] }
 0x274   : > { %v2557_v23 = vpop.f32.mrf.mxu2  ;;  %v2382_v57 = vpop.f32.mrf.mxu0 }
 0x275   : > { %v2558_v44 = vadd.f32 %v2557_v23, %v2469_v6  ;;  %v12594_v9 = vpop.f32.mrf.mxu3  ;;  %v2383_v45 = vadd.f32 %v2382_v57, %v12109_v41  ;;  %v2471_v49 = vpop.f32.mrf.mxu1  ;;  %v15666_v41 = vld [vmem:[#allocation53_spill] sm:$0xff]  ;;  %v15667_v6 = vld [vmem:[#allocation60_spill] sm:$0xff] }
 0x277   : > { %v3249_v2 = vmax.f32 %v2558_v44, 0.0  ;;  %v2472_v3 = vadd.f32 %v2471_v49, %v2383_v45  ;;  %2697 = vmatmul.bf16.gmra.mxu0 %v15663_v30 }
 0x278   : > { %2786 = vmatmul.bf16.gmra.mxu1 %v15664_v53 }
 0x279   : > { %2875 = vmatmul.bf16.gmra.mxu2 %v15665_v29  ;;  %v12606_v37 = vpack.c.bf16 %v3249_v2, %v3247_v1 }
 0x27a   : > { %2964 = vmatmul.bf16.gmra.mxu3 %v15666_v41  ;;  %v15668_v41 = vld [vmem:[#allocation9_spill] sm:$0xff] }
 0x27c   : > { %v2560_v62 = vpop.f32.mrf.mxu2  ;;  %v2384_v26 = vpop.f32.mrf.mxu0 }
 0x27d   : > { %v2561_v33 = vadd.f32 %v2560_v62, %v2472_v3  ;;  %v12609_v13 = vpop.f32.mrf.mxu3  ;;  %v2385_v23 = vadd.f32 %v2384_v26, %v15667_v6  ;;  %v2473_v44 = vpop.f32.mrf.mxu1  ;;  %v15669_v3 = vld [vmem:[#allocation10_spill] sm:$0xff]  ;;  %v15672_v26 = vld [vmem:[#allocation57_spill] sm:$0xff] }
 0x27f   : > { %v2474_v57 = vadd.f32 %v2473_v44, %v2385_v23  ;;  %v3251_v29 = vmax.f32 %v2561_v33, 0.0 }
 0x284   : > { %v2562_v45 = vpop.f32.mrf.mxu2  ;;  %v2387_v30 = vpop.f32.mrf.mxu0 }
 0x285   : > { %v2563_v49 = vadd.f32 %v2562_v45, %v2474_v57  ;;  %v12612_v53 = vpop.f32.mrf.mxu3  ;;  %v2388_v1 = vadd.f32 %v2387_v30, %v12132_v15  ;;  %v2476_v2 = vpop.f32.mrf.mxu1  ;;  %v15673_v15 = vld [vmem:[#allocation64_spill] sm:$0xff] }
 0x287   : > { %v3253_v38 = vmax.f32 %v2563_v49, 0.0  ;;  %v2477_v16 = vadd.f32 %v2476_v2, %v2388_v1  ;;  %2702 = vmatmul.bf16.gmra.mxu0 %v15668_v41 }
 0x288   : > { %2791 = vmatmul.bf16.gmra.mxu1 %v15669_v3 }
 0x289   : > { %2880 = vmatmul.bf16.gmra.mxu2 %v15670_v52  ;;  %v12618_v62 = vpack.c.bf16 %v3253_v38, %v3251_v29 }
 0x28a   : > { %2969 = vmatmul.bf16.gmra.mxu3 %v15672_v26 }
 0x28b   : > { %15671 = vst [vmem:[#allocation2_spill] sm:$0xff] %v12618_v62 }
 0x28c   : > { %v2565_v6 = vpop.f32.mrf.mxu2  ;;  %v2389_v44 = vpop.f32.mrf.mxu0 }
 0x28d   : > { %v2566_v23 = vadd.f32 %v2565_v6, %v2477_v16  ;;  %v12621_v57 = vpop.f32.mrf.mxu3  ;;  %v2390_v45 = vadd.f32 %v2389_v44, %v15673_v15  ;;  %v2478_v33 = vpop.f32.mrf.mxu1  ;;  %v15675_v16 = vld [vmem:[#allocation13_spill] sm:$0xff]  ;;  %v15676_v6 = vld [vmem:[#allocation14_spill] sm:$0xff]  ;;  %v10912_v44 = vld [vmem:[%s15564_s1 + $0x2b4] sm:$0xf] }
 0x28e   : > { %v9777_v15 = vld [vmem:[%s15564_s1 + $0x2b8] sm:$0xf0] }
 0x28f   : > { %v2479_v49 = vadd.f32 %v2478_v33, %v2390_v45  ;;  %v3255_v38 = vmax.f32 %v2566_v23, 0.0  ;;  %v9780_v23 = vor.u32 %v10912_v44, %v9777_v15 }
 0x291   : > { %3029 = vmatpush.bf16.msrb.mxu0 %v9780_v23  ;;  %v15680_v23 = vld [vmem:[#allocation15_spill] sm:$0xff] }
 0x294   : > { %v2567_v30 = vpop.f32.mrf.mxu2  ;;  %v2392_v2 = vpop.f32.mrf.mxu0 }
 0x295   : > { %v2568_v1 = vadd.f32 %v2567_v30, %v2479_v49  ;;  %v12624_v41 = vpop.f32.mrf.mxu3  ;;  %v2393_v3 = vadd.f32 %v2392_v2, %v12167_v55  ;;  %v2481_v29 = vpop.f32.mrf.mxu1  ;;  %v15677_v55 = vld [vmem:[#allocation61_spill] sm:$0xff] }
 0x297   : > { %v3257_v52 = vmax.f32 %v2568_v1, 0.0  ;;  %v2482_v26 = vadd.f32 %v2481_v29, %v2393_v3  ;;  %2707 = vmatmul.bf16.gmra.mxu0 %v15674_v25  ;;  %v15678_v1 = vld [vmem:[#allocation68_spill] sm:$0xff] }
 0x298   : > { %2796 = vmatmul.bf16.gmra.mxu1 %v15675_v16 }
 0x299   : > { %2885 = vmatmul.bf16.gmra.mxu2 %v15676_v6  ;;  %v12636_v45 = vpack.c.bf16 %v3257_v52, %v3255_v38  ;;  %v10931_v38 = vld [vmem:[%s15679_s22 + $0x38] sm:$0xff] }
 0x29a   : > { %2974 = vmatmul.bf16.gmra.mxu3 %v15677_v55  ;;  %3428 = vmatpush.bf16.msrb.mxu2 %v10931_v38  ;;  %v11108_v38 = vld [vmem:[%s15475_s17] ss:$8 sm:$0x3] }
 0x29c   : > { %v2570_v33 = vpop.f32.mrf.mxu2  ;;  %v2394_v49 = vpop.f32.mrf.mxu0 }
 0x29d   : > { %v2571_v25 = vadd.f32 %v2570_v33, %v2482_v26  ;;  %v12639_v30 = vpop.f32.mrf.mxu3  ;;  %v2395_v2 = vadd.f32 %v2394_v49, %v15678_v1  ;;  %v2483_v3 = vpop.f32.mrf.mxu1  ;;  %v10939_v33 = vld [vmem:[%s15679_s22 + $0x78] sm:$0xff]  ;;  %v15681_v49 = vld [vmem:[#allocation16_spill] sm:$0xff] }
 0x29e   : > { %v15682_v1 = vld [vmem:[#allocation17_spill] sm:$0xff]  ;;  %3517 = vmatpush.bf16.msrb.mxu3 %v10939_v33 }
 0x29f   : > { %v2484_v29 = vadd.f32 %v2483_v3, %v2395_v2  ;;  %v3259_v26 = vmax.f32 %v2571_v25, 0.0  ;;  %v15684_v3 = vld [vmem:[#allocation65_spill] sm:$0xff] }
 0x2a4   : > { %v2572_v16 = vpop.f32.mrf.mxu2  ;;  %v2397_v11 = vpop.f32.mrf.mxu0 }
 0x2a5   : > { %v2573_v6 = vadd.f32 %v2572_v16, %v2484_v29  ;;  %v12642_v62 = vpop.f32.mrf.mxu3  ;;  %v2398_v52 = vadd.f32 %v2397_v11, %v12202_v50  ;;  %v2486_v44 = vpop.f32.mrf.mxu1 }
 0x2a7   : > { %v3261_v15 = vmax.f32 %v2573_v6, 0.0  ;;  %v2487_v55 = vadd.f32 %v2486_v44, %v2398_v52  ;;  %2712 = vmatmul.bf16.gmra.mxu0 %v15680_v23  ;;  %v12663_v52 = vperm.slane %v11108_v38, 1  ;;  %v15687_v38 = vld [vmem:[#allocation20_spill] sm:$0xff] }
 0x2a8   : > { %2801 = vmatmul.bf16.gmra.mxu1 %v15681_v49 }
 0x2a9   : > { %2890 = vmatmul.bf16.gmra.mxu2 %v15682_v1  ;;  %v12654_v2 = vpack.c.bf16 %v3261_v15, %v3259_v26  ;;  %v2590_v26 = vadd.f32 %v12236_v32, %v12663_v52  ;;  %v10910_v32 = vld [vmem:[%s15564_s1 + $0x2a4] sm:$0xf] }
 0x2aa   : > { %2979 = vmatmul.bf16.gmra.mxu3 %v15684_v3 }
 0x2ab   : > { %15683 = vst [vmem:[#allocation46_spill] sm:$0xff] %v12654_v2  ;;  %v15686_v2 = vld [vmem:[#allocation19_spill] sm:$0xff] }
 0x2ac   : > { %v2575_v50 = vpop.f32.mrf.mxu2  ;;  %v2399_v25 = vpop.f32.mrf.mxu0 }
 0x2ad   : > { %v2576_v11 = vadd.f32 %v2575_v50, %v2487_v55  ;;  %v12657_v29 = vpop.f32.mrf.mxu3  ;;  %v2400_v16 = vadd.f32 %v2399_v25, %v12217_v22  ;;  %v2488_v6 = vpop.f32.mrf.mxu1  ;;  %v15685_v25 = vld [vmem:[#allocation18_spill] sm:$0xff] }
 0x2af   : > { %v2489_v44 = vadd.f32 %v2488_v6, %v2400_v16  ;;  %v3263_v3 = vmax.f32 %v2576_v11, 0.0  ;;  %v9769_v16 = vld [vmem:[%s15564_s1 + $0x2a8] sm:$0xf0] }
 0x2b0   : > { %v9772_v11 = vor.u32 %v10910_v32, %v9769_v16 }
 0x2b2   : > { %3030 = vmatpush.bf16.msrb.mxu0 %v9772_v11 }
 0x2b4   : > { %v2577_v15 = vpop.f32.mrf.mxu2  ;;  %v2678_v55 = vpop.f32.mrf.mxu0 }
 0x2b5   : > { %v2578_v23 = vadd.f32 %v2577_v15, %v2489_v44  ;;  %v12667_v33 = vpop.f32.mrf.mxu3  ;;  %v2679_v49 = vadd.f32 %v2678_v55, %v2590_v26  ;;  %v2767_v1 = vpop.f32.mrf.mxu1  ;;  %v2592_v44 = vadd.f32 %v12247_v5, %v12663_v52  ;;  %v10930_v5 = vld [vmem:[%s15679_s22 + $0x30] sm:$0xff] }
 0x2b6   : > { %3429 = vmatpush.bf16.msrb.mxu2 %v10930_v5  ;;  %v2600_v5 = vadd.f32 %v12310_v19, %v12663_v52  ;;  %v9761_v19 = vld [vmem:[%s15564_s1 + $0x298] sm:$0xf0] }
 0x2b7   : > { %v3265_v22 = vmax.f32 %v2578_v23, 0.0  ;;  %v2768_v50 = vadd.f32 %v2767_v1, %v2679_v49  ;;  %2717 = vmatmul.bf16.gmra.mxu0 %v15685_v25 }
 0x2b8   : > { %2806 = vmatmul.bf16.gmra.mxu1 %v15686_v2 }
 0x2b9   : > { %2895 = vmatmul.bf16.gmra.mxu2 %v15687_v38  ;;  %v12678_v6 = vpack.c.bf16 %v3265_v22, %v3263_v3  ;;  %v2595_v3 = vadd.f32 %v12273_v7, %v12663_v52  ;;  %v10938_v7 = vld [vmem:[%s15679_s22 + $0x70] sm:$0xff] }
 0x2ba   : > { %2984 = vmatmul.bf16.gmra.mxu3 %v12210_v12 }
 0x2bb   : > { %3518 = vmatpush.bf16.msrb.mxu3 %v10938_v7 }
 0x2bc   : > { %v2856_v26 = vpop.f32.mrf.mxu2  ;;  %v2680_v15 = vpop.f32.mrf.mxu0 }
 0x2bd   : > { %v2857_v2 = vadd.f32 %v2856_v26, %v2768_v50  ;;  %v2945_v23 = vpop.f32.mrf.mxu3  ;;  %v2681_v55 = vadd.f32 %v2680_v15, %v2592_v44  ;;  %v2769_v49 = vpop.f32.mrf.mxu1  ;;  %v15688_v26 = vld [vmem:[#allocation21_spill] sm:$0xff]  ;;  %v15690_v15 = vld [vmem:[#allocation23_spill] sm:$0xff] }
 0x2bf   : > { %v12683_v1 = vadd.f32 %v2945_v23, %v2857_v2  ;;  %v2770_v25 = vadd.f32 %v2769_v49, %v2681_v55  ;;  %v15689_v2 = vld [vmem:[#allocation22_spill] sm:$0xff]  ;;  %v2597_v23 = vadd.f32 %v12284_v61, %v12663_v52 }
 0x2c4   : > { %v2858_v22 = vpop.f32.mrf.mxu2  ;;  %v2683_v12 = vpop.f32.mrf.mxu0 }
 0x2c5   : > { %v2859_v38 = vadd.f32 %v2858_v22, %v2770_v25  ;;  %v2947_v32 = vpop.f32.mrf.mxu3  ;;  %v2684_v16 = vadd.f32 %v2683_v12, %v2595_v3  ;;  %v2772_v50 = vpop.f32.mrf.mxu1 }
 0x2c7   : > { %v12690_v11 = vadd.f32 %v2947_v32, %v2859_v38  ;;  %v2773_v44 = vadd.f32 %v2772_v50, %v2684_v16  ;;  %2722 = vmatmul.bf16.gmra.mxu0 %v15688_v26 }
 0x2c8   : > { %2811 = vmatmul.bf16.gmra.mxu1 %v15689_v2 }
 0x2c9   : > { %2900 = vmatmul.bf16.gmra.mxu2 %v15690_v15 }
 0x2ca   : > { %2989 = vmatmul.bf16.gmra.mxu3 %v12245_v20 }
 0x2cc   : > { %v2861_v55 = vpop.f32.mrf.mxu2  ;;  %v2685_v25 = vpop.f32.mrf.mxu0 }
 0x2cd   : > { %v2862_v49 = vadd.f32 %v2861_v55, %v2773_v44  ;;  %v2950_v3 = vpop.f32.mrf.mxu3  ;;  %v2686_v22 = vadd.f32 %v2685_v25, %v2597_v23  ;;  %v2774_v38 = vpop.f32.mrf.mxu1  ;;  %v15691_v44 = vld [vmem:[#allocation24_spill] sm:$0xff]  ;;  %v15692_v55 = vld [vmem:[#allocation25_spill] sm:$0xff]  ;;  %v15693_v23 = vld [vmem:[#allocation26_spill] sm:$0xff] }
 0x2cf   : > { %v12701_v12 = vadd.f32 %v2950_v3, %v2862_v49  ;;  %v2775_v32 = vadd.f32 %v2774_v38, %v2686_v22  ;;  %v10908_v49 = vld [vmem:[%s15564_s1 + $0x294] sm:$0xf]  ;;  %v2602_v3 = vadd.f32 %v12321_v51, %v12663_v52  ;;  %v10929_v51 = vld [vmem:[%s15679_s22 + $0x28] sm:$0xff] }
 0x2d0   : > { %v9764_v25 = vor.u32 %v10908_v49, %v9761_v19  ;;  %3430 = vmatpush.bf16.msrb.mxu2 %v10929_v51 }
 0x2d2   : > { %3031 = vmatpush.bf16.msrb.mxu0 %v9764_v25  ;;  %v15694_v25 = vld [vmem:[#allocation27_spill] sm:$0xff] }
 0x2d4   : > { %v2863_v16 = vpop.f32.mrf.mxu2  ;;  %v2688_v26 = vpop.f32.mrf.mxu0 }
 0x2d5   : > { %v2864_v50 = vadd.f32 %v2863_v16, %v2775_v32  ;;  %v2952_v20 = vpop.f32.mrf.mxu3  ;;  %v2689_v7 = vadd.f32 %v2688_v26, %v2600_v5  ;;  %v2777_v2 = vpop.f32.mrf.mxu1 }
 0x2d7   : > { %v12705_v15 = vadd.f32 %v2952_v20, %v2864_v50  ;;  %v2778_v61 = vadd.f32 %v2777_v2, %v2689_v7  ;;  %2727 = vmatmul.bf16.gmra.mxu0 %v15691_v44  ;;  %v2605_v7 = vadd.f32 %v12347_v43, %v12663_v52  ;;  %v10937_v43 = vld [vmem:[%s15679_s22 + $0x68] sm:$0xff] }
 0x2d8   : > { %2816 = vmatmul.bf16.gmra.mxu1 %v15692_v55  ;;  %3519 = vmatpush.bf16.msrb.mxu3 %v10937_v43 }
 0x2d9   : > { %2905 = vmatmul.bf16.gmra.mxu2 %v15693_v23 }
 0x2da   : > { %2994 = vmatmul.bf16.gmra.mxu3 %v12282_v21 }
 0x2dc   : > { %v2866_v22 = vpop.f32.mrf.mxu2  ;;  %v2690_v32 = vpop.f32.mrf.mxu0 }
 0x2dd   : > { %v2867_v38 = vadd.f32 %v2866_v22, %v2778_v61  ;;  %v2955_v5 = vpop.f32.mrf.mxu3  ;;  %v2691_v16 = vadd.f32 %v2690_v32, %v2602_v3  ;;  %v2779_v50 = vpop.f32.mrf.mxu1  ;;  %v15695_v3 = vld [vmem:[#allocation28_spill] sm:$0xff]  ;;  %v15696_v22 = vld [vmem:[#allocation29_spill] sm:$0xff] }
 0x2df   : > { %v12719_v26 = vadd.f32 %v2955_v5, %v2867_v38  ;;  %v2780_v20 = vadd.f32 %v2779_v50, %v2691_v16  ;;  %v2607_v38 = vadd.f32 %v12358_v0, %v12663_v52 }
 0x2e4   : > { %v2868_v2 = vpop.f32.mrf.mxu2  ;;  %v2693_v21 = vpop.f32.mrf.mxu0 }
 0x2e5   : > { %v2869_v44 = vadd.f32 %v2868_v2, %v2780_v20  ;;  %v2957_v55 = vpop.f32.mrf.mxu3  ;;  %v2694_v23 = vadd.f32 %v2693_v21, %v2605_v7  ;;  %v2782_v61 = vpop.f32.mrf.mxu1  ;;  %v2610_v21 = vadd.f32 %v12384_v35, %v12663_v52  ;;  %v9753_v35 = vld [vmem:[%s15564_s1 + $0x288] sm:$0xf0] }
 0x2e7   : > { %v12726_v49 = vadd.f32 %v2957_v55, %v2869_v44  ;;  %v2783_v19 = vadd.f32 %v2782_v61, %v2694_v23  ;;  %2732 = vmatmul.bf16.gmra.mxu0 %v15694_v25 }
 0x2e8   : > { %2821 = vmatmul.bf16.gmra.mxu1 %v15695_v3  ;;  %v15698_v3 = vld [vmem:[#allocation31_spill] sm:$0xff] }
 0x2e9   : > { %2910 = vmatmul.bf16.gmra.mxu2 %v15696_v22  ;;  %v15699_v22 = vld [vmem:[#allocation32_spill] sm:$0xff] }
 0x2ea   : > { %2999 = vmatmul.bf16.gmra.mxu3 %v12319_v54 }
 0x2ec   : > { %v2871_v32 = vpop.f32.mrf.mxu2  ;;  %v2695_v16 = vpop.f32.mrf.mxu0 }
 0x2ed   : > { %v2872_v5 = vadd.f32 %v2871_v32, %v2783_v19  ;;  %v2960_v50 = vpop.f32.mrf.mxu3  ;;  %v2696_v20 = vadd.f32 %v2695_v16, %v2607_v38  ;;  %v2784_v7 = vpop.f32.mrf.mxu1  ;;  %v15697_v19 = vld [vmem:[#allocation30_spill] sm:$0xff] }
 0x2ee   : > { %v10906_v38 = vld [vmem:[%s15564_s1 + $0x284] sm:$0xf] }
 0x2ef   : > { %v12737_v2 = vadd.f32 %v2960_v50, %v2872_v5  ;;  %v2785_v44 = vadd.f32 %v2784_v7, %v2696_v20  ;;  %v9756_v32 = vor.u32 %v10906_v38, %v9753_v35  ;;  %v2612_v5 = vadd.f32 %v12401_v42, %v12663_v52  ;;  %v10927_v38 = vld [vmem:[%s15679_s22 + $0x18] sm:$0xff]  ;;  %v15701_v35 = vld [vmem:[#allocation34_spill] sm:$0xff] }
 0x2f1   : > { %3032 = vmatpush.bf16.msrb.mxu0 %v9756_v32  ;;  %v15702_v32 = vld [vmem:[#allocation35_spill] sm:$0xff] }
 0x2f4   : > { %v2873_v55 = vpop.f32.mrf.mxu2  ;;  %v2698_v23 = vpop.f32.mrf.mxu0 }
 0x2f5   : > { %v2874_v51 = vadd.f32 %v2873_v55, %v2785_v44  ;;  %v2962_v54 = vpop.f32.mrf.mxu3  ;;  %v2699_v61 = vadd.f32 %v2698_v23, %v2610_v21  ;;  %v2787_v25 = vpop.f32.mrf.mxu1  ;;  %v2615_v23 = vadd.f32 %v12439_v17, %v12663_v52  ;;  %v10936_v17 = vld [vmem:[%s15679_s22 + $0x60] sm:$0xff] }
 0x2f6   : > { %3520 = vmatpush.bf16.msrb.mxu3 %v10936_v17 }
 0x2f7   : > { %v12741_v43 = vadd.f32 %v2962_v54, %v2874_v51  ;;  %v2788_v0 = vadd.f32 %v2787_v25, %v2699_v61  ;;  %2737 = vmatmul.bf16.gmra.mxu0 %v15697_v19 }
 0x2f8   : > { %2826 = vmatmul.bf16.gmra.mxu1 %v15698_v3 }
 0x2f9   : > { %2915 = vmatmul.bf16.gmra.mxu2 %v15699_v22  ;;  %v15700_v22 = vld [vmem:[#allocation33_spill] sm:$0xff] }
 0x2fa   : > { %3004 = vmatmul.bf16.gmra.mxu3 %v12356_v18  ;;  %v10928_v18 = vld [vmem:[%s15679_s22 + $0x20] sm:$0xff] }
 0x2fb   : > { %3431 = vmatpush.bf16.msrb.mxu2 %v10928_v18 }
 0x2fc   : > { %v2876_v16 = vpop.f32.mrf.mxu2  ;;  %v2700_v20 = vpop.f32.mrf.mxu0 }
 0x2fd   : > { %v2877_v50 = vadd.f32 %v2876_v16, %v2788_v0  ;;  %v2965_v7 = vpop.f32.mrf.mxu3  ;;  %v2701_v44 = vadd.f32 %v2700_v20, %v2612_v5  ;;  %v2789_v21 = vpop.f32.mrf.mxu1  ;;  %v15703_v5 = vld [vmem:[#allocation83_spill] sm:$0xff]  ;;  %v2617_v16 = vadd.f32 %v12474_v8, %v12663_v52  ;;  %v10926_v20 = vld [vmem:[%s15679_s22 + $0x10] sm:$0xff]  ;;  %v2620_v8 = vadd.f32 %v12506_v60, %v12663_v52 }
 0x2fe   : > { %v2622_v60 = vadd.f32 %v12517_v39, %v12663_v52 }
 0x2ff   : > { %v12755_v55 = vadd.f32 %v2965_v7, %v2877_v50  ;;  %v2790_v51 = vadd.f32 %v2789_v21, %v2701_v44  ;;  %3432 = vmatpush.bf16.msrb.mxu2 %v10927_v38 }
 0x303   : > { %3433 = vmatpush.bf16.msrb.mxu2 %v10926_v20 }
 0x304   : > { %v2878_v54 = vpop.f32.mrf.mxu2  ;;  %v2703_v42 = vpop.f32.mrf.mxu0 }
 0x305   : > { %v12762_v61 = vadd.f32 %v2878_v54, %v2790_v51  ;;  %v12764_v25 = vpop.f32.mrf.mxu3  ;;  %v2704_v0 = vadd.f32 %v2703_v42, %v2615_v23  ;;  %v2792_v19 = vpop.f32.mrf.mxu1  ;;  %v10925_v42 = vld [vmem:[%s15679_s22 + $0x8] sm:$0xff] }
 0x307   : > { %v2793_v3 = vadd.f32 %v2792_v19, %v2704_v0  ;;  %2742 = vmatmul.bf16.gmra.mxu0 %v15700_v22  ;;  %3434 = vmatpush.bf16.msrb.mxu2 %v10925_v42  ;;  %v10924_v19 = vld [vmem:[%s15679_s22] sm:$0xff] }
 0x308   : > { %2831 = vmatmul.bf16.gmra.mxu1 %v15701_v35 }
 0x309   : > { %2920 = vmatmul.bf16.gmra.mxu2 %v15702_v32 }
 0x30a   : > { %3009 = vmatmul.bf16.gmra.mxu3 %v15703_v5  ;;  %v15704_v5 = vld [vmem:[#allocation36_spill] sm:$0xff] }
 0x30b   : > { %3435 = vmatpush.bf16.msrb.mxu2 %v10924_v19 }
 0x30c   : > { %v2881_v50 = vpop.f32.mrf.mxu2  ;;  %v2705_v44 = vpop.f32.mrf.mxu0 }
 0x30d   : > { %v2882_v7 = vadd.f32 %v2881_v50, %v2793_v3  ;;  %v2970_v21 = vpop.f32.mrf.mxu3  ;;  %v2706_v51 = vadd.f32 %v2705_v44, %v2617_v16  ;;  %v2794_v23 = vpop.f32.mrf.mxu1  ;;  %v15705_v16 = vld [vmem:[#allocation37_spill] sm:$0xff]  ;;  %v15706_v50 = vld [vmem:[#allocation38_spill] sm:$0xff] }
 0x30f   : > { %v12781_v54 = vadd.f32 %v2970_v21, %v2882_v7  ;;  %v2795_v18 = vadd.f32 %v2794_v23, %v2706_v51 }
 0x314   : > { %v2883_v0 = vpop.f32.mrf.mxu2  ;;  %v2708_v22 = vpop.f32.mrf.mxu0 }
 0x315   : > { %v12791_v3 = vadd.f32 %v2883_v0, %v2795_v18  ;;  %v12793_v17 = vpop.f32.mrf.mxu3  ;;  %v2709_v38 = vadd.f32 %v2708_v22, %v2620_v8  ;;  %v2797_v35 = vpop.f32.mrf.mxu1  ;;  %v2625_v8 = vadd.f32 %v12531_v63, %v12663_v52  ;;  %v2627_v63 = vadd.f32 %v12534_v58, %v12663_v52 }
 0x317   : > { %v2798_v32 = vadd.f32 %v2797_v35, %v2709_v38  ;;  %2747 = vmatmul.bf16.gmra.mxu0 %v15704_v5  ;;  %v10935_v5 = vld [vmem:[%s15679_s22 + $0x58] sm:$0xff] }
 0x318   : > { %2836 = vmatmul.bf16.gmra.mxu1 %v15705_v16  ;;  %v15708_v16 = vld [vmem:[#allocation40_spill] sm:$0xff]  ;;  %3521 = vmatpush.bf16.msrb.mxu3 %v10935_v5  ;;  %v15711_v5 = vld [vmem:[#allocation43_spill] sm:$0xff] }
 0x319   : > { %2925 = vmatmul.bf16.gmra.mxu2 %v15706_v50  ;;  %v15709_v50 = vld [vmem:[#allocation41_spill] sm:$0xff] }
 0x31a   : > { %3014 = vmatmul.bf16.gmra.mxu3 %v12472_v27 }
 0x31c   : > { %v2886_v20 = vpop.f32.mrf.mxu2  ;;  %v2710_v44 = vpop.f32.mrf.mxu0 }
 0x31d   : > { %v2887_v7 = vadd.f32 %v2886_v20, %v2798_v32  ;;  %v2975_v21 = vpop.f32.mrf.mxu3  ;;  %v2711_v51 = vadd.f32 %v2710_v44, %v2622_v60  ;;  %v2799_v23 = vpop.f32.mrf.mxu1  ;;  %v15707_v32 = vld [vmem:[#allocation39_spill] sm:$0xff] }
 0x31f   : > { %v12801_v18 = vadd.f32 %v2975_v21, %v2887_v7  ;;  %v2800_v42 = vadd.f32 %v2799_v23, %v2711_v51 }
 0x324   : > { %v2888_v0 = vpop.f32.mrf.mxu2  ;;  %v2713_v22 = vpop.f32.mrf.mxu0 }
 0x325   : > { %v12805_v19 = vadd.f32 %v2888_v0, %v2800_v42  ;;  %v12807_v27 = vpop.f32.mrf.mxu3  ;;  %v2714_v38 = vadd.f32 %v2713_v22, %v2625_v8  ;;  %v2802_v39 = vpop.f32.mrf.mxu1  ;;  %v2630_v8 = vadd.f32 %v12549_v46, %v12663_v52  ;;  %v10947_v46 = vld [vmem:[%s15713_s30 + $0x38] sm:$0xff] }
 0x326   : > { %3719 = vmatpush.bf16.msra.mxu0 %v10947_v46  ;;  %v15715_v46 = vld [vmem:[#allocation45_spill] sm:$0xff] }
 0x327   : > { %v2803_v35 = vadd.f32 %v2802_v39, %v2714_v38  ;;  %2752 = vmatmul.bf16.gmra.mxu0 %v15707_v32 }
 0x328   : > { %2841 = vmatmul.bf16.gmra.mxu1 %v15708_v16  ;;  %v15712_v16 = vld [vmem:[#allocation73_spill] sm:$0xff] }
 0x329   : > { %2930 = vmatmul.bf16.gmra.mxu2 %v15709_v50  ;;  %v2632_v50 = vadd.f32 %v12552_v47, %v12663_v52 }
 0x32a   : > { %3019 = vmatmul.bf16.gmra.mxu3 %v12515_v4 }
 0x32c   : > { %v2891_v60 = vpop.f32.mrf.mxu2  ;;  %v2715_v7 = vpop.f32.mrf.mxu0 }
 0x32d   : > { %v2892_v20 = vadd.f32 %v2891_v60, %v2803_v35  ;;  %v2980_v44 = vpop.f32.mrf.mxu3  ;;  %v2716_v21 = vadd.f32 %v2715_v7, %v2627_v63  ;;  %v2804_v51 = vpop.f32.mrf.mxu1  ;;  %v15710_v35 = vld [vmem:[#allocation42_spill] sm:$0xff] }
 0x32f   : > { %v12818_v23 = vadd.f32 %v2980_v44, %v2892_v20  ;;  %v2805_v42 = vadd.f32 %v2804_v51, %v2716_v21 }
 0x334   : > { %v2893_v0 = vpop.f32.mrf.mxu2  ;;  %v2718_v4 = vpop.f32.mrf.mxu0 }
 0x335   : > { %v12822_v22 = vadd.f32 %v2893_v0, %v2805_v42  ;;  %v12824_v38 = vpop.f32.mrf.mxu3  ;;  %v2719_v39 = vadd.f32 %v2718_v4, %v2630_v8  ;;  %v2807_v58 = vpop.f32.mrf.mxu1  ;;  %v2635_v8 = vadd.f32 %v12561_v48, %v12663_v52  ;;  %v2637_v48 = vadd.f32 %v12564_v24, %v12663_v52 }
 0x337   : > { %v2808_v32 = vadd.f32 %v2807_v58, %v2719_v39  ;;  %3033 = vmatmul.bf16.vlgmr.msrb.gmra.mxu0 %v15710_v35 }
 0x338   : > { %9837 = vmatmul.msk.bf16.vlgmr.msrb.gmra.mxu1 %vm1908_vm0, %v15711_v5 }
 0x339   : > { %3436 = vmatmul.bf16.vlgmr.msrb.gmra.mxu2 %v15712_v16  ;;  %v10934_v16 = vld [vmem:[%s15679_s22 + $0x50] sm:$0xff] }
 0x33a   : > { %3522 = vmatpush.bf16.msrb.mxu3 %v10934_v16 }
 0x33c   : > { %v2896_v63 = vpop.f32.mrf.mxu2  ;;  %v2720_v20 = vpop.f32.mrf.mxu0 }
 0x33d   : > { %v2897_v60 = vadd.f32 %v2896_v63, %v2808_v32  ;;  %v2985_v7 = vpop.f32.mrf.mxu3  ;;  %v2721_v44 = vadd.f32 %v2720_v20, %v2632_v50  ;;  %v2809_v21 = vpop.f32.mrf.mxu1  ;;  %v15714_v32 = vld [vmem:[#allocation44_spill] sm:$0xff] }
 0x33e   : > { %v15716_v50 = vld [vmem:[#allocation76_spill] sm:$0xff] }
 0x33f   : > { %v12835_v51 = vadd.f32 %v2985_v7, %v2897_v60  ;;  %v2810_v42 = vadd.f32 %v2809_v21, %v2721_v44 }
 0x344   : > { %v2898_v0 = vpop.f32.mrf.mxu2  ;;  %v2723_v39 = vpop.f32.mrf.mxu0 }
 0x345   : > { %v12839_v4 = vadd.f32 %v2898_v0, %v2810_v42  ;;  %v12841_v58 = vpop.f32.mrf.mxu3  ;;  %v2724_v35 = vadd.f32 %v2723_v39, %v2635_v8  ;;  %v2812_v47 = vpop.f32.mrf.mxu1  ;;  %v2640_v0 = vadd.f32 %v12579_v14, %v12663_v52  ;;  %v10946_v14 = vld [vmem:[%s15713_s30 + $0x30] sm:$0xff] }
 0x346   : > { %3720 = vmatpush.bf16.msra.mxu0 %v10946_v14 }
 0x347   : > { %v2813_v5 = vadd.f32 %v2812_v47, %v2724_v35  ;;  %3038 = vmatmul.bf16.gmra.mxu0 %v15714_v32 }
 0x348   : > { %9838 = vmatmul.msk.bf16.gmra.mxu1 %vm1908_vm0, %v15715_v46 }
 0x349   : > { %3441 = vmatmul.bf16.gmra.mxu2 %v15716_v50  ;;  %v15718_v50 = vld [vmem:[#allocation48_spill] sm:$0xff] }
 0x34c   : > { %v2901_v63 = vpop.f32.mrf.mxu2  ;;  %v2725_v20 = vpop.f32.mrf.mxu0 }
 0x34d   : > { %v2902_v60 = vadd.f32 %v2901_v63, %v2813_v5  ;;  %v2990_v7 = vpop.f32.mrf.mxu3  ;;  %v2726_v44 = vadd.f32 %v2725_v20, %v2637_v48  ;;  %v2814_v21 = vpop.f32.mrf.mxu1  ;;  %v15717_v5 = vld [vmem:[#allocation47_spill] sm:$0xff]  ;;  %v2642_v63 = vadd.f32 %v12582_v10, %v12663_v52 }
 0x34e   : > { %v15719_v48 = vld [vmem:[#allocation79_spill] sm:$0xff] }
 0x34f   : > { %v12852_v42 = vadd.f32 %v2990_v7, %v2902_v60  ;;  %v2815_v8 = vadd.f32 %v2814_v21, %v2726_v44 }
 0x354   : > { %v2903_v39 = vpop.f32.mrf.mxu2  ;;  %v2728_v47 = vpop.f32.mrf.mxu0 }
 0x355   : > { %v12856_v35 = vadd.f32 %v2903_v39, %v2815_v8  ;;  %v12858_v32 = vpop.f32.mrf.mxu3  ;;  %v2729_v16 = vadd.f32 %v2728_v47, %v2640_v0  ;;  %v2817_v24 = vpop.f32.mrf.mxu1  ;;  %v2645_v47 = vadd.f32 %v12591_v28, %v12663_v52  ;;  %v2647_v28 = vadd.f32 %v12594_v9, %v12663_v52 }
 0x357   : > { %v2818_v46 = vadd.f32 %v2817_v24, %v2729_v16  ;;  %3043 = vmatmul.bf16.gmra.mxu0 %v15717_v5 }
 0x358   : > { %9839 = vmatmul.msk.bf16.gmra.mxu1 %vm1908_vm0, %v15718_v50 }
 0x359   : > { %3446 = vmatmul.bf16.gmra.mxu2 %v15719_v48 }
 0x35c   : > { %v2906_v60 = vpop.f32.mrf.mxu2  ;;  %v2730_v7 = vpop.f32.mrf.mxu0 }
 0x35d   : > { %v2907_v20 = vadd.f32 %v2906_v60, %v2818_v46  ;;  %v2995_v44 = vpop.f32.mrf.mxu3  ;;  %v2731_v21 = vadd.f32 %v2730_v7, %v2642_v63  ;;  %v2819_v8 = vpop.f32.mrf.mxu1  ;;  %v15721_v46 = vld [vmem:[#allocation50_spill] sm:$0xff]  ;;  %v10933_v63 = vld [vmem:[%s15679_s22 + $0x48] sm:$0xff] }
 0x35e   : > { %v15722_v60 = vld [vmem:[#allocation51_spill] sm:$0xff]  ;;  %3523 = vmatpush.bf16.msrb.mxu3 %v10933_v63 }
 0x35f   : > { %v12869_v0 = vadd.f32 %v2995_v44, %v2907_v20  ;;  %v2820_v39 = vadd.f32 %v2819_v8, %v2731_v21  ;;  %v15723_v20 = vld [vmem:[#allocation82_spill] sm:$0xff] }
 0x364   : > { %v2908_v16 = vpop.f32.mrf.mxu2  ;;  %v2733_v5 = vpop.f32.mrf.mxu0 }
 0x365   : > { %v12873_v24 = vadd.f32 %v2908_v16, %v2820_v39  ;;  %v12875_v50 = vpop.f32.mrf.mxu3  ;;  %v2734_v48 = vadd.f32 %v2733_v5, %v2645_v47  ;;  %v2822_v10 = vpop.f32.mrf.mxu1 }
 0x366   : > { %15720 = vst [vmem:[#allocation52_spill] sm:$0xff] %v12875_v50 }
 0x367   : > { %v2823_v14 = vadd.f32 %v2822_v10, %v2734_v48  ;;  %3048 = vmatmul.bf16.gmra.mxu0 %v15721_v46  ;;  %v2650_v48 = vadd.f32 %v12609_v13, %v12663_v52  ;;  %v10945_v13 = vld [vmem:[%s15713_s30 + $0x28] sm:$0xff] }
 0x368   : > { %9840 = vmatmul.msk.bf16.gmra.mxu1 %vm1908_vm0, %v15722_v60  ;;  %3721 = vmatpush.bf16.msra.mxu0 %v10945_v13 }
 0x369   : > { %3451 = vmatmul.bf16.gmra.mxu2 %v15723_v20 }
 0x36c   : > { %v2911_v7 = vpop.f32.mrf.mxu2  ;;  %v2735_v21 = vpop.f32.mrf.mxu0 }
 0x36d   : > { %v2912_v44 = vadd.f32 %v2911_v7, %v2823_v14  ;;  %v3000_v8 = vpop.f32.mrf.mxu3  ;;  %v2736_v39 = vadd.f32 %v2735_v21, %v2647_v28  ;;  %v2824_v47 = vpop.f32.mrf.mxu1  ;;  %v15725_v14 = vld [vmem:[#allocation54_spill] sm:$0xff]  ;;  %v15726_v7 = vld [vmem:[#allocation55_spill] sm:$0xff] }
 0x36e   : > { %v15727_v28 = vld [vmem:[#allocation86_spill] sm:$0xff] }
 0x36f   : > { %v12886_v16 = vadd.f32 %v3000_v8, %v2912_v44  ;;  %v2825_v5 = vadd.f32 %v2824_v47, %v2736_v39  ;;  %v2652_v44 = vadd.f32 %v12612_v53, %v12663_v52 }
 0x374   : > { %v2913_v10 = vpop.f32.mrf.mxu2  ;;  %v2738_v60 = vpop.f32.mrf.mxu0 }
 0x375   : > { %v12890_v46 = vadd.f32 %v2913_v10, %v2825_v5  ;;  %v12892_v63 = vpop.f32.mrf.mxu3  ;;  %v2739_v20 = vadd.f32 %v2738_v60, %v2650_v48  ;;  %v2827_v9 = vpop.f32.mrf.mxu1 }
 0x376   : > { %15724 = vst [vmem:[#allocation3_spill] sm:$0xff] %v12892_v63 }
 0x377   : > { %v2828_v50 = vadd.f32 %v2827_v9, %v2739_v20  ;;  %3053 = vmatmul.bf16.gmra.mxu0 %v15725_v14  ;;  %v2655_v20 = vadd.f32 %v12621_v57, %v12663_v52  ;;  %v2657_v57 = vadd.f32 %v12624_v41, %v12663_v52 }
 0x378   : > { %9841 = vmatmul.msk.bf16.gmra.mxu1 %vm1908_vm0, %v15726_v7 }
 0x379   : > { %3456 = vmatmul.bf16.gmra.mxu2 %v15727_v28 }
 0x37c   : > { %v2916_v21 = vpop.f32.mrf.mxu2  ;;  %v2740_v39 = vpop.f32.mrf.mxu0 }
 0x37d   : > { %v2917_v8 = vadd.f32 %v2916_v21, %v2828_v50  ;;  %v3005_v47 = vpop.f32.mrf.mxu3  ;;  %v2741_v5 = vadd.f32 %v2740_v39, %v2652_v44  ;;  %v2829_v48 = vpop.f32.mrf.mxu1  ;;  %v15728_v50 = vld [vmem:[#allocation58_spill] sm:$0xff]  ;;  %v15729_v21 = vld [vmem:[#allocation59_spill] sm:$0xff] }
 0x37e   : > { %v10932_v44 = vld [vmem:[%s15679_s22 + $0x40] sm:$0xff] }
 0x37f   : > { %v12903_v10 = vadd.f32 %v3005_v47, %v2917_v8  ;;  %v2830_v60 = vadd.f32 %v2829_v48, %v2741_v5  ;;  %3524 = vmatpush.bf16.msrb.mxu3 %v10932_v44 }
 0x384   : > { %v2918_v9 = vpop.f32.mrf.mxu2  ;;  %v2743_v7 = vpop.f32.mrf.mxu0 }
 0x385   : > { %v12907_v14 = vadd.f32 %v2918_v9, %v2830_v60  ;;  %v12909_v28 = vpop.f32.mrf.mxu3  ;;  %v2744_v13 = vadd.f32 %v2743_v7, %v2655_v20  ;;  %v2832_v53 = vpop.f32.mrf.mxu1  ;;  %v2660_v7 = vadd.f32 %v12639_v30, %v12663_v52  ;;  %v10944_v30 = vld [vmem:[%s15713_s30 + $0x20] sm:$0xff] }
 0x386   : > { %3722 = vmatpush.bf16.msra.mxu0 %v10944_v30 }
 0x387   : > { %v2833_v63 = vadd.f32 %v2832_v53, %v2744_v13  ;;  %3058 = vmatmul.bf16.gmra.mxu0 %v15728_v50 }
 0x388   : > { %9842 = vmatmul.msk.bf16.gmra.mxu1 %vm1908_vm0, %v15729_v21 }
 0x389   : > { %3461 = vmatmul.bf16.gmra.mxu2 %v12497_v34 }
 0x38c   : > { %v2921_v8 = vpop.f32.mrf.mxu2  ;;  %v2745_v47 = vpop.f32.mrf.mxu0 }
 0x38d   : > { %v2922_v39 = vadd.f32 %v2921_v8, %v2833_v63  ;;  %v3010_v5 = vpop.f32.mrf.mxu3  ;;  %v2746_v48 = vadd.f32 %v2745_v47, %v2657_v57  ;;  %v2834_v60 = vpop.f32.mrf.mxu1  ;;  %v15730_v63 = vld [vmem:[#allocation62_spill] sm:$0xff]  ;;  %v15731_v8 = vld [vmem:[#allocation63_spill] sm:$0xff]  ;;  %v2662_v57 = vadd.f32 %v12642_v62, %v12663_v52 }
 0x38f   : > { %v12920_v20 = vadd.f32 %v3010_v5, %v2922_v39  ;;  %v2835_v9 = vadd.f32 %v2834_v60, %v2746_v48 }
 0x394   : > { %v2923_v13 = vpop.f32.mrf.mxu2  ;;  %v2748_v34 = vpop.f32.mrf.mxu0 }
 0x395   : > { %v12924_v53 = vadd.f32 %v2923_v13, %v2835_v9  ;;  %v12926_v50 = vpop.f32.mrf.mxu3  ;;  %v2749_v44 = vadd.f32 %v2748_v34, %v2660_v7  ;;  %v2837_v41 = vpop.f32.mrf.mxu1 }
 0x397   : > { %v2838_v21 = vadd.f32 %v2837_v41, %v2749_v44  ;;  %3063 = vmatmul.bf16.gmra.mxu0 %v15730_v63 }
 0x398   : > { %9843 = vmatmul.msk.bf16.gmra.mxu1 %vm1908_vm0, %v15731_v8 }
 0x399   : > { %3466 = vmatmul.bf16.gmra.mxu2 %v12528_v31  ;;  %v2665_v31 = vadd.f32 %v12657_v29, %v12663_v52 }
 0x39c   : > { %v2926_v39 = vpop.f32.mrf.mxu2  ;;  %v2750_v5 = vpop.f32.mrf.mxu0 }
 0x39d   : > { %v2927_v47 = vadd.f32 %v2926_v39, %v2838_v21  ;;  %v3015_v48 = vpop.f32.mrf.mxu3  ;;  %v2751_v60 = vadd.f32 %v2750_v5, %v2662_v57  ;;  %v2839_v9 = vpop.f32.mrf.mxu1  ;;  %v15732_v21 = vld [vmem:[#allocation66_spill] sm:$0xff]  ;;  %v15733_v39 = vld [vmem:[#allocation67_spill] sm:$0xff]  ;;  %v2667_v57 = vadd.f32 %v12667_v33, %v12663_v52  ;;  %v10943_v33 = vld [vmem:[%s15713_s30 + $0x18] sm:$0xff] }
 0x39e   : > { %3723 = vmatpush.bf16.msra.mxu0 %v10943_v33 }
 0x39f   : > { %v12937_v7 = vadd.f32 %v3015_v48, %v2927_v47  ;;  %v2840_v13 = vadd.f32 %v2839_v9, %v2751_v60 }
 0x3a4   : > { %v2928_v34 = vpop.f32.mrf.mxu2  ;;  %v2753_v41 = vpop.f32.mrf.mxu0 }
 0x3a5   : > { %v12941_v44 = vadd.f32 %v2928_v34, %v2840_v13  ;;  %v12943_v63 = vpop.f32.mrf.mxu3  ;;  %v2754_v62 = vadd.f32 %v2753_v41, %v2665_v31  ;;  %v2842_v8 = vpop.f32.mrf.mxu1 }
 0x3a7   : > { %v2843_v30 = vadd.f32 %v2842_v8, %v2754_v62  ;;  %3068 = vmatmul.bf16.gmra.mxu0 %v15732_v21  ;;  %v15734_v21 = vld [vmem:[#allocation69_spill] sm:$0xff] }
 0x3a8   : > { %9844 = vmatmul.msk.bf16.gmra.mxu1 %vm1908_vm0, %v15733_v39 }
 0x3a9   : > { %3471 = vmatmul.bf16.gmra.mxu2 %v12546_v59  ;;  %v15735_v59 = vld [vmem:[#allocation70_spill] sm:$0xff] }
 0x3ac   : > { %v2931_v29 = vpop.f32.mrf.mxu2  ;;  %v2755_v5 = vpop.f32.mrf.mxu0 }
 0x3ad   : > { %v2932_v47 = vadd.f32 %v2931_v29, %v2843_v30  ;;  %v3020_v48 = vpop.f32.mrf.mxu3  ;;  %v2756_v60 = vadd.f32 %v2755_v5, %v2667_v57  ;;  %v2844_v9 = vpop.f32.mrf.mxu1 }
 0x3af   : > { %v12951_v13 = vadd.f32 %v3020_v48, %v2932_v47  ;;  %v2845_v31 = vadd.f32 %v2844_v9, %v2756_v60 }
 0x3b4   : > { %v2933_v34 = vpop.f32.mrf.mxu2  ;;  %v3034_v62 = vpop.f32.mrf.mxu0 }
 0x3b5   : > { %v12953_v41 = vadd.f32 %v2933_v34, %v2845_v31  ;;  %v3123_v8 = vpop.f32.mrf.mxu1  ;;  %v3035_v52 = vadd.f32 %v3034_v62, %v12683_v1  ;;  %v15736_v31 = vld [vmem:[#allocation71_spill] sm:$0xff]  ;;  %v15737_v34 = vld [vmem:[#allocation72_spill] sm:$0xff] }
 0x3b7   : > { %3073 = vmatmul.bf16.gmra.mxu0 %v15734_v21  ;;  %v3124_v39 = vadd.f32 %v3123_v8, %v3035_v52 }
 0x3b8   : > { %9845 = vmatmul.msk.bf16.gmra.mxu1 %vm1908_vm0, %v15735_v59 }
 0x3b9   : > { %3476 = vmatmul.bf16.gmra.mxu2 %v12558_v40  ;;  %v3204_v5 = vmax.f32 %v3124_v39, 0.0  ;;  %v10951_v40 = vld [vmem:[%s15462_s4 + $0x18] sm:$0xff] }
 0x3ba   : > { %3942 = vmatpush.bf16.msra.mxu1 %v10951_v40 }
 0x3bc   : > { %v3036_v30 = vpop.f32.mrf.mxu0 }
 0x3bd   : > { %v3037_v57 = vadd.f32 %v3036_v30, %v12690_v11  ;;  %v3125_v29 = vpop.f32.mrf.mxu1 }
 0x3bf   : > { %v3126_v47 = vadd.f32 %v3125_v29, %v3037_v57 }
 0x3c1   : > { %v3206_v48 = vmax.f32 %v3126_v47, 0.0  ;;  %v15738_v47 = vld [vmem:[#allocation74_spill] sm:$0xff] }
 0x3c3   : > { %v3268_v60 = vpack.c.bf16 %v3206_v48, %v3204_v5  ;;  %v15739_v5 = vld [vmem:[#allocation75_spill] sm:$0xff] }
 0x3c4   : > { %v3039_v9 = vpop.f32.mrf.mxu0 }
 0x3c5   : > { %v3128_v1 = vpop.f32.mrf.mxu1  ;;  %3525 = vmatmul.bf16.vlgmr.msrb.gmra.mxu3 %v3268_v60  ;;  %v3040_v11 = vadd.f32 %v3039_v9, %v12701_v12  ;;  %v10942_v12 = vld [vmem:[%s15713_s30 + $0x10] sm:$0xff] }
 0x3c6   : > { %3724 = vmatpush.bf16.msra.mxu0 %v10942_v12 }
 0x3c7   : > { %3078 = vmatmul.bf16.gmra.mxu0 %v15736_v31  ;;  %v3129_v8 = vadd.f32 %v3128_v1, %v3040_v11 }
 0x3c8   : > { %9846 = vmatmul.msk.bf16.gmra.mxu1 %vm1908_vm0, %v15737_v34  ;;  %v12982_v34 = vpop.f32.mrf.mxu2 }
 0x3c9   : > { %3481 = vmatmul.bf16.gmra.mxu2 %v12576_v36  ;;  %v3208_v33 = vmax.f32 %v3129_v8, 0.0  ;;  %v15741_v8 = vld [vmem:[#allocation78_spill] sm:$0xff] }
 0x3cc   : > { %v3041_v62 = vpop.f32.mrf.mxu0 }
 0x3cd   : > { %v3042_v21 = vadd.f32 %v3041_v62, %v12705_v15  ;;  %v3130_v59 = vpop.f32.mrf.mxu1 }
 0x3cf   : > { %v3131_v52 = vadd.f32 %v3130_v59, %v3042_v21 }
 0x3d1   : > { %v3210_v30 = vmax.f32 %v3131_v52, 0.0 }
 0x3d3   : > { %v3270_v39 = vpack.c.bf16 %v3210_v30, %v3208_v33 }
 0x3d4   : > { %v3044_v57 = vpop.f32.mrf.mxu0 }
 0x3d5   : > { %v3133_v29 = vpop.f32.mrf.mxu1  ;;  %3530 = vmatmul.bf16.gmra.mxu3 %v3270_v39  ;;  %v3045_v36 = vadd.f32 %v3044_v57, %v12719_v26  ;;  %v15740_v26 = vld [vmem:[#allocation77_spill] sm:$0xff] }
 0x3d7   : > { %3083 = vmatmul.bf16.gmra.mxu0 %v15738_v47  ;;  %v3134_v48 = vadd.f32 %v3133_v29, %v3045_v36 }
 0x3d8   : > { %9847 = vmatmul.msk.bf16.gmra.mxu1 %vm1908_vm0, %v15739_v5 }
 0x3d9   : > { %3486 = vmatmul.bf16.gmra.mxu2 %v12588_v56  ;;  %v3212_v1 = vmax.f32 %v3134_v48, 0.0 }
 0x3dc   : > { %v3046_v15 = vpop.f32.mrf.mxu0 }
 0x3dd   : > { %v3047_v60 = vadd.f32 %v3046_v15, %v12726_v49  ;;  %v3135_v9 = vpop.f32.mrf.mxu1  ;;  %v12989_v49 = vpop.f32.mrf.mxu2  ;;  %v15742_v15 = vld [vmem:[#allocation80_spill] sm:$0xff] }
 0x3df   : > { %v3136_v40 = vadd.f32 %v3135_v9, %v3047_v60  ;;  %v2968_v60 = vadd.f32 %v12764_v25, %v12762_v61  ;;  %v15745_v61 = vld [vmem:[#allocation84_spill] sm:$0xff]  ;;  %v15746_v25 = vld [vmem:[#allocation85_spill] sm:$0xff] }
 0x3e1   : > { %v3214_v31 = vmax.f32 %v3136_v40, 0.0 }
 0x3e3   : > { %v3272_v11 = vpack.c.bf16 %v3214_v31, %v3212_v1 }
 0x3e4   : > { %v3049_v62 = vpop.f32.mrf.mxu0 }
 0x3e5   : > { %v3138_v56 = vpop.f32.mrf.mxu1  ;;  %3535 = vmatmul.bf16.gmra.mxu3 %v3272_v11  ;;  %v3050_v21 = vadd.f32 %v3049_v62, %v12737_v2  ;;  %v12992_v12 = vpop.f32.mrf.mxu2  ;;  %v15744_v2 = vld [vmem:[#allocation2_spill] sm:$0xff] }
 0x3e7   : > { %3088 = vmatmul.bf16.gmra.mxu0 %v15740_v26  ;;  %v3139_v52 = vadd.f32 %v3138_v56, %v3050_v21 }
 0x3e8   : > { %9848 = vmatmul.msk.bf16.gmra.mxu1 %vm1908_vm0, %v15741_v8 }
 0x3e9   : > { %3491 = vmatmul.bf16.gmra.mxu2 %v12606_v37  ;;  %v3216_v57 = vmax.f32 %v3139_v52, 0.0  ;;  %v15743_v37 = vld [vmem:[#allocation81_spill] sm:$0xff] }
 0x3ec   : > { %v3051_v59 = vpop.f32.mrf.mxu0 }
 0x3ed   : > { %v3052_v33 = vadd.f32 %v3051_v59, %v12741_v43  ;;  %v3140_v30 = vpop.f32.mrf.mxu1  ;;  %v10941_v43 = vld [vmem:[%s15713_s30 + $0x8] sm:$0xff]  ;;  %v13004_v62 = vpop.f32.mrf.mxu2 }
 0x3ee   : > { %3725 = vmatpush.bf16.msra.mxu0 %v10941_v43 }
 0x3ef   : > { %v3141_v39 = vadd.f32 %v3140_v30, %v3052_v33  ;;  %v2973_v30 = vadd.f32 %v12793_v17, %v12791_v3  ;;  %v10940_v17 = vld [vmem:[%s15713_s30] sm:$0xff] }
 0x3f1   : > { %v3218_v29 = vmax.f32 %v3141_v39, 0.0 }
 0x3f2   : > { %3726 = vmatpush.bf16.msra.mxu0 %v10940_v17 }
 0x3f3   : > { %v3274_v47 = vpack.c.bf16 %v3218_v29, %v3216_v57 }
 0x3f4   : > { %v3054_v5 = vpop.f32.mrf.mxu0 }
 0x3f5   : > { %v3143_v36 = vpop.f32.mrf.mxu1  ;;  %3540 = vmatmul.bf16.gmra.mxu3 %v3274_v47  ;;  %v3055_v48 = vadd.f32 %v3054_v5, %v12755_v55  ;;  %v10950_v55 = vld [vmem:[%s15462_s4 + $0x10] sm:$0xff]  ;;  %v13014_v33 = vpop.f32.mrf.mxu2 }
 0x3f6   : > { %3943 = vmatpush.bf16.msra.mxu1 %v10950_v55 }
 0x3f7   : > { %3093 = vmatmul.bf16.gmra.mxu0 %v15742_v15  ;;  %v3144_v40 = vadd.f32 %v3143_v36, %v3055_v48 }
 0x3f8   : > { %9849 = vmatmul.msk.bf16.gmra.mxu1 %vm1908_vm0, %v15743_v37 }
 0x3f9   : > { %3496 = vmatmul.bf16.gmra.mxu2 %v15744_v2  ;;  %v3220_v56 = vmax.f32 %v3144_v40, 0.0 }
 0x3fc   : > { %v3056_v9 = vpop.f32.mrf.mxu0 }
 0x3fd   : > { %v3057_v1 = vadd.f32 %v3056_v9, %v2968_v60  ;;  %v3145_v31 = vpop.f32.mrf.mxu1  ;;  %v13018_v2 = vpop.f32.mrf.mxu2  ;;  %v15749_v60 = vld [vmem:[#allocation46_spill] sm:$0xff]  ;;  %v2978_v9 = vadd.f32 %v12807_v27, %v12805_v19  ;;  %v2983_v27 = vadd.f32 %v12824_v38, %v12822_v22 }
 0x3ff   : > { %v3146_v11 = vadd.f32 %v3145_v31, %v3057_v1 }
 0x401   : > { %v3222_v26 = vmax.f32 %v3146_v11, 0.0 }
 0x403   : > { %v3276_v8 = vpack.c.bf16 %v3222_v26, %v3220_v56 }
 0x404   : > { %v3059_v21 = vpop.f32.mrf.mxu0 }
 0x405   : > { %v3148_v59 = vpop.f32.mrf.mxu1  ;;  %3545 = vmatmul.bf16.gmra.mxu3 %v3276_v8  ;;  %v3060_v52 = vadd.f32 %v3059_v21, %v12781_v54  ;;  %v15748_v54 = vld [vmem:[#allocation88_spill] sm:$0xff]  ;;  %v13030_v56 = vpop.f32.mrf.mxu2 }
 0x407   : > { %3098 = vmatmul.bf16.gmra.mxu0 %v15745_v61  ;;  %v3149_v57 = vadd.f32 %v3148_v59, %v3060_v52  ;;  %v15750_v61 = vld [vmem:[#allocation89_spill] sm:$0xff]  ;;  %v15751_v52 = vld [vmem:[#allocation90_spill] sm:$0xff] }
 0x408   : > { %9850 = vmatmul.msk.bf16.gmra.mxu1 %vm1908_vm0, %v15746_v25 }
 0x409   : > { %3501 = vmatmul.bf16.gmra.mxu2 %v12636_v45  ;;  %v3224_v36 = vmax.f32 %v3149_v57, 0.0  ;;  %v15747_v45 = vld [vmem:[#allocation87_spill] sm:$0xff] }
 0x40c   : > { %v3061_v39 = vpop.f32.mrf.mxu0 }
 0x40d   : > { %v3062_v29 = vadd.f32 %v3061_v39, %v2973_v30  ;;  %v3150_v47 = vpop.f32.mrf.mxu1  ;;  %v13033_v25 = vpop.f32.mrf.mxu2 }
 0x40f   : > { %v3151_v5 = vadd.f32 %v3150_v47, %v3062_v29 }
 0x411   : > { %v3226_v15 = vmax.f32 %v3151_v5, 0.0 }
 0x413   : > { %v3278_v37 = vpack.c.bf16 %v3226_v15, %v3224_v36 }
 0x414   : > { %v3064_v48 = vpop.f32.mrf.mxu0 }
 0x415   : > { %v3153_v43 = vpop.f32.mrf.mxu1  ;;  %3550 = vmatmul.bf16.gmra.mxu3 %v3278_v37  ;;  %v3065_v3 = vadd.f32 %v3064_v48, %v12801_v18 }
 0x417   : > { %3103 = vmatmul.bf16.gmra.mxu0 %v15747_v45  ;;  %v3154_v1 = vadd.f32 %v3153_v43, %v3065_v3 }
 0x418   : > { %9851 = vmatmul.msk.bf16.gmra.mxu1 %vm1908_vm0, %v15748_v54 }
 0x419   : > { %3506 = vmatmul.bf16.gmra.mxu2 %v15749_v60  ;;  %v3228_v8 = vmax.f32 %v3154_v1, 0.0  ;;  %v13044_v60 = vpop.f32.mrf.mxu3  ;;  %v10949_v1 = vld [vmem:[%s15462_s4 + $0x8] sm:$0xff] }
 0x41a   : > { %3944 = vmatpush.bf16.msra.mxu1 %v10949_v1 }
 0x41c   : > { %v3066_v40 = vpop.f32.mrf.mxu0 }
 0x41d   : > { %v3067_v31 = vadd.f32 %v3066_v40, %v2978_v9  ;;  %v3155_v11 = vpop.f32.mrf.mxu1 }
 0x41f   : > { %v3156_v26 = vadd.f32 %v3155_v11, %v3067_v31  ;;  %v2993_v11 = vadd.f32 %v12858_v32, %v12856_v35  ;;  %v10953_v35 = vld [vmem:[%s15463_s5 + $0x8] sm:$0xff] }
 0x420   : > { %4147 = vmatpush.bf16.msra.mxu2 %v10953_v35 }
 0x421   : > { %v3230_v21 = vmax.f32 %v3156_v26, 0.0 }
 0x423   : > { %v3280_v55 = vpack.c.bf16 %v3230_v21, %v3228_v8 }
 0x424   : > { %v3069_v59 = vpop.f32.mrf.mxu0 }
 0x425   : > { %v3158_v18 = vpop.f32.mrf.mxu1  ;;  %3555 = vmatmul.bf16.gmra.mxu3 %v3280_v55  ;;  %v3070_v19 = vadd.f32 %v3069_v59, %v12818_v23 }
 0x427   : > { %3108 = vmatmul.bf16.gmra.mxu0 %v15750_v61  ;;  %v3159_v39 = vadd.f32 %v3158_v18, %v3070_v19 }
 0x428   : > { %9852 = vmatmul.msk.bf16.gmra.mxu1 %vm1908_vm0, %v15751_v52 }
 0x429   : > { %3511 = vmatmul.bf16.gmra.mxu2 %v12678_v6  ;;  %v3232_v5 = vmax.f32 %v3159_v39, 0.0  ;;  %v2988_v6 = vadd.f32 %v12841_v58, %v12839_v4  ;;  %v13053_v58 = vld [vmem:[%s15475_s17 + $0x1] ss:$0 sm:$0xff] }
 0x42a   : > { %v3438_v8 = vadd.f32 %v12982_v34, %v13053_v58  ;;  %v3440_v18 = vadd.f32 %v12989_v49, %v13053_v58 }
 0x42c   : > { %v3071_v30 = vpop.f32.mrf.mxu0 }
 0x42d   : > { %v3072_v57 = vadd.f32 %v3071_v30, %v2983_v27  ;;  %v3160_v29 = vpop.f32.mrf.mxu1 }
 0x42f   : > { %v3161_v47 = vadd.f32 %v3160_v29, %v3072_v57 }
 0x431   : > { %v3234_v36 = vmax.f32 %v3161_v47, 0.0 }
 0x433   : > { %v3282_v15 = vpack.c.bf16 %v3234_v36, %v3232_v5  ;;  %v13064_v5 = vpop.f32.mrf.mxu2 }
 0x434   : > { %v3074_v37 = vpop.f32.mrf.mxu0 }
 0x435   : > { %v3163_v48 = vpop.f32.mrf.mxu1  ;;  %3560 = vmatmul.bf16.gmra.mxu3 %v3282_v15  ;;  %v3075_v43 = vadd.f32 %v3074_v37, %v12835_v51  ;;  %v15752_v15 = vld [vmem:[#allocation52_spill] sm:$0xff] }
 0x436   : > { %v2998_v37 = vadd.f32 %v15752_v15, %v12873_v24 }
 0x437   : > { %v3164_v45 = vadd.f32 %v3163_v48, %v3075_v43  ;;  %v3443_v43 = vadd.f32 %v12992_v12, %v13053_v58 }
 0x439   : > { %v3236_v3 = vmax.f32 %v3164_v45, 0.0 }
 0x43c   : > { %v3076_v23 = vpop.f32.mrf.mxu0 }
 0x43d   : > { %v3077_v54 = vadd.f32 %v3076_v23, %v2988_v6  ;;  %v3165_v22 = vpop.f32.mrf.mxu1 }
 0x43f   : > { %v3166_v38 = vadd.f32 %v3165_v22, %v3077_v54  ;;  %v3445_v54 = vadd.f32 %v13004_v62, %v13053_v58 }
 0x441   : > { %v3238_v17 = vmax.f32 %v3166_v38, 0.0 }
 0x443   : > { %v3284_v9 = vpack.c.bf16 %v3238_v17, %v3236_v3  ;;  %v13073_v3 = vpop.f32.mrf.mxu2 }
 0x444   : > { %v3079_v40 = vpop.f32.mrf.mxu0 }
 0x445   : > { %v3168_v31 = vpop.f32.mrf.mxu1  ;;  %3565 = vmatmul.bf16.gmra.mxu3 %v3284_v9  ;;  %v3080_v4 = vadd.f32 %v3079_v40, %v12852_v42 }
 0x447   : > { %v3169_v21 = vadd.f32 %v3168_v31, %v3080_v4 }
 0x448   : > { %v3526_v51 = vpop.f32.mrf.mxu3 }
 0x449   : > { %v3527_v61 = vadd.f32 %v3526_v51, %v3438_v8  ;;  %v3240_v19 = vmax.f32 %v3169_v21, 0.0  ;;  %v15753_v8 = vld [vmem:[#allocation3_spill] sm:$0xff] }
 0x44a   : > { %v3003_v21 = vadd.f32 %v15753_v8, %v12890_v46 }
 0x44b   : > { %v3606_v32 = vmax.f32 %v3527_v61, 0.0  ;;  %v13076_v62 = vpop.f32.mrf.mxu2 }
 0x44c   : > { %v3081_v26 = vpop.f32.mrf.mxu0 }
 0x44d   : > { %v3082_v55 = vadd.f32 %v3081_v26, %v2993_v11  ;;  %v3170_v59 = vpop.f32.mrf.mxu1 }
 0x44f   : > { %v3171_v42 = vadd.f32 %v3170_v59, %v3082_v55  ;;  %v3448_v59 = vadd.f32 %v13014_v33, %v13053_v58 }
 0x450   : > { %v3528_v52 = vpop.f32.mrf.mxu3 }
 0x451   : > { %v3242_v27 = vmax.f32 %v3171_v42, 0.0  ;;  %v3529_v30 = vadd.f32 %v3528_v52, %v3440_v18  ;;  %v3450_v52 = vadd.f32 %v13018_v2, %v13053_v58  ;;  %v3008_v2 = vadd.f32 %v12909_v28, %v12907_v14 }
 0x453   : > { %v3607_v39 = vmax.f32 %v3529_v30, 0.0  ;;  %v3286_v57 = vpack.c.bf16 %v3242_v27, %v3240_v19  ;;  %v13084_v46 = vpop.f32.mrf.mxu2 }
 0x454   : > { %v3084_v34 = vpop.f32.mrf.mxu0 }
 0x455   : > { %v3638_v29 = vpack.c.bf16 %v3607_v39, %v3606_v32  ;;  %v3173_v47 = vpop.f32.mrf.mxu1  ;;  %3570 = vmatmul.bf16.gmra.mxu3 %v3286_v57  ;;  %v3085_v36 = vadd.f32 %v3084_v34, %v12869_v0 }
 0x457   : > { %3727 = vmatmul.bf16.vlgmr.msra.gmra.mxu0 %v3638_v29  ;;  %v3174_v6 = vadd.f32 %v3173_v47, %v3085_v36 }
 0x458   : > { %v3531_v49 = vpop.f32.mrf.mxu3 }
 0x459   : > { %v3532_v22 = vadd.f32 %v3531_v49, %v3443_v43  ;;  %v3244_v9 = vmax.f32 %v3174_v6, 0.0 }
 0x45b   : > { %v3608_v1 = vmax.f32 %v3532_v22, 0.0 }
 0x45c   : > { %v3086_v48 = vpop.f32.mrf.mxu0 }
 0x45d   : > { %v3087_v23 = vadd.f32 %v3086_v48, %v2998_v37  ;;  %v3175_v45 = vpop.f32.mrf.mxu1  ;;  %v3453_v37 = vadd.f32 %v13030_v56, %v13053_v58  ;;  %v10948_v56 = vld [vmem:[%s15462_s4] sm:$0xff] }
 0x45e   : > { %3945 = vmatpush.bf16.msra.mxu1 %v10948_v56 }
 0x45f   : > { %v3176_v38 = vadd.f32 %v3175_v45, %v3087_v23  ;;  %v13091_v23 = vpop.f32.mrf.mxu2  ;;  %v3455_v45 = vadd.f32 %v13033_v25, %v13053_v58 }
 0x460   : > { %v3533_v17 = vpop.f32.mrf.mxu3 }
 0x461   : > { %v3246_v0 = vmax.f32 %v3176_v38, 0.0  ;;  %v3534_v40 = vadd.f32 %v3533_v17, %v3445_v54 }
 0x463   : > { %v3609_v24 = vmax.f32 %v3534_v40, 0.0  ;;  %v3288_v31 = vpack.c.bf16 %v3246_v0, %v3244_v9 }
 0x464   : > { %v3089_v51 = vpop.f32.mrf.mxu0 }
 0x465   : > { %v3178_v4 = vpop.f32.mrf.mxu1  ;;  %3575 = vmatmul.bf16.gmra.mxu3 %v3288_v31  ;;  %v3639_v12 = vpack.c.bf16 %v3609_v24, %v3608_v1  ;;  %v3090_v26 = vadd.f32 %v3089_v51, %v12886_v16 }
 0x467   : > { %3732 = vmatmul.bf16.gmra.mxu0 %v3639_v12  ;;  %v3179_v18 = vadd.f32 %v3178_v4, %v3090_v26  ;;  %v3469_v25 = vpop.f32.mrf.mxu2  ;;  %v3013_v4 = vadd.f32 %v12926_v50, %v12924_v53 }
 0x468   : > { %v3536_v11 = vpop.f32.mrf.mxu3 }
 0x469   : > { %v3537_v19 = vadd.f32 %v3536_v11, %v3448_v59  ;;  %v3248_v35 = vmax.f32 %v3179_v18, 0.0  ;;  %v3458_v11 = vadd.f32 %v13064_v5, %v13053_v58 }
 0x46b   : > { %v3610_v39 = vmax.f32 %v3537_v19, 0.0 }
 0x46c   : > { %v3091_v55 = vpop.f32.mrf.mxu0 }
 0x46d   : > { %v3092_v61 = vadd.f32 %v3091_v55, %v3003_v21  ;;  %v3180_v42 = vpop.f32.mrf.mxu1  ;;  %v3460_v55 = vadd.f32 %v13073_v3, %v13053_v58  ;;  %v3018_v3 = vadd.f32 %v12943_v63, %v12941_v44 }
 0x46f   : > { %v3181_v27 = vadd.f32 %v3180_v42, %v3092_v61 }
 0x470   : > { %v3538_v30 = vpop.f32.mrf.mxu3 }
 0x471   : > { %v3250_v16 = vmax.f32 %v3181_v27, 0.0  ;;  %v3539_v32 = vadd.f32 %v3538_v30, %v3450_v52 }
 0x473   : > { %v3611_v57 = vmax.f32 %v3539_v32, 0.0  ;;  %v3290_v34 = vpack.c.bf16 %v3250_v16, %v3248_v35 }
 0x474   : > { %v3094_v29 = vpop.f32.mrf.mxu0 }
 0x475   : > { %v3183_v47 = vpop.f32.mrf.mxu1  ;;  %3580 = vmatmul.bf16.gmra.mxu3 %v3290_v34  ;;  %v3640_v33 = vpack.c.bf16 %v3611_v57, %v3610_v39  ;;  %v3095_v36 = vadd.f32 %v3094_v29, %v12903_v10  ;;  %v3463_v34 = vadd.f32 %v13076_v62, %v13053_v58 }
 0x477   : > { %3737 = vmatmul.bf16.gmra.mxu0 %v3640_v33  ;;  %v3184_v48 = vadd.f32 %v3183_v47, %v3095_v36 }
 0x478   : > { %v3541_v49 = vpop.f32.mrf.mxu3 }
 0x479   : > { %v3542_v54 = vadd.f32 %v3541_v49, %v3453_v37  ;;  %v3252_v17 = vmax.f32 %v3184_v48, 0.0  ;;  %v3465_v49 = vadd.f32 %v13084_v46, %v13053_v58  ;;  %v3023_v46 = vadd.f32 %v13044_v60, %v12953_v41 }
 0x47b   : > { %v3612_v0 = vmax.f32 %v3542_v54, 0.0 }
 0x47c   : > { %v3096_v15 = vpop.f32.mrf.mxu0 }
 0x47d   : > { %v3097_v43 = vadd.f32 %v3096_v15, %v3008_v2  ;;  %v3185_v6 = vpop.f32.mrf.mxu1 }
 0x47f   : > { %v3186_v22 = vadd.f32 %v3185_v6, %v3097_v43 }
 0x480   : > { %v3543_v38 = vpop.f32.mrf.mxu3 }
 0x481   : > { %v3254_v10 = vmax.f32 %v3186_v22, 0.0  ;;  %v3544_v9 = vadd.f32 %v3543_v38, %v3455_v45 }
 0x483   : > { %v3613_v14 = vmax.f32 %v3544_v9, 0.0  ;;  %v3292_v28 = vpack.c.bf16 %v3254_v10, %v3252_v17  ;;  %v3468_v10 = vadd.f32 %v13091_v23, %v13053_v58 }
 0x484   : > { %v3099_v40 = vpop.f32.mrf.mxu0 }
 0x485   : > { %v3188_v1 = vpop.f32.mrf.mxu1  ;;  %3585 = vmatmul.bf16.gmra.mxu3 %v3292_v28  ;;  %v3641_v24 = vpack.c.bf16 %v3613_v14, %v3612_v0  ;;  %v3100_v51 = vadd.f32 %v3099_v40, %v12920_v20  ;;  %v3472_v20 = vpop.f32.mrf.mxu2  ;;  %v3470_v28 = vadd.f32 %v3469_v25, %v13053_v58 }
 0x487   : > { %3742 = vmatmul.bf16.gmra.mxu0 %v3641_v24  ;;  %v3189_v26 = vadd.f32 %v3188_v1, %v3100_v51 }
 0x488   : > { %v3546_v31 = vpop.f32.mrf.mxu3 }
 0x489   : > { %v3547_v59 = vadd.f32 %v3546_v31, %v3458_v11  ;;  %v3256_v42 = vmax.f32 %v3189_v26, 0.0  ;;  %v3473_v26 = vadd.f32 %v3472_v20, %v13053_v58  ;;  %v10952_v20 = vld [vmem:[%s15463_s5] sm:$0xff] }
 0x48a   : > { %4148 = vmatpush.bf16.msra.mxu2 %v10952_v20 }
 0x48b   : > { %v3614_v27 = vmax.f32 %v3547_v59, 0.0 }
 0x48c   : > { %v3101_v12 = vpop.f32.mrf.mxu0 }
 0x48d   : > { %v3102_v8 = vadd.f32 %v3101_v12, %v3013_v4  ;;  %v3190_v21 = vpop.f32.mrf.mxu1  ;;  %v3474_v39 = vpop.f32.mrf.mxu2 }
 0x48f   : > { %v3191_v18 = vadd.f32 %v3190_v21, %v3102_v8  ;;  %v3475_v8 = vadd.f32 %v3474_v39, %v13053_v58 }
 0x490   : > { %v3548_v61 = vpop.f32.mrf.mxu3 }
 0x491   : > { %v3258_v52 = vmax.f32 %v3191_v18, 0.0  ;;  %v3549_v19 = vadd.f32 %v3548_v61, %v3460_v55 }
 0x493   : > { %v3615_v30 = vmax.f32 %v3549_v19, 0.0  ;;  %v3294_v53 = vpack.c.bf16 %v3258_v52, %v3256_v42 }
 0x494   : > { %v3104_v50 = vpop.f32.mrf.mxu0 }
 0x495   : > { %v3193_v35 = vpop.f32.mrf.mxu1  ;;  %3590 = vmatmul.bf16.gmra.mxu3 %v3294_v53  ;;  %v3642_v5 = vpack.c.bf16 %v3615_v30, %v3614_v27  ;;  %v3105_v32 = vadd.f32 %v3104_v50, %v12937_v7  ;;  %v3477_v62 = vpop.f32.mrf.mxu2 }
 0x496   : > { %v3478_v19 = vadd.f32 %v3477_v62, %v13053_v58 }
 0x497   : > { %3747 = vmatmul.bf16.gmra.mxu0 %v3642_v5  ;;  %v3194_v29 = vadd.f32 %v3193_v35, %v3105_v32 }
 0x498   : > { %v3551_v16 = vpop.f32.mrf.mxu3 }
 0x499   : > { %v3552_v36 = vadd.f32 %v3551_v16, %v3463_v34  ;;  %v3260_v37 = vmax.f32 %v3194_v29, 0.0 }
 0x49b   : > { %v3616_v43 = vmax.f32 %v3552_v36, 0.0 }
 0x49c   : > { %v3106_v57 = vpop.f32.mrf.mxu0 }
 0x49d   : > { %v3107_v47 = vadd.f32 %v3106_v57, %v3018_v3  ;;  %v3195_v33 = vpop.f32.mrf.mxu1  ;;  %v3479_v1 = vpop.f32.mrf.mxu2  ;;  %v13128_v57 = vld [vmem:[%s15475_s17 + $0x2] ss:$0 sm:$0xff] }
 0x49e   : > { %v3480_v30 = vadd.f32 %v3479_v1, %v13053_v58 }
 0x49f   : > { %v3196_v2 = vadd.f32 %v3195_v33, %v3107_v47 }
 0x4a0   : > { %v3553_v15 = vpop.f32.mrf.mxu3 }
 0x4a1   : > { %v3262_v48 = vmax.f32 %v3196_v2, 0.0  ;;  %v3554_v7 = vadd.f32 %v3553_v15, %v3465_v49 }
 0x4a3   : > { %v3617_v6 = vmax.f32 %v3554_v7, 0.0  ;;  %v3296_v44 = vpack.c.bf16 %v3262_v48, %v3260_v37 }
 0x4a4   : > { %v3109_v63 = vpop.f32.mrf.mxu0 }
 0x4a5   : > { %v3198_v45 = vpop.f32.mrf.mxu1  ;;  %3595 = vmatmul.bf16.gmra.mxu3 %v3296_v44  ;;  %v3643_v54 = vpack.c.bf16 %v3617_v6, %v3616_v43  ;;  %v3110_v38 = vadd.f32 %v3109_v63, %v12951_v13  ;;  %v3482_v23 = vpop.f32.mrf.mxu2 }
 0x4a6   : > { %v3483_v33 = vadd.f32 %v3482_v23, %v13053_v58 }
 0x4a7   : > { %3752 = vmatmul.bf16.gmra.mxu0 %v3643_v54  ;;  %v3199_v9 = vadd.f32 %v3198_v45, %v3110_v38  ;;  %v10954_v45 = vld [vmem:[%s15464_s6] sm:$0xff] }
 0x4a8   : > { %v3556_v22 = vpop.f32.mrf.mxu3  ;;  %4342 = vmatpush.bf16.msra.mxu3 %v10954_v45 }
 0x4a9   : > { %v3557_v40 = vadd.f32 %v3556_v22, %v3468_v10  ;;  %v3264_v31 = vmax.f32 %v3199_v9, 0.0 }
 0x4ab   : > { %v3618_v13 = vmax.f32 %v3557_v40, 0.0 }
 0x4ac   : > { %v3111_v17 = vpop.f32.mrf.mxu0 }
 0x4ad   : > { %v3112_v0 = vadd.f32 %v3111_v17, %v3023_v46  ;;  %v3200_v14 = vpop.f32.mrf.mxu1  ;;  %v3484_v61 = vpop.f32.mrf.mxu2 }
 0x4ae   : > { %v3485_v36 = vadd.f32 %v3484_v61, %v13053_v58 }
 0x4af   : > { %v3201_v56 = vadd.f32 %v3200_v14, %v3112_v0 }
 0x4b0   : > { %v3558_v24 = vpop.f32.mrf.mxu3 }
 0x4b1   : > { %v3266_v51 = vmax.f32 %v3201_v56, 0.0  ;;  %v3559_v4 = vadd.f32 %v3558_v24, %v3470_v28 }
 0x4b3   : > { %v3619_v12 = vmax.f32 %v3559_v4, 0.0  ;;  %v3298_v11 = vpack.c.bf16 %v3266_v51, %v3264_v31 }
 0x4b5   : > { %3600 = vmatmul.bf16.gmra.mxu3 %v3298_v11  ;;  %v3644_v41 = vpack.c.bf16 %v3619_v12, %v3618_v13  ;;  %v3487_v27 = vpop.f32.mrf.mxu2 }
 0x4b6   : > { %v3488_v10 = vadd.f32 %v3487_v27, %v13053_v58 }
 0x4b7   : > { %3757 = vmatmul.bf16.gmra.mxu0 %v3644_v41 }
 0x4b8   : > { %v3561_v60 = vpop.f32.mrf.mxu3 }
 0x4b9   : > { %v3562_v25 = vadd.f32 %v3561_v60, %v3473_v26 }
 0x4bb   : > { %v3620_v59 = vmax.f32 %v3562_v25, 0.0 }
 0x4bd   : > { %v3489_v39 = vpop.f32.mrf.mxu2 }
 0x4be   : > { %v3490_v0 = vadd.f32 %v3489_v39, %v13053_v58 }
 0x4c0   : > { %v3563_v21 = vpop.f32.mrf.mxu3 }
 0x4c1   : > { %v3564_v55 = vadd.f32 %v3563_v21, %v3475_v8 }
 0x4c3   : > { %v3621_v18 = vmax.f32 %v3564_v55, 0.0 }
 0x4c5   : > { %v3645_v42 = vpack.c.bf16 %v3621_v18, %v3620_v59  ;;  %v3492_v6 = vpop.f32.mrf.mxu2 }
 0x4c6   : > { %v3493_v23 = vadd.f32 %v3492_v6, %v13053_v58 }
 0x4c7   : > { %3762 = vmatmul.bf16.gmra.mxu0 %v3645_v42 }
 0x4c8   : > { %v3566_v52 = vpop.f32.mrf.mxu3 }
 0x4c9   : > { %v3567_v53 = vadd.f32 %v3566_v52, %v3478_v19 }
 0x4cb   : > { %v3622_v5 = vmax.f32 %v3567_v53, 0.0 }
 0x4cd   : > { %v3494_v46 = vpop.f32.mrf.mxu2 }
 0x4ce   : > { %v3495_v8 = vadd.f32 %v3494_v46, %v13053_v58 }
 0x4d0   : > { %v3568_v50 = vpop.f32.mrf.mxu3 }
 0x4d1   : > { %v3569_v35 = vadd.f32 %v3568_v50, %v3480_v30 }
 0x4d3   : > { %v3623_v16 = vmax.f32 %v3569_v35, 0.0 }
 0x4d4   : > { %v3728_v32 = vpop.f32.mrf.mxu0 }
 0x4d5   : > { %v3646_v3 = vpack.c.bf16 %v3623_v16, %v3622_v5  ;;  %v3729_v29 = vadd.f32 %v3728_v32, %v13128_v57  ;;  %v3497_v12 = vpop.f32.mrf.mxu2 }
 0x4d6   : > { %v3498_v5 = vadd.f32 %v3497_v12, %v13053_v58 }
 0x4d7   : > { %3767 = vmatmul.bf16.gmra.mxu0 %v3646_v3  ;;  %v3808_v2 = vmax.f32 %v3729_v29, 0.0 }
 0x4d8   : > { %v3571_v34 = vpop.f32.mrf.mxu3 }
 0x4d9   : > { %v3572_v15 = vadd.f32 %v3571_v34, %v3483_v33 }
 0x4db   : > { %v3624_v44 = vmax.f32 %v3572_v15, 0.0 }
 0x4dc   : > { %v3730_v47 = vpop.f32.mrf.mxu0 }
 0x4dd   : > { %v3731_v49 = vadd.f32 %v3730_v47, %v13128_v57  ;;  %v3499_v59 = vpop.f32.mrf.mxu2 }
 0x4de   : > { %v3500_v32 = vadd.f32 %v3499_v59, %v13053_v58 }
 0x4df   : > { %v3809_v37 = vmax.f32 %v3731_v49, 0.0 }
 0x4e0   : > { %v3573_v48 = vpop.f32.mrf.mxu3 }
 0x4e1   : > { %v3840_v7 = vpack.c.bf16 %v3809_v37, %v3808_v2  ;;  %v3574_v43 = vadd.f32 %v3573_v48, %v3485_v36 }
 0x4e3   : > { %v3625_v63 = vmax.f32 %v3574_v43, 0.0  ;;  %9965 = vmatmul.msk.bf16.vlgmr.msra.gmra.mxu1 %vm3889_vm1, %v3840_v7 }
 0x4e4   : > { %v3733_v54 = vpop.f32.mrf.mxu0 }
 0x4e5   : > { %v3647_v62 = vpack.c.bf16 %v3625_v63, %v3624_v44  ;;  %v3734_v38 = vadd.f32 %v3733_v54, %v13128_v57  ;;  %v3502_v50 = vpop.f32.mrf.mxu2 }
 0x4e6   : > { %v3503_v6 = vadd.f32 %v3502_v50, %v13053_v58 }
 0x4e7   : > { %3772 = vmatmul.bf16.gmra.mxu0 %v3647_v62  ;;  %v3810_v14 = vmax.f32 %v3734_v38, 0.0 }
 0x4e8   : > { %v3576_v22 = vpop.f32.mrf.mxu3 }
 0x4e9   : > { %v3577_v28 = vadd.f32 %v3576_v22, %v3488_v10 }
 0x4eb   : > { %v3626_v31 = vmax.f32 %v3577_v28, 0.0 }
 0x4ec   : > { %v3735_v17 = vpop.f32.mrf.mxu0 }
 0x4ed   : > { %v3736_v9 = vadd.f32 %v3735_v17, %v13128_v57  ;;  %v3504_v2 = vpop.f32.mrf.mxu2 }
 0x4ee   : > { %v3505_v45 = vadd.f32 %v3504_v2, %v13053_v58 }
 0x4ef   : > { %v3811_v40 = vmax.f32 %v3736_v9, 0.0 }
 0x4f0   : > { %v3578_v56 = vpop.f32.mrf.mxu3 }
 0x4f1   : > { %v3841_v1 = vpack.c.bf16 %v3811_v40, %v3810_v14  ;;  %v3579_v24 = vadd.f32 %v3578_v56, %v3490_v0 }
 0x4f3   : > { %v3627_v51 = vmax.f32 %v3579_v24, 0.0  ;;  %9966 = vmatmul.msk.bf16.gmra.mxu1 %vm3889_vm1, %v3841_v1 }
 0x4f4   : > { %v3738_v4 = vpop.f32.mrf.mxu0 }
 0x4f5   : > { %v3648_v13 = vpack.c.bf16 %v3627_v51, %v3626_v31  ;;  %v3739_v41 = vadd.f32 %v3738_v4, %v13128_v57  ;;  %v3507_v63 = vpop.f32.mrf.mxu2 }
 0x4f6   : > { %v3508_v24 = vadd.f32 %v3507_v63, %v13053_v58 }
 0x4f7   : > { %3777 = vmatmul.bf16.gmra.mxu0 %v3648_v13  ;;  %v3812_v25 = vmax.f32 %v3739_v41, 0.0 }
 0x4f8   : > { %v3581_v11 = vpop.f32.mrf.mxu3 }
 0x4f9   : > { %v3582_v21 = vadd.f32 %v3581_v11, %v3493_v23 }
 0x4fb   : > { %v3628_v52 = vmax.f32 %v3582_v21, 0.0 }
 0x4fc   : > { %v3740_v60 = vpop.f32.mrf.mxu0 }
 0x4fd   : > { %v3741_v26 = vadd.f32 %v3740_v60, %v13128_v57  ;;  %v3509_v28 = vpop.f32.mrf.mxu2 }
 0x4fe   : > { %v3510_v51 = vadd.f32 %v3509_v28, %v13053_v58 }
 0x4ff   : > { %v3813_v55 = vmax.f32 %v3741_v26, 0.0 }
 0x500   : > { %v3583_v18 = vpop.f32.mrf.mxu3 }
 0x501   : > { %v3842_v61 = vpack.c.bf16 %v3813_v55, %v3812_v25  ;;  %v3584_v42 = vadd.f32 %v3583_v18, %v3495_v8 }
 0x503   : > { %v3629_v19 = vmax.f32 %v3584_v42, 0.0  ;;  %9967 = vmatmul.msk.bf16.gmra.mxu1 %vm3889_vm1, %v3842_v61 }
 0x504   : > { %v3743_v27 = vpop.f32.mrf.mxu0 }
 0x505   : > { %v3649_v30 = vpack.c.bf16 %v3629_v19, %v3628_v52  ;;  %v3744_v35 = vadd.f32 %v3743_v27, %v13128_v57  ;;  %v3512_v23 = vpop.f32.mrf.mxu2 }
 0x506   : > { %v3513_v42 = vadd.f32 %v3512_v23, %v13053_v58 }
 0x507   : > { %3782 = vmatmul.bf16.gmra.mxu0 %v3649_v30  ;;  %v3814_v3 = vmax.f32 %v3744_v35, 0.0 }
 0x508   : > { %v3586_v53 = vpop.f32.mrf.mxu3 }
 0x509   : > { %v3587_v39 = vadd.f32 %v3586_v53, %v3498_v5 }
 0x50b   : > { %v3630_v49 = vmax.f32 %v3587_v39, 0.0 }
 0x50c   : > { %v3745_v20 = vpop.f32.mrf.mxu0 }
 0x50d   : > { %v3746_v16 = vadd.f32 %v3745_v20, %v13128_v57  ;;  %v3514_v18 = vpop.f32.mrf.mxu2 }
 0x50e   : > { %v3515_v19 = vadd.f32 %v3514_v18, %v13053_v58 }
 0x50f   : > { %v3815_v34 = vmax.f32 %v3746_v16, 0.0 }
 0x510   : > { %v3588_v29 = vpop.f32.mrf.mxu3 }
 0x511   : > { %v3843_v47 = vpack.c.bf16 %v3815_v34, %v3814_v3  ;;  %v3589_v33 = vadd.f32 %v3588_v29, %v3500_v32 }
 0x513   : > { %v3631_v36 = vmax.f32 %v3589_v33, 0.0  ;;  %9968 = vmatmul.msk.bf16.gmra.mxu1 %vm3889_vm1, %v3843_v47 }
 0x514   : > { %v3748_v15 = vpop.f32.mrf.mxu0 }
 0x515   : > { %v3650_v37 = vpack.c.bf16 %v3631_v36, %v3630_v49  ;;  %v3749_v7 = vadd.f32 %v3748_v15, %v13128_v57 }
 0x517   : > { %3787 = vmatmul.bf16.gmra.mxu0 %v3650_v37  ;;  %v3816_v54 = vmax.f32 %v3749_v7, 0.0 }
 0x518   : > { %v3591_v48 = vpop.f32.mrf.mxu3 }
 0x519   : > { %v3592_v62 = vadd.f32 %v3591_v48, %v3503_v6  ;;  %v13177_v6 = vld [vmem:[%s15475_s17 + $0x3] ss:$0 sm:$0xff] }
 0x51b   : > { %v3632_v10 = vmax.f32 %v3592_v62, 0.0 }
 0x51c   : > { %v3750_v43 = vpop.f32.mrf.mxu0 }
 0x51d   : > { %v3751_v44 = vadd.f32 %v3750_v43, %v13128_v57 }
 0x51f   : > { %v3817_v22 = vmax.f32 %v3751_v44, 0.0 }
 0x520   : > { %v3593_v38 = vpop.f32.mrf.mxu3 }
 0x521   : > { %v3844_v46 = vpack.c.bf16 %v3817_v22, %v3816_v54  ;;  %v3594_v17 = vadd.f32 %v3593_v38, %v3505_v45 }
 0x523   : > { %v3633_v9 = vmax.f32 %v3594_v17, 0.0  ;;  %9969 = vmatmul.msk.bf16.gmra.mxu1 %vm3889_vm1, %v3844_v46 }
 0x524   : > { %v3753_v0 = vpop.f32.mrf.mxu0 }
 0x525   : > { %v3651_v14 = vpack.c.bf16 %v3633_v9, %v3632_v10  ;;  %v3754_v56 = vadd.f32 %v3753_v0, %v13128_v57 }
 0x527   : > { %3792 = vmatmul.bf16.gmra.mxu0 %v3651_v14  ;;  %v3818_v4 = vmax.f32 %v3754_v56, 0.0 }
 0x528   : > { %v3596_v40 = vpop.f32.mrf.mxu3 }
 0x529   : > { %v3597_v13 = vadd.f32 %v3596_v40, %v3508_v24  ;;  %v4472_v40 = vld [vmem:[%s15465_s7] sm:$0xf] }
 0x52b   : > { %v3634_v26 = vmax.f32 %v3597_v13, 0.0 }
 0x52c   : > { %v3755_v1 = vpop.f32.mrf.mxu0 }
 0x52d   : > { %v3756_v31 = vadd.f32 %v3755_v1, %v13128_v57  ;;  %v4525_v1 = vsel %vm4523_vm3, %v4472_v40, 0 }
 0x52e   : > { %4534 = vmatpush.bf16.msrb.mxu0 %v4525_v1 }
 0x52f   : > { %v3819_v12 = vmax.f32 %v3756_v31, 0.0 }
 0x530   : > { %v3598_v11 = vpop.f32.mrf.mxu3 }
 0x531   : > { %v3845_v41 = vpack.c.bf16 %v3819_v12, %v3818_v4  ;;  %v3599_v60 = vadd.f32 %v3598_v11, %v3510_v51 }
 0x533   : > { %v3635_v8 = vmax.f32 %v3599_v60, 0.0  ;;  %9970 = vmatmul.msk.bf16.gmra.mxu1 %vm3889_vm1, %v3845_v41 }
 0x534   : > { %v3758_v25 = vpop.f32.mrf.mxu0 }
 0x535   : > { %v3652_v21 = vpack.c.bf16 %v3635_v8, %v3634_v26  ;;  %v3759_v59 = vadd.f32 %v3758_v25, %v13128_v57 }
 0x537   : > { %3797 = vmatmul.bf16.gmra.mxu0 %v3652_v21  ;;  %v3820_v27 = vmax.f32 %v3759_v59, 0.0 }
 0x538   : > { %v3601_v55 = vpop.f32.mrf.mxu3 }
 0x539   : > { %v3602_v30 = vadd.f32 %v3601_v55, %v3513_v42 }
 0x53b   : > { %v3636_v5 = vmax.f32 %v3602_v30, 0.0 }
 0x53c   : > { %v3760_v61 = vpop.f32.mrf.mxu0 }
 0x53d   : > { %v3761_v52 = vadd.f32 %v3760_v61, %v13128_v57 }
 0x53f   : > { %v3821_v53 = vmax.f32 %v3761_v52, 0.0 }
 0x540   : > { %v3603_v50 = vpop.f32.mrf.mxu3 }
 0x541   : > { %v3846_v35 = vpack.c.bf16 %v3821_v53, %v3820_v27  ;;  %v3604_v20 = vadd.f32 %v3603_v50, %v3515_v19 }
 0x543   : > { %v3637_v16 = vmax.f32 %v3604_v20, 0.0  ;;  %9971 = vmatmul.msk.bf16.gmra.mxu1 %vm3889_vm1, %v3846_v35 }
 0x544   : > { %v3763_v32 = vpop.f32.mrf.mxu0 }
 0x545   : > { %v3653_v3 = vpack.c.bf16 %v3637_v16, %v3636_v5  ;;  %v3764_v39 = vadd.f32 %v3763_v32, %v13128_v57 }
 0x547   : > { %3802 = vmatmul.bf16.gmra.mxu0 %v3653_v3  ;;  %v3822_v47 = vmax.f32 %v3764_v39, 0.0 }
 0x54c   : > { %v3765_v34 = vpop.f32.mrf.mxu0 }
 0x54d   : > { %v3766_v29 = vadd.f32 %v3765_v34, %v13128_v57 }
 0x54f   : > { %v3823_v58 = vmax.f32 %v3766_v29, 0.0 }
 0x551   : > { %v3847_v33 = vpack.c.bf16 %v3823_v58, %v3822_v47 }
 0x553   : > { %9972 = vmatmul.msk.bf16.gmra.mxu1 %vm3889_vm1, %v3847_v33 }
 0x554   : > { %v3768_v49 = vpop.f32.mrf.mxu0 }
 0x555   : > { %v3769_v36 = vadd.f32 %v3768_v49, %v13128_v57 }
 0x557   : > { %v3824_v37 = vmax.f32 %v3769_v36, 0.0 }
 0x55c   : > { %v3770_v2 = vpop.f32.mrf.mxu0 }
 0x55d   : > { %v3771_v15 = vadd.f32 %v3770_v2, %v13128_v57 }
 0x55f   : > { %v3825_v48 = vmax.f32 %v3771_v15, 0.0 }
 0x560   : > { %v3947_v7 = vpop.f32.mrf.mxu1 }
 0x561   : > { %v3848_v43 = vpack.c.bf16 %v3825_v48, %v3824_v37  ;;  %v3948_v63 = vadd.f32 %v3947_v7, %v13177_v6 }
 0x563   : > { %9973 = vmatmul.msk.bf16.gmra.mxu1 %vm3889_vm1, %v3848_v43  ;;  %v4027_v62 = vmax.f32 %v3948_v63, 0.0 }
 0x564   : > { %v3773_v44 = vpop.f32.mrf.mxu0 }
 0x565   : > { %v3774_v22 = vadd.f32 %v3773_v44, %v13128_v57 }
 0x567   : > { %v3826_v9 = vmax.f32 %v3774_v22, 0.0 }
 0x568   : > { %v3949_v45 = vpop.f32.mrf.mxu1 }
 0x569   : > { %v3950_v54 = vadd.f32 %v3949_v45, %v13177_v6 }
 0x56b   : > { %v4028_v38 = vmax.f32 %v3950_v54, 0.0 }
 0x56c   : > { %v3775_v46 = vpop.f32.mrf.mxu0 }
 0x56d   : > { %v4059_v17 = vpack.c.bf16 %v4028_v38, %v4027_v62  ;;  %v3776_v10 = vadd.f32 %v3775_v46, %v13128_v57 }
 0x56f   : > { %v3827_v0 = vmax.f32 %v3776_v10, 0.0  ;;  %9989 = vmatmul.msk.bf16.vlgmr.msra.gmra.mxu2 %vm4092_vm2, %v4059_v17 }
 0x570   : > { %v3952_v14 = vpop.f32.mrf.mxu1 }
 0x571   : > { %v3849_v28 = vpack.c.bf16 %v3827_v0, %v3826_v9  ;;  %v3953_v24 = vadd.f32 %v3952_v14, %v13177_v6 }
 0x573   : > { %9974 = vmatmul.msk.bf16.gmra.mxu1 %vm3889_vm1, %v3849_v28  ;;  %v4029_v4 = vmax.f32 %v3953_v24, 0.0 }
 0x574   : > { %v3778_v56 = vpop.f32.mrf.mxu0 }
 0x575   : > { %v3779_v13 = vadd.f32 %v3778_v56, %v13128_v57 }
 0x577   : > { %v3828_v23 = vmax.f32 %v3779_v13, 0.0 }
 0x578   : > { %v3954_v31 = vpop.f32.mrf.mxu1 }
 0x579   : > { %v3955_v51 = vadd.f32 %v3954_v31, %v13177_v6 }
 0x57b   : > { %v4030_v12 = vmax.f32 %v3955_v51, 0.0 }
 0x57c   : > { %v3780_v11 = vpop.f32.mrf.mxu0 }
 0x57d   : > { %v4060_v41 = vpack.c.bf16 %v4030_v12, %v4029_v4  ;;  %v3781_v60 = vadd.f32 %v3780_v11, %v13128_v57 }
 0x57f   : > { %v3829_v26 = vmax.f32 %v3781_v60, 0.0  ;;  %9990 = vmatmul.msk.bf16.gmra.mxu2 %vm4092_vm2, %v4060_v41 }
 0x580   : > { %v3957_v8 = vpop.f32.mrf.mxu1 }
 0x581   : > { %v3850_v25 = vpack.c.bf16 %v3829_v26, %v3828_v23  ;;  %v3958_v55 = vadd.f32 %v3957_v8, %v13177_v6 }
 0x583   : > { %9975 = vmatmul.msk.bf16.gmra.mxu1 %vm3889_vm1, %v3850_v25  ;;  %v4031_v61 = vmax.f32 %v3958_v55, 0.0 }
 0x584   : > { %v3783_v21 = vpop.f32.mrf.mxu0 }
 0x585   : > { %v3784_v42 = vadd.f32 %v3783_v21, %v13128_v57 }
 0x587   : > { %v3830_v53 = vmax.f32 %v3784_v42, 0.0 }
 0x588   : > { %v3959_v59 = vpop.f32.mrf.mxu1 }
 0x589   : > { %v3960_v18 = vadd.f32 %v3959_v59, %v13177_v6 }
 0x58b   : > { %v4032_v52 = vmax.f32 %v3960_v18, 0.0 }
 0x58c   : > { %v3785_v19 = vpop.f32.mrf.mxu0 }
 0x58d   : > { %v4061_v27 = vpack.c.bf16 %v4032_v52, %v4031_v61  ;;  %v3786_v30 = vadd.f32 %v3785_v19, %v13128_v57 }
 0x58f   : > { %v3831_v50 = vmax.f32 %v3786_v30, 0.0  ;;  %9991 = vmatmul.msk.bf16.gmra.mxu2 %vm4092_vm2, %v4061_v27 }
 0x590   : > { %v3962_v35 = vpop.f32.mrf.mxu1 }
 0x591   : > { %v3851_v20 = vpack.c.bf16 %v3831_v50, %v3830_v53  ;;  %v3963_v16 = vadd.f32 %v3962_v35, %v13177_v6 }
 0x593   : > { %9976 = vmatmul.msk.bf16.gmra.mxu1 %vm3889_vm1, %v3851_v20  ;;  %v4033_v39 = vmax.f32 %v3963_v16, 0.0 }
 0x594   : > { %v3788_v5 = vpop.f32.mrf.mxu0 }
 0x595   : > { %v3789_v34 = vadd.f32 %v3788_v5, %v13128_v57 }
 0x597   : > { %v3832_v49 = vmax.f32 %v3789_v34, 0.0 }
 0x598   : > { %v3964_v32 = vpop.f32.mrf.mxu1 }
 0x599   : > { %v3965_v3 = vadd.f32 %v3964_v32, %v13177_v6 }
 0x59b   : > { %v4034_v29 = vmax.f32 %v3965_v3, 0.0 }
 0x59c   : > { %v3790_v47 = vpop.f32.mrf.mxu0 }
 0x59d   : > { %v4062_v58 = vpack.c.bf16 %v4034_v29, %v4033_v39  ;;  %v3791_v33 = vadd.f32 %v3790_v47, %v13128_v57 }
 0x59f   : > { %v3833_v36 = vmax.f32 %v3791_v33, 0.0  ;;  %9992 = vmatmul.msk.bf16.gmra.mxu2 %vm4092_vm2, %v4062_v58  ;;  %v13234_v58 = vld [vmem:[%s15475_s17 + $0x4] ss:$0 sm:$0xff] }
 0x5a0   : > { %v3967_v2 = vpop.f32.mrf.mxu1 }
 0x5a1   : > { %v3852_v15 = vpack.c.bf16 %v3833_v36, %v3832_v49  ;;  %v3968_v48 = vadd.f32 %v3967_v2, %v13177_v6 }
 0x5a3   : > { %9977 = vmatmul.msk.bf16.gmra.mxu1 %vm3889_vm1, %v3852_v15  ;;  %v4035_v44 = vmax.f32 %v3968_v48, 0.0 }
 0x5a4   : > { %v3793_v37 = vpop.f32.mrf.mxu0 }
 0x5a5   : > { %v3794_v63 = vadd.f32 %v3793_v37, %v13128_v57 }
 0x5a7   : > { %v3834_v38 = vmax.f32 %v3794_v63, 0.0 }
 0x5a8   : > { %v3969_v7 = vpop.f32.mrf.mxu1 }
 0x5a9   : > { %v3970_v43 = vadd.f32 %v3969_v7, %v13177_v6 }
 0x5ab   : > { %v4036_v45 = vmax.f32 %v3970_v43, 0.0 }
 0x5ac   : > { %v3795_v54 = vpop.f32.mrf.mxu0 }
 0x5ad   : > { %v4063_v62 = vpack.c.bf16 %v4036_v45, %v4035_v44  ;;  %v3796_v22 = vadd.f32 %v3795_v54, %v13128_v57  ;;  %v4664_v54 = vld [vmem:[%s15466_s8] sm:$0x3] }
 0x5af   : > { %v3835_v46 = vmax.f32 %v3796_v22, 0.0  ;;  %9993 = vmatmul.msk.bf16.gmra.mxu2 %vm4092_vm2, %v4063_v62  ;;  %v4717_v22 = vsel %vm4715_vm4, %v4664_v54, 0 }
 0x5b0   : > { %v3972_v17 = vpop.f32.mrf.mxu1  ;;  %4726 = vmatpush.bf16.msrb.mxu1 %v4717_v22 }
 0x5b1   : > { %v3853_v10 = vpack.c.bf16 %v3835_v46, %v3834_v38  ;;  %v3973_v0 = vadd.f32 %v3972_v17, %v13177_v6 }
 0x5b3   : > { %9978 = vmatmul.msk.bf16.gmra.mxu1 %vm3889_vm1, %v3853_v10  ;;  %v4037_v40 = vmax.f32 %v3973_v0, 0.0 }
 0x5b4   : > { %v3798_v9 = vpop.f32.mrf.mxu0 }
 0x5b5   : > { %v3799_v56 = vadd.f32 %v3798_v9, %v13128_v57 }
 0x5b7   : > { %v3836_v4 = vmax.f32 %v3799_v56, 0.0 }
 0x5b8   : > { %v3974_v14 = vpop.f32.mrf.mxu1 }
 0x5b9   : > { %v3975_v28 = vadd.f32 %v3974_v14, %v13177_v6 }
 0x5bb   : > { %v4038_v1 = vmax.f32 %v3975_v28, 0.0 }
 0x5bc   : > { %v3800_v24 = vpop.f32.mrf.mxu0 }
 0x5bd   : > { %v4064_v31 = vpack.c.bf16 %v4038_v1, %v4037_v40  ;;  %v3801_v51 = vadd.f32 %v3800_v24, %v13128_v57 }
 0x5bf   : > { %v3837_v13 = vmax.f32 %v3801_v51, 0.0  ;;  %9994 = vmatmul.msk.bf16.gmra.mxu2 %vm4092_vm2, %v4064_v31 }
 0x5c0   : > { %v3977_v12 = vpop.f32.mrf.mxu1 }
 0x5c1   : > { %v3854_v11 = vpack.c.bf16 %v3837_v13, %v3836_v4  ;;  %v3978_v60 = vadd.f32 %v3977_v12, %v13177_v6 }
 0x5c3   : > { %9979 = vmatmul.msk.bf16.gmra.mxu1 %vm3889_vm1, %v3854_v11  ;;  %v4039_v8 = vmax.f32 %v3978_v60, 0.0 }
 0x5c4   : > { %v3803_v41 = vpop.f32.mrf.mxu0 }
 0x5c5   : > { %v3804_v25 = vadd.f32 %v3803_v41, %v13128_v57 }
 0x5c7   : > { %v3838_v61 = vmax.f32 %v3804_v25, 0.0 }
 0x5c8   : > { %v3979_v23 = vpop.f32.mrf.mxu1 }
 0x5c9   : > { %v3980_v26 = vadd.f32 %v3979_v23, %v13177_v6 }
 0x5cb   : > { %v4040_v21 = vmax.f32 %v3980_v26, 0.0 }
 0x5cc   : > { %v3805_v55 = vpop.f32.mrf.mxu0 }
 0x5cd   : > { %v4065_v59 = vpack.c.bf16 %v4040_v21, %v4039_v8  ;;  %v3806_v18 = vadd.f32 %v3805_v55, %v13128_v57 }
 0x5cf   : > { %v3839_v42 = vmax.f32 %v3806_v18, 0.0  ;;  %9995 = vmatmul.msk.bf16.gmra.mxu2 %vm4092_vm2, %v4065_v59 }
 0x5d0   : > { %v3982_v52 = vpop.f32.mrf.mxu1 }
 0x5d1   : > { %v3855_v19 = vpack.c.bf16 %v3839_v42, %v3838_v61  ;;  %v3983_v27 = vadd.f32 %v3982_v52, %v13177_v6 }
 0x5d3   : > { %9980 = vmatmul.msk.bf16.gmra.mxu1 %vm3889_vm1, %v3855_v19  ;;  %v4041_v50 = vmax.f32 %v3983_v27, 0.0 }
 0x5d8   : > { %v3984_v30 = vpop.f32.mrf.mxu1 }
 0x5d9   : > { %v3985_v53 = vadd.f32 %v3984_v30, %v13177_v6 }
 0x5db   : > { %v4042_v35 = vmax.f32 %v3985_v53, 0.0 }
 0x5dd   : > { %v4066_v20 = vpack.c.bf16 %v4042_v35, %v4041_v50 }
 0x5df   : > { %9996 = vmatmul.msk.bf16.gmra.mxu2 %vm4092_vm2, %v4066_v20 }
 0x5e0   : > { %v3987_v5 = vpop.f32.mrf.mxu1 }
 0x5e1   : > { %v3988_v57 = vadd.f32 %v3987_v5, %v13177_v6 }
 0x5e3   : > { %v4043_v3 = vmax.f32 %v3988_v57, 0.0 }
 0x5e8   : > { %v3989_v16 = vpop.f32.mrf.mxu1 }
 0x5e9   : > { %v3990_v32 = vadd.f32 %v3989_v16, %v13177_v6 }
 0x5eb   : > { %v4044_v39 = vmax.f32 %v3990_v32, 0.0 }
 0x5ed   : > { %v4067_v34 = vpack.c.bf16 %v4044_v39, %v4043_v3 }
 0x5ef   : > { %9997 = vmatmul.msk.bf16.gmra.mxu2 %vm4092_vm2, %v4067_v34 }
 0x5f0   : > { %v3992_v29 = vpop.f32.mrf.mxu1 }
 0x5f1   : > { %v3993_v33 = vadd.f32 %v3992_v29, %v13177_v6 }
 0x5f2   : > { %v4150_v47 = vpop.f32.mrf.mxu2 }
 0x5f3   : > { %v4151_v36 = vadd.f32 %v4150_v47, %v13234_v58  ;;  %v4045_v37 = vmax.f32 %v3993_v33, 0.0 }
 0x5f5   : > { %v4230_v43 = vmax.f32 %v4151_v36, 0.0 }
 0x5f8   : > { %v3994_v49 = vpop.f32.mrf.mxu1 }
 0x5f9   : > { %v3995_v2 = vadd.f32 %v3994_v49, %v13177_v6 }
 0x5fa   : > { %v4152_v15 = vpop.f32.mrf.mxu2 }
 0x5fb   : > { %v4046_v48 = vmax.f32 %v3995_v2, 0.0  ;;  %v4153_v7 = vadd.f32 %v4152_v15, %v13234_v58 }
 0x5fd   : > { %v4068_v44 = vpack.c.bf16 %v4046_v48, %v4045_v37  ;;  %v4231_v63 = vmax.f32 %v4153_v7, 0.0 }
 0x5ff   : > { %v4262_v45 = vpack.c.bf16 %v4231_v63, %v4230_v43  ;;  %9998 = vmatmul.msk.bf16.gmra.mxu2 %vm4092_vm2, %v4068_v44 }
 0x600   : > { %v3997_v62 = vpop.f32.mrf.mxu1 }
 0x601   : > { %10009 = vmatmul.msk.bf16.vlgmr.msra.gmra.mxu3 %vm1908_vm0, %v4262_v45  ;;  %v3998_v46 = vadd.f32 %v3997_v62, %v13177_v6 }
 0x602   : > { %v4155_v38 = vpop.f32.mrf.mxu2 }
 0x603   : > { %v4156_v10 = vadd.f32 %v4155_v38, %v13234_v58  ;;  %v4047_v14 = vmax.f32 %v3998_v46, 0.0 }
 0x605   : > { %v4232_v56 = vmax.f32 %v4156_v10, 0.0 }
 0x608   : > { %v3999_v17 = vpop.f32.mrf.mxu1 }
 0x609   : > { %v4000_v9 = vadd.f32 %v3999_v17, %v13177_v6 }
 0x60a   : > { %v4157_v0 = vpop.f32.mrf.mxu2 }
 0x60b   : > { %v4048_v28 = vmax.f32 %v4000_v9, 0.0  ;;  %v4158_v40 = vadd.f32 %v4157_v0, %v13234_v58 }
 0x60d   : > { %v4069_v1 = vpack.c.bf16 %v4048_v28, %v4047_v14  ;;  %v4233_v24 = vmax.f32 %v4158_v40, 0.0 }
 0x60f   : > { %v4263_v31 = vpack.c.bf16 %v4233_v24, %v4232_v56  ;;  %9999 = vmatmul.msk.bf16.gmra.mxu2 %vm4092_vm2, %v4069_v1 }
 0x610   : > { %v4002_v51 = vpop.f32.mrf.mxu1 }
 0x611   : > { %10010 = vmatmul.msk.bf16.gmra.mxu3 %vm1908_vm0, %v4263_v31  ;;  %v4003_v13 = vadd.f32 %v4002_v51, %v13177_v6 }
 0x612   : > { %v4160_v4 = vpop.f32.mrf.mxu2 }
 0x613   : > { %v4161_v11 = vadd.f32 %v4160_v4, %v13234_v58  ;;  %v4049_v23 = vmax.f32 %v4003_v13, 0.0 }
 0x615   : > { %v4234_v25 = vmax.f32 %v4161_v11, 0.0 }
 0x618   : > { %v4004_v12 = vpop.f32.mrf.mxu1 }
 0x619   : > { %v4005_v41 = vadd.f32 %v4004_v12, %v13177_v6 }
 0x61a   : > { %v4162_v60 = vpop.f32.mrf.mxu2 }
 0x61b   : > { %v4050_v26 = vmax.f32 %v4005_v41, 0.0  ;;  %v4163_v8 = vadd.f32 %v4162_v60, %v13234_v58 }
 0x61d   : > { %v4070_v21 = vpack.c.bf16 %v4050_v26, %v4049_v23  ;;  %v4235_v55 = vmax.f32 %v4163_v8, 0.0 }
 0x61f   : > { %v4264_v59 = vpack.c.bf16 %v4235_v55, %v4234_v25  ;;  %10000 = vmatmul.msk.bf16.gmra.mxu2 %vm4092_vm2, %v4070_v21 }
 0x620   : > { %v4007_v18 = vpop.f32.mrf.mxu1 }
 0x621   : > { %10011 = vmatmul.msk.bf16.gmra.mxu3 %vm1908_vm0, %v4264_v59  ;;  %v4008_v42 = vadd.f32 %v4007_v18, %v13177_v6 }
 0x622   : > { %v4165_v61 = vpop.f32.mrf.mxu2 }
 0x623   : > { %v4166_v19 = vadd.f32 %v4165_v61, %v13234_v58  ;;  %v4051_v53 = vmax.f32 %v4008_v42, 0.0 }
 0x625   : > { %v4236_v20 = vmax.f32 %v4166_v19, 0.0 }
 0x628   : > { %v4009_v52 = vpop.f32.mrf.mxu1 }
 0x629   : > { %v4010_v27 = vadd.f32 %v4009_v52, %v13177_v6 }
 0x62a   : > { %v4167_v30 = vpop.f32.mrf.mxu2 }
 0x62b   : > { %v4052_v50 = vmax.f32 %v4010_v27, 0.0  ;;  %v4168_v35 = vadd.f32 %v4167_v30, %v13234_v58 }
 0x62d   : > { %v4071_v5 = vpack.c.bf16 %v4052_v50, %v4051_v53  ;;  %v4237_v57 = vmax.f32 %v4168_v35, 0.0  ;;  %v13291_v35 = vld [vmem:[%s15475_s17 + $0x5] ss:$0 sm:$0xff] }
 0x62f   : > { %v4265_v16 = vpack.c.bf16 %v4237_v57, %v4236_v20  ;;  %10001 = vmatmul.msk.bf16.gmra.mxu2 %vm4092_vm2, %v4071_v5 }
 0x630   : > { %v4012_v32 = vpop.f32.mrf.mxu1 }
 0x631   : > { %10012 = vmatmul.msk.bf16.gmra.mxu3 %vm1908_vm0, %v4265_v16  ;;  %v4013_v39 = vadd.f32 %v4012_v32, %v13177_v6 }
 0x632   : > { %v4170_v3 = vpop.f32.mrf.mxu2 }
 0x633   : > { %v4171_v29 = vadd.f32 %v4170_v3, %v13234_v58  ;;  %v4053_v49 = vmax.f32 %v4013_v39, 0.0 }
 0x635   : > { %v4238_v15 = vmax.f32 %v4171_v29, 0.0 }
 0x638   : > { %v4014_v34 = vpop.f32.mrf.mxu1 }
 0x639   : > { %v4015_v47 = vadd.f32 %v4014_v34, %v13177_v6 }
 0x63a   : > { %v4172_v33 = vpop.f32.mrf.mxu2 }
 0x63b   : > { %v4054_v36 = vmax.f32 %v4015_v47, 0.0  ;;  %v4173_v2 = vadd.f32 %v4172_v33, %v13234_v58 }
 0x63d   : > { %v4072_v37 = vpack.c.bf16 %v4054_v36, %v4053_v49  ;;  %v4239_v48 = vmax.f32 %v4173_v2, 0.0  ;;  %v10962_v49 = vld [vmem:[%s15467_s9 + $0x38] sm:$0xff] }
 0x63e   : > { %4953 = vmatpush.bf16.msrb.mxu2 %v10962_v49 }
 0x63f   : > { %v4266_v7 = vpack.c.bf16 %v4239_v48, %v4238_v15  ;;  %10002 = vmatmul.msk.bf16.gmra.mxu2 %vm4092_vm2, %v4072_v37 }
 0x640   : > { %v4017_v43 = vpop.f32.mrf.mxu1 }
 0x641   : > { %10013 = vmatmul.msk.bf16.gmra.mxu3 %vm1908_vm0, %v4266_v7  ;;  %v4018_v63 = vadd.f32 %v4017_v43, %v13177_v6 }
 0x642   : > { %v4175_v44 = vpop.f32.mrf.mxu2 }
 0x643   : > { %v4176_v54 = vadd.f32 %v4175_v44, %v13234_v58  ;;  %v4055_v38 = vmax.f32 %v4018_v63, 0.0 }
 0x645   : > { %v4240_v10 = vmax.f32 %v4176_v54, 0.0 }
 0x648   : > { %v4019_v45 = vpop.f32.mrf.mxu1 }
 0x649   : > { %v4020_v62 = vadd.f32 %v4019_v45, %v13177_v6 }
 0x64a   : > { %v4177_v22 = vpop.f32.mrf.mxu2 }
 0x64b   : > { %v4056_v46 = vmax.f32 %v4020_v62, 0.0  ;;  %v4178_v17 = vadd.f32 %v4177_v22, %v13234_v58 }
 0x64d   : > { %v4073_v9 = vpack.c.bf16 %v4056_v46, %v4055_v38  ;;  %v4241_v0 = vmax.f32 %v4178_v17, 0.0 }
 0x64f   : > { %v4267_v14 = vpack.c.bf16 %v4241_v0, %v4240_v10  ;;  %10003 = vmatmul.msk.bf16.gmra.mxu2 %vm4092_vm2, %v4073_v9 }
 0x650   : > { %v4022_v28 = vpop.f32.mrf.mxu1 }
 0x651   : > { %10014 = vmatmul.msk.bf16.gmra.mxu3 %vm1908_vm0, %v4267_v14  ;;  %v4023_v56 = vadd.f32 %v4022_v28, %v13177_v6 }
 0x652   : > { %v4180_v40 = vpop.f32.mrf.mxu2 }
 0x653   : > { %v4181_v24 = vadd.f32 %v4180_v40, %v13234_v58  ;;  %v4057_v4 = vmax.f32 %v4023_v56, 0.0 }
 0x655   : > { %v4242_v11 = vmax.f32 %v4181_v24, 0.0 }
 0x658   : > { %v4024_v1 = vpop.f32.mrf.mxu1 }
 0x659   : > { %v4025_v31 = vadd.f32 %v4024_v1, %v13177_v6 }
 0x65a   : > { %v4182_v51 = vpop.f32.mrf.mxu2 }
 0x65b   : > { %v4058_v13 = vmax.f32 %v4025_v31, 0.0  ;;  %v4183_v12 = vadd.f32 %v4182_v51, %v13234_v58 }
 0x65d   : > { %v4074_v41 = vpack.c.bf16 %v4058_v13, %v4057_v4  ;;  %v4243_v60 = vmax.f32 %v4183_v12, 0.0  ;;  %v10961_v13 = vld [vmem:[%s15467_s9 + $0x30] sm:$0xff] }
 0x65e   : > { %4954 = vmatpush.bf16.msrb.mxu2 %v10961_v13 }
 0x65f   : > { %v4268_v23 = vpack.c.bf16 %v4243_v60, %v4242_v11  ;;  %10004 = vmatmul.msk.bf16.gmra.mxu2 %vm4092_vm2, %v4074_v41 }
 0x661   : > { %10015 = vmatmul.msk.bf16.gmra.mxu3 %vm1908_vm0, %v4268_v23 }
 0x662   : > { %v4185_v26 = vpop.f32.mrf.mxu2 }
 0x663   : > { %v4186_v8 = vadd.f32 %v4185_v26, %v13234_v58 }
 0x665   : > { %v4244_v6 = vmax.f32 %v4186_v8, 0.0 }
 0x66a   : > { %v4187_v25 = vpop.f32.mrf.mxu2 }
 0x66b   : > { %v4188_v21 = vadd.f32 %v4187_v25, %v13234_v58 }
 0x66d   : > { %v4245_v55 = vmax.f32 %v4188_v21, 0.0 }
 0x66f   : > { %v4269_v59 = vpack.c.bf16 %v4245_v55, %v4244_v6 }
 0x671   : > { %10016 = vmatmul.msk.bf16.gmra.mxu3 %vm1908_vm0, %v4269_v59 }
 0x672   : > { %v4190_v18 = vpop.f32.mrf.mxu2 }
 0x673   : > { %v4191_v61 = vadd.f32 %v4190_v18, %v13234_v58 }
 0x675   : > { %v4246_v19 = vmax.f32 %v4191_v61, 0.0 }
 0x67a   : > { %v4192_v42 = vpop.f32.mrf.mxu2 }
 0x67b   : > { %v4193_v52 = vadd.f32 %v4192_v42, %v13234_v58 }
 0x67d   : > { %v4247_v27 = vmax.f32 %v4193_v52, 0.0 }
 0x67f   : > { %v4270_v30 = vpack.c.bf16 %v4247_v27, %v4246_v19 }
 0x681   : > { %10017 = vmatmul.msk.bf16.gmra.mxu3 %vm1908_vm0, %v4270_v30 }
 0x682   : > { %v4195_v53 = vpop.f32.mrf.mxu2 }
 0x683   : > { %v4196_v20 = vadd.f32 %v4195_v53, %v13234_v58 }
 0x684   : > { %v4344_v50 = vpop.f32.mrf.mxu3 }
 0x685   : > { %v4345_v57 = vadd.f32 %v4344_v50, %v13291_v35  ;;  %v4248_v3 = vmax.f32 %v4196_v20, 0.0 }
 0x687   : > { %v4424_v29 = vmax.f32 %v4345_v57, 0.0 }
 0x68a   : > { %v4197_v5 = vpop.f32.mrf.mxu2 }
 0x68b   : > { %v4198_v16 = vadd.f32 %v4197_v5, %v13234_v58 }
 0x68c   : > { %v4346_v32 = vpop.f32.mrf.mxu3 }
 0x68d   : > { %v4249_v39 = vmax.f32 %v4198_v16, 0.0  ;;  %v4347_v34 = vadd.f32 %v4346_v32, %v13291_v35 }
 0x68f   : > { %v4271_v47 = vpack.c.bf16 %v4249_v39, %v4248_v3  ;;  %v4425_v33 = vmax.f32 %v4347_v34, 0.0  ;;  %v10960_v34 = vld [vmem:[%s15467_s9 + $0x28] sm:$0xff] }
 0x690   : > { %4955 = vmatpush.bf16.msrb.mxu2 %v10960_v34 }
 0x691   : > { %v4456_v36 = vpack.c.bf16 %v4425_v33, %v4424_v29  ;;  %10018 = vmatmul.msk.bf16.gmra.mxu3 %vm1908_vm0, %v4271_v47 }
 0x692   : > { %v4200_v2 = vpop.f32.mrf.mxu2 }
 0x693   : > { %10025 = vmatmul.msk.bf16.vlgmr.msrb.gmra.mxu0 %vm4474_vm5, %v4456_v36  ;;  %v4201_v37 = vadd.f32 %v4200_v2, %v13234_v58 }
 0x694   : > { %v4349_v15 = vpop.f32.mrf.mxu3 }
 0x695   : > { %v4350_v7 = vadd.f32 %v4349_v15, %v13291_v35  ;;  %v4250_v63 = vmax.f32 %v4201_v37, 0.0 }
 0x697   : > { %v4426_v62 = vmax.f32 %v4350_v7, 0.0 }
 0x69a   : > { %v4202_v48 = vpop.f32.mrf.mxu2 }
 0x69b   : > { %v4203_v43 = vadd.f32 %v4202_v48, %v13234_v58 }
 0x69c   : > { %v4351_v44 = vpop.f32.mrf.mxu3 }
 0x69d   : > { %v4251_v45 = vmax.f32 %v4203_v43, 0.0  ;;  %v4352_v54 = vadd.f32 %v4351_v44, %v13291_v35 }
 0x69f   : > { %v4272_v22 = vpack.c.bf16 %v4251_v45, %v4250_v63  ;;  %v4427_v38 = vmax.f32 %v4352_v54, 0.0 }
 0x6a1   : > { %v4457_v46 = vpack.c.bf16 %v4427_v38, %v4426_v62  ;;  %10019 = vmatmul.msk.bf16.gmra.mxu3 %vm1908_vm0, %v4272_v22  ;;  %v10959_v38 = vld [vmem:[%s15467_s9 + $0x20] sm:$0xff] }
 0x6a2   : > { %v4205_v17 = vpop.f32.mrf.mxu2  ;;  %4956 = vmatpush.bf16.msrb.mxu2 %v10959_v38 }
 0x6a3   : > { %10026 = vmatmul.msk.bf16.gmra.mxu0 %vm4474_vm5, %v4457_v46  ;;  %v4206_v9 = vadd.f32 %v4205_v17, %v13234_v58 }
 0x6a4   : > { %v4354_v10 = vpop.f32.mrf.mxu3 }
 0x6a5   : > { %v4355_v14 = vadd.f32 %v4354_v10, %v13291_v35  ;;  %v4252_v56 = vmax.f32 %v4206_v9, 0.0 }
 0x6a7   : > { %v4428_v31 = vmax.f32 %v4355_v14, 0.0 }
 0x6aa   : > { %v4207_v0 = vpop.f32.mrf.mxu2 }
 0x6ab   : > { %v4208_v28 = vadd.f32 %v4207_v0, %v13234_v58 }
 0x6ac   : > { %v4356_v40 = vpop.f32.mrf.mxu3 }
 0x6ad   : > { %v4253_v1 = vmax.f32 %v4208_v28, 0.0  ;;  %v4357_v24 = vadd.f32 %v4356_v40, %v13291_v35 }
 0x6af   : > { %v4273_v51 = vpack.c.bf16 %v4253_v1, %v4252_v56  ;;  %v4429_v4 = vmax.f32 %v4357_v24, 0.0 }
 0x6b1   : > { %v4458_v12 = vpack.c.bf16 %v4429_v4, %v4428_v31  ;;  %10020 = vmatmul.msk.bf16.gmra.mxu3 %vm1908_vm0, %v4273_v51 }
 0x6b2   : > { %v4210_v11 = vpop.f32.mrf.mxu2 }
 0x6b3   : > { %10027 = vmatmul.msk.bf16.gmra.mxu0 %vm4474_vm5, %v4458_v12  ;;  %v4211_v60 = vadd.f32 %v4210_v11, %v13234_v58 }
 0x6b4   : > { %v4359_v41 = vpop.f32.mrf.mxu3 }
 0x6b5   : > { %v4360_v26 = vadd.f32 %v4359_v41, %v13291_v35  ;;  %v4254_v21 = vmax.f32 %v4211_v60, 0.0 }
 0x6b7   : > { %v4430_v59 = vmax.f32 %v4360_v26, 0.0 }
 0x6ba   : > { %v4212_v23 = vpop.f32.mrf.mxu2 }
 0x6bb   : > { %v4213_v8 = vadd.f32 %v4212_v23, %v13234_v58 }
 0x6bc   : > { %v4361_v25 = vpop.f32.mrf.mxu3 }
 0x6bd   : > { %v4255_v6 = vmax.f32 %v4213_v8, 0.0  ;;  %v4362_v55 = vadd.f32 %v4361_v25, %v13291_v35  ;;  %v10958_v25 = vld [vmem:[%s15467_s9 + $0x18] sm:$0xff] }
 0x6be   : > { %4957 = vmatpush.bf16.msrb.mxu2 %v10958_v25 }
 0x6bf   : > { %v4274_v18 = vpack.c.bf16 %v4255_v6, %v4254_v21  ;;  %v4431_v61 = vmax.f32 %v4362_v55, 0.0 }
 0x6c1   : > { %v4459_v42 = vpack.c.bf16 %v4431_v61, %v4430_v59  ;;  %10021 = vmatmul.msk.bf16.gmra.mxu3 %vm1908_vm0, %v4274_v18  ;;  %v13359_v18 = vld [vmem:[%s15475_s17 + $0x6] ss:$0 sm:$0xff] }
 0x6c2   : > { %v4215_v52 = vpop.f32.mrf.mxu2 }
 0x6c3   : > { %10028 = vmatmul.msk.bf16.gmra.mxu0 %vm4474_vm5, %v4459_v42  ;;  %v4216_v27 = vadd.f32 %v4215_v52, %v13234_v58 }
 0x6c4   : > { %v4364_v19 = vpop.f32.mrf.mxu3 }
 0x6c5   : > { %v4365_v53 = vadd.f32 %v4364_v19, %v13291_v35  ;;  %v4256_v5 = vmax.f32 %v4216_v27, 0.0 }
 0x6c7   : > { %v4432_v32 = vmax.f32 %v4365_v53, 0.0 }
 0x6ca   : > { %v4217_v30 = vpop.f32.mrf.mxu2 }
 0x6cb   : > { %v4218_v50 = vadd.f32 %v4217_v30, %v13234_v58 }
 0x6cc   : > { %v4366_v20 = vpop.f32.mrf.mxu3 }
 0x6cd   : > { %v4257_v57 = vmax.f32 %v4218_v50, 0.0  ;;  %v4367_v16 = vadd.f32 %v4366_v20, %v13291_v35 }
 0x6cf   : > { %v4275_v3 = vpack.c.bf16 %v4257_v57, %v4256_v5  ;;  %v4433_v39 = vmax.f32 %v4367_v16, 0.0 }
 0x6d1   : > { %v4460_v29 = vpack.c.bf16 %v4433_v39, %v4432_v32  ;;  %10022 = vmatmul.msk.bf16.gmra.mxu3 %vm1908_vm0, %v4275_v3  ;;  %v5090_v39 = vld [vmem:[%s15468_s10] sm:$0x3] }
 0x6d2   : > { %v4220_v47 = vpop.f32.mrf.mxu2  ;;  %v5141_v34 = vsel %vm4715_vm4, %v5090_v39, 0 }
 0x6d3   : > { %10029 = vmatmul.msk.bf16.gmra.mxu0 %vm4474_vm5, %v4460_v29  ;;  %v4221_v49 = vadd.f32 %v4220_v47, %v13234_v58  ;;  %5150 = vmatpush.bf16.msrb.mxu3 %v5141_v34 }
 0x6d4   : > { %v4369_v33 = vpop.f32.mrf.mxu3 }
 0x6d5   : > { %v4370_v2 = vadd.f32 %v4369_v33, %v13291_v35  ;;  %v4258_v48 = vmax.f32 %v4221_v49, 0.0 }
 0x6d7   : > { %v4434_v44 = vmax.f32 %v4370_v2, 0.0 }
 0x6da   : > { %v4222_v36 = vpop.f32.mrf.mxu2 }
 0x6db   : > { %v4223_v15 = vadd.f32 %v4222_v36, %v13234_v58 }
 0x6dc   : > { %v4371_v37 = vpop.f32.mrf.mxu3 }
 0x6dd   : > { %v4259_v7 = vmax.f32 %v4223_v15, 0.0  ;;  %v4372_v43 = vadd.f32 %v4371_v37, %v13291_v35 }
 0x6df   : > { %v4276_v63 = vpack.c.bf16 %v4259_v7, %v4258_v48  ;;  %v4435_v45 = vmax.f32 %v4372_v43, 0.0  ;;  %v10957_v43 = vld [vmem:[%s15467_s9 + $0x10] sm:$0xff] }
 0x6e0   : > { %4958 = vmatpush.bf16.msrb.mxu2 %v10957_v43 }
 0x6e1   : > { %v4461_v54 = vpack.c.bf16 %v4435_v45, %v4434_v44  ;;  %10023 = vmatmul.msk.bf16.gmra.mxu3 %vm1908_vm0, %v4276_v63 }
 0x6e2   : > { %v4225_v62 = vpop.f32.mrf.mxu2 }
 0x6e3   : > { %10030 = vmatmul.msk.bf16.gmra.mxu0 %vm4474_vm5, %v4461_v54  ;;  %v4226_v46 = vadd.f32 %v4225_v62, %v13234_v58 }
 0x6e4   : > { %v4374_v22 = vpop.f32.mrf.mxu3 }
 0x6e5   : > { %v4375_v10 = vadd.f32 %v4374_v22, %v13291_v35  ;;  %v4260_v14 = vmax.f32 %v4226_v46, 0.0 }
 0x6e7   : > { %v4436_v56 = vmax.f32 %v4375_v10, 0.0 }
 0x6ea   : > { %v4227_v17 = vpop.f32.mrf.mxu2 }
 0x6eb   : > { %v4228_v9 = vadd.f32 %v4227_v17, %v13234_v58 }
 0x6ec   : > { %v4376_v0 = vpop.f32.mrf.mxu3 }
 0x6ed   : > { %v4261_v28 = vmax.f32 %v4228_v9, 0.0  ;;  %v4377_v40 = vadd.f32 %v4376_v0, %v13291_v35 }
 0x6ef   : > { %v4277_v1 = vpack.c.bf16 %v4261_v28, %v4260_v14  ;;  %v4437_v24 = vmax.f32 %v4377_v40, 0.0 }
 0x6f1   : > { %v4462_v31 = vpack.c.bf16 %v4437_v24, %v4436_v56  ;;  %10024 = vmatmul.msk.bf16.gmra.mxu3 %vm1908_vm0, %v4277_v1 }
 0x6f3   : > { %10031 = vmatmul.msk.bf16.gmra.mxu0 %vm4474_vm5, %v4462_v31 }
 0x6f4   : > { %v4379_v51 = vpop.f32.mrf.mxu3 }
 0x6f5   : > { %v4380_v4 = vadd.f32 %v4379_v51, %v13291_v35 }
 0x6f7   : > { %v4438_v58 = vmax.f32 %v4380_v4, 0.0 }
 0x6fc   : > { %v4381_v13 = vpop.f32.mrf.mxu3 }
 0x6fd   : > { %v4382_v12 = vadd.f32 %v4381_v13, %v13291_v35 }
 0x6ff   : > { %v4439_v11 = vmax.f32 %v4382_v12, 0.0 }
 0x701   : > { %v4463_v41 = vpack.c.bf16 %v4439_v11, %v4438_v58 }
 0x703   : > { %10032 = vmatmul.msk.bf16.gmra.mxu0 %vm4474_vm5, %v4463_v41 }
 0x704   : > { %v4384_v60 = vpop.f32.mrf.mxu3 }
 0x705   : > { %v4385_v23 = vadd.f32 %v4384_v60, %v13291_v35 }
 0x707   : > { %v4440_v21 = vmax.f32 %v4385_v23, 0.0 }
 0x70c   : > { %v4386_v26 = vpop.f32.mrf.mxu3 }
 0x70d   : > { %v4387_v8 = vadd.f32 %v4386_v26, %v13291_v35  ;;  %v10956_v26 = vld [vmem:[%s15467_s9 + $0x8] sm:$0xff] }
 0x70e   : > { %4959 = vmatpush.bf16.msrb.mxu2 %v10956_v26 }
 0x70f   : > { %v4441_v6 = vmax.f32 %v4387_v8, 0.0 }
 0x710   : > { %v4536_v55 = vpop.f32.mrf.mxu0 }
 0x711   : > { %v4464_v59 = vpack.c.bf16 %v4441_v6, %v4440_v21  ;;  %v4537_v42 = vadd.f32 %v4536_v55, %v13359_v18 }
 0x713   : > { %10033 = vmatmul.msk.bf16.gmra.mxu0 %vm4474_vm5, %v4464_v59  ;;  %v4616_v27 = vmax.f32 %v4537_v42, 0.0 }
 0x714   : > { %v4389_v61 = vpop.f32.mrf.mxu3 }
 0x715   : > { %v4390_v30 = vadd.f32 %v4389_v61, %v13291_v35 }
 0x717   : > { %v4442_v57 = vmax.f32 %v4390_v30, 0.0 }
 0x718   : > { %v4538_v52 = vpop.f32.mrf.mxu0 }
 0x719   : > { %v4539_v19 = vadd.f32 %v4538_v52, %v13359_v18 }
 0x71b   : > { %v4617_v53 = vmax.f32 %v4539_v19, 0.0 }
 0x71c   : > { %v4391_v50 = vpop.f32.mrf.mxu3 }
 0x71d   : > { %v4648_v20 = vpack.c.bf16 %v4617_v53, %v4616_v27  ;;  %v4392_v5 = vadd.f32 %v4391_v50, %v13291_v35 }
 0x71f   : > { %v4443_v16 = vmax.f32 %v4392_v5, 0.0  ;;  %10041 = vmatmul.msk.bf16.vlgmr.msrb.gmra.mxu1 %vm4666_vm6, %v4648_v20 }
 0x720   : > { %v4541_v32 = vpop.f32.mrf.mxu0 }
 0x721   : > { %v4465_v3 = vpack.c.bf16 %v4443_v16, %v4442_v57  ;;  %v4542_v47 = vadd.f32 %v4541_v32, %v13359_v18 }
 0x723   : > { %10034 = vmatmul.msk.bf16.gmra.mxu0 %vm4474_vm5, %v4465_v3  ;;  %v4618_v36 = vmax.f32 %v4542_v47, 0.0 }
 0x724   : > { %v4394_v29 = vpop.f32.mrf.mxu3 }
 0x725   : > { %v4395_v2 = vadd.f32 %v4394_v29, %v13291_v35 }
 0x727   : > { %v4444_v44 = vmax.f32 %v4395_v2, 0.0 }
 0x728   : > { %v4543_v33 = vpop.f32.mrf.mxu0 }
 0x729   : > { %v4544_v49 = vadd.f32 %v4543_v33, %v13359_v18 }
 0x72b   : > { %v4619_v15 = vmax.f32 %v4544_v49, 0.0 }
 0x72c   : > { %v4396_v37 = vpop.f32.mrf.mxu3 }
 0x72d   : > { %v4649_v48 = vpack.c.bf16 %v4619_v15, %v4618_v36  ;;  %v4397_v7 = vadd.f32 %v4396_v37, %v13291_v35  ;;  %v10955_v15 = vld [vmem:[%s15467_s9] sm:$0xff] }
 0x72e   : > { %4960 = vmatpush.bf16.msrb.mxu2 %v10955_v15 }
 0x72f   : > { %v4445_v63 = vmax.f32 %v4397_v7, 0.0  ;;  %10042 = vmatmul.msk.bf16.gmra.mxu1 %vm4666_vm6, %v4649_v48 }
 0x730   : > { %v4546_v45 = vpop.f32.mrf.mxu0 }
 0x731   : > { %v4466_v54 = vpack.c.bf16 %v4445_v63, %v4444_v44  ;;  %v4547_v22 = vadd.f32 %v4546_v45, %v13359_v18 }
 0x733   : > { %10035 = vmatmul.msk.bf16.gmra.mxu0 %vm4474_vm5, %v4466_v54  ;;  %v4620_v17 = vmax.f32 %v4547_v22, 0.0 }
 0x734   : > { %v4399_v62 = vpop.f32.mrf.mxu3 }
 0x735   : > { %v4400_v10 = vadd.f32 %v4399_v62, %v13291_v35 }
 0x737   : > { %v4446_v40 = vmax.f32 %v4400_v10, 0.0 }
 0x738   : > { %v4548_v38 = vpop.f32.mrf.mxu0 }
 0x739   : > { %v4549_v46 = vadd.f32 %v4548_v38, %v13359_v18 }
 0x73b   : > { %v4621_v9 = vmax.f32 %v4549_v46, 0.0 }
 0x73c   : > { %v4401_v0 = vpop.f32.mrf.mxu3 }
 0x73d   : > { %v4650_v14 = vpack.c.bf16 %v4621_v9, %v4620_v17  ;;  %v4402_v28 = vadd.f32 %v4401_v0, %v13291_v35 }
 0x73f   : > { %v4447_v56 = vmax.f32 %v4402_v28, 0.0  ;;  %10043 = vmatmul.msk.bf16.gmra.mxu1 %vm4666_vm6, %v4650_v14 }
 0x740   : > { %v4551_v1 = vpop.f32.mrf.mxu0 }
 0x741   : > { %v4467_v24 = vpack.c.bf16 %v4447_v56, %v4446_v40  ;;  %v4552_v51 = vadd.f32 %v4551_v1, %v13359_v18 }
 0x743   : > { %10036 = vmatmul.msk.bf16.gmra.mxu0 %vm4474_vm5, %v4467_v24  ;;  %v4622_v12 = vmax.f32 %v4552_v51, 0.0 }
 0x744   : > { %v4404_v31 = vpop.f32.mrf.mxu3 }
 0x745   : > { %v4405_v58 = vadd.f32 %v4404_v31, %v13291_v35 }
 0x747   : > { %v4448_v8 = vmax.f32 %v4405_v58, 0.0  ;;  %v13424_v58 = vld [vmem:[%s15475_s17 + $0x7] ss:$0 sm:$0xff] }
 0x748   : > { %v4553_v4 = vpop.f32.mrf.mxu0 }
 0x749   : > { %v4554_v13 = vadd.f32 %v4553_v4, %v13359_v18 }
 0x74b   : > { %v4623_v11 = vmax.f32 %v4554_v13, 0.0 }
 0x74c   : > { %v4406_v41 = vpop.f32.mrf.mxu3 }
 0x74d   : > { %v4651_v60 = vpack.c.bf16 %v4623_v11, %v4622_v12  ;;  %v4407_v23 = vadd.f32 %v4406_v41, %v13291_v35 }
 0x74f   : > { %v4449_v25 = vmax.f32 %v4407_v23, 0.0  ;;  %10044 = vmatmul.msk.bf16.gmra.mxu1 %vm4666_vm6, %v4651_v60 }
 0x750   : > { %v4556_v21 = vpop.f32.mrf.mxu0 }
 0x751   : > { %v4468_v6 = vpack.c.bf16 %v4449_v25, %v4448_v8  ;;  %v4557_v59 = vadd.f32 %v4556_v21, %v13359_v18 }
 0x753   : > { %10037 = vmatmul.msk.bf16.gmra.mxu0 %vm4474_vm5, %v4468_v6  ;;  %v4624_v52 = vmax.f32 %v4557_v59, 0.0 }
 0x754   : > { %v4409_v55 = vpop.f32.mrf.mxu3 }
 0x755   : > { %v4410_v19 = vadd.f32 %v4409_v55, %v13291_v35 }
 0x757   : > { %v4450_v20 = vmax.f32 %v4410_v19, 0.0 }
 0x758   : > { %v4558_v61 = vpop.f32.mrf.mxu0 }
 0x759   : > { %v4559_v42 = vadd.f32 %v4558_v61, %v13359_v18 }
 0x75b   : > { %v4625_v27 = vmax.f32 %v4559_v42, 0.0 }
 0x75c   : > { %v4411_v30 = vpop.f32.mrf.mxu3 }
 0x75d   : > { %v4652_v53 = vpack.c.bf16 %v4625_v27, %v4624_v52  ;;  %v4412_v50 = vadd.f32 %v4411_v30, %v13291_v35 }
 0x75f   : > { %v4451_v5 = vmax.f32 %v4412_v50, 0.0  ;;  %10045 = vmatmul.msk.bf16.gmra.mxu1 %vm4666_vm6, %v4652_v53 }
 0x760   : > { %v4561_v57 = vpop.f32.mrf.mxu0 }
 0x761   : > { %v4469_v16 = vpack.c.bf16 %v4451_v5, %v4450_v20  ;;  %v4562_v3 = vadd.f32 %v4561_v57, %v13359_v18  ;;  %v5280_v57 = vld [vmem:[%s15469_s11] sm:$0xf] }
 0x763   : > { %10038 = vmatmul.msk.bf16.gmra.mxu0 %vm4474_vm5, %v4469_v16  ;;  %v4626_v29 = vmax.f32 %v4562_v3, 0.0  ;;  %v5331_v16 = vsel %vm4523_vm3, %v5280_v57, 0 }
 0x764   : > { %v4414_v32 = vpop.f32.mrf.mxu3  ;;  %5340 = vmatpush.bf16.msra.mxu0 %v5331_v16 }
 0x765   : > { %v4415_v47 = vadd.f32 %v4414_v32, %v13291_v35 }
 0x767   : > { %v4452_v37 = vmax.f32 %v4415_v47, 0.0 }
 0x768   : > { %v4563_v39 = vpop.f32.mrf.mxu0 }
 0x769   : > { %v4564_v34 = vadd.f32 %v4563_v39, %v13359_v18 }
 0x76b   : > { %v4627_v33 = vmax.f32 %v4564_v34, 0.0 }
 0x76c   : > { %v4416_v49 = vpop.f32.mrf.mxu3 }
 0x76d   : > { %v4653_v36 = vpack.c.bf16 %v4627_v33, %v4626_v29  ;;  %v4417_v2 = vadd.f32 %v4416_v49, %v13291_v35 }
 0x76f   : > { %v4453_v48 = vmax.f32 %v4417_v2, 0.0  ;;  %10046 = vmatmul.msk.bf16.gmra.mxu1 %vm4666_vm6, %v4653_v36 }
 0x770   : > { %v4566_v7 = vpop.f32.mrf.mxu0 }
 0x771   : > { %v4470_v43 = vpack.c.bf16 %v4453_v48, %v4452_v37  ;;  %v4567_v63 = vadd.f32 %v4566_v7, %v13359_v18 }
 0x773   : > { %10039 = vmatmul.msk.bf16.gmra.mxu0 %vm4474_vm5, %v4470_v43  ;;  %v4628_v62 = vmax.f32 %v4567_v63, 0.0 }
 0x774   : > { %v4419_v44 = vpop.f32.mrf.mxu3 }
 0x775   : > { %v4420_v22 = vadd.f32 %v4419_v44, %v13291_v35 }
 0x777   : > { %v4454_v9 = vmax.f32 %v4420_v22, 0.0 }
 0x778   : > { %v4568_v45 = vpop.f32.mrf.mxu0 }
 0x779   : > { %v4569_v54 = vadd.f32 %v4568_v45, %v13359_v18 }
 0x77b   : > { %v4629_v38 = vmax.f32 %v4569_v54, 0.0 }
 0x77c   : > { %v4421_v46 = vpop.f32.mrf.mxu3 }
 0x77d   : > { %v4654_v17 = vpack.c.bf16 %v4629_v38, %v4628_v62  ;;  %v4422_v10 = vadd.f32 %v4421_v46, %v13291_v35 }
 0x77f   : > { %v4455_v0 = vmax.f32 %v4422_v10, 0.0  ;;  %10047 = vmatmul.msk.bf16.gmra.mxu1 %vm4666_vm6, %v4654_v17 }
 0x780   : > { %v4571_v14 = vpop.f32.mrf.mxu0 }
 0x781   : > { %v4471_v28 = vpack.c.bf16 %v4455_v0, %v4454_v9  ;;  %v4572_v40 = vadd.f32 %v4571_v14, %v13359_v18 }
 0x783   : > { %10040 = vmatmul.msk.bf16.gmra.mxu0 %vm4474_vm5, %v4471_v28  ;;  %v4630_v24 = vmax.f32 %v4572_v40, 0.0 }
 0x788   : > { %v4573_v56 = vpop.f32.mrf.mxu0 }
 0x789   : > { %v4574_v1 = vadd.f32 %v4573_v56, %v13359_v18 }
 0x78b   : > { %v4631_v31 = vmax.f32 %v4574_v1, 0.0 }
 0x78d   : > { %v4655_v51 = vpack.c.bf16 %v4631_v31, %v4630_v24 }
 0x78f   : > { %10048 = vmatmul.msk.bf16.gmra.mxu1 %vm4666_vm6, %v4655_v51 }
 0x790   : > { %v4576_v35 = vpop.f32.mrf.mxu0 }
 0x791   : > { %v4577_v4 = vadd.f32 %v4576_v35, %v13359_v18 }
 0x793   : > { %v4632_v11 = vmax.f32 %v4577_v4, 0.0 }
 0x798   : > { %v4578_v13 = vpop.f32.mrf.mxu0 }
 0x799   : > { %v4579_v12 = vadd.f32 %v4578_v13, %v13359_v18 }
 0x79b   : > { %v4633_v41 = vmax.f32 %v4579_v12, 0.0 }
 0x79c   : > { %v4728_v60 = vpop.f32.mrf.mxu1 }
 0x79d   : > { %v4656_v23 = vpack.c.bf16 %v4633_v41, %v4632_v11  ;;  %v4729_v26 = vadd.f32 %v4728_v60, %v13424_v58 }
 0x79f   : > { %v4808_v8 = vmax.f32 %v4729_v26, 0.0  ;;  %10049 = vmatmul.msk.bf16.gmra.mxu1 %vm4666_vm6, %v4656_v23 }
 0x7a0   : > { %v4581_v25 = vpop.f32.mrf.mxu0 }
 0x7a1   : > { %4840 = vst [vmem:[%s13431_s2] sm:$0xff] %v4808_v8  ;;  %v4582_v55 = vadd.f32 %v4581_v25, %v13359_v18 }
 0x7a3   : > { %v4634_v19 = vmax.f32 %v4582_v55, 0.0 }
 0x7a4   : > { %v4730_v21 = vpop.f32.mrf.mxu1 }
 0x7a5   : > { %v4731_v6 = vadd.f32 %v4730_v21, %v13424_v58 }
 0x7a7   : > { %v4809_v59 = vmax.f32 %v4731_v6, 0.0 }
 0x7a8   : > { %v4583_v61 = vpop.f32.mrf.mxu0 }
 0x7a9   : > { %4841 = vst [vmem:[%s13431_s2 + $0x8] sm:$0xff] %v4809_v59  ;;  %v4872_v42 = vpack.c.bf16 %v4809_v59, %v4808_v8  ;;  %v4584_v52 = vadd.f32 %v4583_v61, %v13359_v18 }
 0x7ab   : > { %v4635_v27 = vmax.f32 %v4584_v52, 0.0  ;;  %4961 = vmatmul.bf16.vlgmr.msrb.gmra.mxu2 %v4872_v42 }
 0x7ac   : > { %v4733_v30 = vpop.f32.mrf.mxu1 }
 0x7ad   : > { %v4657_v53 = vpack.c.bf16 %v4635_v27, %v4634_v19  ;;  %v4734_v50 = vadd.f32 %v4733_v30, %v13424_v58 }
 0x7af   : > { %v4810_v20 = vmax.f32 %v4734_v50, 0.0  ;;  %10050 = vmatmul.msk.bf16.gmra.mxu1 %vm4666_vm6, %v4657_v53 }
 0x7b0   : > { %v4586_v5 = vpop.f32.mrf.mxu0 }
 0x7b1   : > { %4842 = vst [vmem:[%s13431_s2 + $0x10] sm:$0xff] %v4810_v20  ;;  %v4587_v39 = vadd.f32 %v4586_v5, %v13359_v18 }
 0x7b3   : > { %v4636_v49 = vmax.f32 %v4587_v39, 0.0 }
 0x7b4   : > { %v4735_v32 = vpop.f32.mrf.mxu1 }
 0x7b5   : > { %v4736_v3 = vadd.f32 %v4735_v32, %v13424_v58 }
 0x7b7   : > { %v4811_v34 = vmax.f32 %v4736_v3, 0.0 }
 0x7b8   : > { %v4588_v29 = vpop.f32.mrf.mxu0 }
 0x7b9   : > { %4843 = vst [vmem:[%s13431_s2 + $0x18] sm:$0xff] %v4811_v34  ;;  %v4589_v47 = vadd.f32 %v4588_v29, %v13359_v18  ;;  %v4873_v33 = vpack.c.bf16 %v4811_v34, %v4810_v20 }
 0x7bb   : > { %v4637_v36 = vmax.f32 %v4589_v47, 0.0  ;;  %4966 = vmatmul.bf16.gmra.mxu2 %v4873_v33 }
 0x7bc   : > { %v4738_v2 = vpop.f32.mrf.mxu1 }
 0x7bd   : > { %v4658_v15 = vpack.c.bf16 %v4637_v36, %v4636_v49  ;;  %v4739_v37 = vadd.f32 %v4738_v2, %v13424_v58 }
 0x7bf   : > { %v4812_v48 = vmax.f32 %v4739_v37, 0.0  ;;  %10051 = vmatmul.msk.bf16.gmra.mxu1 %vm4666_vm6, %v4658_v15 }
 0x7c0   : > { %v4591_v7 = vpop.f32.mrf.mxu0 }
 0x7c1   : > { %4844 = vst [vmem:[%s13431_s2 + $0x20] sm:$0xff] %v4812_v48  ;;  %v4592_v63 = vadd.f32 %v4591_v7, %v13359_v18 }
 0x7c3   : > { %v4638_v38 = vmax.f32 %v4592_v63, 0.0 }
 0x7c4   : > { %v4740_v43 = vpop.f32.mrf.mxu1 }
 0x7c5   : > { %v4741_v44 = vadd.f32 %v4740_v43, %v13424_v58 }
 0x7c7   : > { %v4813_v45 = vmax.f32 %v4741_v44, 0.0 }
 0x7c8   : > { %v4593_v54 = vpop.f32.mrf.mxu0 }
 0x7c9   : > { %4845 = vst [vmem:[%s13431_s2 + $0x28] sm:$0xff] %v4813_v45  ;;  %v4594_v62 = vadd.f32 %v4593_v54, %v13359_v18  ;;  %v4874_v22 = vpack.c.bf16 %v4813_v45, %v4812_v48 }
 0x7cb   : > { %v4639_v46 = vmax.f32 %v4594_v62, 0.0  ;;  %4971 = vmatmul.bf16.gmra.mxu2 %v4874_v22 }
 0x7cc   : > { %v4743_v17 = vpop.f32.mrf.mxu1 }
 0x7cd   : > { %v4659_v10 = vpack.c.bf16 %v4639_v46, %v4638_v38  ;;  %v4744_v9 = vadd.f32 %v4743_v17, %v13424_v58 }
 0x7cf   : > { %v4814_v0 = vmax.f32 %v4744_v9, 0.0  ;;  %10052 = vmatmul.msk.bf16.gmra.mxu1 %vm4666_vm6, %v4659_v10 }
 0x7d0   : > { %v4596_v14 = vpop.f32.mrf.mxu0 }
 0x7d1   : > { %4846 = vst [vmem:[%s13431_s2 + $0x30] sm:$0xff] %v4814_v0  ;;  %v4597_v56 = vadd.f32 %v4596_v14, %v13359_v18 }
 0x7d3   : > { %v4640_v35 = vmax.f32 %v4597_v56, 0.0 }
 0x7d4   : > { %v4745_v28 = vpop.f32.mrf.mxu1 }
 0x7d5   : > { %v4746_v40 = vadd.f32 %v4745_v28, %v13424_v58 }
 0x7d7   : > { %v4815_v1 = vmax.f32 %v4746_v40, 0.0 }
 0x7d8   : > { %v4598_v24 = vpop.f32.mrf.mxu0 }
 0x7d9   : > { %4847 = vst [vmem:[%s13431_s2 + $0x38] sm:$0xff] %v4815_v1  ;;  %v4599_v31 = vadd.f32 %v4598_v24, %v13359_v18  ;;  %v4875_v51 = vpack.c.bf16 %v4815_v1, %v4814_v0 }
 0x7db   : > { %v4641_v4 = vmax.f32 %v4599_v31, 0.0  ;;  %4976 = vmatmul.bf16.gmra.mxu2 %v4875_v51 }
 0x7dc   : > { %v4748_v13 = vpop.f32.mrf.mxu1 }
 0x7dd   : > { %v4660_v12 = vpack.c.bf16 %v4641_v4, %v4640_v35  ;;  %v4749_v11 = vadd.f32 %v4748_v13, %v13424_v58  ;;  %v13499_v35 = vld [vmem:[%s15475_s17 + $0x38] ss:$0 sm:$0xff] }
 0x7df   : > { %v4816_v41 = vmax.f32 %v4749_v11, 0.0  ;;  %10053 = vmatmul.msk.bf16.gmra.mxu1 %vm4666_vm6, %v4660_v12 }
 0x7e0   : > { %v4601_v60 = vpop.f32.mrf.mxu0 }
 0x7e1   : > { %4848 = vst [vmem:[%s13431_s2 + $0x40] sm:$0xff] %v4816_v41  ;;  %v4602_v8 = vadd.f32 %v4601_v60, %v13359_v18 }
 0x7e3   : > { %v4642_v59 = vmax.f32 %v4602_v8, 0.0 }
 0x7e4   : > { %v4750_v23 = vpop.f32.mrf.mxu1 }
 0x7e5   : > { %v4751_v26 = vadd.f32 %v4750_v23, %v13424_v58 }
 0x7e7   : > { %v4817_v25 = vmax.f32 %v4751_v26, 0.0 }
 0x7e8   : > { %v4603_v21 = vpop.f32.mrf.mxu0 }
 0x7e9   : > { %4849 = vst [vmem:[%s13431_s2 + $0x48] sm:$0xff] %v4817_v25  ;;  %v4604_v6 = vadd.f32 %v4603_v21, %v13359_v18  ;;  %v4876_v55 = vpack.c.bf16 %v4817_v25, %v4816_v41  ;;  %v10963_v21 = vld [vmem:[%s15470_s12] sm:$0xff] }
 0x7ea   : > { %5534 = vmatpush.bf16.msra.mxu1 %v10963_v21 }
 0x7eb   : > { %v4643_v61 = vmax.f32 %v4604_v6, 0.0  ;;  %4981 = vmatmul.bf16.gmra.mxu2 %v4876_v55 }
 0x7ec   : > { %v4753_v42 = vpop.f32.mrf.mxu1 }
 0x7ed   : > { %v4661_v52 = vpack.c.bf16 %v4643_v61, %v4642_v59  ;;  %v4754_v19 = vadd.f32 %v4753_v42, %v13424_v58 }
 0x7ef   : > { %v4818_v27 = vmax.f32 %v4754_v19, 0.0  ;;  %10054 = vmatmul.msk.bf16.gmra.mxu1 %vm4666_vm6, %v4661_v52 }
 0x7f0   : > { %v4606_v30 = vpop.f32.mrf.mxu0 }
 0x7f1   : > { %4850 = vst [vmem:[%s13431_s2 + $0x50] sm:$0xff] %v4818_v27  ;;  %v4607_v20 = vadd.f32 %v4606_v30, %v13359_v18 }
 0x7f3   : > { %v4644_v3 = vmax.f32 %v4607_v20, 0.0 }
 0x7f4   : > { %v4755_v53 = vpop.f32.mrf.mxu1 }
 0x7f5   : > { %v4756_v50 = vadd.f32 %v4755_v53, %v13424_v58 }
 0x7f7   : > { %v4819_v5 = vmax.f32 %v4756_v50, 0.0 }
 0x7f8   : > { %v4608_v57 = vpop.f32.mrf.mxu0 }
 0x7f9   : > { %4851 = vst [vmem:[%s13431_s2 + $0x58] sm:$0xff] %v4819_v5  ;;  %v4609_v16 = vadd.f32 %v4608_v57, %v13359_v18  ;;  %v4877_v32 = vpack.c.bf16 %v4819_v5, %v4818_v27 }
 0x7fb   : > { %v4645_v39 = vmax.f32 %v4609_v16, 0.0  ;;  %4986 = vmatmul.bf16.gmra.mxu2 %v4877_v32 }
 0x7fc   : > { %v4758_v34 = vpop.f32.mrf.mxu1 }
 0x7fd   : > { %v4662_v29 = vpack.c.bf16 %v4645_v39, %v4644_v3  ;;  %v4759_v47 = vadd.f32 %v4758_v34, %v13424_v58 }
 0x7ff   : > { %v4820_v33 = vmax.f32 %v4759_v47, 0.0  ;;  %10055 = vmatmul.msk.bf16.gmra.mxu1 %vm4666_vm6, %v4662_v29 }
 0x800   : > { %v4611_v49 = vpop.f32.mrf.mxu0 }
 0x801   : > { %4852 = vst [vmem:[%s13431_s2 + $0x60] sm:$0xff] %v4820_v33  ;;  %v4612_v15 = vadd.f32 %v4611_v49, %v13359_v18 }
 0x803   : > { %v4646_v44 = vmax.f32 %v4612_v15, 0.0 }
 0x804   : > { %v4760_v36 = vpop.f32.mrf.mxu1 }
 0x805   : > { %v4761_v2 = vadd.f32 %v4760_v36, %v13424_v58 }
 0x807   : > { %v4821_v37 = vmax.f32 %v4761_v2, 0.0 }
 0x808   : > { %v4613_v48 = vpop.f32.mrf.mxu0 }
 0x809   : > { %4853 = vst [vmem:[%s13431_s2 + $0x68] sm:$0xff] %v4821_v37  ;;  %v4614_v7 = vadd.f32 %v4613_v48, %v13359_v18  ;;  %v4878_v43 = vpack.c.bf16 %v4821_v37, %v4820_v33 }
 0x80b   : > { %v4647_v63 = vmax.f32 %v4614_v7, 0.0  ;;  %4991 = vmatmul.bf16.gmra.mxu2 %v4878_v43 }
 0x80c   : > { %v4763_v45 = vpop.f32.mrf.mxu1 }
 0x80d   : > { %v4663_v54 = vpack.c.bf16 %v4647_v63, %v4646_v44  ;;  %v4764_v62 = vadd.f32 %v4763_v45, %v13424_v58 }
 0x80f   : > { %v4822_v22 = vmax.f32 %v4764_v62, 0.0  ;;  %10056 = vmatmul.msk.bf16.gmra.mxu1 %vm4666_vm6, %v4663_v54 }
 0x811   : > { %4854 = vst [vmem:[%s13431_s2 + $0x70] sm:$0xff] %v4822_v22 }
 0x814   : > { %v4765_v38 = vpop.f32.mrf.mxu1 }
 0x815   : > { %v4766_v46 = vadd.f32 %v4765_v38, %v13424_v58 }
 0x817   : > { %v4823_v17 = vmax.f32 %v4766_v46, 0.0 }
 0x819   : > { %4855 = vst [vmem:[%s13431_s2 + $0x78] sm:$0xff] %v4823_v17  ;;  %v4879_v18 = vpack.c.bf16 %v4823_v17, %v4822_v22 }
 0x81b   : > { %4996 = vmatmul.bf16.gmra.mxu2 %v4879_v18 }
 0x81c   : > { %v4768_v10 = vpop.f32.mrf.mxu1 }
 0x81d   : > { %v4769_v9 = vadd.f32 %v4768_v10, %v13424_v58 }
 0x81f   : > { %v4824_v0 = vmax.f32 %v4769_v9, 0.0 }
 0x821   : > { %4856 = vst [vmem:[%s13431_s2 + $0x80] sm:$0xff] %v4824_v0 }
 0x824   : > { %v4770_v14 = vpop.f32.mrf.mxu1 }
 0x825   : > { %v4771_v28 = vadd.f32 %v4770_v14, %v13424_v58 }
 0x827   : > { %v4825_v40 = vmax.f32 %v4771_v28, 0.0 }
 0x829   : > { %4857 = vst [vmem:[%s13431_s2 + $0x88] sm:$0xff] %v4825_v40  ;;  %v4880_v56 = vpack.c.bf16 %v4825_v40, %v4824_v0 }
 0x82b   : > { %5001 = vmatmul.bf16.gmra.mxu2 %v4880_v56 }
 0x82c   : > { %v4773_v1 = vpop.f32.mrf.mxu1 }
 0x82d   : > { %v4774_v24 = vadd.f32 %v4773_v1, %v13424_v58 }
 0x82e   : > { %v4962_v31 = vpop.f32.mrf.mxu2 }
 0x82f   : > { %v4826_v51 = vmax.f32 %v4774_v24, 0.0  ;;  %v4963_v13 = vadd.f32 %v4962_v31, %v13499_v35 }
 0x831   : > { %4858 = vst [vmem:[%s13431_s2 + $0x90] sm:$0xff] %v4826_v51  ;;  %v5042_v23 = vmax.f32 %v4963_v13, 0.0 }
 0x834   : > { %v4775_v4 = vpop.f32.mrf.mxu1 }
 0x835   : > { %v4776_v12 = vadd.f32 %v4775_v4, %v13424_v58 }
 0x836   : > { %v4964_v11 = vpop.f32.mrf.mxu2 }
 0x837   : > { %v4827_v41 = vmax.f32 %v4776_v12, 0.0  ;;  %v4965_v60 = vadd.f32 %v4964_v11, %v13499_v35 }
 0x839   : > { %4859 = vst [vmem:[%s13431_s2 + $0x98] sm:$0xff] %v4827_v41  ;;  %v5043_v26 = vmax.f32 %v4965_v60, 0.0  ;;  %v4881_v8 = vpack.c.bf16 %v4827_v41, %v4826_v51 }
 0x83b   : > { %v5074_v25 = vpack.c.bf16 %v5043_v26, %v5042_v23  ;;  %5006 = vmatmul.bf16.gmra.mxu2 %v4881_v8 }
 0x83c   : > { %v4778_v6 = vpop.f32.mrf.mxu1 }
 0x83d   : > { %v4779_v55 = vadd.f32 %v4778_v6, %v13424_v58  ;;  %10089 = vmatmul.msk.bf16.vlgmr.msrb.gmra.mxu3 %vm4666_vm6, %v5074_v25 }
 0x83e   : > { %v4967_v59 = vpop.f32.mrf.mxu2 }
 0x83f   : > { %v4828_v61 = vmax.f32 %v4779_v55, 0.0  ;;  %v4968_v52 = vadd.f32 %v4967_v59, %v13499_v35 }
 0x841   : > { %4860 = vst [vmem:[%s13431_s2 + $0xa0] sm:$0xff] %v4828_v61  ;;  %v5044_v50 = vmax.f32 %v4968_v52, 0.0 }
 0x844   : > { %v4780_v42 = vpop.f32.mrf.mxu1 }
 0x845   : > { %v4781_v19 = vadd.f32 %v4780_v42, %v13424_v58 }
 0x846   : > { %v4969_v27 = vpop.f32.mrf.mxu2 }
 0x847   : > { %v4829_v30 = vmax.f32 %v4781_v19, 0.0  ;;  %v4970_v53 = vadd.f32 %v4969_v27, %v13499_v35 }
 0x849   : > { %4861 = vst [vmem:[%s13431_s2 + $0xa8] sm:$0xff] %v4829_v30  ;;  %v5045_v20 = vmax.f32 %v4970_v53, 0.0  ;;  %v4882_v5 = vpack.c.bf16 %v4829_v30, %v4828_v61 }
 0x84b   : > { %v5075_v57 = vpack.c.bf16 %v5045_v20, %v5044_v50  ;;  %5011 = vmatmul.bf16.gmra.mxu2 %v4882_v5 }
 0x84c   : > { %v4783_v16 = vpop.f32.mrf.mxu1 }
 0x84d   : > { %v4784_v32 = vadd.f32 %v4783_v16, %v13424_v58  ;;  %10090 = vmatmul.msk.bf16.gmra.mxu3 %vm4666_vm6, %v5075_v57 }
 0x84e   : > { %v4972_v3 = vpop.f32.mrf.mxu2 }
 0x84f   : > { %v4830_v39 = vmax.f32 %v4784_v32, 0.0  ;;  %v4973_v29 = vadd.f32 %v4972_v3, %v13499_v35 }
 0x851   : > { %4862 = vst [vmem:[%s13431_s2 + $0xb0] sm:$0xff] %v4830_v39  ;;  %v5046_v2 = vmax.f32 %v4973_v29, 0.0 }
 0x854   : > { %v4785_v34 = vpop.f32.mrf.mxu1 }
 0x855   : > { %v4786_v47 = vadd.f32 %v4785_v34, %v13424_v58 }
 0x856   : > { %v4974_v33 = vpop.f32.mrf.mxu2 }
 0x857   : > { %v4831_v49 = vmax.f32 %v4786_v47, 0.0  ;;  %v4975_v36 = vadd.f32 %v4974_v33, %v13499_v35 }
 0x859   : > { %4863 = vst [vmem:[%s13431_s2 + $0xb8] sm:$0xff] %v4831_v49  ;;  %v5047_v15 = vmax.f32 %v4975_v36, 0.0  ;;  %v4883_v37 = vpack.c.bf16 %v4831_v49, %v4830_v39 }
 0x85b   : > { %v5076_v48 = vpack.c.bf16 %v5047_v15, %v5046_v2  ;;  %5016 = vmatmul.bf16.gmra.mxu2 %v4883_v37 }
 0x85c   : > { %v4788_v7 = vpop.f32.mrf.mxu1 }
 0x85d   : > { %v4789_v43 = vadd.f32 %v4788_v7, %v13424_v58  ;;  %10091 = vmatmul.msk.bf16.gmra.mxu3 %vm4666_vm6, %v5076_v48 }
 0x85e   : > { %v4977_v44 = vpop.f32.mrf.mxu2 }
 0x85f   : > { %v4832_v63 = vmax.f32 %v4789_v43, 0.0  ;;  %v4978_v54 = vadd.f32 %v4977_v44, %v13499_v35 }
 0x861   : > { %4864 = vst [vmem:[%s13431_s2 + $0xc0] sm:$0xff] %v4832_v63  ;;  %v5048_v17 = vmax.f32 %v4978_v54, 0.0 }
 0x864   : > { %v4790_v45 = vpop.f32.mrf.mxu1 }
 0x865   : > { %v4791_v62 = vadd.f32 %v4790_v45, %v13424_v58 }
 0x866   : > { %v4979_v22 = vpop.f32.mrf.mxu2 }
 0x867   : > { %v4833_v38 = vmax.f32 %v4791_v62, 0.0  ;;  %v4980_v46 = vadd.f32 %v4979_v22, %v13499_v35 }
 0x869   : > { %4865 = vst [vmem:[%s13431_s2 + $0xc8] sm:$0xff] %v4833_v38  ;;  %v5049_v18 = vmax.f32 %v4980_v46, 0.0  ;;  %v4884_v10 = vpack.c.bf16 %v4833_v38, %v4832_v63  ;;  %v13560_v46 = vld [vmem:[%s15475_s17 + $0x39] ss:$0 sm:$0xff] }
 0x86b   : > { %v5077_v9 = vpack.c.bf16 %v5049_v18, %v5048_v17  ;;  %5021 = vmatmul.bf16.gmra.mxu2 %v4884_v10 }
 0x86c   : > { %v4793_v0 = vpop.f32.mrf.mxu1 }
 0x86d   : > { %v4794_v14 = vadd.f32 %v4793_v0, %v13424_v58  ;;  %10092 = vmatmul.msk.bf16.gmra.mxu3 %vm4666_vm6, %v5077_v9 }
 0x86e   : > { %v4982_v28 = vpop.f32.mrf.mxu2 }
 0x86f   : > { %v4834_v40 = vmax.f32 %v4794_v14, 0.0  ;;  %v4983_v1 = vadd.f32 %v4982_v28, %v13499_v35 }
 0x871   : > { %4866 = vst [vmem:[%s13431_s2 + $0xd0] sm:$0xff] %v4834_v40  ;;  %v5050_v13 = vmax.f32 %v4983_v1, 0.0 }
 0x874   : > { %v4795_v56 = vpop.f32.mrf.mxu1 }
 0x875   : > { %v4796_v24 = vadd.f32 %v4795_v56, %v13424_v58 }
 0x876   : > { %v4984_v31 = vpop.f32.mrf.mxu2 }
 0x877   : > { %v4835_v51 = vmax.f32 %v4796_v24, 0.0  ;;  %v4985_v4 = vadd.f32 %v4984_v31, %v13499_v35  ;;  %v10965_v31 = vld [vmem:[%s15471_s13 + $0x8] sm:$0xff] }
 0x878   : > { %5735 = vmatpush.bf16.msra.mxu2 %v10965_v31 }
 0x879   : > { %4867 = vst [vmem:[%s13431_s2 + $0xd8] sm:$0xff] %v4835_v51  ;;  %v5051_v12 = vmax.f32 %v4985_v4, 0.0  ;;  %v4885_v11 = vpack.c.bf16 %v4835_v51, %v4834_v40 }
 0x87b   : > { %v5078_v41 = vpack.c.bf16 %v5051_v12, %v5050_v13  ;;  %5026 = vmatmul.bf16.gmra.mxu2 %v4885_v11 }
 0x87c   : > { %v4798_v60 = vpop.f32.mrf.mxu1 }
 0x87d   : > { %v4799_v23 = vadd.f32 %v4798_v60, %v13424_v58  ;;  %10093 = vmatmul.msk.bf16.gmra.mxu3 %vm4666_vm6, %v5078_v41 }
 0x87e   : > { %v4987_v26 = vpop.f32.mrf.mxu2 }
 0x87f   : > { %v4836_v8 = vmax.f32 %v4799_v23, 0.0  ;;  %v4988_v21 = vadd.f32 %v4987_v26, %v13499_v35 }
 0x881   : > { %4868 = vst [vmem:[%s13431_s2 + $0xe0] sm:$0xff] %v4836_v8  ;;  %v5052_v42 = vmax.f32 %v4988_v21, 0.0 }
 0x884   : > { %v4800_v25 = vpop.f32.mrf.mxu1 }
 0x885   : > { %v4801_v6 = vadd.f32 %v4800_v25, %v13424_v58 }
 0x886   : > { %v4989_v55 = vpop.f32.mrf.mxu2 }
 0x887   : > { %v4837_v59 = vmax.f32 %v4801_v6, 0.0  ;;  %v4990_v61 = vadd.f32 %v4989_v55, %v13499_v35 }
 0x889   : > { %4869 = vst [vmem:[%s13431_s2 + $0xe8] sm:$0xff] %v4837_v59  ;;  %v5053_v52 = vmax.f32 %v4990_v61, 0.0  ;;  %v4886_v19 = vpack.c.bf16 %v4837_v59, %v4836_v8 }
 0x88b   : > { %v5079_v27 = vpack.c.bf16 %v5053_v52, %v5052_v42  ;;  %5031 = vmatmul.bf16.gmra.mxu2 %v4886_v19 }
 0x88c   : > { %v4803_v30 = vpop.f32.mrf.mxu1 }
 0x88d   : > { %v4804_v53 = vadd.f32 %v4803_v30, %v13424_v58  ;;  %10094 = vmatmul.msk.bf16.gmra.mxu3 %vm4666_vm6, %v5079_v27 }
 0x88e   : > { %v4992_v50 = vpop.f32.mrf.mxu2 }
 0x88f   : > { %v4838_v20 = vmax.f32 %v4804_v53, 0.0  ;;  %v4993_v57 = vadd.f32 %v4992_v50, %v13499_v35 }
 0x891   : > { %4870 = vst [vmem:[%s13431_s2 + $0xf0] sm:$0xff] %v4838_v20  ;;  %v5054_v34 = vmax.f32 %v4993_v57, 0.0 }
 0x894   : > { %v4805_v5 = vpop.f32.mrf.mxu1 }
 0x895   : > { %v4806_v16 = vadd.f32 %v4805_v5, %v13424_v58 }
 0x896   : > { %v4994_v32 = vpop.f32.mrf.mxu2 }
 0x897   : > { %v4839_v3 = vmax.f32 %v4806_v16, 0.0  ;;  %v4995_v39 = vadd.f32 %v4994_v32, %v13499_v35 }
 0x899   : > { %4871 = vst [vmem:[%s13431_s2 + $0xf8] sm:$0xff] %v4839_v3  ;;  %v5055_v29 = vmax.f32 %v4995_v39, 0.0  ;;  %v4887_v47 = vpack.c.bf16 %v4839_v3, %v4838_v20 }
 0x89b   : > { %v5080_v33 = vpack.c.bf16 %v5055_v29, %v5054_v34  ;;  %5036 = vmatmul.bf16.gmra.mxu2 %v4887_v47 }
 0x89d   : > { %10095 = vmatmul.msk.bf16.gmra.mxu3 %vm4666_vm6, %v5080_v33 }
 0x89e   : > { %v4997_v49 = vpop.f32.mrf.mxu2 }
 0x89f   : > { %v4998_v36 = vadd.f32 %v4997_v49, %v13499_v35 }
 0x8a1   : > { %v5056_v37 = vmax.f32 %v4998_v36, 0.0 }
 0x8a6   : > { %v4999_v2 = vpop.f32.mrf.mxu2 }
 0x8a7   : > { %v5000_v15 = vadd.f32 %v4999_v2, %v13499_v35 }
 0x8a9   : > { %v5057_v58 = vmax.f32 %v5000_v15, 0.0 }
 0x8ab   : > { %v5081_v48 = vpack.c.bf16 %v5057_v58, %v5056_v37 }
 0x8ad   : > { %10096 = vmatmul.msk.bf16.gmra.mxu3 %vm4666_vm6, %v5081_v48 }
 0x8ae   : > { %v5002_v7 = vpop.f32.mrf.mxu2 }
 0x8af   : > { %v5003_v43 = vadd.f32 %v5002_v7, %v13499_v35 }
 0x8b1   : > { %v5058_v45 = vmax.f32 %v5003_v43, 0.0 }
 0x8b6   : > { %v5004_v44 = vpop.f32.mrf.mxu2 }
 0x8b7   : > { %v5005_v63 = vadd.f32 %v5004_v44, %v13499_v35 }
 0x8b9   : > { %v5059_v54 = vmax.f32 %v5005_v63, 0.0 }
 0x8bb   : > { %v5082_v62 = vpack.c.bf16 %v5059_v54, %v5058_v45 }
 0x8bd   : > { %10097 = vmatmul.msk.bf16.gmra.mxu3 %vm4666_vm6, %v5082_v62 }
 0x8be   : > { %v5007_v22 = vpop.f32.mrf.mxu2 }
 0x8bf   : > { %v5008_v17 = vadd.f32 %v5007_v22, %v13499_v35 }
 0x8c0   : > { %v5152_v38 = vpop.f32.mrf.mxu3 }
 0x8c1   : > { %v5153_v10 = vadd.f32 %v5152_v38, %v13560_v46  ;;  %v5060_v14 = vmax.f32 %v5008_v17, 0.0 }
 0x8c3   : > { %v5232_v56 = vmax.f32 %v5153_v10, 0.0 }
 0x8c6   : > { %v5009_v18 = vpop.f32.mrf.mxu2 }
 0x8c7   : > { %v5010_v9 = vadd.f32 %v5009_v18, %v13499_v35 }
 0x8c8   : > { %v5154_v0 = vpop.f32.mrf.mxu3 }
 0x8c9   : > { %v5061_v28 = vmax.f32 %v5010_v9, 0.0  ;;  %v5155_v40 = vadd.f32 %v5154_v0, %v13560_v46 }
 0x8cb   : > { %v5083_v1 = vpack.c.bf16 %v5061_v28, %v5060_v14  ;;  %v5233_v24 = vmax.f32 %v5155_v40, 0.0 }
 0x8cd   : > { %v5264_v51 = vpack.c.bf16 %v5233_v24, %v5232_v56  ;;  %10098 = vmatmul.msk.bf16.gmra.mxu3 %vm4666_vm6, %v5083_v1 }
 0x8ce   : > { %v5012_v4 = vpop.f32.mrf.mxu2 }
 0x8cf   : > { %10105 = vmatmul.msk.bf16.vlgmr.msra.gmra.mxu0 %vm4474_vm5, %v5264_v51  ;;  %v5013_v12 = vadd.f32 %v5012_v4, %v13499_v35 }
 0x8d0   : > { %v5157_v13 = vpop.f32.mrf.mxu3 }
 0x8d1   : > { %v5158_v41 = vadd.f32 %v5157_v13, %v13560_v46  ;;  %v5062_v26 = vmax.f32 %v5013_v12, 0.0 }
 0x8d3   : > { %v5234_v21 = vmax.f32 %v5158_v41, 0.0 }
 0x8d6   : > { %v5014_v11 = vpop.f32.mrf.mxu2 }
 0x8d7   : > { %v5015_v60 = vadd.f32 %v5014_v11, %v13499_v35 }
 0x8d8   : > { %v5159_v23 = vpop.f32.mrf.mxu3 }
 0x8d9   : > { %v5063_v8 = vmax.f32 %v5015_v60, 0.0  ;;  %v5160_v25 = vadd.f32 %v5159_v23, %v13560_v46 }
 0x8db   : > { %v5084_v6 = vpack.c.bf16 %v5063_v8, %v5062_v26  ;;  %v5235_v55 = vmax.f32 %v5160_v25, 0.0 }
 0x8dd   : > { %v5265_v59 = vpack.c.bf16 %v5235_v55, %v5234_v21  ;;  %10099 = vmatmul.msk.bf16.gmra.mxu3 %vm4666_vm6, %v5084_v6 }
 0x8de   : > { %v5017_v61 = vpop.f32.mrf.mxu2 }
 0x8df   : > { %10106 = vmatmul.msk.bf16.gmra.mxu0 %vm4474_vm5, %v5265_v59  ;;  %v5018_v52 = vadd.f32 %v5017_v61, %v13499_v35 }
 0x8e0   : > { %v5162_v42 = vpop.f32.mrf.mxu3 }
 0x8e1   : > { %v5163_v27 = vadd.f32 %v5162_v42, %v13560_v46  ;;  %v5064_v50 = vmax.f32 %v5018_v52, 0.0 }
 0x8e3   : > { %v5236_v57 = vmax.f32 %v5163_v27, 0.0 }
 0x8e6   : > { %v5019_v19 = vpop.f32.mrf.mxu2 }
 0x8e7   : > { %v5020_v30 = vadd.f32 %v5019_v19, %v13499_v35 }
 0x8e8   : > { %v5164_v53 = vpop.f32.mrf.mxu3 }
 0x8e9   : > { %v5065_v20 = vmax.f32 %v5020_v30, 0.0  ;;  %v5165_v5 = vadd.f32 %v5164_v53, %v13560_v46 }
 0x8eb   : > { %v5085_v16 = vpack.c.bf16 %v5065_v20, %v5064_v50  ;;  %v5237_v32 = vmax.f32 %v5165_v5, 0.0 }
 0x8ed   : > { %v5266_v3 = vpack.c.bf16 %v5237_v32, %v5236_v57  ;;  %10100 = vmatmul.msk.bf16.gmra.mxu3 %vm4666_vm6, %v5085_v16 }
 0x8ee   : > { %v5022_v39 = vpop.f32.mrf.mxu2 }
 0x8ef   : > { %10107 = vmatmul.msk.bf16.gmra.mxu0 %vm4474_vm5, %v5266_v3  ;;  %v5023_v29 = vadd.f32 %v5022_v39, %v13499_v35 }
 0x8f0   : > { %v5167_v34 = vpop.f32.mrf.mxu3 }
 0x8f1   : > { %v5168_v33 = vadd.f32 %v5167_v34, %v13560_v46  ;;  %v5066_v2 = vmax.f32 %v5023_v29, 0.0 }
 0x8f3   : > { %v5238_v58 = vmax.f32 %v5168_v33, 0.0  ;;  %v10964_v33 = vld [vmem:[%s15471_s13] sm:$0xff] }
 0x8f4   : > { %5736 = vmatpush.bf16.msra.mxu2 %v10964_v33 }
 0x8f6   : > { %v5024_v47 = vpop.f32.mrf.mxu2 }
 0x8f7   : > { %v5025_v49 = vadd.f32 %v5024_v47, %v13499_v35 }
 0x8f8   : > { %v5169_v36 = vpop.f32.mrf.mxu3 }
 0x8f9   : > { %v5067_v15 = vmax.f32 %v5025_v49, 0.0  ;;  %v5170_v37 = vadd.f32 %v5169_v36, %v13560_v46 }
 0x8fb   : > { %v5086_v48 = vpack.c.bf16 %v5067_v15, %v5066_v2  ;;  %v5239_v7 = vmax.f32 %v5170_v37, 0.0  ;;  %v13619_v37 = vld [vmem:[%s15475_s17 + $0x3a] ss:$0 sm:$0xff] }
 0x8fd   : > { %v5267_v43 = vpack.c.bf16 %v5239_v7, %v5238_v58  ;;  %10101 = vmatmul.msk.bf16.gmra.mxu3 %vm4666_vm6, %v5086_v48 }
 0x8fe   : > { %v5027_v44 = vpop.f32.mrf.mxu2 }
 0x8ff   : > { %10108 = vmatmul.msk.bf16.gmra.mxu0 %vm4474_vm5, %v5267_v43  ;;  %v5028_v45 = vadd.f32 %v5027_v44, %v13499_v35 }
 0x900   : > { %v5172_v63 = vpop.f32.mrf.mxu3 }
 0x901   : > { %v5173_v62 = vadd.f32 %v5172_v63, %v13560_v46  ;;  %v5068_v17 = vmax.f32 %v5028_v45, 0.0 }
 0x903   : > { %v5240_v9 = vmax.f32 %v5173_v62, 0.0 }
 0x906   : > { %v5029_v54 = vpop.f32.mrf.mxu2 }
 0x907   : > { %v5030_v22 = vadd.f32 %v5029_v54, %v13499_v35 }
 0x908   : > { %v5174_v38 = vpop.f32.mrf.mxu3 }
 0x909   : > { %v5069_v18 = vmax.f32 %v5030_v22, 0.0  ;;  %v5175_v10 = vadd.f32 %v5174_v38, %v13560_v46 }
 0x90b   : > { %v5087_v0 = vpack.c.bf16 %v5069_v18, %v5068_v17  ;;  %v5241_v14 = vmax.f32 %v5175_v10, 0.0 }
 0x90d   : > { %v5268_v28 = vpack.c.bf16 %v5241_v14, %v5240_v9  ;;  %10102 = vmatmul.msk.bf16.gmra.mxu3 %vm4666_vm6, %v5087_v0  ;;  %v10969_v9 = vld [vmem:[%s15472_s14 + $0x18] sm:$0xff] }
 0x90e   : > { %v5032_v40 = vpop.f32.mrf.mxu2  ;;  %5951 = vmatpush.bf16.msra.mxu3 %v10969_v9 }
 0x90f   : > { %10109 = vmatmul.msk.bf16.gmra.mxu0 %vm4474_vm5, %v5268_v28  ;;  %v5033_v1 = vadd.f32 %v5032_v40, %v13499_v35 }
 0x910   : > { %v5177_v56 = vpop.f32.mrf.mxu3 }
 0x911   : > { %v5178_v31 = vadd.f32 %v5177_v56, %v13560_v46  ;;  %v5070_v13 = vmax.f32 %v5033_v1, 0.0 }
 0x913   : > { %v5242_v41 = vmax.f32 %v5178_v31, 0.0 }
 0x916   : > { %v5034_v24 = vpop.f32.mrf.mxu2 }
 0x917   : > { %v5035_v51 = vadd.f32 %v5034_v24, %v13499_v35 }
 0x918   : > { %v5179_v4 = vpop.f32.mrf.mxu3 }
 0x919   : > { %v5071_v12 = vmax.f32 %v5035_v51, 0.0  ;;  %v5180_v11 = vadd.f32 %v5179_v4, %v13560_v46 }
 0x91b   : > { %v5088_v60 = vpack.c.bf16 %v5071_v12, %v5070_v13  ;;  %v5243_v23 = vmax.f32 %v5180_v11, 0.0 }
 0x91d   : > { %v5269_v26 = vpack.c.bf16 %v5243_v23, %v5242_v41  ;;  %10103 = vmatmul.msk.bf16.gmra.mxu3 %vm4666_vm6, %v5088_v60 }
 0x91e   : > { %v5037_v8 = vpop.f32.mrf.mxu2 }
 0x91f   : > { %10110 = vmatmul.msk.bf16.gmra.mxu0 %vm4474_vm5, %v5269_v26  ;;  %v5038_v21 = vadd.f32 %v5037_v8, %v13499_v35 }
 0x920   : > { %v5182_v25 = vpop.f32.mrf.mxu3 }
 0x921   : > { %v5183_v55 = vadd.f32 %v5182_v25, %v13560_v46  ;;  %v5072_v42 = vmax.f32 %v5038_v21, 0.0 }
 0x923   : > { %v5244_v27 = vmax.f32 %v5183_v55, 0.0 }
 0x926   : > { %v5039_v6 = vpop.f32.mrf.mxu2 }
 0x927   : > { %v5040_v59 = vadd.f32 %v5039_v6, %v13499_v35 }
 0x928   : > { %v5184_v61 = vpop.f32.mrf.mxu3 }
 0x929   : > { %v5073_v52 = vmax.f32 %v5040_v59, 0.0  ;;  %v5185_v19 = vadd.f32 %v5184_v61, %v13560_v46 }
 0x92b   : > { %v5089_v30 = vpack.c.bf16 %v5073_v52, %v5072_v42  ;;  %v5245_v53 = vmax.f32 %v5185_v19, 0.0 }
 0x92d   : > { %v5270_v50 = vpack.c.bf16 %v5245_v53, %v5244_v27  ;;  %10104 = vmatmul.msk.bf16.gmra.mxu3 %vm4666_vm6, %v5089_v30 }
 0x92f   : > { %10111 = vmatmul.msk.bf16.gmra.mxu0 %vm4474_vm5, %v5270_v50 }
 0x930   : > { %v5187_v20 = vpop.f32.mrf.mxu3 }
 0x931   : > { %v5188_v5 = vadd.f32 %v5187_v20, %v13560_v46 }
 0x933   : > { %v5246_v35 = vmax.f32 %v5188_v5, 0.0 }
 0x938   : > { %v5189_v57 = vpop.f32.mrf.mxu3 }
 0x939   : > { %v5190_v16 = vadd.f32 %v5189_v57, %v13560_v46 }
 0x93b   : > { %v5247_v32 = vmax.f32 %v5190_v16, 0.0 }
 0x93d   : > { %v5271_v3 = vpack.c.bf16 %v5247_v32, %v5246_v35 }
 0x93f   : > { %10112 = vmatmul.msk.bf16.gmra.mxu0 %vm4474_vm5, %v5271_v3 }
 0x940   : > { %v5192_v39 = vpop.f32.mrf.mxu3 }
 0x941   : > { %v5193_v34 = vadd.f32 %v5192_v39, %v13560_v46 }
 0x943   : > { %v5248_v49 = vmax.f32 %v5193_v34, 0.0 }
 0x948   : > { %v5194_v29 = vpop.f32.mrf.mxu3 }
 0x949   : > { %v5195_v47 = vadd.f32 %v5194_v29, %v13560_v46 }
 0x94b   : > { %v5249_v36 = vmax.f32 %v5195_v47, 0.0 }
 0x94c   : > { %v5342_v2 = vpop.f32.mrf.mxu0 }
 0x94d   : > { %v5272_v15 = vpack.c.bf16 %v5249_v36, %v5248_v49  ;;  %v5343_v48 = vadd.f32 %v5342_v2, %v13619_v37 }
 0x94f   : > { %10113 = vmatmul.msk.bf16.gmra.mxu0 %vm4474_vm5, %v5272_v15  ;;  %v5422_v44 = vmax.f32 %v5343_v48, 0.0 }
 0x950   : > { %v5197_v58 = vpop.f32.mrf.mxu3 }
 0x951   : > { %v5198_v63 = vadd.f32 %v5197_v58, %v13560_v46 }
 0x953   : > { %v5250_v38 = vmax.f32 %v5198_v63, 0.0 }
 0x954   : > { %v5344_v7 = vpop.f32.mrf.mxu0 }
 0x955   : > { %v5345_v43 = vadd.f32 %v5344_v7, %v13619_v37 }
 0x957   : > { %v5423_v45 = vmax.f32 %v5345_v43, 0.0 }
 0x958   : > { %v5199_v54 = vpop.f32.mrf.mxu3 }
 0x959   : > { %v5454_v62 = vpack.c.bf16 %v5423_v45, %v5422_v44  ;;  %v5200_v22 = vadd.f32 %v5199_v54, %v13560_v46 }
 0x95b   : > { %v5251_v17 = vmax.f32 %v5200_v22, 0.0  ;;  %10125 = vmatmul.msk.bf16.vlgmr.msra.gmra.mxu1 %vm1908_vm0, %v5454_v62  ;;  %v10968_v22 = vld [vmem:[%s15472_s14 + $0x10] sm:$0xff] }
 0x95c   : > { %v5347_v18 = vpop.f32.mrf.mxu0  ;;  %5952 = vmatpush.bf16.msra.mxu3 %v10968_v22 }
 0x95d   : > { %v5273_v10 = vpack.c.bf16 %v5251_v17, %v5250_v38  ;;  %v5348_v14 = vadd.f32 %v5347_v18, %v13619_v37 }
 0x95f   : > { %10114 = vmatmul.msk.bf16.gmra.mxu0 %vm4474_vm5, %v5273_v10  ;;  %v5424_v56 = vmax.f32 %v5348_v14, 0.0 }
 0x960   : > { %v5202_v0 = vpop.f32.mrf.mxu3 }
 0x961   : > { %v5203_v1 = vadd.f32 %v5202_v0, %v13560_v46 }
 0x963   : > { %v5252_v13 = vmax.f32 %v5203_v1, 0.0 }
 0x964   : > { %v5349_v28 = vpop.f32.mrf.mxu0 }
 0x965   : > { %v5350_v40 = vadd.f32 %v5349_v28, %v13619_v37 }
 0x967   : > { %v5425_v24 = vmax.f32 %v5350_v40, 0.0 }
 0x968   : > { %v5204_v31 = vpop.f32.mrf.mxu3 }
 0x969   : > { %v5455_v51 = vpack.c.bf16 %v5425_v24, %v5424_v56  ;;  %v5205_v4 = vadd.f32 %v5204_v31, %v13560_v46 }
 0x96b   : > { %v5253_v12 = vmax.f32 %v5205_v4, 0.0  ;;  %10126 = vmatmul.msk.bf16.gmra.mxu1 %vm1908_vm0, %v5455_v51 }
 0x96c   : > { %v5352_v11 = vpop.f32.mrf.mxu0 }
 0x96d   : > { %v5274_v41 = vpack.c.bf16 %v5253_v12, %v5252_v13  ;;  %v5353_v23 = vadd.f32 %v5352_v11, %v13619_v37 }
 0x96f   : > { %10115 = vmatmul.msk.bf16.gmra.mxu0 %vm4474_vm5, %v5274_v41  ;;  %v5426_v25 = vmax.f32 %v5353_v23, 0.0 }
 0x970   : > { %v5207_v60 = vpop.f32.mrf.mxu3 }
 0x971   : > { %v5208_v21 = vadd.f32 %v5207_v60, %v13560_v46 }
 0x973   : > { %v5254_v42 = vmax.f32 %v5208_v21, 0.0 }
 0x974   : > { %v5354_v26 = vpop.f32.mrf.mxu0 }
 0x975   : > { %v5355_v8 = vadd.f32 %v5354_v26, %v13619_v37 }
 0x977   : > { %v5427_v6 = vmax.f32 %v5355_v8, 0.0 }
 0x978   : > { %v5209_v55 = vpop.f32.mrf.mxu3 }
 0x979   : > { %v5456_v59 = vpack.c.bf16 %v5427_v6, %v5426_v25  ;;  %v5210_v61 = vadd.f32 %v5209_v55, %v13560_v46 }
 0x97b   : > { %v5255_v52 = vmax.f32 %v5210_v61, 0.0  ;;  %10127 = vmatmul.msk.bf16.gmra.mxu1 %vm1908_vm0, %v5456_v59 }
 0x97c   : > { %v5357_v19 = vpop.f32.mrf.mxu0 }
 0x97d   : > { %v5275_v27 = vpack.c.bf16 %v5255_v52, %v5254_v42  ;;  %v5358_v53 = vadd.f32 %v5357_v19, %v13619_v37 }
 0x97f   : > { %10116 = vmatmul.msk.bf16.gmra.mxu0 %vm4474_vm5, %v5275_v27  ;;  %v5428_v5 = vmax.f32 %v5358_v53, 0.0 }
 0x980   : > { %v5212_v30 = vpop.f32.mrf.mxu3 }
 0x981   : > { %v5213_v57 = vadd.f32 %v5212_v30, %v13560_v46 }
 0x983   : > { %v5256_v39 = vmax.f32 %v5213_v57, 0.0 }
 0x984   : > { %v5359_v50 = vpop.f32.mrf.mxu0 }
 0x985   : > { %v5360_v20 = vadd.f32 %v5359_v50, %v13619_v37 }
 0x987   : > { %v5429_v16 = vmax.f32 %v5360_v20, 0.0 }
 0x988   : > { %v5214_v35 = vpop.f32.mrf.mxu3 }
 0x989   : > { %v5457_v32 = vpack.c.bf16 %v5429_v16, %v5428_v5  ;;  %v5215_v3 = vadd.f32 %v5214_v35, %v13560_v46 }
 0x98b   : > { %v5257_v34 = vmax.f32 %v5215_v3, 0.0  ;;  %10128 = vmatmul.msk.bf16.gmra.mxu1 %vm1908_vm0, %v5457_v32  ;;  %v10967_v32 = vld [vmem:[%s15472_s14 + $0x8] sm:$0xff]  ;;  %v13681_v3 = vld [vmem:[%s15475_s17 + $0x3b] ss:$0 sm:$0xff] }
 0x98c   : > { %v5362_v29 = vpop.f32.mrf.mxu0  ;;  %5953 = vmatpush.bf16.msra.mxu3 %v10967_v32 }
 0x98d   : > { %v5276_v47 = vpack.c.bf16 %v5257_v34, %v5256_v39  ;;  %v5363_v49 = vadd.f32 %v5362_v29, %v13619_v37 }
 0x98f   : > { %10117 = vmatmul.msk.bf16.gmra.mxu0 %vm4474_vm5, %v5276_v47  ;;  %v5430_v15 = vmax.f32 %v5363_v49, 0.0 }
 0x990   : > { %v5217_v33 = vpop.f32.mrf.mxu3 }
 0x991   : > { %v5218_v58 = vadd.f32 %v5217_v33, %v13560_v46 }
 0x993   : > { %v5258_v63 = vmax.f32 %v5218_v58, 0.0 }
 0x994   : > { %v5364_v36 = vpop.f32.mrf.mxu0 }
 0x995   : > { %v5365_v2 = vadd.f32 %v5364_v36, %v13619_v37 }
 0x997   : > { %v5431_v48 = vmax.f32 %v5365_v2, 0.0 }
 0x998   : > { %v5219_v7 = vpop.f32.mrf.mxu3 }
 0x999   : > { %v5458_v43 = vpack.c.bf16 %v5431_v48, %v5430_v15  ;;  %v5220_v44 = vadd.f32 %v5219_v7, %v13560_v46 }
 0x99b   : > { %v5259_v45 = vmax.f32 %v5220_v44, 0.0  ;;  %10129 = vmatmul.msk.bf16.gmra.mxu1 %vm1908_vm0, %v5458_v43 }
 0x99c   : > { %v5367_v54 = vpop.f32.mrf.mxu0 }
 0x99d   : > { %v5277_v62 = vpack.c.bf16 %v5259_v45, %v5258_v63  ;;  %v5368_v17 = vadd.f32 %v5367_v54, %v13619_v37  ;;  %v10256_v63 = vld [vmem:[%s15473_s15 + $0x70] sm:$0xf]  ;;  %v10985_v45 = vld [vmem:[%s15473_s15 + $0x74] sm:$0xf0] }
 0x99f   : > { %10118 = vmatmul.msk.bf16.gmra.mxu0 %vm4474_vm5, %v5277_v62  ;;  %v5432_v9 = vmax.f32 %v5368_v17, 0.0  ;;  %v10257_v62 = vor.u32 %v10985_v45, %v10256_v63  ;;  %v10258_v17 = vld [vmem:[%s15473_s15 + $0x78] sm:$0xf0] }
 0x9a0   : > { %v5222_v38 = vpop.f32.mrf.mxu3 }
 0x9a1   : > { %v5223_v0 = vadd.f32 %v5222_v38, %v13560_v46  ;;  %6187 = vmatpush.bf16.msrb.mxu0 %v10257_v62  ;;  %v10984_v38 = vld [vmem:[%s15473_s15 + $0x74] sm:$0xf] }
 0x9a3   : > { %v5260_v1 = vmax.f32 %v5223_v0, 0.0 }
 0x9a4   : > { %v5369_v18 = vpop.f32.mrf.mxu0 }
 0x9a5   : > { %v5370_v10 = vadd.f32 %v5369_v18, %v13619_v37 }
 0x9a7   : > { %v5433_v14 = vmax.f32 %v5370_v10, 0.0  ;;  %v10261_v10 = vor.u32 %v10984_v38, %v10258_v17 }
 0x9a8   : > { %v5224_v28 = vpop.f32.mrf.mxu3 }
 0x9a9   : > { %v5459_v40 = vpack.c.bf16 %v5433_v14, %v5432_v9  ;;  %v5225_v56 = vadd.f32 %v5224_v28, %v13560_v46  ;;  %6276 = vmatpush.bf16.msrb.mxu1 %v10261_v10  ;;  %v10981_v10 = vld [vmem:[%s15473_s15 + $0x54] sm:$0xf0] }
 0x9ab   : > { %v5261_v24 = vmax.f32 %v5225_v56, 0.0  ;;  %10130 = vmatmul.msk.bf16.gmra.mxu1 %vm1908_vm0, %v5459_v40 }
 0x9ac   : > { %v5372_v31 = vpop.f32.mrf.mxu0 }
 0x9ad   : > { %v5278_v51 = vpack.c.bf16 %v5261_v24, %v5260_v1  ;;  %v5373_v13 = vadd.f32 %v5372_v31, %v13619_v37 }
 0x9af   : > { %10119 = vmatmul.msk.bf16.gmra.mxu0 %vm4474_vm5, %v5278_v51  ;;  %v5434_v41 = vmax.f32 %v5373_v13, 0.0 }
 0x9b0   : > { %v5227_v4 = vpop.f32.mrf.mxu3 }
 0x9b1   : > { %v5228_v60 = vadd.f32 %v5227_v4, %v13560_v46 }
 0x9b3   : > { %v5262_v21 = vmax.f32 %v5228_v60, 0.0 }
 0x9b4   : > { %v5374_v12 = vpop.f32.mrf.mxu0 }
 0x9b5   : > { %v5375_v11 = vadd.f32 %v5374_v12, %v13619_v37 }
 0x9b7   : > { %v5435_v23 = vmax.f32 %v5375_v11, 0.0 }
 0x9b8   : > { %v5229_v26 = vpop.f32.mrf.mxu3 }
 0x9b9   : > { %v5460_v8 = vpack.c.bf16 %v5435_v23, %v5434_v41  ;;  %v5230_v25 = vadd.f32 %v5229_v26, %v13560_v46 }
 0x9bb   : > { %v5263_v6 = vmax.f32 %v5230_v25, 0.0  ;;  %10131 = vmatmul.msk.bf16.gmra.mxu1 %vm1908_vm0, %v5460_v8 }
 0x9bc   : > { %v5377_v55 = vpop.f32.mrf.mxu0 }
 0x9bd   : > { %v5279_v59 = vpack.c.bf16 %v5263_v6, %v5262_v21  ;;  %v5378_v61 = vadd.f32 %v5377_v55, %v13619_v37 }
 0x9bf   : > { %10120 = vmatmul.msk.bf16.gmra.mxu0 %vm4474_vm5, %v5279_v59  ;;  %v5436_v19 = vmax.f32 %v5378_v61, 0.0 }
 0x9c4   : > { %v5379_v42 = vpop.f32.mrf.mxu0 }
 0x9c5   : > { %v5380_v52 = vadd.f32 %v5379_v42, %v13619_v37  ;;  %v10248_v42 = vld [vmem:[%s15473_s15 + $0x60] sm:$0xf] }
 0x9c7   : > { %v5437_v27 = vmax.f32 %v5380_v52, 0.0  ;;  %v10983_v52 = vld [vmem:[%s15473_s15 + $0x64] sm:$0xf0] }
 0x9c9   : > { %v5461_v30 = vpack.c.bf16 %v5437_v27, %v5436_v19  ;;  %v10249_v27 = vor.u32 %v10983_v52, %v10248_v42 }
 0x9cb   : > { %10132 = vmatmul.msk.bf16.gmra.mxu1 %vm1908_vm0, %v5461_v30  ;;  %6188 = vmatpush.bf16.msrb.mxu0 %v10249_v27 }
 0x9cc   : > { %v5382_v53 = vpop.f32.mrf.mxu0 }
 0x9cd   : > { %v5383_v46 = vadd.f32 %v5382_v53, %v13619_v37  ;;  %v10982_v53 = vld [vmem:[%s15473_s15 + $0x64] sm:$0xf] }
 0x9cf   : > { %v5438_v5 = vmax.f32 %v5383_v46, 0.0  ;;  %v10250_v46 = vld [vmem:[%s15473_s15 + $0x68] sm:$0xf0] }
 0x9d4   : > { %v5384_v50 = vpop.f32.mrf.mxu0 }
 0x9d5   : > { %v5385_v20 = vadd.f32 %v5384_v50, %v13619_v37 }
 0x9d7   : > { %v5439_v57 = vmax.f32 %v5385_v20, 0.0  ;;  %v10253_v20 = vor.u32 %v10982_v53, %v10250_v46 }
 0x9d8   : > { %v5536_v16 = vpop.f32.mrf.mxu1 }
 0x9d9   : > { %v5462_v35 = vpack.c.bf16 %v5439_v57, %v5438_v5  ;;  %v5537_v34 = vadd.f32 %v5536_v16, %v13681_v3  ;;  %6277 = vmatpush.bf16.msrb.mxu1 %v10253_v20  ;;  %v10979_v20 = vld [vmem:[%s15473_s15 + $0x44] sm:$0xf0] }
 0x9db   : > { %10133 = vmatmul.msk.bf16.gmra.mxu1 %vm1908_vm0, %v5462_v35  ;;  %v5616_v33 = vmax.f32 %v5537_v34, 0.0 }
 0x9dc   : > { %v5387_v39 = vpop.f32.mrf.mxu0 }
 0x9dd   : > { %v5388_v49 = vadd.f32 %v5387_v39, %v13619_v37 }
 0x9df   : > { %v5440_v48 = vmax.f32 %v5388_v49, 0.0 }
 0x9e0   : > { %v5538_v29 = vpop.f32.mrf.mxu1 }
 0x9e1   : > { %v5539_v47 = vadd.f32 %v5538_v29, %v13681_v3 }
 0x9e3   : > { %v5617_v36 = vmax.f32 %v5539_v47, 0.0 }
 0x9e4   : > { %v5389_v2 = vpop.f32.mrf.mxu0 }
 0x9e5   : > { %v5648_v15 = vpack.c.bf16 %v5617_v36, %v5616_v33  ;;  %v5390_v58 = vadd.f32 %v5389_v2, %v13619_v37  ;;  %v10966_v36 = vld [vmem:[%s15472_s14] sm:$0xff] }
 0x9e6   : > { %5954 = vmatpush.bf16.msra.mxu3 %v10966_v36 }
 0x9e7   : > { %v5441_v7 = vmax.f32 %v5390_v58, 0.0  ;;  %10149 = vmatmul.msk.bf16.vlgmr.msra.gmra.mxu2 %vm4092_vm2, %v5648_v15 }
 0x9e8   : > { %v5541_v43 = vpop.f32.mrf.mxu1 }
 0x9e9   : > { %v5463_v44 = vpack.c.bf16 %v5441_v7, %v5440_v48  ;;  %v5542_v22 = vadd.f32 %v5541_v43, %v13681_v3 }
 0x9eb   : > { %10134 = vmatmul.msk.bf16.gmra.mxu1 %vm1908_vm0, %v5463_v44  ;;  %v5618_v0 = vmax.f32 %v5542_v22, 0.0 }
 0x9ec   : > { %v5392_v54 = vpop.f32.mrf.mxu0 }
 0x9ed   : > { %v5393_v14 = vadd.f32 %v5392_v54, %v13619_v37 }
 0x9ef   : > { %v5442_v24 = vmax.f32 %v5393_v14, 0.0  ;;  %v10980_v14 = vld [vmem:[%s15473_s15 + $0x54] sm:$0xf] }
 0x9f0   : > { %v5543_v18 = vpop.f32.mrf.mxu1 }
 0x9f1   : > { %v5544_v9 = vadd.f32 %v5543_v18, %v13681_v3  ;;  %v10240_v18 = vld [vmem:[%s15473_s15 + $0x50] sm:$0xf] }
 0x9f3   : > { %v5619_v28 = vmax.f32 %v5544_v9, 0.0 }
 0x9f4   : > { %v5394_v40 = vpop.f32.mrf.mxu0 }
 0x9f5   : > { %v5649_v56 = vpack.c.bf16 %v5619_v28, %v5618_v0  ;;  %v5395_v1 = vadd.f32 %v5394_v40, %v13619_v37  ;;  %v10241_v0 = vor.u32 %v10981_v10, %v10240_v18  ;;  %v10242_v28 = vld [vmem:[%s15473_s15 + $0x58] sm:$0xf0] }
 0x9f6   : > { %v10245_v40 = vor.u32 %v10980_v14, %v10242_v28 }
 0x9f7   : > { %v5443_v31 = vmax.f32 %v5395_v1, 0.0  ;;  %10150 = vmatmul.msk.bf16.gmra.mxu2 %vm4092_vm2, %v5649_v56  ;;  %6189 = vmatpush.bf16.msrb.mxu0 %v10241_v0 }
 0x9f8   : > { %v5546_v51 = vpop.f32.mrf.mxu1  ;;  %6278 = vmatpush.bf16.msrb.mxu1 %v10245_v40 }
 0x9f9   : > { %v5464_v4 = vpack.c.bf16 %v5443_v31, %v5442_v24  ;;  %v5547_v12 = vadd.f32 %v5546_v51, %v13681_v3 }
 0x9fb   : > { %10135 = vmatmul.msk.bf16.gmra.mxu1 %vm1908_vm0, %v5464_v4  ;;  %v5620_v60 = vmax.f32 %v5547_v12, 0.0 }
 0x9fc   : > { %v5397_v13 = vpop.f32.mrf.mxu0 }
 0x9fd   : > { %v5398_v23 = vadd.f32 %v5397_v13, %v13619_v37 }
 0x9ff   : > { %v5444_v6 = vmax.f32 %v5398_v23, 0.0 }
 0xa00   : > { %v5548_v11 = vpop.f32.mrf.mxu1 }
 0xa01   : > { %v5549_v41 = vadd.f32 %v5548_v11, %v13681_v3 }
 0xa03   : > { %v5621_v26 = vmax.f32 %v5549_v41, 0.0 }
 0xa04   : > { %v5399_v8 = vpop.f32.mrf.mxu0 }
 0xa05   : > { %v5650_v25 = vpack.c.bf16 %v5621_v26, %v5620_v60  ;;  %v5400_v21 = vadd.f32 %v5399_v8, %v13619_v37 }
 0xa07   : > { %v5445_v55 = vmax.f32 %v5400_v21, 0.0  ;;  %10151 = vmatmul.msk.bf16.gmra.mxu2 %vm4092_vm2, %v5650_v25 }
 0xa08   : > { %v5551_v59 = vpop.f32.mrf.mxu1 }
 0xa09   : > { %v5465_v61 = vpack.c.bf16 %v5445_v55, %v5444_v6  ;;  %v5552_v30 = vadd.f32 %v5551_v59, %v13681_v3 }
 0xa0b   : > { %10136 = vmatmul.msk.bf16.gmra.mxu1 %vm1908_vm0, %v5465_v61  ;;  %v5622_v57 = vmax.f32 %v5552_v30, 0.0 }
 0xa0c   : > { %v5402_v19 = vpop.f32.mrf.mxu0 }
 0xa0d   : > { %v5403_v16 = vadd.f32 %v5402_v19, %v13619_v37 }
 0xa0f   : > { %v5446_v29 = vmax.f32 %v5403_v16, 0.0 }
 0xa10   : > { %v5553_v50 = vpop.f32.mrf.mxu1 }
 0xa11   : > { %v5554_v5 = vadd.f32 %v5553_v50, %v13681_v3  ;;  %v10232_v50 = vld [vmem:[%s15473_s15 + $0x40] sm:$0xf] }
 0xa13   : > { %v5623_v35 = vmax.f32 %v5554_v5, 0.0  ;;  %v10233_v5 = vor.u32 %v10979_v20, %v10232_v50  ;;  %v10975_v50 = vld [vmem:[%s15473_s15 + $0x24] sm:$0xf0] }
 0xa14   : > { %v5404_v32 = vpop.f32.mrf.mxu0 }
 0xa15   : > { %v5651_v39 = vpack.c.bf16 %v5623_v35, %v5622_v57  ;;  %v5405_v34 = vadd.f32 %v5404_v32, %v13619_v37  ;;  %v10234_v57 = vld [vmem:[%s15473_s15 + $0x48] sm:$0xf0]  ;;  %6190 = vmatpush.bf16.msrb.mxu0 %v10233_v5 }
 0xa16   : > { %v10218_v5 = vld [vmem:[%s15473_s15 + $0x28] sm:$0xf0] }
 0xa17   : > { %v5447_v47 = vmax.f32 %v5405_v34, 0.0  ;;  %10152 = vmatmul.msk.bf16.gmra.mxu2 %vm4092_vm2, %v5651_v39 }
 0xa18   : > { %v5556_v33 = vpop.f32.mrf.mxu1 }
 0xa19   : > { %v5466_v49 = vpack.c.bf16 %v5447_v47, %v5446_v29  ;;  %v5557_v15 = vadd.f32 %v5556_v33, %v13681_v3 }
 0xa1b   : > { %10137 = vmatmul.msk.bf16.gmra.mxu1 %vm1908_vm0, %v5466_v49  ;;  %v5624_v7 = vmax.f32 %v5557_v15, 0.0 }
 0xa1c   : > { %v5407_v2 = vpop.f32.mrf.mxu0 }
 0xa1d   : > { %v5408_v43 = vadd.f32 %v5407_v2, %v13619_v37 }
 0xa1f   : > { %v5448_v62 = vmax.f32 %v5408_v43, 0.0 }
 0xa20   : > { %v5558_v58 = vpop.f32.mrf.mxu1 }
 0xa21   : > { %v5559_v48 = vadd.f32 %v5558_v58, %v13681_v3 }
 0xa23   : > { %v5625_v44 = vmax.f32 %v5559_v48, 0.0 }
 0xa24   : > { %v5409_v63 = vpop.f32.mrf.mxu0 }
 0xa25   : > { %v5652_v45 = vpack.c.bf16 %v5625_v44, %v5624_v7  ;;  %v5410_v54 = vadd.f32 %v5409_v63, %v13619_v37  ;;  %v10224_v44 = vld [vmem:[%s15473_s15 + $0x30] sm:$0xf]  ;;  %v10977_v63 = vld [vmem:[%s15473_s15 + $0x34] sm:$0xf0] }
 0xa27   : > { %v5449_v22 = vmax.f32 %v5410_v54, 0.0  ;;  %10153 = vmatmul.msk.bf16.gmra.mxu2 %vm4092_vm2, %v5652_v45  ;;  %v13791_v45 = vld [vmem:[%s15475_s17 + $0x3c] ss:$0 sm:$0xff]  ;;  %v10225_v54 = vor.u32 %v10977_v63, %v10224_v44  ;;  %v10658_v63 = vld [vmem:[%s15474_s16 + $0x310] sm:$0xf] }
 0xa28   : > { %v5561_v38 = vpop.f32.mrf.mxu1 }
 0xa29   : > { %v5467_v17 = vpack.c.bf16 %v5449_v22, %v5448_v62  ;;  %v5562_v56 = vadd.f32 %v5561_v38, %v13681_v3  ;;  %v10976_v62 = vld [vmem:[%s15473_s15 + $0x34] sm:$0xf]  ;;  %v10226_v22 = vld [vmem:[%s15473_s15 + $0x38] sm:$0xf0]  ;;  %6191 = vmatpush.bf16.msrb.mxu0 %v10225_v54  ;;  %v11087_v54 = vld [vmem:[%s15474_s16 + $0x328] sm:$0xf0] }
 0xa2b   : > { %10138 = vmatmul.msk.bf16.gmra.mxu1 %vm1908_vm0, %v5467_v17  ;;  %v5626_v31 = vmax.f32 %v5562_v56, 0.0  ;;  %v10229_v17 = vor.u32 %v10976_v62, %v10226_v22  ;;  %v10659_v62 = vor.u32 %v11087_v54, %v10658_v63 }
 0xa2c   : > { %v5412_v9 = vpop.f32.mrf.mxu0 }
 0xa2d   : > { %v5413_v51 = vadd.f32 %v5412_v9, %v13619_v37 }
 0xa2f   : > { %v5450_v41 = vmax.f32 %v5413_v51, 0.0  ;;  %v10462_v51 = vld [vmem:[%s15474_s16 + $0x188] sm:$0xf] }
 0xa30   : > { %v5563_v1 = vpop.f32.mrf.mxu1 }
 0xa31   : > { %v5564_v24 = vadd.f32 %v5563_v1, %v13681_v3 }
 0xa33   : > { %v5627_v4 = vmax.f32 %v5564_v24, 0.0 }
 0xa34   : > { %v5414_v13 = vpop.f32.mrf.mxu0 }
 0xa35   : > { %v5653_v12 = vpack.c.bf16 %v5627_v4, %v5626_v31  ;;  %v5415_v11 = vadd.f32 %v5414_v13, %v13619_v37  ;;  %v11038_v4 = vld [vmem:[%s15474_s16 + $0x1a0] sm:$0xf0] }
 0xa37   : > { %v5451_v60 = vmax.f32 %v5415_v11, 0.0  ;;  %10154 = vmatmul.msk.bf16.gmra.mxu2 %vm4092_vm2, %v5653_v12  ;;  %v10463_v12 = vor.u32 %v11038_v4, %v10462_v51  ;;  %v10208_v51 = vld [vmem:[%s15473_s15 + $0x10] sm:$0xf]  ;;  %v10973_v4 = vld [vmem:[%s15473_s15 + $0x14] sm:$0xf0] }
 0xa38   : > { %v5566_v23 = vpop.f32.mrf.mxu1 }
 0xa39   : > { %v5468_v26 = vpack.c.bf16 %v5451_v60, %v5450_v41  ;;  %v5567_v25 = vadd.f32 %v5566_v23, %v13681_v3  ;;  %7184 = vmatpush.bf16.msrb.mxu2 %v10463_v12  ;;  %v10686_v41 = vld [vmem:[%s15474_s16 + $0x348] sm:$0xf]  ;;  %v11094_v60 = vld [vmem:[%s15474_s16 + $0x360] sm:$0xf0]  ;;  %v10972_v12 = vld [vmem:[%s15473_s15 + $0x14] sm:$0xf] }
 0xa3a   : > { %v10687_v23 = vor.u32 %v11094_v60, %v10686_v41 }
 0xa3b   : > { %10139 = vmatmul.msk.bf16.gmra.mxu1 %vm1908_vm0, %v5468_v26  ;;  %v5628_v55 = vmax.f32 %v5567_v25, 0.0 }
 0xa3c   : > { %v5417_v8 = vpop.f32.mrf.mxu0  ;;  %7273 = vmatpush.bf16.msrb.mxu3 %v10687_v23 }
 0xa3d   : > { %v5418_v59 = vadd.f32 %v5417_v8, %v13619_v37 }
 0xa3f   : > { %v5452_v27 = vmax.f32 %v5418_v59, 0.0 }
 0xa40   : > { %v5568_v21 = vpop.f32.mrf.mxu1  ;;  %7274 = vmatpush.bf16.msrb.mxu3 %v10659_v62 }
 0xa41   : > { %v5569_v6 = vadd.f32 %v5568_v21, %v13681_v3 }
 0xa43   : > { %v5629_v61 = vmax.f32 %v5569_v6, 0.0 }
 0xa44   : > { %v5419_v42 = vpop.f32.mrf.mxu0 }
 0xa45   : > { %v5654_v52 = vpack.c.bf16 %v5629_v61, %v5628_v55  ;;  %v5420_v19 = vadd.f32 %v5419_v42, %v13619_v37  ;;  %v10978_v37 = vld [vmem:[%s15473_s15 + $0x44] sm:$0xf] }
 0xa46   : > { %v10237_v35 = vor.u32 %v10978_v37, %v10234_v57  ;;  %v10974_v37 = vld [vmem:[%s15473_s15 + $0x24] sm:$0xf] }
 0xa47   : > { %v5453_v30 = vmax.f32 %v5420_v19, 0.0  ;;  %10155 = vmatmul.msk.bf16.gmra.mxu2 %vm4092_vm2, %v5654_v52 }
 0xa48   : > { %v5571_v53 = vpop.f32.mrf.mxu1  ;;  %6279 = vmatpush.bf16.msrb.mxu1 %v10237_v35 }
 0xa49   : > { %v5469_v46 = vpack.c.bf16 %v5453_v30, %v5452_v27  ;;  %v5572_v16 = vadd.f32 %v5571_v53, %v13681_v3 }
 0xa4b   : > { %10140 = vmatmul.msk.bf16.gmra.mxu1 %vm1908_vm0, %v5469_v46  ;;  %v5630_v34 = vmax.f32 %v5572_v16, 0.0  ;;  %v10216_v46 = vld [vmem:[%s15473_s15 + $0x20] sm:$0xf]  ;;  %v10221_v16 = vor.u32 %v10974_v37, %v10218_v5 }
 0xa4c   : > { %6280 = vmatpush.bf16.msrb.mxu1 %v10229_v17  ;;  %v10217_v20 = vor.u32 %v10975_v50, %v10216_v46  ;;  %v10630_v46 = vld [vmem:[%s15474_s16 + $0x2d8] sm:$0xf]  ;;  %v11080_v50 = vld [vmem:[%s15474_s16 + $0x2f0] sm:$0xf0] }
 0xa4d   : > { %v10631_v37 = vor.u32 %v11080_v50, %v10630_v46  ;;  %v13946_v50 = vld [vmem:[%s15475_s17 + $0x3d] ss:$0 sm:$0xff] }
 0xa4e   : > { %6192 = vmatpush.bf16.msrb.mxu0 %v10217_v20 }
 0xa4f   : > { %7275 = vmatpush.bf16.msrb.mxu3 %v10631_v37 }
 0xa50   : > { %v5573_v32 = vpop.f32.mrf.mxu1  ;;  %6281 = vmatpush.bf16.msrb.mxu1 %v10221_v16 }
 0xa51   : > { %v5574_v39 = vadd.f32 %v5573_v32, %v13681_v3 }
 0xa53   : > { %v5631_v29 = vmax.f32 %v5574_v39, 0.0 }
 0xa55   : > { %v5655_v47 = vpack.c.bf16 %v5631_v29, %v5630_v34 }
 0xa57   : > { %10156 = vmatmul.msk.bf16.gmra.mxu2 %vm4092_vm2, %v5655_v47 }
 0xa58   : > { %v5576_v33 = vpop.f32.mrf.mxu1 }
 0xa59   : > { %v5577_v49 = vadd.f32 %v5576_v33, %v13681_v3 }
 0xa5b   : > { %v5632_v15 = vmax.f32 %v5577_v49, 0.0 }
 0xa60   : > { %v5578_v36 = vpop.f32.mrf.mxu1 }
 0xa61   : > { %v5579_v2 = vadd.f32 %v5578_v36, %v13681_v3 }
 0xa63   : > { %v5633_v58 = vmax.f32 %v5579_v2, 0.0 }
 0xa65   : > { %v5656_v48 = vpack.c.bf16 %v5633_v58, %v5632_v15  ;;  %v10434_v58 = vld [vmem:[%s15474_s16 + $0x150] sm:$0xf] }
 0xa67   : > { %10157 = vmatmul.msk.bf16.gmra.mxu2 %vm4092_vm2, %v5656_v48  ;;  %v11031_v48 = vld [vmem:[%s15474_s16 + $0x168] sm:$0xf0] }
 0xa68   : > { %v5581_v7 = vpop.f32.mrf.mxu1 }
 0xa69   : > { %v5582_v38 = vadd.f32 %v5581_v7, %v13681_v3 }
 0xa6a   : > { %v5738_v43 = vpop.f32.mrf.mxu2 }
 0xa6b   : > { %v5739_v10 = vadd.f32 %v5738_v43, %v13791_v45  ;;  %v5634_v14 = vmax.f32 %v5582_v38, 0.0  ;;  %v10435_v43 = vor.u32 %v11031_v48, %v10434_v58  ;;  %v10200_v58 = vld [vmem:[%s15473_s15] sm:$0xf]  ;;  %v10971_v48 = vld [vmem:[%s15473_s15 + $0x4] sm:$0xf0] }
 0xa6d   : > { %v5818_v56 = vmax.f32 %v5739_v10, 0.0  ;;  %7185 = vmatpush.bf16.msrb.mxu2 %v10435_v43  ;;  %v10970_v43 = vld [vmem:[%s15473_s15 + $0x4] sm:$0xf] }
 0xa70   : > { %v5583_v18 = vpop.f32.mrf.mxu1 }
 0xa71   : > { %v5584_v9 = vadd.f32 %v5583_v18, %v13681_v3 }
 0xa72   : > { %v5740_v0 = vpop.f32.mrf.mxu2 }
 0xa73   : > { %v5635_v28 = vmax.f32 %v5584_v9, 0.0  ;;  %v5741_v40 = vadd.f32 %v5740_v0, %v13791_v45 }
 0xa75   : > { %v5657_v1 = vpack.c.bf16 %v5635_v28, %v5634_v14  ;;  %v5819_v24 = vmax.f32 %v5741_v40, 0.0 }
 0xa77   : > { %v5850_v31 = vpack.c.bf16 %v5819_v24, %v5818_v56  ;;  %10158 = vmatmul.msk.bf16.gmra.mxu2 %vm4092_vm2, %v5657_v1 }
 0xa78   : > { %v5586_v13 = vpop.f32.mrf.mxu1 }
 0xa79   : > { %10181 = vmatmul.msk.bf16.vlgmr.msra.gmra.mxu3 %vm3889_vm1, %v5850_v31  ;;  %v5587_v26 = vadd.f32 %v5586_v13, %v13681_v3  ;;  %v10209_v13 = vor.u32 %v10973_v4, %v10208_v51 }
 0xa7a   : > { %v5743_v11 = vpop.f32.mrf.mxu2 }
 0xa7b   : > { %v5744_v25 = vadd.f32 %v5743_v11, %v13791_v45  ;;  %v5636_v55 = vmax.f32 %v5587_v26, 0.0  ;;  %v10210_v11 = vld [vmem:[%s15473_s15 + $0x18] sm:$0xf0]  ;;  %6193 = vmatpush.bf16.msrb.mxu0 %v10209_v13 }
 0xa7c   : > { %v10213_v60 = vor.u32 %v10972_v12, %v10210_v11 }
 0xa7d   : > { %v5820_v42 = vmax.f32 %v5744_v25, 0.0 }
 0xa7e   : > { %6282 = vmatpush.bf16.msrb.mxu1 %v10213_v60 }
 0xa80   : > { %v5588_v8 = vpop.f32.mrf.mxu1 }
 0xa81   : > { %v5589_v21 = vadd.f32 %v5588_v8, %v13681_v3 }
 0xa82   : > { %v5745_v6 = vpop.f32.mrf.mxu2 }
 0xa83   : > { %v5637_v59 = vmax.f32 %v5589_v21, 0.0  ;;  %v5746_v61 = vadd.f32 %v5745_v6, %v13791_v45 }
 0xa85   : > { %v5658_v52 = vpack.c.bf16 %v5637_v59, %v5636_v55  ;;  %v5821_v19 = vmax.f32 %v5746_v61, 0.0 }
 0xa87   : > { %v5851_v27 = vpack.c.bf16 %v5821_v19, %v5820_v42  ;;  %10159 = vmatmul.msk.bf16.gmra.mxu2 %vm4092_vm2, %v5658_v52  ;;  %v10406_v19 = vld [vmem:[%s15474_s16 + $0x118] sm:$0xf] }
 0xa88   : > { %v5591_v30 = vpop.f32.mrf.mxu1 }
 0xa89   : > { %10182 = vmatmul.msk.bf16.gmra.mxu3 %vm3889_vm1, %v5851_v27  ;;  %v5592_v57 = vadd.f32 %v5591_v30, %v13681_v3  ;;  %v11024_v27 = vld [vmem:[%s15474_s16 + $0x130] sm:$0xf0] }
 0xa8a   : > { %v5748_v53 = vpop.f32.mrf.mxu2 }
 0xa8b   : > { %v5749_v32 = vadd.f32 %v5748_v53, %v13791_v45  ;;  %v5638_v29 = vmax.f32 %v5592_v57, 0.0  ;;  %v10407_v53 = vor.u32 %v11024_v27, %v10406_v19  ;;  %v10574_v19 = vld [vmem:[%s15474_s16 + $0x268] sm:$0xf]  ;;  %v11066_v27 = vld [vmem:[%s15474_s16 + $0x280] sm:$0xf0] }
 0xa8d   : > { %v5822_v49 = vmax.f32 %v5749_v32, 0.0  ;;  %7186 = vmatpush.bf16.msrb.mxu2 %v10407_v53  ;;  %v10575_v53 = vor.u32 %v11066_v27, %v10574_v19 }
 0xa90   : > { %v5593_v35 = vpop.f32.mrf.mxu1 }
 0xa91   : > { %v5594_v39 = vadd.f32 %v5593_v35, %v13681_v3 }
 0xa92   : > { %v5750_v34 = vpop.f32.mrf.mxu2 }
 0xa93   : > { %v5639_v47 = vmax.f32 %v5594_v39, 0.0  ;;  %v5751_v33 = vadd.f32 %v5750_v34, %v13791_v45 }
 0xa95   : > { %v5659_v36 = vpack.c.bf16 %v5639_v47, %v5638_v29  ;;  %v5823_v2 = vmax.f32 %v5751_v33, 0.0 }
 0xa97   : > { %v5852_v15 = vpack.c.bf16 %v5823_v2, %v5822_v49  ;;  %10160 = vmatmul.msk.bf16.gmra.mxu2 %vm4092_vm2, %v5659_v36 }
 0xa98   : > { %v5596_v7 = vpop.f32.mrf.mxu1 }
 0xa99   : > { %10183 = vmatmul.msk.bf16.gmra.mxu3 %vm3889_vm1, %v5852_v15  ;;  %v5597_v22 = vadd.f32 %v5596_v7, %v13681_v3  ;;  %v10201_v7 = vor.u32 %v10971_v48, %v10200_v58 }
 0xa9a   : > { %v5753_v44 = vpop.f32.mrf.mxu2 }
 0xa9b   : > { %v5754_v17 = vadd.f32 %v5753_v44, %v13791_v45  ;;  %v5640_v9 = vmax.f32 %v5597_v22, 0.0  ;;  %v10202_v44 = vld [vmem:[%s15473_s15 + $0x8] sm:$0xf0]  ;;  %6194 = vmatpush.bf16.msrb.mxu0 %v10201_v7 }
 0xa9c   : > { %v10205_v54 = vor.u32 %v10970_v43, %v10202_v44 }
 0xa9d   : > { %v5824_v28 = vmax.f32 %v5754_v17, 0.0 }
 0xa9e   : > { %6283 = vmatpush.bf16.msrb.mxu1 %v10205_v54 }
 0xaa0   : > { %v5598_v38 = vpop.f32.mrf.mxu1 }
 0xaa1   : > { %v5599_v18 = vadd.f32 %v5598_v38, %v13681_v3 }
 0xaa2   : > { %v5755_v10 = vpop.f32.mrf.mxu2 }
 0xaa3   : > { %v5641_v0 = vmax.f32 %v5599_v18, 0.0  ;;  %v5756_v14 = vadd.f32 %v5755_v10, %v13791_v45 }
 0xaa5   : > { %v5660_v40 = vpack.c.bf16 %v5641_v0, %v5640_v9  ;;  %v5825_v56 = vmax.f32 %v5756_v14, 0.0 }
 0xaa7   : > { %v5853_v1 = vpack.c.bf16 %v5825_v56, %v5824_v28  ;;  %10161 = vmatmul.msk.bf16.gmra.mxu2 %vm4092_vm2, %v5660_v40  ;;  %v10378_v56 = vld [vmem:[%s15474_s16 + $0xe0] sm:$0xf] }
 0xaa8   : > { %v5601_v24 = vpop.f32.mrf.mxu1 }
 0xaa9   : > { %10184 = vmatmul.msk.bf16.gmra.mxu3 %vm3889_vm1, %v5853_v1  ;;  %v5602_v41 = vadd.f32 %v5601_v24, %v13681_v3  ;;  %v10602_v24 = vld [vmem:[%s15474_s16 + $0x2a0] sm:$0xf] }
 0xaaa   : > { %v5758_v31 = vpop.f32.mrf.mxu2 }
 0xaab   : > { %v5759_v26 = vadd.f32 %v5758_v31, %v13791_v45  ;;  %v5642_v21 = vmax.f32 %v5602_v41, 0.0  ;;  %v11073_v31 = vld [vmem:[%s15474_s16 + $0x2b8] sm:$0xf0] }
 0xaac   : > { %v10603_v4 = vor.u32 %v11073_v31, %v10602_v24 }
 0xaad   : > { %v5826_v59 = vmax.f32 %v5759_v26, 0.0 }
 0xaae   : > { %7276 = vmatpush.bf16.msrb.mxu3 %v10603_v4 }
 0xab0   : > { %v5603_v23 = vpop.f32.mrf.mxu1 }
 0xab1   : > { %v5604_v8 = vadd.f32 %v5603_v23, %v13681_v3 }
 0xab2   : > { %v5760_v25 = vpop.f32.mrf.mxu2  ;;  %7277 = vmatpush.bf16.msrb.mxu3 %v10575_v53  ;;  %v10996_v53 = vld [vmem:[%s15474_s16 + $0x50] sm:$0xf0] }
 0xab3   : > { %v5643_v6 = vmax.f32 %v5604_v8, 0.0  ;;  %v5761_v55 = vadd.f32 %v5760_v25, %v13791_v45 }
 0xab5   : > { %v5661_v61 = vpack.c.bf16 %v5643_v6, %v5642_v21  ;;  %v5827_v42 = vmax.f32 %v5761_v55, 0.0 }
 0xab7   : > { %v5854_v52 = vpack.c.bf16 %v5827_v42, %v5826_v59  ;;  %10162 = vmatmul.msk.bf16.gmra.mxu2 %vm4092_vm2, %v5661_v61  ;;  %v10350_v61 = vld [vmem:[%s15474_s16 + $0xa8] sm:$0xf]  ;;  %v11010_v42 = vld [vmem:[%s15474_s16 + $0xc0] sm:$0xf0] }
 0xab8   : > { %v5606_v30 = vpop.f32.mrf.mxu1 }
 0xab9   : > { %10185 = vmatmul.msk.bf16.gmra.mxu3 %vm3889_vm1, %v5854_v52  ;;  %v5607_v5 = vadd.f32 %v5606_v30, %v13681_v3  ;;  %v10351_v52 = vor.u32 %v11010_v42, %v10350_v61 }
 0xaba   : > { %v5763_v20 = vpop.f32.mrf.mxu2 }
 0xabb   : > { %v5764_v16 = vadd.f32 %v5763_v20, %v13791_v45  ;;  %v5644_v39 = vmax.f32 %v5607_v5, 0.0 }
 0xabd   : > { %v5828_v47 = vmax.f32 %v5764_v16, 0.0 }
 0xac0   : > { %v5608_v57 = vpop.f32.mrf.mxu1 }
 0xac1   : > { %v5609_v35 = vadd.f32 %v5608_v57, %v13681_v3 }
 0xac2   : > { %v5765_v32 = vpop.f32.mrf.mxu2 }
 0xac3   : > { %v5645_v34 = vmax.f32 %v5609_v35, 0.0  ;;  %v5766_v29 = vadd.f32 %v5765_v32, %v13791_v45 }
 0xac5   : > { %v5662_v33 = vpack.c.bf16 %v5645_v34, %v5644_v39  ;;  %v5829_v49 = vmax.f32 %v5766_v29, 0.0 }
 0xac7   : > { %v5855_v36 = vpack.c.bf16 %v5829_v49, %v5828_v47  ;;  %10163 = vmatmul.msk.bf16.gmra.mxu2 %vm4092_vm2, %v5662_v33 }
 0xac8   : > { %v5611_v2 = vpop.f32.mrf.mxu1 }
 0xac9   : > { %10186 = vmatmul.msk.bf16.gmra.mxu3 %vm3889_vm1, %v5855_v36  ;;  %v5612_v63 = vadd.f32 %v5611_v2, %v13681_v3 }
 0xaca   : > { %v5768_v15 = vpop.f32.mrf.mxu2 }
 0xacb   : > { %v5769_v22 = vadd.f32 %v5768_v15, %v13791_v45  ;;  %v5646_v18 = vmax.f32 %v5612_v63, 0.0 }
 0xacd   : > { %v5830_v0 = vmax.f32 %v5769_v22, 0.0 }
 0xad0   : > { %v5613_v62 = vpop.f32.mrf.mxu1 }
 0xad1   : > { %v5614_v38 = vadd.f32 %v5613_v62, %v13681_v3  ;;  %v11017_v3 = vld [vmem:[%s15474_s16 + $0xf8] sm:$0xf0] }
 0xad2   : > { %v5770_v17 = vpop.f32.mrf.mxu2  ;;  %v10379_v1 = vor.u32 %v11017_v3, %v10378_v56 }
 0xad3   : > { %v5647_v10 = vmax.f32 %v5614_v38, 0.0  ;;  %v5771_v9 = vadd.f32 %v5770_v17, %v13791_v45  ;;  %v10322_v38 = vld [vmem:[%s15474_s16 + $0x70] sm:$0xf]  ;;  %v11003_v17 = vld [vmem:[%s15474_s16 + $0x88] sm:$0xf0] }
 0xad4   : > { %7187 = vmatpush.bf16.msrb.mxu2 %v10379_v1 }
 0xad5   : > { %v5663_v14 = vpack.c.bf16 %v5647_v10, %v5646_v18  ;;  %v5831_v28 = vmax.f32 %v5771_v9, 0.0  ;;  %v10323_v18 = vor.u32 %v11003_v17, %v10322_v38  ;;  %v10546_v9 = vld [vmem:[%s15474_s16 + $0x230] sm:$0xf] }
 0xad7   : > { %v5856_v40 = vpack.c.bf16 %v5831_v28, %v5830_v0  ;;  %10164 = vmatmul.msk.bf16.gmra.mxu2 %vm4092_vm2, %v5663_v14  ;;  %v11059_v0 = vld [vmem:[%s15474_s16 + $0x248] sm:$0xf0] }
 0xad8   : > { %7188 = vmatpush.bf16.msrb.mxu2 %v10351_v52  ;;  %v10547_v28 = vor.u32 %v11059_v0, %v10546_v9 }
 0xad9   : > { %10187 = vmatmul.msk.bf16.gmra.mxu3 %vm3889_vm1, %v5856_v40 }
 0xada   : > { %v5773_v51 = vpop.f32.mrf.mxu2  ;;  %7278 = vmatpush.bf16.msrb.mxu3 %v10547_v28  ;;  %v10989_v28 = vld [vmem:[%s15474_s16 + $0x18] sm:$0xf0] }
 0xadb   : > { %v5774_v13 = vadd.f32 %v5773_v51, %v13791_v45 }
 0xadc   : > { %7189 = vmatpush.bf16.msrb.mxu2 %v10323_v18 }
 0xadd   : > { %v5832_v41 = vmax.f32 %v5774_v13, 0.0 }
 0xae2   : > { %v5775_v12 = vpop.f32.mrf.mxu2 }
 0xae3   : > { %v5776_v11 = vadd.f32 %v5775_v12, %v13791_v45 }
 0xae5   : > { %v5833_v60 = vmax.f32 %v5776_v11, 0.0 }
 0xae7   : > { %v5857_v23 = vpack.c.bf16 %v5833_v60, %v5832_v41 }
 0xae9   : > { %10188 = vmatmul.msk.bf16.gmra.mxu3 %vm3889_vm1, %v5857_v23 }
 0xaea   : > { %v5778_v26 = vpop.f32.mrf.mxu2 }
 0xaeb   : > { %v5779_v8 = vadd.f32 %v5778_v26, %v13791_v45 }
 0xaed   : > { %v5834_v6 = vmax.f32 %v5779_v8, 0.0 }
 0xaf2   : > { %v5780_v25 = vpop.f32.mrf.mxu2 }
 0xaf3   : > { %v5781_v21 = vadd.f32 %v5780_v25, %v13791_v45 }
 0xaf5   : > { %v5835_v55 = vmax.f32 %v5781_v21, 0.0 }
 0xaf7   : > { %v5858_v59 = vpack.c.bf16 %v5835_v55, %v5834_v6 }
 0xaf9   : > { %10189 = vmatmul.msk.bf16.gmra.mxu3 %vm3889_vm1, %v5858_v59 }
 0xafa   : > { %v5783_v30 = vpop.f32.mrf.mxu2 }
 0xafb   : > { %v5784_v20 = vadd.f32 %v5783_v30, %v13791_v45  ;;  %v10294_v30 = vld [vmem:[%s15474_s16 + $0x38] sm:$0xf] }
 0xafc   : > { %v5956_v46 = vpop.f32.mrf.mxu3 }
 0xafd   : > { %v5957_v5 = vadd.f32 %v5956_v46, %v13946_v50  ;;  %v5836_v35 = vmax.f32 %v5784_v20, 0.0  ;;  %v10295_v46 = vor.u32 %v10996_v53, %v10294_v30 }
 0xaff   : > { %v6036_v34 = vmax.f32 %v5957_v5, 0.0  ;;  %v11052_v5 = vld [vmem:[%s15474_s16 + $0x210] sm:$0xf0]  ;;  %7190 = vmatpush.bf16.msrb.mxu2 %v10295_v46  ;;  %v10694_v46 = vld [vmem:[%s15474_s16 + $0x350] sm:$0xf] }
 0xb02   : > { %v5785_v37 = vpop.f32.mrf.mxu2 }
 0xb03   : > { %v5786_v57 = vadd.f32 %v5785_v37, %v13791_v45  ;;  %v10518_v37 = vld [vmem:[%s15474_s16 + $0x1f8] sm:$0xf] }
 0xb04   : > { %v5958_v16 = vpop.f32.mrf.mxu3 }
 0xb05   : > { %v5837_v32 = vmax.f32 %v5786_v57, 0.0  ;;  %v5959_v39 = vadd.f32 %v5958_v16, %v13946_v50  ;;  %v10519_v16 = vor.u32 %v11052_v5, %v10518_v37 }
 0xb07   : > { %v5859_v29 = vpack.c.bf16 %v5837_v32, %v5836_v35  ;;  %v6037_v47 = vmax.f32 %v5959_v39, 0.0  ;;  %7279 = vmatpush.bf16.msrb.mxu3 %v10519_v16  ;;  %v10464_v16 = vld [vmem:[%s15474_s16 + $0x1a4] sm:$0xf0] }
 0xb09   : > { %v6068_v33 = vpack.c.bf16 %v6037_v47, %v6036_v34  ;;  %10190 = vmatmul.msk.bf16.gmra.mxu3 %vm3889_vm1, %v5859_v29 }
 0xb0a   : > { %v5788_v49 = vpop.f32.mrf.mxu2 }
 0xb0b   : > { %6195 = vmatmul.bf16.vlgmr.msrb.gmra.mxu0 %v6068_v33  ;;  %6284 = vmatmul.bf16.vlgmr.msrb.gmra.mxu1 %v6068_v33  ;;  %v5789_v2 = vadd.f32 %v5788_v49, %v13791_v45 }
 0xb0c   : > { %v5961_v36 = vpop.f32.mrf.mxu3 }
 0xb0d   : > { %v5962_v58 = vadd.f32 %v5961_v36, %v13946_v50  ;;  %v5838_v43 = vmax.f32 %v5789_v2, 0.0 }
 0xb0f   : > { %v6038_v54 = vmax.f32 %v5962_v58, 0.0 }
 0xb12   : > { %v5790_v15 = vpop.f32.mrf.mxu2 }
 0xb13   : > { %v5791_v48 = vadd.f32 %v5790_v15, %v13791_v45 }
 0xb14   : > { %v5963_v7 = vpop.f32.mrf.mxu3 }
 0xb15   : > { %v5839_v44 = vmax.f32 %v5791_v48, 0.0  ;;  %v5964_v63 = vadd.f32 %v5963_v7, %v13946_v50 }
 0xb17   : > { %v5860_v62 = vpack.c.bf16 %v5839_v44, %v5838_v43  ;;  %v6039_v22 = vmax.f32 %v5964_v63, 0.0 }
 0xb19   : > { %10191 = vmatmul.msk.bf16.gmra.mxu3 %vm3889_vm1, %v5860_v62  ;;  %v6069_v10 = vpack.c.bf16 %v6039_v22, %v6038_v54 }
 0xb1a   : > { %v5793_v14 = vpop.f32.mrf.mxu2 }
 0xb1b   : > { %6200 = vmatmul.bf16.gmra.mxu0 %v6069_v10  ;;  %6289 = vmatmul.bf16.gmra.mxu1 %v6069_v10  ;;  %v5794_v56 = vadd.f32 %v5793_v14, %v13791_v45  ;;  %v10266_v14 = vld [vmem:[%s15474_s16] sm:$0xf] }
 0xb1c   : > { %v5966_v40 = vpop.f32.mrf.mxu3 }
 0xb1d   : > { %v5967_v1 = vadd.f32 %v5966_v40, %v13946_v50  ;;  %v5840_v51 = vmax.f32 %v5794_v56, 0.0  ;;  %v10267_v40 = vor.u32 %v10989_v28, %v10266_v14  ;;  %v10490_v56 = vld [vmem:[%s15474_s16 + $0x1c0] sm:$0xf] }
 0xb1f   : > { %v6040_v12 = vmax.f32 %v5967_v1, 0.0  ;;  %7191 = vmatpush.bf16.msrb.mxu2 %v10267_v40 }
 0xb22   : > { %v5795_v3 = vpop.f32.mrf.mxu2 }
 0xb23   : > { %v5796_v24 = vadd.f32 %v5795_v3, %v13791_v45  ;;  %v11045_v3 = vld [vmem:[%s15474_s16 + $0x1d8] sm:$0xf0] }
 0xb24   : > { %v5968_v31 = vpop.f32.mrf.mxu3 }
 0xb25   : > { %v5841_v4 = vmax.f32 %v5796_v24, 0.0  ;;  %v5969_v13 = vadd.f32 %v5968_v31, %v13946_v50  ;;  %v10491_v24 = vor.u32 %v11045_v3, %v10490_v56 }
 0xb27   : > { %v5861_v11 = vpack.c.bf16 %v5841_v4, %v5840_v51  ;;  %v6041_v41 = vmax.f32 %v5969_v13, 0.0  ;;  %7280 = vmatpush.bf16.msrb.mxu3 %v10491_v24 }
 0xb29   : > { %10192 = vmatmul.msk.bf16.gmra.mxu3 %vm3889_vm1, %v5861_v11  ;;  %v6070_v60 = vpack.c.bf16 %v6041_v41, %v6040_v12 }
 0xb2a   : > { %v5798_v23 = vpop.f32.mrf.mxu2 }
 0xb2b   : > { %6205 = vmatmul.bf16.gmra.mxu0 %v6070_v60  ;;  %6294 = vmatmul.bf16.gmra.mxu1 %v6070_v60  ;;  %v5799_v8 = vadd.f32 %v5798_v23, %v13791_v45 }
 0xb2c   : > { %v5971_v26 = vpop.f32.mrf.mxu3 }
 0xb2d   : > { %v5972_v21 = vadd.f32 %v5971_v26, %v13946_v50  ;;  %v5842_v59 = vmax.f32 %v5799_v8, 0.0 }
 0xb2f   : > { %v6042_v52 = vmax.f32 %v5972_v21, 0.0 }
 0xb32   : > { %v5800_v25 = vpop.f32.mrf.mxu2 }
 0xb33   : > { %v5801_v6 = vadd.f32 %v5800_v25, %v13791_v45 }
 0xb34   : > { %v5973_v55 = vpop.f32.mrf.mxu3 }
 0xb35   : > { %v5843_v61 = vmax.f32 %v5801_v6, 0.0  ;;  %v5974_v42 = vadd.f32 %v5973_v55, %v13946_v50 }
 0xb37   : > { %v5862_v19 = vpack.c.bf16 %v5843_v61, %v5842_v59  ;;  %v6043_v27 = vmax.f32 %v5974_v42, 0.0 }
 0xb39   : > { %10193 = vmatmul.msk.bf16.gmra.mxu3 %vm3889_vm1, %v5862_v19  ;;  %v6071_v20 = vpack.c.bf16 %v6043_v27, %v6042_v52  ;;  %v10470_v19 = vld [vmem:[%s15474_s16 + $0x190] sm:$0xf]  ;;  %v11039_v27 = vld [vmem:[%s15474_s16 + $0x1a8] sm:$0xf0] }
 0xb3a   : > { %v5803_v57 = vpop.f32.mrf.mxu2  ;;  %v10471_v30 = vor.u32 %v11039_v27, %v10470_v19 }
 0xb3b   : > { %6210 = vmatmul.bf16.gmra.mxu0 %v6071_v20  ;;  %6299 = vmatmul.bf16.gmra.mxu1 %v6071_v20  ;;  %v5804_v32 = vadd.f32 %v5803_v57, %v13791_v45  ;;  %v11095_v20 = vld [vmem:[%s15474_s16 + $0x368] sm:$0xf0] }
 0xb3c   : > { %v5976_v35 = vpop.f32.mrf.mxu3  ;;  %7540 = vmatpush.bf16.msra.mxu2 %v10471_v30  ;;  %v10695_v5 = vor.u32 %v11095_v20, %v10694_v46  ;;  %v11035_v57 = vld [vmem:[%s15474_s16 + $0x18c] sm:$0xf] }
 0xb3d   : > { %v5977_v34 = vadd.f32 %v5976_v35, %v13946_v50  ;;  %v5844_v33 = vmax.f32 %v5804_v32, 0.0  ;;  %v10467_v35 = vor.u32 %v11035_v57, %v10464_v16  ;;  %v11091_v32 = vld [vmem:[%s15474_s16 + $0x34c] sm:$0xf] }
 0xb3e   : > { %7629 = vmatpush.bf16.msra.mxu3 %v10695_v5 }
 0xb3f   : > { %v6044_v2 = vmax.f32 %v5977_v34, 0.0  ;;  %7362 = vmatpush.bf16.msra.mxu0 %v10467_v35 }
 0xb42   : > { %v5805_v39 = vpop.f32.mrf.mxu2 }
 0xb43   : > { %v5806_v29 = vadd.f32 %v5805_v39, %v13791_v45  ;;  %v10688_v39 = vld [vmem:[%s15474_s16 + $0x364] sm:$0xf0] }
 0xb44   : > { %v5978_v47 = vpop.f32.mrf.mxu3  ;;  %v10691_v34 = vor.u32 %v11091_v32, %v10688_v39 }
 0xb45   : > { %v5845_v49 = vmax.f32 %v5806_v29, 0.0  ;;  %v5979_v36 = vadd.f32 %v5978_v47, %v13946_v50 }
 0xb46   : > { %7451 = vmatpush.bf16.msra.mxu1 %v10691_v34 }
 0xb47   : > { %v5863_v15 = vpack.c.bf16 %v5845_v49, %v5844_v33  ;;  %v6045_v58 = vmax.f32 %v5979_v36, 0.0 }
 0xb49   : > { %10194 = vmatmul.msk.bf16.gmra.mxu3 %vm3889_vm1, %v5863_v15  ;;  %v6072_v48 = vpack.c.bf16 %v6045_v58, %v6044_v2  ;;  %v10197_v2 = vld [vmem:[%s15475_s17 + $0x3e] ss:$8 sm:$0x3] }
 0xb4a   : > { %v5808_v7 = vpop.f32.mrf.mxu2 }
 0xb4b   : > { %6215 = vmatmul.bf16.gmra.mxu0 %v6072_v48  ;;  %6304 = vmatmul.bf16.gmra.mxu1 %v6072_v48  ;;  %v5809_v44 = vadd.f32 %v5808_v7, %v13791_v45  ;;  %v14050_v7 = vperm.slane %v10197_v2, 0 }
 0xb4c   : > { %v5981_v43 = vpop.f32.mrf.mxu3 }
 0xb4d   : > { %v5982_v54 = vadd.f32 %v5981_v43, %v13946_v50  ;;  %v5846_v38 = vmax.f32 %v5809_v44, 0.0  ;;  %v14052_v43 = vperm.slane %v10197_v2, 1 }
 0xb4f   : > { %v6046_v10 = vmax.f32 %v5982_v54, 0.0 }
 0xb52   : > { %v5810_v63 = vpop.f32.mrf.mxu2 }
 0xb53   : > { %v5811_v62 = vadd.f32 %v5810_v63, %v13791_v45 }
 0xb54   : > { %v5983_v22 = vpop.f32.mrf.mxu3 }
 0xb55   : > { %v5847_v17 = vmax.f32 %v5811_v62, 0.0  ;;  %v5984_v18 = vadd.f32 %v5983_v22, %v13946_v50 }
 0xb57   : > { %v5864_v9 = vpack.c.bf16 %v5847_v17, %v5846_v38  ;;  %v6047_v0 = vmax.f32 %v5984_v18, 0.0 }
 0xb59   : > { %10195 = vmatmul.msk.bf16.gmra.mxu3 %vm3889_vm1, %v5864_v9  ;;  %v6073_v1 = vpack.c.bf16 %v6047_v0, %v6046_v10 }
 0xb5a   : > { %v5813_v31 = vpop.f32.mrf.mxu2 }
 0xb5b   : > { %6220 = vmatmul.bf16.gmra.mxu0 %v6073_v1  ;;  %6309 = vmatmul.bf16.gmra.mxu1 %v6073_v1  ;;  %v5814_v4 = vadd.f32 %v5813_v31, %v13791_v45  ;;  %v10442_v31 = vld [vmem:[%s15474_s16 + $0x158] sm:$0xf] }
 0xb5c   : > { %v5986_v51 = vpop.f32.mrf.mxu3 }
 0xb5d   : > { %v5987_v12 = vadd.f32 %v5986_v51, %v13946_v50  ;;  %v5848_v60 = vmax.f32 %v5814_v4, 0.0  ;;  %v11032_v51 = vld [vmem:[%s15474_s16 + $0x170] sm:$0xf0] }
 0xb5f   : > { %v6048_v8 = vmax.f32 %v5987_v12, 0.0  ;;  %v10443_v12 = vor.u32 %v11032_v51, %v10442_v31  ;;  %v10638_v51 = vld [vmem:[%s15474_s16 + $0x2e0] sm:$0xf] }
 0xb61   : > { %7541 = vmatpush.bf16.msra.mxu2 %v10443_v12 }
 0xb62   : > { %v5815_v13 = vpop.f32.mrf.mxu2 }
 0xb63   : > { %v5816_v11 = vadd.f32 %v5815_v13, %v13791_v45 }
 0xb64   : > { %v5988_v41 = vpop.f32.mrf.mxu3 }
 0xb65   : > { %v5849_v23 = vmax.f32 %v5816_v11, 0.0  ;;  %v5989_v26 = vadd.f32 %v5988_v41, %v13946_v50  ;;  %v10666_v41 = vld [vmem:[%s15474_s16 + $0x318] sm:$0xf] }
 0xb67   : > { %v5865_v25 = vpack.c.bf16 %v5849_v23, %v5848_v60  ;;  %v6049_v21 = vmax.f32 %v5989_v26, 0.0  ;;  %v11088_v60 = vld [vmem:[%s15474_s16 + $0x330] sm:$0xf0] }
 0xb68   : > { %v10667_v26 = vor.u32 %v11088_v60, %v10666_v41  ;;  %v11021_v60 = vld [vmem:[%s15474_s16 + $0x11c] sm:$0xf] }
 0xb69   : > { %10196 = vmatmul.msk.bf16.gmra.mxu3 %vm3889_vm1, %v5865_v25  ;;  %v6074_v6 = vpack.c.bf16 %v6049_v21, %v6048_v8  ;;  %v11028_v21 = vld [vmem:[%s15474_s16 + $0x154] sm:$0xf] }
 0xb6a   : > { %7630 = vmatpush.bf16.msra.mxu3 %v10667_v26 }
 0xb6b   : > { %6225 = vmatmul.bf16.gmra.mxu0 %v6074_v6  ;;  %6314 = vmatmul.bf16.gmra.mxu1 %v6074_v6  ;;  %v10436_v6 = vld [vmem:[%s15474_s16 + $0x16c] sm:$0xf0] }
 0xb6c   : > { %v5991_v55 = vpop.f32.mrf.mxu3 }
 0xb6d   : > { %v5992_v59 = vadd.f32 %v5991_v55, %v13946_v50 }
 0xb6f   : > { %v6050_v45 = vmax.f32 %v5992_v59, 0.0 }
 0xb74   : > { %v5993_v61 = vpop.f32.mrf.mxu3 }
 0xb75   : > { %v5994_v42 = vadd.f32 %v5993_v61, %v13946_v50  ;;  %v10439_v61 = vor.u32 %v11028_v21, %v10436_v6  ;;  %v11077_v21 = vld [vmem:[%s15474_s16 + $0x2dc] sm:$0xf]  ;;  %v10632_v6 = vld [vmem:[%s15474_s16 + $0x2f4] sm:$0xf0] }
 0xb77   : > { %v6051_v52 = vmax.f32 %v5994_v42, 0.0  ;;  %v11084_v42 = vld [vmem:[%s15474_s16 + $0x314] sm:$0xf]  ;;  %7363 = vmatpush.bf16.msra.mxu0 %v10439_v61  ;;  %v10635_v61 = vor.u32 %v11077_v21, %v10632_v6 }
 0xb79   : > { %v6075_v53 = vpack.c.bf16 %v6051_v52, %v6050_v45  ;;  %v10660_v45 = vld [vmem:[%s15474_s16 + $0x32c] sm:$0xf0] }
 0xb7a   : > { %v10663_v27 = vor.u32 %v11084_v42, %v10660_v45 }
 0xb7b   : > { %6230 = vmatmul.bf16.gmra.mxu0 %v6075_v53  ;;  %6319 = vmatmul.bf16.gmra.mxu1 %v6075_v53 }
 0xb7c   : > { %v5996_v37 = vpop.f32.mrf.mxu3  ;;  %7452 = vmatpush.bf16.msra.mxu1 %v10663_v27 }
 0xb7d   : > { %v5997_v29 = vadd.f32 %v5996_v37, %v13946_v50 }
 0xb7f   : > { %v6052_v49 = vmax.f32 %v5997_v29, 0.0 }
 0xb80   : > { %7453 = vmatpush.bf16.msra.mxu1 %v10635_v61 }
 0xb84   : > { %v5998_v47 = vpop.f32.mrf.mxu3 }
 0xb85   : > { %v5999_v33 = vadd.f32 %v5998_v47, %v13946_v50 }
 0xb87   : > { %v6053_v36 = vmax.f32 %v5999_v33, 0.0 }
 0xb88   : > { %v6196_v15 = vpop.f32.mrf.mxu0  ;;  %v6285_v58 = vpop.f32.mrf.mxu1 }
 0xb89   : > { %v6076_v48 = vpack.c.bf16 %v6053_v36, %v6052_v49  ;;  %v6197_v63 = vadd.f32 %v6196_v15, %v14050_v7  ;;  %v6286_v54 = vadd.f32 %v6285_v58, %v14052_v43 }
 0xb8b   : > { %6235 = vmatmul.bf16.gmra.mxu0 %v6076_v48  ;;  %6324 = vmatmul.bf16.gmra.mxu1 %v6076_v48  ;;  %v6365_v18 = vmax.f32 %v6197_v63, 0.0  ;;  %v6366_v10 = vmax.f32 %v6286_v54, 0.0 }
 0xb8c   : > { %v6001_v44 = vpop.f32.mrf.mxu3 }
 0xb8d   : > { %v6002_v9 = vadd.f32 %v6001_v44, %v13946_v50 }
 0xb8f   : > { %v6054_v1 = vmax.f32 %v6002_v9, 0.0 }
 0xb90   : > { %v6198_v62 = vpop.f32.mrf.mxu0  ;;  %v6287_v22 = vpop.f32.mrf.mxu1 }
 0xb91   : > { %v6199_v38 = vadd.f32 %v6198_v62, %v14050_v7  ;;  %v6288_v17 = vadd.f32 %v6287_v22, %v14052_v43 }
 0xb93   : > { %v6367_v0 = vmax.f32 %v6199_v38, 0.0  ;;  %v6368_v14 = vmax.f32 %v6288_v17, 0.0 }
 0xb94   : > { %v6003_v28 = vpop.f32.mrf.mxu3 }
 0xb95   : > { %v14059_v40 = vpack.c.bf16 %v6367_v0, %v6365_v18  ;;  %v14061_v56 = vpack.c.bf16 %v6368_v14, %v6366_v10  ;;  %v6004_v3 = vadd.f32 %v6003_v28, %v13946_v50  ;;  %v10414_v14 = vld [vmem:[%s15474_s16 + $0x120] sm:$0xf]  ;;  %v11025_v28 = vld [vmem:[%s15474_s16 + $0x138] sm:$0xf0] }
 0xb97   : > { %v6055_v24 = vmax.f32 %v6004_v3, 0.0  ;;  %7192 = vmatmul.bf16.vlgmr.msrb.gmra.mxu2 %v14059_v40  ;;  %7281 = vmatmul.bf16.vlgmr.msrb.gmra.mxu3 %v14061_v56 }
 0xb98   : > { %v6201_v4 = vpop.f32.mrf.mxu0  ;;  %v6290_v13 = vpop.f32.mrf.mxu1 }
 0xb99   : > { %v6077_v11 = vpack.c.bf16 %v6055_v24, %v6054_v1  ;;  %v6202_v8 = vadd.f32 %v6201_v4, %v14050_v7  ;;  %v6291_v25 = vadd.f32 %v6290_v13, %v14052_v43  ;;  %v10415_v24 = vor.u32 %v11025_v28, %v10414_v14  ;;  %v11081_v4 = vld [vmem:[%s15474_s16 + $0x2f8] sm:$0xf0] }
 0xb9a   : > { %v10639_v12 = vor.u32 %v11081_v4, %v10638_v51 }
 0xb9b   : > { %6240 = vmatmul.bf16.gmra.mxu0 %v6077_v11  ;;  %6329 = vmatmul.bf16.gmra.mxu1 %v6077_v11  ;;  %v6369_v30 = vmax.f32 %v6202_v8, 0.0  ;;  %v6370_v53 = vmax.f32 %v6291_v25, 0.0 }
 0xb9c   : > { %v6006_v23 = vpop.f32.mrf.mxu3  ;;  %7542 = vmatpush.bf16.msra.mxu2 %v10415_v24  ;;  %7631 = vmatpush.bf16.msra.mxu3 %v10639_v12 }
 0xb9d   : > { %v6007_v46 = vadd.f32 %v6006_v23, %v13946_v50  ;;  %v10408_v23 = vld [vmem:[%s15474_s16 + $0x134] sm:$0xf0] }
 0xb9e   : > { %v10411_v25 = vor.u32 %v11021_v60, %v10408_v23  ;;  %v10352_v60 = vld [vmem:[%s15474_s16 + $0xc4] sm:$0xf0]  ;;  %v11063_v23 = vld [vmem:[%s15474_s16 + $0x26c] sm:$0xf] }
 0xb9f   : > { %v6056_v32 = vmax.f32 %v6007_v46, 0.0 }
 0xba0   : > { %v6203_v55 = vpop.f32.mrf.mxu0  ;;  %v6292_v59 = vpop.f32.mrf.mxu1  ;;  %7364 = vmatpush.bf16.msra.mxu0 %v10411_v25 }
 0xba1   : > { %v6204_v52 = vadd.f32 %v6203_v55, %v14050_v7  ;;  %v6293_v19 = vadd.f32 %v6292_v59, %v14052_v43 }
 0xba3   : > { %v6371_v20 = vmax.f32 %v6204_v52, 0.0  ;;  %v6372_v37 = vmax.f32 %v6293_v19, 0.0 }
 0xba4   : > { %v6008_v5 = vpop.f32.mrf.mxu3 }
 0xba5   : > { %v14095_v57 = vpack.c.bf16 %v6371_v20, %v6369_v30  ;;  %v14097_v16 = vpack.c.bf16 %v6372_v37, %v6370_v53  ;;  %v6009_v35 = vadd.f32 %v6008_v5, %v13946_v50 }
 0xba7   : > { %v6057_v39 = vmax.f32 %v6009_v35, 0.0  ;;  %7197 = vmatmul.bf16.gmra.mxu2 %v14095_v57  ;;  %7286 = vmatmul.bf16.gmra.mxu3 %v14097_v16 }
 0xba8   : > { %v6206_v34 = vpop.f32.mrf.mxu0  ;;  %v6295_v29 = vpop.f32.mrf.mxu1 }
 0xba9   : > { %v6078_v47 = vpack.c.bf16 %v6057_v39, %v6056_v32  ;;  %v6207_v49 = vadd.f32 %v6206_v34, %v14050_v7  ;;  %v6296_v36 = vadd.f32 %v6295_v29, %v14052_v43 }
 0xbab   : > { %6245 = vmatmul.bf16.gmra.mxu0 %v6078_v47  ;;  %6334 = vmatmul.bf16.gmra.mxu1 %v6078_v47  ;;  %v6373_v44 = vmax.f32 %v6207_v49, 0.0  ;;  %v6374_v63 = vmax.f32 %v6296_v36, 0.0 }
 0xbac   : > { %v6011_v33 = vpop.f32.mrf.mxu3 }
 0xbad   : > { %v6012_v54 = vadd.f32 %v6011_v33, %v13946_v50 }
 0xbaf   : > { %v6058_v9 = vmax.f32 %v6012_v54, 0.0 }
 0xbb0   : > { %v6208_v2 = vpop.f32.mrf.mxu0  ;;  %v6297_v15 = vpop.f32.mrf.mxu1 }
 0xbb1   : > { %v6209_v58 = vadd.f32 %v6208_v2, %v14050_v7  ;;  %v6298_v48 = vadd.f32 %v6297_v15, %v14052_v43 }
 0xbb3   : > { %v6375_v62 = vmax.f32 %v6209_v58, 0.0  ;;  %v6376_v22 = vmax.f32 %v6298_v48, 0.0 }
 0xbb4   : > { %v6013_v38 = vpop.f32.mrf.mxu3 }
 0xbb5   : > { %v14107_v17 = vpack.c.bf16 %v6375_v62, %v6373_v44  ;;  %v14109_v18 = vpack.c.bf16 %v6376_v22, %v6374_v63  ;;  %v6014_v10 = vadd.f32 %v6013_v38, %v13946_v50 }
 0xbb7   : > { %v6059_v0 = vmax.f32 %v6014_v10, 0.0  ;;  %7202 = vmatmul.bf16.gmra.mxu2 %v14107_v17  ;;  %7291 = vmatmul.bf16.gmra.mxu3 %v14109_v18  ;;  %v11014_v10 = vld [vmem:[%s15474_s16 + $0xe4] sm:$0xf] }
 0xbb8   : > { %v6211_v3 = vpop.f32.mrf.mxu0  ;;  %v6300_v1 = vpop.f32.mrf.mxu1 }
 0xbb9   : > { %v6079_v31 = vpack.c.bf16 %v6059_v0, %v6058_v9  ;;  %v6212_v11 = vadd.f32 %v6211_v3, %v14050_v7  ;;  %v6301_v41 = vadd.f32 %v6300_v1, %v14052_v43  ;;  %v10380_v9 = vld [vmem:[%s15474_s16 + $0xfc] sm:$0xf0]  ;;  %v11070_v0 = vld [vmem:[%s15474_s16 + $0x2a4] sm:$0xf]  ;;  %v10386_v3 = vld [vmem:[%s15474_s16 + $0xe8] sm:$0xf] }
 0xbba   : > { %v11018_v1 = vld [vmem:[%s15474_s16 + $0x100] sm:$0xf0]  ;;  %v10383_v24 = vor.u32 %v11014_v10, %v10380_v9  ;;  %v10268_v9 = vld [vmem:[%s15474_s16 + $0x1c] sm:$0xf0] }
 0xbbb   : > { %6250 = vmatmul.bf16.gmra.mxu0 %v6079_v31  ;;  %6339 = vmatmul.bf16.gmra.mxu1 %v6079_v31  ;;  %v6377_v42 = vmax.f32 %v6212_v11, 0.0  ;;  %v6378_v45 = vmax.f32 %v6301_v41, 0.0  ;;  %v10387_v4 = vor.u32 %v11018_v1, %v10386_v3  ;;  %v11007_v41 = vld [vmem:[%s15474_s16 + $0xac] sm:$0xf]  ;;  %v10986_v10 = vld [vmem:[%s15474_s16 + $0x4] sm:$0xf] }
 0xbbc   : > { %v6016_v13 = vpop.f32.mrf.mxu3  ;;  %7365 = vmatpush.bf16.msra.mxu0 %v10383_v24  ;;  %v10355_v25 = vor.u32 %v11007_v41, %v10352_v60  ;;  %v10271_v3 = vor.u32 %v10986_v10, %v10268_v9  ;;  %v10492_v1 = vld [vmem:[%s15474_s16 + $0x1dc] sm:$0xf0] }
 0xbbd   : > { %v6017_v52 = vadd.f32 %v6016_v13, %v13946_v50  ;;  %v10604_v13 = vld [vmem:[%s15474_s16 + $0x2bc] sm:$0xf0]  ;;  %7543 = vmatpush.bf16.msra.mxu2 %v10387_v4 }
 0xbbe   : > { %v10607_v11 = vor.u32 %v11070_v0, %v10604_v13  ;;  %v11042_v0 = vld [vmem:[%s15474_s16 + $0x1c4] sm:$0xf] }
 0xbbf   : > { %v6060_v37 = vmax.f32 %v6017_v52, 0.0  ;;  %v10324_v52 = vld [vmem:[%s15474_s16 + $0x8c] sm:$0xf0] }
 0xbc0   : > { %v6213_v26 = vpop.f32.mrf.mxu0  ;;  %v6302_v8 = vpop.f32.mrf.mxu1  ;;  %7454 = vmatpush.bf16.msra.mxu1 %v10607_v11  ;;  %7366 = vmatpush.bf16.msra.mxu0 %v10355_v25 }
 0xbc1   : > { %v6214_v55 = vadd.f32 %v6213_v26, %v14050_v7  ;;  %v6303_v59 = vadd.f32 %v6302_v8, %v14052_v43  ;;  %v10610_v26 = vld [vmem:[%s15474_s16 + $0x2a8] sm:$0xf]  ;;  %v11074_v8 = vld [vmem:[%s15474_s16 + $0x2c0] sm:$0xf0] }
 0xbc2   : > { %v10611_v6 = vor.u32 %v11074_v8, %v10610_v26 }
 0xbc3   : > { %v6379_v19 = vmax.f32 %v6214_v55, 0.0  ;;  %v6380_v27 = vmax.f32 %v6303_v59, 0.0  ;;  %v10576_v55 = vld [vmem:[%s15474_s16 + $0x284] sm:$0xf0] }
 0xbc4   : > { %v6018_v30 = vpop.f32.mrf.mxu3  ;;  %7632 = vmatpush.bf16.msra.mxu3 %v10611_v6 }
 0xbc5   : > { %v14143_v53 = vpack.c.bf16 %v6379_v19, %v6377_v42  ;;  %v14145_v46 = vpack.c.bf16 %v6380_v27, %v6378_v45  ;;  %v6019_v20 = vadd.f32 %v6018_v30, %v13946_v50  ;;  %v10579_v42 = vor.u32 %v11063_v23, %v10576_v55  ;;  %v11000_v45 = vld [vmem:[%s15474_s16 + $0x74] sm:$0xf]  ;;  %v10548_v30 = vld [vmem:[%s15474_s16 + $0x24c] sm:$0xf0] }
 0xbc6   : > { %v11056_v19 = vld [vmem:[%s15474_s16 + $0x234] sm:$0xf]  ;;  %v10327_v27 = vor.u32 %v11000_v45, %v10324_v52 }
 0xbc7   : > { %v6061_v5 = vmax.f32 %v6019_v20, 0.0  ;;  %7207 = vmatmul.bf16.gmra.mxu2 %v14143_v53  ;;  %7296 = vmatmul.bf16.gmra.mxu3 %v14145_v46 }
 0xbc8   : > { %v6216_v35 = vpop.f32.mrf.mxu0  ;;  %v6305_v32 = vpop.f32.mrf.mxu1  ;;  %7455 = vmatpush.bf16.msra.mxu1 %v10579_v42  ;;  %7367 = vmatpush.bf16.msra.mxu0 %v10327_v27  ;;  %v10358_v27 = vld [vmem:[%s15474_s16 + $0xb0] sm:$0xf] }
 0xbc9   : > { %v6080_v39 = vpack.c.bf16 %v6061_v5, %v6060_v37  ;;  %v6217_v29 = vadd.f32 %v6216_v35, %v14050_v7  ;;  %v6306_v47 = vadd.f32 %v6305_v32, %v14052_v43  ;;  %v10551_v5 = vor.u32 %v11056_v19, %v10548_v30  ;;  %v11011_v30 = vld [vmem:[%s15474_s16 + $0xc8] sm:$0xf0] }
 0xbcb   : > { %6255 = vmatmul.bf16.gmra.mxu0 %v6080_v39  ;;  %6344 = vmatmul.bf16.gmra.mxu1 %v6080_v39  ;;  %v6381_v15 = vmax.f32 %v6217_v29, 0.0  ;;  %v6382_v58 = vmax.f32 %v6306_v47, 0.0  ;;  %v10993_v29 = vld [vmem:[%s15474_s16 + $0x3c] sm:$0xf]  ;;  %v10296_v47 = vld [vmem:[%s15474_s16 + $0x54] sm:$0xf0] }
 0xbcc   : > { %v6021_v34 = vpop.f32.mrf.mxu3  ;;  %7456 = vmatpush.bf16.msra.mxu1 %v10551_v5  ;;  %v10359_v5 = vor.u32 %v11011_v30, %v10358_v27  ;;  %v11060_v27 = vld [vmem:[%s15474_s16 + $0x250] sm:$0xf0] }
 0xbcd   : > { %v6022_v48 = vadd.f32 %v6021_v34, %v13946_v50 }
 0xbce   : > { %7544 = vmatpush.bf16.msra.mxu2 %v10359_v5 }
 0xbcf   : > { %v6062_v14 = vmax.f32 %v6022_v48, 0.0 }
 0xbd0   : > { %v6218_v33 = vpop.f32.mrf.mxu0  ;;  %v6307_v49 = vpop.f32.mrf.mxu1 }
 0xbd1   : > { %v6219_v36 = vadd.f32 %v6218_v33, %v14050_v7  ;;  %v6308_v2 = vadd.f32 %v6307_v49, %v14052_v43  ;;  %v11049_v33 = vld [vmem:[%s15474_s16 + $0x1fc] sm:$0xf] }
 0xbd3   : > { %v6383_v44 = vmax.f32 %v6219_v36, 0.0  ;;  %v6384_v63 = vmax.f32 %v6308_v2, 0.0 }
 0xbd4   : > { %v6023_v54 = vpop.f32.mrf.mxu3 }
 0xbd5   : > { %v14155_v62 = vpack.c.bf16 %v6383_v44, %v6381_v15  ;;  %v14157_v22 = vpack.c.bf16 %v6384_v63, %v6382_v58  ;;  %v6024_v38 = vadd.f32 %v6023_v54, %v13946_v50  ;;  %v10299_v15 = vor.u32 %v10993_v29, %v10296_v47  ;;  %v10520_v58 = vld [vmem:[%s15474_s16 + $0x214] sm:$0xf0] }
 0xbd6   : > { %v10523_v44 = vor.u32 %v11049_v33, %v10520_v58 }
 0xbd7   : > { %v6063_v28 = vmax.f32 %v6024_v38, 0.0  ;;  %7212 = vmatmul.bf16.gmra.mxu2 %v14155_v62  ;;  %7301 = vmatmul.bf16.gmra.mxu3 %v14157_v22 }
 0xbd8   : > { %v6221_v31 = vpop.f32.mrf.mxu0  ;;  %v6310_v51 = vpop.f32.mrf.mxu1  ;;  %7368 = vmatpush.bf16.msra.mxu0 %v10299_v15  ;;  %7457 = vmatpush.bf16.msra.mxu1 %v10523_v44 }
 0xbd9   : > { %v6081_v12 = vpack.c.bf16 %v6063_v28, %v6062_v14  ;;  %v6222_v59 = vadd.f32 %v6221_v31, %v14050_v7  ;;  %v6311_v61 = vadd.f32 %v6310_v51, %v14052_v43  ;;  %v10495_v51 = vor.u32 %v11042_v0, %v10492_v1 }
 0xbdb   : > { %6260 = vmatmul.bf16.gmra.mxu0 %v6081_v12  ;;  %6349 = vmatmul.bf16.gmra.mxu1 %v6081_v12  ;;  %v6385_v35 = vmax.f32 %v6222_v59, 0.0  ;;  %v6386_v32 = vmax.f32 %v6311_v61, 0.0 }
 0xbdc   : > { %v6026_v21 = vpop.f32.mrf.mxu3  ;;  %7369 = vmatpush.bf16.msra.mxu0 %v10271_v3  ;;  %7458 = vmatpush.bf16.msra.mxu1 %v10495_v51  ;;  %v10263_v3 = vld [vmem:[%s15475_s17 + $0x3f] ss:$8 sm:$0xf0] }
 0xbdd   : > { %v6027_v49 = vadd.f32 %v6026_v21, %v13946_v50 }
 0xbdf   : > { %v6064_v14 = vmax.f32 %v6027_v49, 0.0 }
 0xbe0   : > { %v6223_v20 = vpop.f32.mrf.mxu0  ;;  %v6312_v37 = vpop.f32.mrf.mxu1 }
 0xbe1   : > { %v6224_v39 = vadd.f32 %v6223_v20, %v14050_v7  ;;  %v6313_v34 = vadd.f32 %v6312_v37, %v14052_v43 }
 0xbe3   : > { %v6387_v36 = vmax.f32 %v6224_v39, 0.0  ;;  %v6388_v2 = vmax.f32 %v6313_v34, 0.0 }
 0xbe4   : > { %v6028_v48 = vpop.f32.mrf.mxu3 }
 0xbe5   : > { %v14227_v63 = vpack.c.bf16 %v6387_v36, %v6385_v35  ;;  %v14229_v54 = vpack.c.bf16 %v6388_v2, %v6386_v32  ;;  %v6029_v38 = vadd.f32 %v6028_v48, %v13946_v50  ;;  %v11067_v32 = vld [vmem:[%s15474_s16 + $0x288] sm:$0xf0] }
 0xbe7   : > { %v6065_v28 = vmax.f32 %v6029_v38, 0.0  ;;  %7217 = vmatmul.bf16.gmra.mxu2 %v14227_v63  ;;  %7306 = vmatmul.bf16.gmra.mxu3 %v14229_v54 }
 0xbe8   : > { %v6226_v24 = vpop.f32.mrf.mxu0  ;;  %v6315_v31 = vpop.f32.mrf.mxu1 }
 0xbe9   : > { %v6082_v4 = vpack.c.bf16 %v6065_v28, %v6064_v14  ;;  %v6227_v12 = vadd.f32 %v6226_v24, %v14050_v7  ;;  %v6316_v11 = vadd.f32 %v6315_v31, %v14052_v43  ;;  %v10262_v28 = vld [vmem:[%s15475_s17 + $0x3f] ss:$8 sm:$0xf] }
 0xbeb   : > { %6265 = vmatmul.bf16.gmra.mxu0 %v6082_v4  ;;  %6354 = vmatmul.bf16.gmra.mxu1 %v6082_v4  ;;  %v6389_v8 = vmax.f32 %v6227_v12, 0.0  ;;  %v6390_v25 = vmax.f32 %v6316_v11, 0.0  ;;  %v14292_v4 = vor.u32 %v10263_v3, %v10262_v28 }
 0xbec   : > { %v6031_v13 = vpop.f32.mrf.mxu3 }
 0xbed   : > { %v6032_v21 = vadd.f32 %v6031_v13, %v13946_v50 }
 0xbef   : > { %v6066_v52 = vmax.f32 %v6032_v21, 0.0  ;;  %v10330_v21 = vld [vmem:[%s15474_s16 + $0x78] sm:$0xf] }
 0xbf0   : > { %v6228_v41 = vpop.f32.mrf.mxu0  ;;  %v6317_v60 = vpop.f32.mrf.mxu1 }
 0xbf1   : > { %v6229_v23 = vadd.f32 %v6228_v41, %v14050_v7  ;;  %v6318_v26 = vadd.f32 %v6317_v60, %v14052_v43 }
 0xbf3   : > { %v6391_v6 = vmax.f32 %v6229_v23, 0.0  ;;  %v6392_v55 = vmax.f32 %v6318_v26, 0.0  ;;  %v14301_v26 = vperm.slane %v14292_v4, 0 }
 0xbf4   : > { %v6033_v59 = vpop.f32.mrf.mxu3 }
 0xbf5   : > { %v14251_v61 = vpack.c.bf16 %v6391_v6, %v6389_v8  ;;  %v14253_v42 = vpack.c.bf16 %v6392_v55, %v6390_v25  ;;  %v6034_v45 = vadd.f32 %v6033_v59, %v13946_v50  ;;  %v10582_v50 = vld [vmem:[%s15474_s16 + $0x270] sm:$0xf]  ;;  %v11004_v6 = vld [vmem:[%s15474_s16 + $0x90] sm:$0xf0] }
 0xbf6   : > { %v10583_v39 = vor.u32 %v11067_v32, %v10582_v50 }
 0xbf7   : > { %v6067_v19 = vmax.f32 %v6034_v45, 0.0  ;;  %7222 = vmatmul.bf16.gmra.mxu2 %v14251_v61  ;;  %7311 = vmatmul.bf16.gmra.mxu3 %v14253_v42  ;;  %v10331_v45 = vor.u32 %v11004_v6, %v10330_v21 }
 0xbf8   : > { %v6231_v20 = vpop.f32.mrf.mxu0  ;;  %v6320_v37 = vpop.f32.mrf.mxu1  ;;  %7633 = vmatpush.bf16.msra.mxu3 %v10583_v39 }
 0xbf9   : > { %v6083_v35 = vpack.c.bf16 %v6067_v19, %v6066_v52  ;;  %v6232_v34 = vadd.f32 %v6231_v20, %v14050_v7  ;;  %v6321_v29 = vadd.f32 %v6320_v37, %v14052_v43  ;;  %v10554_v19 = vld [vmem:[%s15474_s16 + $0x238] sm:$0xf]  ;;  %7545 = vmatpush.bf16.msra.mxu2 %v10331_v45 }
 0xbfa   : > { %v10555_v30 = vor.u32 %v11060_v27, %v10554_v19 }
 0xbfb   : > { %6270 = vmatmul.bf16.gmra.mxu0 %v6083_v35  ;;  %6359 = vmatmul.bf16.gmra.mxu1 %v6083_v35  ;;  %v6393_v2 = vmax.f32 %v6232_v34, 0.0  ;;  %v6394_v15 = vmax.f32 %v6321_v29, 0.0 }
 0xbfc   : > { %7634 = vmatpush.bf16.msra.mxu3 %v10555_v30 }
 0xc00   : > { %v6233_v47 = vpop.f32.mrf.mxu0  ;;  %v6322_v33 = vpop.f32.mrf.mxu1 }
 0xc01   : > { %v6234_v49 = vadd.f32 %v6233_v47, %v14050_v7  ;;  %v6323_v36 = vadd.f32 %v6322_v33, %v14052_v43 }
 0xc03   : > { %v6395_v58 = vmax.f32 %v6234_v49, 0.0  ;;  %v6396_v48 = vmax.f32 %v6323_v36, 0.0 }
 0xc05   : > { %v14274_v44 = vpack.c.bf16 %v6395_v58, %v6393_v2  ;;  %v14276_v38 = vpack.c.bf16 %v6396_v48, %v6394_v15 }
 0xc07   : > { %7227 = vmatmul.bf16.gmra.mxu2 %v14274_v44  ;;  %7316 = vmatmul.bf16.gmra.mxu3 %v14276_v38 }
 0xc08   : > { %v6236_v10 = vpop.f32.mrf.mxu0  ;;  %v6325_v9 = vpop.f32.mrf.mxu1 }
 0xc09   : > { %v6237_v0 = vadd.f32 %v6236_v10, %v14050_v7  ;;  %v6326_v14 = vadd.f32 %v6325_v9, %v14052_v43 }
 0xc0b   : > { %7370 = vmatmul.bf16.vlgmr.msra.gmra.mxu0 %v14059_v40  ;;  %7459 = vmatmul.bf16.vlgmr.msra.gmra.mxu1 %v14061_v56  ;;  %v6397_v13 = vmax.f32 %v6237_v0, 0.0  ;;  %v6398_v12 = vmax.f32 %v6326_v14, 0.0 }
 0xc10   : > { %v6238_v1 = vpop.f32.mrf.mxu0  ;;  %v6327_v24 = vpop.f32.mrf.mxu1 }
 0xc11   : > { %v6239_v31 = vadd.f32 %v6238_v1, %v14050_v7  ;;  %v6328_v51 = vadd.f32 %v6327_v24, %v14052_v43 }
 0xc13   : > { %v6399_v11 = vmax.f32 %v6239_v31, 0.0  ;;  %v6400_v41 = vmax.f32 %v6328_v51, 0.0 }
 0xc15   : > { %v14294_v60 = vpack.c.bf16 %v6399_v11, %v6397_v13  ;;  %v14296_v23 = vpack.c.bf16 %v6400_v41, %v6398_v12 }
 0xc17   : > { %7232 = vmatmul.bf16.gmra.mxu2 %v14294_v60  ;;  %7321 = vmatmul.bf16.gmra.mxu3 %v14296_v23 }
 0xc18   : > { %v6241_v8 = vpop.f32.mrf.mxu0  ;;  %v6330_v25 = vpop.f32.mrf.mxu1 }
 0xc19   : > { %v6242_v37 = vadd.f32 %v6241_v8, %v14050_v7  ;;  %v6331_v5 = vadd.f32 %v6330_v25, %v14052_v43 }
 0xc1a   : > { %v7193_v55 = vpop.f32.mrf.mxu2  ;;  %v7282_v59 = vpop.f32.mrf.mxu3 }
 0xc1b   : > { %v7194_v52 = vadd.f32 %v7193_v55, %v14301_v26  ;;  %7375 = vmatmul.bf16.gmra.mxu0 %v14095_v57  ;;  %7464 = vmatmul.bf16.gmra.mxu1 %v14097_v16  ;;  %v6401_v29 = vmax.f32 %v6242_v37, 0.0  ;;  %v6402_v49 = vmax.f32 %v6331_v5, 0.0 }
 0xc1d   : > { %v7283_v20 = vadd.f32 %v7282_v59, %v7194_v52 }
 0xc1f   : > { %v8430_v35 = vmax.f32 %v7283_v20, 0.0 }
 0xc20   : > { %v6243_v50 = vpop.f32.mrf.mxu0  ;;  %v6332_v32 = vpop.f32.mrf.mxu1 }
 0xc21   : > { %8654 = vst [vmem:[%s14323_s28] sm:$0xff] %v8430_v35  ;;  %v6244_v39 = vadd.f32 %v6243_v50, %v14050_v7  ;;  %v6333_v34 = vadd.f32 %v6332_v32, %v14052_v43  ;;  %v10302_v35 = vld [vmem:[%s15474_s16 + $0x40] sm:$0xf]  ;;  %v10997_v50 = vld [vmem:[%s15474_s16 + $0x58] sm:$0xf0] }
 0xc22   : > { %v7195_v47 = vpop.f32.mrf.mxu2  ;;  %v7284_v33 = vpop.f32.mrf.mxu3 }
 0xc23   : > { %v6403_v36 = vmax.f32 %v6244_v39, 0.0  ;;  %v6404_v2 = vmax.f32 %v6333_v34, 0.0  ;;  %v7196_v15 = vadd.f32 %v7195_v47, %v14301_v26  ;;  %v10303_v34 = vor.u32 %v10997_v50, %v10302_v35  ;;  %v10526_v47 = vld [vmem:[%s15474_s16 + $0x200] sm:$0xf] }
 0xc25   : > { %v14330_v58 = vpack.c.bf16 %v6403_v36, %v6401_v29  ;;  %v14332_v48 = vpack.c.bf16 %v6404_v2, %v6402_v49  ;;  %v7285_v10 = vadd.f32 %v7284_v33, %v7196_v15  ;;  %v11053_v33 = vld [vmem:[%s15474_s16 + $0x218] sm:$0xf0]  ;;  %7546 = vmatpush.bf16.msra.mxu2 %v10303_v34 }
 0xc26   : > { %v10527_v49 = vor.u32 %v11053_v33, %v10526_v47 }
 0xc27   : > { %v8437_v9 = vmax.f32 %v7285_v10, 0.0  ;;  %7237 = vmatmul.bf16.gmra.mxu2 %v14330_v58  ;;  %7326 = vmatmul.bf16.gmra.mxu3 %v14332_v48 }
 0xc28   : > { %v6246_v0 = vpop.f32.mrf.mxu0  ;;  %v6335_v14 = vpop.f32.mrf.mxu1  ;;  %7635 = vmatpush.bf16.msra.mxu3 %v10527_v49 }
 0xc29   : > { %8661 = vst [vmem:[%s14323_s28 + $0x38] sm:$0xff] %v8437_v9  ;;  %v6247_v31 = vadd.f32 %v6246_v0, %v14050_v7  ;;  %v6336_v51 = vadd.f32 %v6335_v14, %v14052_v43 }
 0xc2a   : > { %v7198_v28 = vpop.f32.mrf.mxu2  ;;  %v7287_v3 = vpop.f32.mrf.mxu3 }
 0xc2b   : > { %v7199_v1 = vadd.f32 %v7198_v28, %v14301_v26  ;;  %7380 = vmatmul.bf16.gmra.mxu0 %v14107_v17  ;;  %7469 = vmatmul.bf16.gmra.mxu1 %v14109_v18  ;;  %v6405_v25 = vmax.f32 %v6247_v31, 0.0  ;;  %v6406_v55 = vmax.f32 %v6336_v51, 0.0 }
 0xc2d   : > { %v7288_v24 = vadd.f32 %v7287_v3, %v7199_v1 }
 0xc2f   : > { %v8444_v13 = vmax.f32 %v7288_v24, 0.0 }
 0xc30   : > { %v6248_v12 = vpop.f32.mrf.mxu0  ;;  %v6337_v11 = vpop.f32.mrf.mxu1 }
 0xc31   : > { %8668 = vst [vmem:[%s14323_s28 + $0x70] sm:$0xff] %v8444_v13  ;;  %v6249_v41 = vadd.f32 %v6248_v12, %v14050_v7  ;;  %v6338_v8 = vadd.f32 %v6337_v11, %v14052_v43 }
 0xc32   : > { %v7200_v21 = vpop.f32.mrf.mxu2  ;;  %v7289_v6 = vpop.f32.mrf.mxu3 }
 0xc33   : > { %v6407_v59 = vmax.f32 %v6249_v41, 0.0  ;;  %v6408_v45 = vmax.f32 %v6338_v8, 0.0  ;;  %v7201_v52 = vadd.f32 %v7200_v21, %v14301_v26 }
 0xc35   : > { %v14346_v19 = vpack.c.bf16 %v6407_v59, %v6405_v25  ;;  %v14348_v27 = vpack.c.bf16 %v6408_v45, %v6406_v55  ;;  %v7290_v30 = vadd.f32 %v7289_v6, %v7201_v52 }
 0xc37   : > { %v8451_v20 = vmax.f32 %v7290_v30, 0.0  ;;  %7242 = vmatmul.bf16.gmra.mxu2 %v14346_v19  ;;  %7331 = vmatmul.bf16.gmra.mxu3 %v14348_v27 }
 0xc38   : > { %v6251_v37 = vpop.f32.mrf.mxu0  ;;  %v6340_v5 = vpop.f32.mrf.mxu1 }
 0xc39   : > { %8675 = vst [vmem:[%s14323_s28 + $0xa8] sm:$0xff] %v8451_v20  ;;  %v6252_v2 = vadd.f32 %v6251_v37, %v14050_v7  ;;  %v6341_v15 = vadd.f32 %v6340_v5, %v14052_v43 }
 0xc3a   : > { %v7203_v32 = vpop.f32.mrf.mxu2  ;;  %v7292_v39 = vpop.f32.mrf.mxu3 }
 0xc3b   : > { %v7204_v29 = vadd.f32 %v7203_v32, %v14301_v26  ;;  %7385 = vmatmul.bf16.gmra.mxu0 %v14143_v53  ;;  %7474 = vmatmul.bf16.gmra.mxu1 %v14145_v46  ;;  %v6409_v3 = vmax.f32 %v6252_v2, 0.0  ;;  %v6410_v31 = vmax.f32 %v6341_v15, 0.0 }
 0xc3d   : > { %v7293_v36 = vadd.f32 %v7292_v39, %v7204_v29 }
 0xc3f   : > { %v8458_v10 = vmax.f32 %v7293_v36, 0.0 }
 0xc40   : > { %v6253_v9 = vpop.f32.mrf.mxu0  ;;  %v6342_v0 = vpop.f32.mrf.mxu1 }
 0xc41   : > { %8682 = vst [vmem:[%s14323_s28 + $0xe0] sm:$0xff] %v8458_v10  ;;  %v6254_v14 = vadd.f32 %v6253_v9, %v14050_v7  ;;  %v6343_v28 = vadd.f32 %v6342_v0, %v14052_v43 }
 0xc42   : > { %v7205_v1 = vpop.f32.mrf.mxu2  ;;  %v7294_v24 = vpop.f32.mrf.mxu3 }
 0xc43   : > { %v6411_v51 = vmax.f32 %v6254_v14, 0.0  ;;  %v6412_v13 = vmax.f32 %v6343_v28, 0.0  ;;  %v7206_v12 = vadd.f32 %v7205_v1, %v14301_v26  ;;  %v10274_v28 = vld [vmem:[%s15474_s16 + $0x8] sm:$0xf] }
 0xc45   : > { %v14374_v11 = vpack.c.bf16 %v6411_v51, %v6409_v3  ;;  %v14376_v41 = vpack.c.bf16 %v6412_v13, %v6410_v31  ;;  %v7295_v8 = vadd.f32 %v7294_v24, %v7206_v12  ;;  %v10990_v3 = vld [vmem:[%s15474_s16 + $0x20] sm:$0xf0]  ;;  %v10498_v13 = vld [vmem:[%s15474_s16 + $0x1c8] sm:$0xf] }
 0xc46   : > { %v10275_v31 = vor.u32 %v10990_v3, %v10274_v28  ;;  %v11046_v12 = vld [vmem:[%s15474_s16 + $0x1e0] sm:$0xf0] }
 0xc47   : > { %v8465_v25 = vmax.f32 %v7295_v8, 0.0  ;;  %7247 = vmatmul.bf16.gmra.mxu2 %v14374_v11  ;;  %7336 = vmatmul.bf16.gmra.mxu3 %v14376_v41  ;;  %v10499_v8 = vor.u32 %v11046_v12, %v10498_v13 }
 0xc48   : > { %v6256_v21 = vpop.f32.mrf.mxu0  ;;  %v6345_v6 = vpop.f32.mrf.mxu1  ;;  %7547 = vmatpush.bf16.msra.mxu2 %v10275_v31 }
 0xc49   : > { %8689 = vst [vmem:[%s14323_s28 + $0x118] sm:$0xff] %v8465_v25  ;;  %v6257_v30 = vadd.f32 %v6256_v21, %v14050_v7  ;;  %v6346_v20 = vadd.f32 %v6345_v6, %v14052_v43  ;;  %7636 = vmatpush.bf16.msra.mxu3 %v10499_v8 }
 0xc4a   : > { %v7208_v55 = vpop.f32.mrf.mxu2  ;;  %v7297_v59 = vpop.f32.mrf.mxu3 }
 0xc4b   : > { %v7209_v45 = vadd.f32 %v7208_v55, %v14301_v26  ;;  %7390 = vmatmul.bf16.gmra.mxu0 %v14155_v62  ;;  %7479 = vmatmul.bf16.gmra.mxu1 %v14157_v22  ;;  %v6413_v39 = vmax.f32 %v6257_v30, 0.0  ;;  %v6414_v47 = vmax.f32 %v6346_v20, 0.0 }
 0xc4d   : > { %v7298_v52 = vadd.f32 %v7297_v59, %v7209_v45 }
 0xc4f   : > { %v8472_v37 = vmax.f32 %v7298_v52, 0.0 }
 0xc50   : > { %v6258_v5 = vpop.f32.mrf.mxu0  ;;  %v6347_v35 = vpop.f32.mrf.mxu1 }
 0xc51   : > { %8696 = vst [vmem:[%s14323_s28 + $0x150] sm:$0xff] %v8472_v37  ;;  %v6259_v50 = vadd.f32 %v6258_v5, %v14050_v7  ;;  %v6348_v32 = vadd.f32 %v6347_v35, %v14052_v43 }
 0xc52   : > { %v7210_v34 = vpop.f32.mrf.mxu2  ;;  %v7299_v29 = vpop.f32.mrf.mxu3 }
 0xc53   : > { %v6415_v33 = vmax.f32 %v6259_v50, 0.0  ;;  %v6416_v49 = vmax.f32 %v6348_v32, 0.0  ;;  %v7211_v36 = vadd.f32 %v7210_v34, %v14301_v26 }
 0xc55   : > { %v14390_v2 = vpack.c.bf16 %v6415_v33, %v6413_v39  ;;  %v14392_v15 = vpack.c.bf16 %v6416_v49, %v6414_v47  ;;  %v7300_v10 = vadd.f32 %v7299_v29, %v7211_v36 }
 0xc57   : > { %v8479_v9 = vmax.f32 %v7300_v10, 0.0  ;;  %7252 = vmatmul.bf16.gmra.mxu2 %v14390_v2  ;;  %7341 = vmatmul.bf16.gmra.mxu3 %v14392_v15 }
 0xc58   : > { %v6261_v0 = vpop.f32.mrf.mxu0  ;;  %v6350_v14 = vpop.f32.mrf.mxu1 }
 0xc59   : > { %8703 = vst [vmem:[%s14323_s28 + $0x188] sm:$0xff] %v8479_v9  ;;  %v6262_v21 = vadd.f32 %v6261_v0, %v14050_v7  ;;  %v6351_v6 = vadd.f32 %v6350_v14, %v14052_v43 }
 0xc5a   : > { %v7213_v1 = vpop.f32.mrf.mxu2  ;;  %v7302_v24 = vpop.f32.mrf.mxu3 }
 0xc5b   : > { %v7214_v51 = vadd.f32 %v7213_v1, %v14301_v26  ;;  %7395 = vmatmul.bf16.gmra.mxu0 %v14227_v63  ;;  %7484 = vmatmul.bf16.gmra.mxu1 %v14229_v54  ;;  %v6417_v20 = vmax.f32 %v6262_v21, 0.0  ;;  %v6418_v35 = vmax.f32 %v6351_v6, 0.0 }
 0xc5d   : > { %v7303_v25 = vadd.f32 %v7302_v24, %v7214_v51 }
 0xc5f   : > { %v8486_v55 = vmax.f32 %v7303_v25, 0.0 }
 0xc60   : > { %v6263_v59 = vpop.f32.mrf.mxu0  ;;  %v6352_v45 = vpop.f32.mrf.mxu1 }
 0xc61   : > { %8710 = vst [vmem:[%s14323_s28 + $0x1c0] sm:$0xff] %v8486_v55  ;;  %v6264_v52 = vadd.f32 %v6263_v59, %v14050_v7  ;;  %v6353_v30 = vadd.f32 %v6352_v45, %v14052_v43 }
 0xc62   : > { %v7215_v37 = vpop.f32.mrf.mxu2  ;;  %v7304_v5 = vpop.f32.mrf.mxu3 }
 0xc63   : > { %v6419_v50 = vmax.f32 %v6264_v52, 0.0  ;;  %v6420_v32 = vmax.f32 %v6353_v30, 0.0  ;;  %v7216_v39 = vadd.f32 %v7215_v37, %v14301_v26 }
 0xc65   : > { %v14418_v34 = vpack.c.bf16 %v6419_v50, %v6417_v20  ;;  %v14420_v29 = vpack.c.bf16 %v6420_v32, %v6418_v35  ;;  %v7305_v47 = vadd.f32 %v7304_v5, %v7216_v39  ;;  %v10478_v35 = vld [vmem:[%s15474_s16 + $0x198] sm:$0xf]  ;;  %v11040_v50 = vld [vmem:[%s15474_s16 + $0x1b0] sm:$0xf0] }
 0xc67   : > { %v8493_v33 = vmax.f32 %v7305_v47, 0.0  ;;  %7257 = vmatmul.bf16.gmra.mxu2 %v14418_v34  ;;  %7346 = vmatmul.bf16.gmra.mxu3 %v14420_v29  ;;  %v10479_v47 = vor.u32 %v11040_v50, %v10478_v35  ;;  %v14479_v50 = vperm.slane %v14292_v4, 1 }
 0xc68   : > { %v6266_v49 = vpop.f32.mrf.mxu0  ;;  %v6355_v36 = vpop.f32.mrf.mxu1 }
 0xc69   : > { %8717 = vst [vmem:[%s14323_s28 + $0x1f8] sm:$0xff] %v8493_v33  ;;  %v6267_v28 = vadd.f32 %v6266_v49, %v14050_v7  ;;  %v6356_v3 = vadd.f32 %v6355_v36, %v14052_v43  ;;  %7896 = vmatpush.bf16.msrb.mxu2 %v10479_v47 }
 0xc6a   : > { %v7218_v10 = vpop.f32.mrf.mxu2  ;;  %v7307_v9 = vpop.f32.mrf.mxu3 }
 0xc6b   : > { %v7219_v0 = vadd.f32 %v7218_v10, %v14301_v26  ;;  %7400 = vmatmul.bf16.gmra.mxu0 %v14251_v61  ;;  %7489 = vmatmul.bf16.gmra.mxu1 %v14253_v42  ;;  %v6421_v12 = vmax.f32 %v6267_v28, 0.0  ;;  %v6422_v21 = vmax.f32 %v6356_v3, 0.0 }
 0xc6d   : > { %v7308_v14 = vadd.f32 %v7307_v9, %v7219_v0  ;;  %v10702_v0 = vld [vmem:[%s15474_s16 + $0x358] sm:$0xf] }
 0xc6f   : > { %v8500_v1 = vmax.f32 %v7308_v14, 0.0  ;;  %v11096_v14 = vld [vmem:[%s15474_s16 + $0x370] sm:$0xf0] }
 0xc70   : > { %v6268_v24 = vpop.f32.mrf.mxu0  ;;  %v6357_v31 = vpop.f32.mrf.mxu1 }
 0xc71   : > { %8724 = vst [vmem:[%s14323_s28 + $0x230] sm:$0xff] %v8500_v1  ;;  %v6269_v51 = vadd.f32 %v6268_v24, %v14050_v7  ;;  %v6358_v13 = vadd.f32 %v6357_v31, %v14052_v43  ;;  %v10703_v1 = vor.u32 %v11096_v14, %v10702_v0 }
 0xc72   : > { %v7220_v8 = vpop.f32.mrf.mxu2  ;;  %v7309_v25 = vpop.f32.mrf.mxu3 }
 0xc73   : > { %v6423_v6 = vmax.f32 %v6269_v51, 0.0  ;;  %v6424_v55 = vmax.f32 %v6358_v13, 0.0  ;;  %v7221_v59 = vadd.f32 %v7220_v8, %v14301_v26  ;;  %v11036_v51 = vld [vmem:[%s15474_s16 + $0x194] sm:$0xf]  ;;  %v10472_v13 = vld [vmem:[%s15474_s16 + $0x1ac] sm:$0xf0]  ;;  %7985 = vmatpush.bf16.msrb.mxu3 %v10703_v1 }
 0xc75   : > { %v14434_v45 = vpack.c.bf16 %v6423_v6, %v6421_v12  ;;  %v14436_v52 = vpack.c.bf16 %v6424_v55, %v6422_v21  ;;  %v7310_v30 = vadd.f32 %v7309_v25, %v7221_v59  ;;  %v10475_v6 = vor.u32 %v11036_v51, %v10472_v13 }
 0xc77   : > { %v8507_v20 = vmax.f32 %v7310_v30, 0.0  ;;  %7262 = vmatmul.bf16.gmra.mxu2 %v14434_v45  ;;  %7351 = vmatmul.bf16.gmra.mxu3 %v14436_v52 }
 0xc78   : > { %v6271_v37 = vpop.f32.mrf.mxu0  ;;  %v6360_v5 = vpop.f32.mrf.mxu1  ;;  %7718 = vmatpush.bf16.msrb.mxu0 %v10475_v6 }
 0xc79   : > { %8731 = vst [vmem:[%s14323_s28 + $0x268] sm:$0xff] %v8507_v20  ;;  %v6272_v36 = vadd.f32 %v6271_v37, %v14050_v7  ;;  %v6361_v10 = vadd.f32 %v6360_v5, %v14052_v43 }
 0xc7a   : > { %v7223_v32 = vpop.f32.mrf.mxu2  ;;  %v7312_v39 = vpop.f32.mrf.mxu3 }
 0xc7b   : > { %v7224_v33 = vadd.f32 %v7223_v32, %v14301_v26  ;;  %7405 = vmatmul.bf16.gmra.mxu0 %v14274_v44  ;;  %7494 = vmatmul.bf16.gmra.mxu1 %v14276_v38  ;;  %v6425_v12 = vmax.f32 %v6272_v36, 0.0  ;;  %v6426_v8 = vmax.f32 %v6361_v10, 0.0 }
 0xc7d   : > { %v7313_v49 = vadd.f32 %v7312_v39, %v7224_v33 }
 0xc7f   : > { %v8514_v9 = vmax.f32 %v7313_v49, 0.0 }
 0xc80   : > { %v6273_v28 = vpop.f32.mrf.mxu0  ;;  %v6362_v3 = vpop.f32.mrf.mxu1 }
 0xc81   : > { %8738 = vst [vmem:[%s14323_s28 + $0x2a0] sm:$0xff] %v8514_v9  ;;  %v6274_v24 = vadd.f32 %v6273_v28, %v14050_v7  ;;  %v6363_v31 = vadd.f32 %v6362_v3, %v14052_v43  ;;  %v11092_v7 = vld [vmem:[%s15474_s16 + $0x354] sm:$0xf]  ;;  %v10696_v43 = vld [vmem:[%s15474_s16 + $0x36c] sm:$0xf0] }
 0xc82   : > { %v7225_v25 = vpop.f32.mrf.mxu2  ;;  %v7314_v21 = vpop.f32.mrf.mxu3  ;;  %v10699_v20 = vor.u32 %v11092_v7, %v10696_v43 }
 0xc83   : > { %v6427_v55 = vmax.f32 %v6274_v24, 0.0  ;;  %v6428_v59 = vmax.f32 %v6363_v31, 0.0  ;;  %v7226_v30 = vadd.f32 %v7225_v25, %v14301_v26 }
 0xc84   : > { %7807 = vmatpush.bf16.msrb.mxu1 %v10699_v20 }
 0xc85   : > { %v14474_v37 = vpack.c.bf16 %v6427_v55, %v6425_v12  ;;  %v14476_v5 = vpack.c.bf16 %v6428_v59, %v6426_v8  ;;  %v7315_v35 = vadd.f32 %v7314_v21, %v7226_v30  ;;  %v10450_v55 = vld [vmem:[%s15474_s16 + $0x160] sm:$0xf]  ;;  %v11033_v59 = vld [vmem:[%s15474_s16 + $0x178] sm:$0xf0] }
 0xc87   : > { %v8521_v32 = vmax.f32 %v7315_v35, 0.0  ;;  %7267 = vmatmul.bf16.gmra.mxu2 %v14474_v37  ;;  %7356 = vmatmul.bf16.gmra.mxu3 %v14476_v5  ;;  %v10451_v35 = vor.u32 %v11033_v59, %v10450_v55 }
 0xc88   : > { %v7371_v39 = vpop.f32.mrf.mxu0  ;;  %v7460_v47 = vpop.f32.mrf.mxu1 }
 0xc89   : > { %8745 = vst [vmem:[%s14323_s28 + $0x2d8] sm:$0xff] %v8521_v32  ;;  %v7372_v33 = vadd.f32 %v7371_v39, %v14479_v50  ;;  %7897 = vmatpush.bf16.msrb.mxu2 %v10451_v35 }
 0xc8a   : > { %v7228_v49 = vpop.f32.mrf.mxu2  ;;  %v7317_v36 = vpop.f32.mrf.mxu3 }
 0xc8b   : > { %v7461_v10 = vadd.f32 %v7460_v47, %v7372_v33  ;;  %v7229_v9 = vadd.f32 %v7228_v49, %v14301_v26  ;;  %7410 = vmatmul.bf16.gmra.mxu0 %v14294_v60  ;;  %7499 = vmatmul.bf16.gmra.mxu1 %v14296_v23 }
 0xc8d   : > { %v8431_v0 = vmax.f32 %v7461_v10, 0.0  ;;  %v7318_v14 = vadd.f32 %v7317_v36, %v7229_v9  ;;  %v10674_v36 = vld [vmem:[%s15474_s16 + $0x320] sm:$0xf]  ;;  %v11089_v10 = vld [vmem:[%s15474_s16 + $0x338] sm:$0xf0] }
 0xc8f   : > { %8655 = vst [vmem:[%s14323_s28 + $0x8] sm:$0xff] %v8431_v0  ;;  %v8528_v28 = vmax.f32 %v7318_v14, 0.0  ;;  %v10675_v14 = vor.u32 %v11089_v10, %v10674_v36 }
 0xc90   : > { %v7373_v3 = vpop.f32.mrf.mxu0  ;;  %v7462_v1 = vpop.f32.mrf.mxu1 }
 0xc91   : > { %8752 = vst [vmem:[%s14323_s28 + $0x310] sm:$0xff] %v8528_v28  ;;  %v7374_v24 = vadd.f32 %v7373_v3, %v14479_v50  ;;  %v11029_v3 = vld [vmem:[%s15474_s16 + $0x15c] sm:$0xf]  ;;  %7986 = vmatpush.bf16.msrb.mxu3 %v10675_v14 }
 0xc92   : > { %v7230_v31 = vpop.f32.mrf.mxu2  ;;  %v7319_v51 = vpop.f32.mrf.mxu3 }
 0xc93   : > { %v7463_v13 = vadd.f32 %v7462_v1, %v7374_v24  ;;  %v7231_v12 = vadd.f32 %v7230_v31, %v14301_v26  ;;  %v10444_v1 = vld [vmem:[%s15474_s16 + $0x174] sm:$0xf0] }
 0xc95   : > { %v8438_v8 = vmax.f32 %v7463_v13, 0.0  ;;  %v7320_v25 = vadd.f32 %v7319_v51, %v7231_v12  ;;  %v10447_v51 = vor.u32 %v11029_v3, %v10444_v1  ;;  %v11085_v13 = vld [vmem:[%s15474_s16 + $0x31c] sm:$0xf]  ;;  %v10668_v12 = vld [vmem:[%s15474_s16 + $0x334] sm:$0xf0] }
 0xc97   : > { %8662 = vst [vmem:[%s14323_s28 + $0x40] sm:$0xff] %v8438_v8  ;;  %v8535_v21 = vmax.f32 %v7320_v25, 0.0  ;;  %7548 = vmatmul.bf16.vlgmr.msra.gmra.mxu2 %v14059_v40  ;;  %7637 = vmatmul.bf16.vlgmr.msra.gmra.mxu3 %v14061_v56 }
 0xc98   : > { %v7376_v6 = vpop.f32.mrf.mxu0  ;;  %v7465_v7 = vpop.f32.mrf.mxu1  ;;  %7719 = vmatpush.bf16.msrb.mxu0 %v10447_v51 }
 0xc99   : > { %8759 = vst [vmem:[%s14323_s28 + $0x348] sm:$0xff] %v8535_v21  ;;  %v7377_v43 = vadd.f32 %v7376_v6, %v14479_v50  ;;  %v10671_v21 = vor.u32 %v11085_v13, %v10668_v12 }
 0xc9a   : > { %v7233_v30 = vpop.f32.mrf.mxu2  ;;  %v7322_v20 = vpop.f32.mrf.mxu3 }
 0xc9b   : > { %v7466_v32 = vadd.f32 %v7465_v7, %v7377_v43  ;;  %v7234_v39 = vadd.f32 %v7233_v30, %v14301_v26  ;;  %7415 = vmatmul.bf16.gmra.mxu0 %v14330_v58  ;;  %7504 = vmatmul.bf16.gmra.mxu1 %v14332_v48 }
 0xc9c   : > { %7808 = vmatpush.bf16.msrb.mxu1 %v10671_v21 }
 0xc9d   : > { %v8445_v47 = vmax.f32 %v7466_v32, 0.0  ;;  %v7323_v33 = vadd.f32 %v7322_v20, %v7234_v39 }
 0xc9f   : > { %8669 = vst [vmem:[%s14323_s28 + $0x78] sm:$0xff] %v8445_v47  ;;  %v8542_v49 = vmax.f32 %v7323_v33, 0.0 }
 0xca0   : > { %v7378_v9 = vpop.f32.mrf.mxu0  ;;  %v7467_v0 = vpop.f32.mrf.mxu1 }
 0xca1   : > { %8766 = vst [vmem:[%s14323_s28 + $0x380] sm:$0xff] %v8542_v49  ;;  %v7379_v28 = vadd.f32 %v7378_v9, %v14479_v50 }
 0xca2   : > { %v7235_v24 = vpop.f32.mrf.mxu2  ;;  %v7324_v31 = vpop.f32.mrf.mxu3 }
 0xca3   : > { %v7468_v8 = vadd.f32 %v7467_v0, %v7379_v28  ;;  %v7236_v25 = vadd.f32 %v7235_v24, %v14301_v26 }
 0xca5   : > { %v8452_v6 = vmax.f32 %v7468_v8, 0.0  ;;  %v7325_v7 = vadd.f32 %v7324_v31, %v7236_v25  ;;  %v10422_v8 = vld [vmem:[%s15474_s16 + $0x128] sm:$0xf]  ;;  %v11026_v25 = vld [vmem:[%s15474_s16 + $0x140] sm:$0xf0] }
 0xca7   : > { %8676 = vst [vmem:[%s14323_s28 + $0xb0] sm:$0xff] %v8452_v6  ;;  %v8549_v43 = vmax.f32 %v7325_v7, 0.0  ;;  %7553 = vmatmul.bf16.gmra.mxu2 %v14095_v57  ;;  %7642 = vmatmul.bf16.gmra.mxu3 %v14097_v16  ;;  %v10423_v7 = vor.u32 %v11026_v25, %v10422_v8 }
 0xca8   : > { %v7381_v55 = vpop.f32.mrf.mxu0  ;;  %v7470_v59 = vpop.f32.mrf.mxu1 }
 0xca9   : > { %8773 = vst [vmem:[%s14323_s28 + $0x3b8] sm:$0xff] %v8549_v43  ;;  %v7382_v30 = vadd.f32 %v7381_v55, %v14479_v50  ;;  %7898 = vmatpush.bf16.msrb.mxu2 %v10423_v7 }
 0xcaa   : > { %v7238_v20 = vpop.f32.mrf.mxu2  ;;  %v7327_v35 = vpop.f32.mrf.mxu3 }
 0xcab   : > { %v7471_v32 = vadd.f32 %v7470_v59, %v7382_v30  ;;  %v7239_v39 = vadd.f32 %v7238_v20, %v14301_v26  ;;  %7420 = vmatmul.bf16.gmra.mxu0 %v14346_v19  ;;  %7509 = vmatmul.bf16.gmra.mxu1 %v14348_v27 }
 0xcad   : > { %v8459_v47 = vmax.f32 %v7471_v32, 0.0  ;;  %v7328_v33 = vadd.f32 %v7327_v35, %v7239_v39  ;;  %v10646_v35 = vld [vmem:[%s15474_s16 + $0x2e8] sm:$0xf]  ;;  %v11082_v32 = vld [vmem:[%s15474_s16 + $0x300] sm:$0xf0] }
 0xcaf   : > { %8683 = vst [vmem:[%s14323_s28 + $0xe8] sm:$0xff] %v8459_v47  ;;  %v8556_v49 = vmax.f32 %v7328_v33, 0.0  ;;  %v10647_v33 = vor.u32 %v11082_v32, %v10646_v35 }
 0xcb0   : > { %v7383_v36 = vpop.f32.mrf.mxu0  ;;  %v7472_v10 = vpop.f32.mrf.mxu1 }
 0xcb1   : > { %8780 = vst [vmem:[%s14323_s28 + $0x3f0] sm:$0xff] %v8556_v49  ;;  %v7384_v9 = vadd.f32 %v7383_v36, %v14479_v50  ;;  %v11022_v36 = vld [vmem:[%s15474_s16 + $0x124] sm:$0xf]  ;;  %7987 = vmatpush.bf16.msrb.mxu3 %v10647_v33 }
 0xcb2   : > { %v7240_v0 = vpop.f32.mrf.mxu2  ;;  %v7329_v14 = vpop.f32.mrf.mxu3 }
 0xcb3   : > { %v7473_v28 = vadd.f32 %v7472_v10, %v7384_v9  ;;  %v7241_v3 = vadd.f32 %v7240_v0, %v14301_v26  ;;  %v10416_v10 = vld [vmem:[%s15474_s16 + $0x13c] sm:$0xf0] }
 0xcb5   : > { %v8466_v1 = vmax.f32 %v7473_v28, 0.0  ;;  %v7330_v24 = vadd.f32 %v7329_v14, %v7241_v3  ;;  %v10419_v14 = vor.u32 %v11022_v36, %v10416_v10  ;;  %v11078_v28 = vld [vmem:[%s15474_s16 + $0x2e4] sm:$0xf]  ;;  %v10640_v3 = vld [vmem:[%s15474_s16 + $0x2fc] sm:$0xf0] }
 0xcb7   : > { %8690 = vst [vmem:[%s14323_s28 + $0x120] sm:$0xff] %v8466_v1  ;;  %v8563_v31 = vmax.f32 %v7330_v24, 0.0  ;;  %7558 = vmatmul.bf16.gmra.mxu2 %v14107_v17  ;;  %7647 = vmatmul.bf16.gmra.mxu3 %v14109_v18 }
 0xcb8   : > { %v7386_v51 = vpop.f32.mrf.mxu0  ;;  %v7475_v13 = vpop.f32.mrf.mxu1  ;;  %7720 = vmatpush.bf16.msrb.mxu0 %v10419_v14  ;;  %v10388_v14 = vld [vmem:[%s15474_s16 + $0x104] sm:$0xf0] }
 0xcb9   : > { %8787 = vst [vmem:[%s14323_s28 + $0x428] sm:$0xff] %v8563_v31  ;;  %v7387_v12 = vadd.f32 %v7386_v51, %v14479_v50  ;;  %v10643_v31 = vor.u32 %v11078_v28, %v10640_v3  ;;  %v11071_v28 = vld [vmem:[%s15474_s16 + $0x2ac] sm:$0xf] }
 0xcba   : > { %v7243_v21 = vpop.f32.mrf.mxu2  ;;  %v7332_v6 = vpop.f32.mrf.mxu3 }
 0xcbb   : > { %v7476_v43 = vadd.f32 %v7475_v13, %v7387_v12  ;;  %v7244_v55 = vadd.f32 %v7243_v21, %v14301_v26  ;;  %7425 = vmatmul.bf16.gmra.mxu0 %v14374_v11  ;;  %7514 = vmatmul.bf16.gmra.mxu1 %v14376_v41 }
 0xcbc   : > { %7809 = vmatpush.bf16.msrb.mxu1 %v10643_v31 }
 0xcbd   : > { %v8473_v59 = vmax.f32 %v7476_v43, 0.0  ;;  %v7333_v30 = vadd.f32 %v7332_v6, %v7244_v55 }
 0xcbf   : > { %8697 = vst [vmem:[%s14323_s28 + $0x158] sm:$0xff] %v8473_v59  ;;  %v8570_v20 = vmax.f32 %v7333_v30, 0.0 }
 0xcc0   : > { %v7388_v39 = vpop.f32.mrf.mxu0  ;;  %v7477_v47 = vpop.f32.mrf.mxu1 }
 0xcc1   : > { %8794 = vst [vmem:[%s14323_s28 + $0x460] sm:$0xff] %v8570_v20  ;;  %v7389_v49 = vadd.f32 %v7388_v39, %v14479_v50 }
 0xcc2   : > { %v7245_v9 = vpop.f32.mrf.mxu2  ;;  %v7334_v0 = vpop.f32.mrf.mxu3 }
 0xcc3   : > { %v7478_v1 = vadd.f32 %v7477_v47, %v7389_v49  ;;  %v7246_v24 = vadd.f32 %v7245_v9, %v14301_v26 }
 0xcc5   : > { %v8480_v51 = vmax.f32 %v7478_v1, 0.0  ;;  %v7335_v13 = vadd.f32 %v7334_v0, %v7246_v24  ;;  %v11015_v0 = vld [vmem:[%s15474_s16 + $0xec] sm:$0xf]  ;;  %v10612_v24 = vld [vmem:[%s15474_s16 + $0x2c4] sm:$0xf0] }
 0xcc6   : > { %v10391_v1 = vor.u32 %v11015_v0, %v10388_v14  ;;  %v10618_v0 = vld [vmem:[%s15474_s16 + $0x2b0] sm:$0xf]  ;;  %v11075_v14 = vld [vmem:[%s15474_s16 + $0x2c8] sm:$0xf0] }
 0xcc7   : > { %8704 = vst [vmem:[%s14323_s28 + $0x190] sm:$0xff] %v8480_v51  ;;  %v8577_v12 = vmax.f32 %v7335_v13, 0.0  ;;  %7563 = vmatmul.bf16.gmra.mxu2 %v14143_v53  ;;  %7652 = vmatmul.bf16.gmra.mxu3 %v14145_v46  ;;  %v10615_v13 = vor.u32 %v11071_v28, %v10612_v24  ;;  %v10619_v24 = vor.u32 %v11075_v14, %v10618_v0 }
 0xcc8   : > { %v7391_v8 = vpop.f32.mrf.mxu0  ;;  %v7480_v25 = vpop.f32.mrf.mxu1  ;;  %7721 = vmatpush.bf16.msrb.mxu0 %v10391_v1 }
 0xcc9   : > { %8801 = vst [vmem:[%s14323_s28 + $0x498] sm:$0xff] %v8577_v12  ;;  %v7392_v21 = vadd.f32 %v7391_v8, %v14479_v50  ;;  %v10394_v8 = vld [vmem:[%s15474_s16 + $0xf0] sm:$0xf]  ;;  %7810 = vmatpush.bf16.msrb.mxu1 %v10615_v13  ;;  %7988 = vmatpush.bf16.msrb.mxu3 %v10619_v24 }
 0xcca   : > { %v7248_v6 = vpop.f32.mrf.mxu2  ;;  %v7337_v7 = vpop.f32.mrf.mxu3 }
 0xccb   : > { %v7481_v43 = vadd.f32 %v7480_v25, %v7392_v21  ;;  %v7249_v55 = vadd.f32 %v7248_v6, %v14301_v26  ;;  %7430 = vmatmul.bf16.gmra.mxu0 %v14390_v2  ;;  %7519 = vmatmul.bf16.gmra.mxu1 %v14392_v15  ;;  %v11019_v25 = vld [vmem:[%s15474_s16 + $0x108] sm:$0xf0] }
 0xccd   : > { %v8487_v59 = vmax.f32 %v7481_v43, 0.0  ;;  %v7338_v30 = vadd.f32 %v7337_v7, %v7249_v55  ;;  %v10395_v7 = vor.u32 %v11019_v25, %v10394_v8  ;;  %v11008_v43 = vld [vmem:[%s15474_s16 + $0xb4] sm:$0xf]  ;;  %v10360_v55 = vld [vmem:[%s15474_s16 + $0xcc] sm:$0xf0] }
 0xcce   : > { %v10994_v25 = vld [vmem:[%s15474_s16 + $0x44] sm:$0xf] }
 0xccf   : > { %8711 = vst [vmem:[%s14323_s28 + $0x1c8] sm:$0xff] %v8487_v59  ;;  %v8584_v20 = vmax.f32 %v7338_v30, 0.0  ;;  %v11064_v59 = vld [vmem:[%s15474_s16 + $0x274] sm:$0xf]  ;;  %7899 = vmatpush.bf16.msrb.mxu2 %v10395_v7 }
 0xcd0   : > { %v7393_v35 = vpop.f32.mrf.mxu0  ;;  %v7482_v32 = vpop.f32.mrf.mxu1 }
 0xcd1   : > { %8808 = vst [vmem:[%s14323_s28 + $0x4d0] sm:$0xff] %v8584_v20  ;;  %v7394_v39 = vadd.f32 %v7393_v35, %v14479_v50  ;;  %v10363_v35 = vor.u32 %v11008_v43, %v10360_v55 }
 0xcd2   : > { %v7250_v47 = vpop.f32.mrf.mxu2  ;;  %v7339_v33 = vpop.f32.mrf.mxu3 }
 0xcd3   : > { %v7483_v49 = vadd.f32 %v7482_v32, %v7394_v39  ;;  %v7251_v36 = vadd.f32 %v7250_v47, %v14301_v26  ;;  %v10584_v32 = vld [vmem:[%s15474_s16 + $0x28c] sm:$0xf0]  ;;  %7722 = vmatpush.bf16.msrb.mxu0 %v10363_v35 }
 0xcd4   : > { %v10587_v39 = vor.u32 %v11064_v59, %v10584_v32  ;;  %v10528_v59 = vld [vmem:[%s15474_s16 + $0x21c] sm:$0xf0]  ;;  %v10987_v32 = vld [vmem:[%s15474_s16 + $0xc] sm:$0xf] }
 0xcd5   : > { %v8494_v10 = vmax.f32 %v7483_v49, 0.0  ;;  %v7340_v9 = vadd.f32 %v7339_v33, %v7251_v36  ;;  %v11001_v49 = vld [vmem:[%s15474_s16 + $0x7c] sm:$0xf]  ;;  %v10332_v36 = vld [vmem:[%s15474_s16 + $0x94] sm:$0xf0] }
 0xcd6   : > { %7811 = vmatpush.bf16.msrb.mxu1 %v10587_v39  ;;  %v10335_v28 = vor.u32 %v11001_v49, %v10332_v36  ;;  %v10276_v39 = vld [vmem:[%s15474_s16 + $0x24] sm:$0xf0] }
 0xcd7   : > { %8718 = vst [vmem:[%s14323_s28 + $0x200] sm:$0xff] %v8494_v10  ;;  %v8591_v3 = vmax.f32 %v7340_v9, 0.0  ;;  %7568 = vmatmul.bf16.gmra.mxu2 %v14155_v62  ;;  %7657 = vmatmul.bf16.gmra.mxu3 %v14157_v22  ;;  %v11057_v10 = vld [vmem:[%s15474_s16 + $0x23c] sm:$0xf]  ;;  %v10279_v49 = vor.u32 %v10987_v32, %v10276_v39  ;;  %v10500_v36 = vld [vmem:[%s15474_s16 + $0x1e4] sm:$0xf0] }
 0xcd8   : > { %v7396_v31 = vpop.f32.mrf.mxu0  ;;  %v7485_v51 = vpop.f32.mrf.mxu1  ;;  %7723 = vmatpush.bf16.msrb.mxu0 %v10335_v28  ;;  %v10366_v39 = vld [vmem:[%s15474_s16 + $0xb8] sm:$0xf] }
 0xcd9   : > { %8815 = vst [vmem:[%s14323_s28 + $0x508] sm:$0xff] %v8591_v3  ;;  %v7397_v12 = vadd.f32 %v7396_v31, %v14479_v50  ;;  %v10556_v31 = vld [vmem:[%s15474_s16 + $0x254] sm:$0xf0] }
 0xcda   : > { %v7253_v21 = vpop.f32.mrf.mxu2  ;;  %v7342_v6 = vpop.f32.mrf.mxu3  ;;  %v10559_v13 = vor.u32 %v11057_v10, %v10556_v31 }
 0xcdb   : > { %v7486_v30 = vadd.f32 %v7485_v51, %v7397_v12  ;;  %v7254_v20 = vadd.f32 %v7253_v21, %v14301_v26  ;;  %7435 = vmatmul.bf16.gmra.mxu0 %v14418_v34  ;;  %7524 = vmatmul.bf16.gmra.mxu1 %v14420_v29  ;;  %v10304_v21 = vld [vmem:[%s15474_s16 + $0x5c] sm:$0xf0] }
 0xcdc   : > { %7812 = vmatpush.bf16.msrb.mxu1 %v10559_v13  ;;  %v10307_v55 = vor.u32 %v10994_v25, %v10304_v21 }
 0xcdd   : > { %v8501_v47 = vmax.f32 %v7486_v30, 0.0  ;;  %v7343_v33 = vadd.f32 %v7342_v6, %v7254_v20  ;;  %v11050_v6 = vld [vmem:[%s15474_s16 + $0x204] sm:$0xf] }
 0xcde   : > { %v10531_v30 = vor.u32 %v11050_v6, %v10528_v59  ;;  %7724 = vmatpush.bf16.msrb.mxu0 %v10307_v55 }
 0xcdf   : > { %8725 = vst [vmem:[%s14323_s28 + $0x238] sm:$0xff] %v8501_v47  ;;  %v8598_v9 = vmax.f32 %v7343_v33, 0.0  ;;  %v11043_v47 = vld [vmem:[%s15474_s16 + $0x1cc] sm:$0xf] }
 0xce0   : > { %v7398_v3 = vpop.f32.mrf.mxu0  ;;  %v7487_v1 = vpop.f32.mrf.mxu1  ;;  %7813 = vmatpush.bf16.msrb.mxu1 %v10531_v30  ;;  %v10503_v0 = vor.u32 %v11043_v47, %v10500_v36  ;;  %v11012_v47 = vld [vmem:[%s15474_s16 + $0xd0] sm:$0xf0] }
 0xce1   : > { %8822 = vst [vmem:[%s14323_s28 + $0x540] sm:$0xff] %v8598_v9  ;;  %v7399_v51 = vadd.f32 %v7398_v3, %v14479_v50  ;;  %v10367_v36 = vor.u32 %v11012_v47, %v10366_v39 }
 0xce2   : > { %v7255_v12 = vpop.f32.mrf.mxu2  ;;  %v7344_v8 = vpop.f32.mrf.mxu3  ;;  %7725 = vmatpush.bf16.msrb.mxu0 %v10279_v49 }
 0xce3   : > { %v7488_v7 = vadd.f32 %v7487_v1, %v7399_v51  ;;  %v7256_v43 = vadd.f32 %v7255_v12, %v14301_v26  ;;  %7900 = vmatpush.bf16.msrb.mxu2 %v10367_v36 }
 0xce4   : > { %7814 = vmatpush.bf16.msrb.mxu1 %v10503_v0 }
 0xce5   : > { %v8508_v20 = vmax.f32 %v7488_v7, 0.0  ;;  %v7345_v35 = vadd.f32 %v7344_v8, %v7256_v43 }
 0xce7   : > { %8732 = vst [vmem:[%s14323_s28 + $0x270] sm:$0xff] %v8508_v20  ;;  %v8605_v33 = vmax.f32 %v7345_v35, 0.0  ;;  %7573 = vmatmul.bf16.gmra.mxu2 %v14227_v63  ;;  %7662 = vmatmul.bf16.gmra.mxu3 %v14229_v54 }
 0xce8   : > { %v7401_v10 = vpop.f32.mrf.mxu0  ;;  %v7490_v9 = vpop.f32.mrf.mxu1 }
 0xce9   : > { %8829 = vst [vmem:[%s14323_s28 + $0x578] sm:$0xff] %v8605_v33  ;;  %v7402_v14 = vadd.f32 %v7401_v10, %v14479_v50 }
 0xcea   : > { %v7258_v28 = vpop.f32.mrf.mxu2  ;;  %v7347_v3 = vpop.f32.mrf.mxu3 }
 0xceb   : > { %v7491_v1 = vadd.f32 %v7490_v9, %v7402_v14  ;;  %v7259_v24 = vadd.f32 %v7258_v28, %v14301_v26  ;;  %7440 = vmatmul.bf16.gmra.mxu0 %v14434_v45  ;;  %7529 = vmatmul.bf16.gmra.mxu1 %v14436_v52 }
 0xced   : > { %v8515_v31 = vmax.f32 %v7491_v1, 0.0  ;;  %v7348_v51 = vadd.f32 %v7347_v3, %v7259_v24  ;;  %v10590_v3 = vld [vmem:[%s15474_s16 + $0x278] sm:$0xf]  ;;  %v11068_v1 = vld [vmem:[%s15474_s16 + $0x290] sm:$0xf0] }
 0xcef   : > { %8739 = vst [vmem:[%s14323_s28 + $0x2a8] sm:$0xff] %v8515_v31  ;;  %v8612_v13 = vmax.f32 %v7348_v51, 0.0  ;;  %v10591_v51 = vor.u32 %v11068_v1, %v10590_v3 }
 0xcf0   : > { %v7403_v12 = vpop.f32.mrf.mxu0  ;;  %v7492_v8 = vpop.f32.mrf.mxu1 }
 0xcf1   : > { %8836 = vst [vmem:[%s14323_s28 + $0x5b0] sm:$0xff] %v8612_v13  ;;  %v7404_v25 = vadd.f32 %v7403_v12, %v14479_v50  ;;  %7989 = vmatpush.bf16.msrb.mxu3 %v10591_v51  ;;  %v14724_v51 = vperm.slane %v14292_v4, 2 }
 0xcf2   : > { %v7260_v21 = vpop.f32.mrf.mxu2  ;;  %v7349_v6 = vpop.f32.mrf.mxu3 }
 0xcf3   : > { %v7493_v7 = vadd.f32 %v7492_v8, %v7404_v25  ;;  %v7261_v43 = vadd.f32 %v7260_v21, %v14301_v26 }
 0xcf5   : > { %v8522_v55 = vmax.f32 %v7493_v7, 0.0  ;;  %v7350_v59 = vadd.f32 %v7349_v6, %v7261_v43 }
 0xcf7   : > { %8746 = vst [vmem:[%s14323_s28 + $0x2e0] sm:$0xff] %v8522_v55  ;;  %v8619_v30 = vmax.f32 %v7350_v59, 0.0  ;;  %7578 = vmatmul.bf16.gmra.mxu2 %v14251_v61  ;;  %7667 = vmatmul.bf16.gmra.mxu3 %v14253_v42 }
 0xcf8   : > { %v7406_v20 = vpop.f32.mrf.mxu0  ;;  %v7495_v35 = vpop.f32.mrf.mxu1 }
 0xcf9   : > { %8843 = vst [vmem:[%s14323_s28 + $0x5e8] sm:$0xff] %v8619_v30  ;;  %v7407_v32 = vadd.f32 %v7406_v20, %v14479_v50 }
 0xcfa   : > { %v7263_v33 = vpop.f32.mrf.mxu2  ;;  %v7352_v49 = vpop.f32.mrf.mxu3 }
 0xcfb   : > { %v7496_v10 = vadd.f32 %v7495_v35, %v7407_v32  ;;  %v7264_v9 = vadd.f32 %v7263_v33, %v14301_v26  ;;  %7445 = vmatmul.bf16.gmra.mxu0 %v14474_v37  ;;  %7534 = vmatmul.bf16.gmra.mxu1 %v14476_v5 }
 0xcfd   : > { %v8529_v0 = vmax.f32 %v7496_v10, 0.0  ;;  %v7353_v14 = vadd.f32 %v7352_v49, %v7264_v9 }
 0xcff   : > { %8753 = vst [vmem:[%s14323_s28 + $0x318] sm:$0xff] %v8529_v0  ;;  %v8626_v28 = vmax.f32 %v7353_v14, 0.0 }
 0xd00   : > { %v7408_v24 = vpop.f32.mrf.mxu0  ;;  %v7497_v31 = vpop.f32.mrf.mxu1 }
 0xd01   : > { %8850 = vst [vmem:[%s14323_s28 + $0x620] sm:$0xff] %v8626_v28  ;;  %v7409_v13 = vadd.f32 %v7408_v24, %v14479_v50 }
 0xd02   : > { %v7265_v12 = vpop.f32.mrf.mxu2  ;;  %v7354_v8 = vpop.f32.mrf.mxu3 }
 0xd03   : > { %v7498_v25 = vadd.f32 %v7497_v31, %v7409_v13  ;;  %v7266_v21 = vadd.f32 %v7265_v12, %v14301_v26 }
 0xd05   : > { %v8536_v6 = vmax.f32 %v7498_v25, 0.0  ;;  %v7355_v7 = vadd.f32 %v7354_v8, %v7266_v21  ;;  %v11005_v25 = vld [vmem:[%s15474_s16 + $0x98] sm:$0xf0] }
 0xd07   : > { %8760 = vst [vmem:[%s14323_s28 + $0x350] sm:$0xff] %v8536_v6  ;;  %v8633_v43 = vmax.f32 %v7355_v7, 0.0  ;;  %7583 = vmatmul.bf16.gmra.mxu2 %v14274_v44  ;;  %7672 = vmatmul.bf16.gmra.mxu3 %v14276_v38 }
 0xd08   : > { %v7411_v55 = vpop.f32.mrf.mxu0  ;;  %v7500_v59 = vpop.f32.mrf.mxu1 }
 0xd09   : > { %8857 = vst [vmem:[%s14323_s28 + $0x658] sm:$0xff] %v8633_v43  ;;  %v7412_v30 = vadd.f32 %v7411_v55, %v14479_v50 }
 0xd0a   : > { %v7268_v20 = vpop.f32.mrf.mxu2  ;;  %v7357_v35 = vpop.f32.mrf.mxu3 }
 0xd0b   : > { %v7501_v32 = vadd.f32 %v7500_v59, %v7412_v30  ;;  %v7269_v39 = vadd.f32 %v7268_v20, %v14301_v26  ;;  %7726 = vmatmul.bf16.vlgmr.msrb.gmra.mxu0 %v14059_v40  ;;  %7815 = vmatmul.bf16.vlgmr.msrb.gmra.mxu1 %v14061_v56 }
 0xd0d   : > { %v8543_v47 = vmax.f32 %v7501_v32, 0.0  ;;  %v7358_v33 = vadd.f32 %v7357_v35, %v7269_v39  ;;  %v10562_v35 = vld [vmem:[%s15474_s16 + $0x240] sm:$0xf]  ;;  %v11061_v32 = vld [vmem:[%s15474_s16 + $0x258] sm:$0xf0] }
 0xd0f   : > { %8767 = vst [vmem:[%s14323_s28 + $0x388] sm:$0xff] %v8543_v47  ;;  %v8640_v49 = vmax.f32 %v7358_v33, 0.0  ;;  %v10563_v33 = vor.u32 %v11061_v32, %v10562_v35 }
 0xd10   : > { %v7413_v36 = vpop.f32.mrf.mxu0  ;;  %v7502_v10 = vpop.f32.mrf.mxu1 }
 0xd11   : > { %8864 = vst [vmem:[%s14323_s28 + $0x690] sm:$0xff] %v8640_v49  ;;  %v7414_v9 = vadd.f32 %v7413_v36, %v14479_v50  ;;  %7990 = vmatpush.bf16.msrb.mxu3 %v10563_v33 }
 0xd12   : > { %v7270_v0 = vpop.f32.mrf.mxu2  ;;  %v7359_v14 = vpop.f32.mrf.mxu3 }
 0xd13   : > { %v7503_v28 = vadd.f32 %v7502_v10, %v7414_v9  ;;  %v7271_v3 = vadd.f32 %v7270_v0, %v14301_v26  ;;  %v10338_v26 = vld [vmem:[%s15474_s16 + $0x80] sm:$0xf] }
 0xd14   : > { %v10339_v7 = vor.u32 %v11005_v25, %v10338_v26 }
 0xd15   : > { %v8550_v1 = vmax.f32 %v7503_v28, 0.0  ;;  %v7360_v24 = vadd.f32 %v7359_v14, %v7271_v3 }
 0xd16   : > { %7901 = vmatpush.bf16.msrb.mxu2 %v10339_v7 }
 0xd17   : > { %8774 = vst [vmem:[%s14323_s28 + $0x3c0] sm:$0xff] %v8550_v1  ;;  %v8647_v31 = vmax.f32 %v7360_v24, 0.0  ;;  %7588 = vmatmul.bf16.gmra.mxu2 %v14294_v60  ;;  %7677 = vmatmul.bf16.gmra.mxu3 %v14296_v23 }
 0xd18   : > { %v7416_v13 = vpop.f32.mrf.mxu0  ;;  %v7505_v12 = vpop.f32.mrf.mxu1 }
 0xd19   : > { %8871 = vst [vmem:[%s14323_s28 + $0x6c8] sm:$0xff] %v8647_v31  ;;  %v7417_v8 = vadd.f32 %v7416_v13, %v14479_v50 }
 0xd1a   : > { %v7549_v21 = vpop.f32.mrf.mxu2  ;;  %v7638_v6 = vpop.f32.mrf.mxu3 }
 0xd1b   : > { %v7506_v43 = vadd.f32 %v7505_v12, %v7417_v8  ;;  %v7550_v55 = vadd.f32 %v7549_v21, %v14724_v51  ;;  %7731 = vmatmul.bf16.gmra.mxu0 %v14095_v57  ;;  %7820 = vmatmul.bf16.gmra.mxu1 %v14097_v16 }
 0xd1d   : > { %v8557_v59 = vmax.f32 %v7506_v43, 0.0  ;;  %v7639_v30 = vadd.f32 %v7638_v6, %v7550_v55 }
 0xd1f   : > { %8781 = vst [vmem:[%s14323_s28 + $0x3f8] sm:$0xff] %v8557_v59  ;;  %v8432_v20 = vmax.f32 %v7639_v30, 0.0 }
 0xd20   : > { %v7418_v39 = vpop.f32.mrf.mxu0  ;;  %v7507_v47 = vpop.f32.mrf.mxu1 }
 0xd21   : > { %8656 = vst [vmem:[%s14323_s28 + $0x10] sm:$0xff] %v8432_v20  ;;  %v7419_v49 = vadd.f32 %v7418_v39, %v14479_v50 }
 0xd22   : > { %v7551_v36 = vpop.f32.mrf.mxu2  ;;  %v7640_v10 = vpop.f32.mrf.mxu3 }
 0xd23   : > { %v7508_v9 = vadd.f32 %v7507_v47, %v7419_v49  ;;  %v7552_v0 = vadd.f32 %v7551_v36, %v14724_v51 }
 0xd25   : > { %v8564_v14 = vmax.f32 %v7508_v9, 0.0  ;;  %v7641_v28 = vadd.f32 %v7640_v10, %v7552_v0  ;;  %v10310_v10 = vld [vmem:[%s15474_s16 + $0x48] sm:$0xf]  ;;  %v10998_v9 = vld [vmem:[%s15474_s16 + $0x60] sm:$0xf0] }
 0xd27   : > { %8788 = vst [vmem:[%s14323_s28 + $0x430] sm:$0xff] %v8564_v14  ;;  %v8439_v3 = vmax.f32 %v7641_v28, 0.0  ;;  %7593 = vmatmul.bf16.gmra.mxu2 %v14330_v58  ;;  %7682 = vmatmul.bf16.gmra.mxu3 %v14332_v48  ;;  %v10311_v28 = vor.u32 %v10998_v9, %v10310_v10 }
 0xd28   : > { %v7421_v1 = vpop.f32.mrf.mxu0  ;;  %v7510_v24 = vpop.f32.mrf.mxu1 }
 0xd29   : > { %8663 = vst [vmem:[%s14323_s28 + $0x48] sm:$0xff] %v8439_v3  ;;  %v7422_v31 = vadd.f32 %v7421_v1, %v14479_v50  ;;  %7902 = vmatpush.bf16.msrb.mxu2 %v10311_v28 }
 0xd2a   : > { %v7554_v13 = vpop.f32.mrf.mxu2  ;;  %v7643_v12 = vpop.f32.mrf.mxu3 }
 0xd2b   : > { %v7511_v8 = vadd.f32 %v7510_v24, %v7422_v31  ;;  %v7555_v26 = vadd.f32 %v7554_v13, %v14724_v51  ;;  %7736 = vmatmul.bf16.gmra.mxu0 %v14107_v17  ;;  %7825 = vmatmul.bf16.gmra.mxu1 %v14109_v18 }
 0xd2d   : > { %v8571_v25 = vmax.f32 %v7511_v8, 0.0  ;;  %v7644_v21 = vadd.f32 %v7643_v12, %v7555_v26  ;;  %v10534_v12 = vld [vmem:[%s15474_s16 + $0x208] sm:$0xf]  ;;  %v11054_v8 = vld [vmem:[%s15474_s16 + $0x220] sm:$0xf0] }
 0xd2f   : > { %8795 = vst [vmem:[%s14323_s28 + $0x468] sm:$0xff] %v8571_v25  ;;  %v8446_v6 = vmax.f32 %v7644_v21, 0.0  ;;  %v10535_v21 = vor.u32 %v11054_v8, %v10534_v12 }
 0xd30   : > { %v7423_v7 = vpop.f32.mrf.mxu0  ;;  %v7512_v43 = vpop.f32.mrf.mxu1 }
 0xd31   : > { %8670 = vst [vmem:[%s14323_s28 + $0x80] sm:$0xff] %v8446_v6  ;;  %v7424_v55 = vadd.f32 %v7423_v7, %v14479_v50  ;;  %7991 = vmatpush.bf16.msrb.mxu3 %v10535_v21 }
 0xd32   : > { %v7556_v59 = vpop.f32.mrf.mxu2  ;;  %v7645_v30 = vpop.f32.mrf.mxu3 }
 0xd33   : > { %v7513_v20 = vadd.f32 %v7512_v43, %v7424_v55  ;;  %v7557_v35 = vadd.f32 %v7556_v59, %v14724_v51 }
 0xd35   : > { %v8578_v32 = vmax.f32 %v7513_v20, 0.0  ;;  %v7646_v39 = vadd.f32 %v7645_v30, %v7557_v35 }
 0xd37   : > { %8802 = vst [vmem:[%s14323_s28 + $0x4a0] sm:$0xff] %v8578_v32  ;;  %v8453_v47 = vmax.f32 %v7646_v39, 0.0  ;;  %7598 = vmatmul.bf16.gmra.mxu2 %v14346_v19  ;;  %7687 = vmatmul.bf16.gmra.mxu3 %v14348_v27 }
 0xd38   : > { %v7426_v33 = vpop.f32.mrf.mxu0  ;;  %v7515_v49 = vpop.f32.mrf.mxu1 }
 0xd39   : > { %8677 = vst [vmem:[%s14323_s28 + $0xb8] sm:$0xff] %v8453_v47  ;;  %v7427_v36 = vadd.f32 %v7426_v33, %v14479_v50 }
 0xd3a   : > { %v7559_v0 = vpop.f32.mrf.mxu2  ;;  %v7648_v14 = vpop.f32.mrf.mxu3 }
 0xd3b   : > { %v7516_v3 = vadd.f32 %v7515_v49, %v7427_v36  ;;  %v7560_v1 = vadd.f32 %v7559_v0, %v14724_v51  ;;  %7741 = vmatmul.bf16.gmra.mxu0 %v14143_v53  ;;  %7830 = vmatmul.bf16.gmra.mxu1 %v14145_v46 }
 0xd3d   : > { %v8585_v24 = vmax.f32 %v7516_v3, 0.0  ;;  %v7649_v31 = vadd.f32 %v7648_v14, %v7560_v1 }
 0xd3f   : > { %8809 = vst [vmem:[%s14323_s28 + $0x4d8] sm:$0xff] %v8585_v24  ;;  %v8460_v13 = vmax.f32 %v7649_v31, 0.0 }
 0xd40   : > { %v7428_v26 = vpop.f32.mrf.mxu0  ;;  %v7517_v25 = vpop.f32.mrf.mxu1 }
 0xd41   : > { %8684 = vst [vmem:[%s14323_s28 + $0xf0] sm:$0xff] %v8460_v13  ;;  %v7429_v6 = vadd.f32 %v7428_v26, %v14479_v50 }
 0xd42   : > { %v7561_v7 = vpop.f32.mrf.mxu2  ;;  %v7650_v43 = vpop.f32.mrf.mxu3 }
 0xd43   : > { %v7518_v55 = vadd.f32 %v7517_v25, %v7429_v6  ;;  %v7562_v59 = vadd.f32 %v7561_v7, %v14724_v51 }
 0xd45   : > { %v8592_v30 = vmax.f32 %v7518_v55, 0.0  ;;  %v7651_v20 = vadd.f32 %v7650_v43, %v7562_v59  ;;  %v10282_v43 = vld [vmem:[%s15474_s16 + $0x10] sm:$0xf]  ;;  %v10991_v55 = vld [vmem:[%s15474_s16 + $0x28] sm:$0xf0] }
 0xd47   : > { %8816 = vst [vmem:[%s14323_s28 + $0x510] sm:$0xff] %v8592_v30  ;;  %v8467_v35 = vmax.f32 %v7651_v20, 0.0  ;;  %7603 = vmatmul.bf16.gmra.mxu2 %v14374_v11  ;;  %7692 = vmatmul.bf16.gmra.mxu3 %v14376_v41  ;;  %v10283_v20 = vor.u32 %v10991_v55, %v10282_v43 }
 0xd48   : > { %v7431_v32 = vpop.f32.mrf.mxu0  ;;  %v7520_v39 = vpop.f32.mrf.mxu1 }
 0xd49   : > { %8691 = vst [vmem:[%s14323_s28 + $0x128] sm:$0xff] %v8467_v35  ;;  %v7432_v47 = vadd.f32 %v7431_v32, %v14479_v50  ;;  %7903 = vmatpush.bf16.msrb.mxu2 %v10283_v20 }
 0xd4a   : > { %v7564_v33 = vpop.f32.mrf.mxu2  ;;  %v7653_v49 = vpop.f32.mrf.mxu3 }
 0xd4b   : > { %v7521_v36 = vadd.f32 %v7520_v39, %v7432_v47  ;;  %v7565_v10 = vadd.f32 %v7564_v33, %v14724_v51  ;;  %7746 = vmatmul.bf16.gmra.mxu0 %v14155_v62  ;;  %7835 = vmatmul.bf16.gmra.mxu1 %v14157_v22 }
 0xd4d   : > { %v8599_v9 = vmax.f32 %v7521_v36, 0.0  ;;  %v7654_v0 = vadd.f32 %v7653_v49, %v7565_v10  ;;  %v10506_v49 = vld [vmem:[%s15474_s16 + $0x1d0] sm:$0xf]  ;;  %v11047_v36 = vld [vmem:[%s15474_s16 + $0x1e8] sm:$0xf0] }
 0xd4f   : > { %8823 = vst [vmem:[%s14323_s28 + $0x548] sm:$0xff] %v8599_v9  ;;  %v8474_v14 = vmax.f32 %v7654_v0, 0.0  ;;  %v10507_v0 = vor.u32 %v11047_v36, %v10506_v49 }
 0xd50   : > { %v7433_v28 = vpop.f32.mrf.mxu0  ;;  %v7522_v3 = vpop.f32.mrf.mxu1 }
 0xd51   : > { %8698 = vst [vmem:[%s14323_s28 + $0x160] sm:$0xff] %v8474_v14  ;;  %v7434_v1 = vadd.f32 %v7433_v28, %v14479_v50  ;;  %7992 = vmatpush.bf16.msrb.mxu3 %v10507_v0 }
 0xd52   : > { %v7566_v24 = vpop.f32.mrf.mxu2  ;;  %v7655_v31 = vpop.f32.mrf.mxu3 }
 0xd53   : > { %v7523_v13 = vadd.f32 %v7522_v3, %v7434_v1  ;;  %v7567_v12 = vadd.f32 %v7566_v24, %v14724_v51 }
 0xd55   : > { %v8606_v8 = vmax.f32 %v7523_v13, 0.0  ;;  %v7656_v26 = vadd.f32 %v7655_v31, %v7567_v12 }
 0xd57   : > { %8830 = vst [vmem:[%s14323_s28 + $0x580] sm:$0xff] %v8606_v8  ;;  %v8481_v25 = vmax.f32 %v7656_v26, 0.0  ;;  %7608 = vmatmul.bf16.gmra.mxu2 %v14390_v2  ;;  %7697 = vmatmul.bf16.gmra.mxu3 %v14392_v15 }
 0xd58   : > { %v7436_v21 = vpop.f32.mrf.mxu0  ;;  %v7525_v6 = vpop.f32.mrf.mxu1 }
 0xd59   : > { %8705 = vst [vmem:[%s14323_s28 + $0x198] sm:$0xff] %v8481_v25  ;;  %v7437_v7 = vadd.f32 %v7436_v21, %v14479_v50 }
 0xd5a   : > { %v7569_v59 = vpop.f32.mrf.mxu2  ;;  %v7658_v30 = vpop.f32.mrf.mxu3 }
 0xd5b   : > { %v7526_v35 = vadd.f32 %v7525_v6, %v7437_v7  ;;  %v7570_v32 = vadd.f32 %v7569_v59, %v14724_v51  ;;  %7751 = vmatmul.bf16.gmra.mxu0 %v14227_v63  ;;  %7840 = vmatmul.bf16.gmra.mxu1 %v14229_v54 }
 0xd5d   : > { %v8613_v39 = vmax.f32 %v7526_v35, 0.0  ;;  %v7659_v47 = vadd.f32 %v7658_v30, %v7570_v32 }
 0xd5f   : > { %8837 = vst [vmem:[%s14323_s28 + $0x5b8] sm:$0xff] %v8613_v39  ;;  %v8488_v33 = vmax.f32 %v7659_v47, 0.0 }
 0xd60   : > { %v7438_v10 = vpop.f32.mrf.mxu0  ;;  %v7527_v9 = vpop.f32.mrf.mxu1 }
 0xd61   : > { %8712 = vst [vmem:[%s14323_s28 + $0x1d0] sm:$0xff] %v8488_v33  ;;  %v7439_v14 = vadd.f32 %v7438_v10, %v14479_v50 }
 0xd62   : > { %v7571_v28 = vpop.f32.mrf.mxu2  ;;  %v7660_v3 = vpop.f32.mrf.mxu3 }
 0xd63   : > { %v7528_v1 = vadd.f32 %v7527_v9, %v7439_v14  ;;  %v7572_v24 = vadd.f32 %v7571_v28, %v14724_v51 }
 0xd65   : > { %v8620_v31 = vmax.f32 %v7528_v1, 0.0  ;;  %v7661_v13 = vadd.f32 %v7660_v3, %v7572_v24  ;;  %v10486_v3 = vld [vmem:[%s15474_s16 + $0x1a0] sm:$0xf]  ;;  %v11041_v1 = vld [vmem:[%s15474_s16 + $0x1b8] sm:$0xf0] }
 0xd67   : > { %8844 = vst [vmem:[%s14323_s28 + $0x5f0] sm:$0xff] %v8620_v31  ;;  %v8495_v12 = vmax.f32 %v7661_v13, 0.0  ;;  %7613 = vmatmul.bf16.gmra.mxu2 %v14418_v34  ;;  %7702 = vmatmul.bf16.gmra.mxu3 %v14420_v29  ;;  %v10487_v13 = vor.u32 %v11041_v1, %v10486_v3 }
 0xd68   : > { %v7441_v8 = vpop.f32.mrf.mxu0  ;;  %v7530_v26 = vpop.f32.mrf.mxu1 }
 0xd69   : > { %8719 = vst [vmem:[%s14323_s28 + $0x208] sm:$0xff] %v8495_v12  ;;  %v7442_v25 = vadd.f32 %v7441_v8, %v14479_v50  ;;  %8252 = vmatpush.bf16.msra.mxu2 %v10487_v13 }
 0xd6a   : > { %v7574_v21 = vpop.f32.mrf.mxu2  ;;  %v7663_v6 = vpop.f32.mrf.mxu3 }
 0xd6b   : > { %v7531_v7 = vadd.f32 %v7530_v26, %v7442_v25  ;;  %v7575_v43 = vadd.f32 %v7574_v21, %v14724_v51  ;;  %7756 = vmatmul.bf16.gmra.mxu0 %v14251_v61  ;;  %7845 = vmatmul.bf16.gmra.mxu1 %v14253_v42 }
 0xd6d   : > { %v8627_v55 = vmax.f32 %v7531_v7, 0.0  ;;  %v7664_v59 = vadd.f32 %v7663_v6, %v7575_v43  ;;  %v10710_v6 = vld [vmem:[%s15474_s16 + $0x360] sm:$0xf]  ;;  %v11097_v7 = vld [vmem:[%s15474_s16 + $0x378] sm:$0xf0] }
 0xd6f   : > { %8851 = vst [vmem:[%s14323_s28 + $0x628] sm:$0xff] %v8627_v55  ;;  %v8502_v30 = vmax.f32 %v7664_v59, 0.0  ;;  %v10711_v59 = vor.u32 %v11097_v7, %v10710_v6 }
 0xd70   : > { %v7443_v20 = vpop.f32.mrf.mxu0  ;;  %v7532_v35 = vpop.f32.mrf.mxu1 }
 0xd71   : > { %8726 = vst [vmem:[%s14323_s28 + $0x240] sm:$0xff] %v8502_v30  ;;  %v7444_v32 = vadd.f32 %v7443_v20, %v14479_v50  ;;  %v11037_v20 = vld [vmem:[%s15474_s16 + $0x19c] sm:$0xf]  ;;  %8341 = vmatpush.bf16.msra.mxu3 %v10711_v59 }
 0xd72   : > { %v7576_v39 = vpop.f32.mrf.mxu2  ;;  %v7665_v47 = vpop.f32.mrf.mxu3 }
 0xd73   : > { %v7533_v33 = vadd.f32 %v7532_v35, %v7444_v32  ;;  %v7577_v49 = vadd.f32 %v7576_v39, %v14724_v51  ;;  %v10480_v35 = vld [vmem:[%s15474_s16 + $0x1b4] sm:$0xf0] }
 0xd75   : > { %v8634_v36 = vmax.f32 %v7533_v33, 0.0  ;;  %v7666_v10 = vadd.f32 %v7665_v47, %v7577_v49  ;;  %v10483_v47 = vor.u32 %v11037_v20, %v10480_v35  ;;  %v11093_v33 = vld [vmem:[%s15474_s16 + $0x35c] sm:$0xf] }
 0xd77   : > { %8858 = vst [vmem:[%s14323_s28 + $0x660] sm:$0xff] %v8634_v36  ;;  %v8509_v9 = vmax.f32 %v7666_v10, 0.0  ;;  %7618 = vmatmul.bf16.gmra.mxu2 %v14434_v45  ;;  %7707 = vmatmul.bf16.gmra.mxu3 %v14436_v52 }
 0xd78   : > { %v7446_v0 = vpop.f32.mrf.mxu0  ;;  %v7535_v14 = vpop.f32.mrf.mxu1  ;;  %8074 = vmatpush.bf16.msra.mxu0 %v10483_v47 }
 0xd79   : > { %8733 = vst [vmem:[%s14323_s28 + $0x278] sm:$0xff] %v8509_v9  ;;  %v7447_v28 = vadd.f32 %v7446_v0, %v14479_v50 }
 0xd7a   : > { %v7579_v24 = vpop.f32.mrf.mxu2  ;;  %v7668_v31 = vpop.f32.mrf.mxu3 }
 0xd7b   : > { %v7536_v12 = vadd.f32 %v7535_v14, %v7447_v28  ;;  %v7580_v8 = vadd.f32 %v7579_v24, %v14724_v51  ;;  %7761 = vmatmul.bf16.gmra.mxu0 %v14274_v44  ;;  %7850 = vmatmul.bf16.gmra.mxu1 %v14276_v38  ;;  %v14868_v14 = vperm.slane %v14292_v4, 3 }
 0xd7d   : > { %v8641_v26 = vmax.f32 %v7536_v12, 0.0  ;;  %v7669_v25 = vadd.f32 %v7668_v31, %v7580_v8 }
 0xd7f   : > { %8865 = vst [vmem:[%s14323_s28 + $0x698] sm:$0xff] %v8641_v26  ;;  %v8516_v21 = vmax.f32 %v7669_v25, 0.0 }
 0xd80   : > { %v7448_v43 = vpop.f32.mrf.mxu0  ;;  %v7537_v55 = vpop.f32.mrf.mxu1 }
 0xd81   : > { %8740 = vst [vmem:[%s14323_s28 + $0x2b0] sm:$0xff] %v8516_v21  ;;  %v7449_v30 = vadd.f32 %v7448_v43, %v14479_v50  ;;  %v10704_v50 = vld [vmem:[%s15474_s16 + $0x374] sm:$0xf0] }
 0xd82   : > { %v7581_v32 = vpop.f32.mrf.mxu2  ;;  %v7670_v39 = vpop.f32.mrf.mxu3  ;;  %v10707_v10 = vor.u32 %v11093_v33, %v10704_v50 }
 0xd83   : > { %v7538_v49 = vadd.f32 %v7537_v55, %v7449_v30  ;;  %v7582_v36 = vadd.f32 %v7581_v32, %v14724_v51 }
 0xd84   : > { %8163 = vmatpush.bf16.msra.mxu1 %v10707_v10 }
 0xd85   : > { %v8648_v9 = vmax.f32 %v7538_v49, 0.0  ;;  %v7671_v0 = vadd.f32 %v7670_v39, %v7582_v36  ;;  %v10458_v49 = vld [vmem:[%s15474_s16 + $0x168] sm:$0xf]  ;;  %v11034_v36 = vld [vmem:[%s15474_s16 + $0x180] sm:$0xf0] }
 0xd87   : > { %8872 = vst [vmem:[%s14323_s28 + $0x6d0] sm:$0xff] %v8648_v9  ;;  %v8523_v28 = vmax.f32 %v7671_v0, 0.0  ;;  %7623 = vmatmul.bf16.gmra.mxu2 %v14474_v37  ;;  %7712 = vmatmul.bf16.gmra.mxu3 %v14476_v5  ;;  %v10459_v0 = vor.u32 %v11034_v36, %v10458_v49 }
 0xd88   : > { %v7727_v3 = vpop.f32.mrf.mxu0  ;;  %v7816_v1 = vpop.f32.mrf.mxu1 }
 0xd89   : > { %8747 = vst [vmem:[%s14323_s28 + $0x2e8] sm:$0xff] %v8523_v28  ;;  %v7728_v24 = vadd.f32 %v7727_v3, %v14868_v14  ;;  %8253 = vmatpush.bf16.msra.mxu2 %v10459_v0 }
 0xd8a   : > { %v7584_v31 = vpop.f32.mrf.mxu2  ;;  %v7673_v13 = vpop.f32.mrf.mxu3 }
 0xd8b   : > { %v7817_v12 = vadd.f32 %v7816_v1, %v7728_v24  ;;  %v7585_v8 = vadd.f32 %v7584_v31, %v14724_v51  ;;  %7766 = vmatmul.bf16.gmra.mxu0 %v14294_v60  ;;  %7855 = vmatmul.bf16.gmra.mxu1 %v14296_v23 }
 0xd8d   : > { %v8433_v26 = vmax.f32 %v7817_v12, 0.0  ;;  %v7674_v25 = vadd.f32 %v7673_v13, %v7585_v8  ;;  %v10682_v13 = vld [vmem:[%s15474_s16 + $0x328] sm:$0xf]  ;;  %v11090_v12 = vld [vmem:[%s15474_s16 + $0x340] sm:$0xf0] }
 0xd8f   : > { %8657 = vst [vmem:[%s14323_s28 + $0x18] sm:$0xff] %v8433_v26  ;;  %v8530_v21 = vmax.f32 %v7674_v25, 0.0  ;;  %v10683_v25 = vor.u32 %v11090_v12, %v10682_v13 }
 0xd90   : > { %v7729_v6 = vpop.f32.mrf.mxu0  ;;  %v7818_v7 = vpop.f32.mrf.mxu1 }
 0xd91   : > { %8754 = vst [vmem:[%s14323_s28 + $0x320] sm:$0xff] %v8530_v21  ;;  %v7730_v43 = vadd.f32 %v7729_v6, %v14868_v14  ;;  %v11030_v6 = vld [vmem:[%s15474_s16 + $0x164] sm:$0xf]  ;;  %8342 = vmatpush.bf16.msra.mxu3 %v10683_v25 }
 0xd92   : > { %v7586_v55 = vpop.f32.mrf.mxu2  ;;  %v7675_v59 = vpop.f32.mrf.mxu3 }
 0xd93   : > { %v7819_v30 = vadd.f32 %v7818_v7, %v7730_v43  ;;  %v7587_v20 = vadd.f32 %v7586_v55, %v14724_v51  ;;  %v10452_v7 = vld [vmem:[%s15474_s16 + $0x17c] sm:$0xf0] }
 0xd95   : > { %v8440_v35 = vmax.f32 %v7819_v30, 0.0  ;;  %v7676_v32 = vadd.f32 %v7675_v59, %v7587_v20  ;;  %v10455_v59 = vor.u32 %v11030_v6, %v10452_v7  ;;  %v11086_v30 = vld [vmem:[%s15474_s16 + $0x324] sm:$0xf]  ;;  %v10676_v20 = vld [vmem:[%s15474_s16 + $0x33c] sm:$0xf0] }
 0xd97   : > { %8664 = vst [vmem:[%s14323_s28 + $0x50] sm:$0xff] %v8440_v35  ;;  %v8537_v39 = vmax.f32 %v7676_v32, 0.0  ;;  %7904 = vmatmul.bf16.vlgmr.msrb.gmra.mxu2 %v14059_v40  ;;  %7993 = vmatmul.bf16.vlgmr.msrb.gmra.mxu3 %v14061_v56 }
 0xd98   : > { %v7732_v47 = vpop.f32.mrf.mxu0  ;;  %v7821_v33 = vpop.f32.mrf.mxu1  ;;  %8075 = vmatpush.bf16.msra.mxu0 %v10455_v59 }
 0xd99   : > { %8761 = vst [vmem:[%s14323_s28 + $0x358] sm:$0xff] %v8537_v39  ;;  %v7733_v50 = vadd.f32 %v7732_v47, %v14868_v14  ;;  %v10679_v39 = vor.u32 %v11086_v30, %v10676_v20 }
 0xd9a   : > { %v7589_v10 = vpop.f32.mrf.mxu2  ;;  %v7678_v9 = vpop.f32.mrf.mxu3 }
 0xd9b   : > { %v7822_v28 = vadd.f32 %v7821_v33, %v7733_v50  ;;  %v7590_v3 = vadd.f32 %v7589_v10, %v14724_v51  ;;  %7771 = vmatmul.bf16.gmra.mxu0 %v14330_v58  ;;  %7860 = vmatmul.bf16.gmra.mxu1 %v14332_v48 }
 0xd9c   : > { %8164 = vmatpush.bf16.msra.mxu1 %v10679_v39 }
 0xd9d   : > { %v8447_v1 = vmax.f32 %v7822_v28, 0.0  ;;  %v7679_v24 = vadd.f32 %v7678_v9, %v7590_v3 }
 0xd9f   : > { %8671 = vst [vmem:[%s14323_s28 + $0x88] sm:$0xff] %v8447_v1  ;;  %v8544_v31 = vmax.f32 %v7679_v24, 0.0 }
 0xda0   : > { %v7734_v8 = vpop.f32.mrf.mxu0  ;;  %v7823_v26 = vpop.f32.mrf.mxu1 }
 0xda1   : > { %8768 = vst [vmem:[%s14323_s28 + $0x390] sm:$0xff] %v8544_v31  ;;  %v7735_v21 = vadd.f32 %v7734_v8, %v14868_v14 }
 0xda2   : > { %v7591_v43 = vpop.f32.mrf.mxu2  ;;  %v7680_v55 = vpop.f32.mrf.mxu3 }
 0xda3   : > { %v7824_v35 = vadd.f32 %v7823_v26, %v7735_v21  ;;  %v7592_v32 = vadd.f32 %v7591_v43, %v14724_v51 }
 0xda5   : > { %v8454_v47 = vmax.f32 %v7824_v35, 0.0  ;;  %v7681_v33 = vadd.f32 %v7680_v55, %v7592_v32  ;;  %v10430_v35 = vld [vmem:[%s15474_s16 + $0x130] sm:$0xf]  ;;  %v11027_v32 = vld [vmem:[%s15474_s16 + $0x148] sm:$0xf0] }
 0xda7   : > { %8678 = vst [vmem:[%s14323_s28 + $0xc0] sm:$0xff] %v8454_v47  ;;  %v8551_v50 = vmax.f32 %v7681_v33, 0.0  ;;  %7909 = vmatmul.bf16.gmra.mxu2 %v14095_v57  ;;  %7998 = vmatmul.bf16.gmra.mxu3 %v14097_v16  ;;  %v10431_v33 = vor.u32 %v11027_v32, %v10430_v35 }
 0xda8   : > { %v7737_v49 = vpop.f32.mrf.mxu0  ;;  %v7826_v36 = vpop.f32.mrf.mxu1 }
 0xda9   : > { %8775 = vst [vmem:[%s14323_s28 + $0x3c8] sm:$0xff] %v8551_v50  ;;  %v7738_v10 = vadd.f32 %v7737_v49, %v14868_v14  ;;  %8254 = vmatpush.bf16.msra.mxu2 %v10431_v33 }
 0xdaa   : > { %v7594_v9 = vpop.f32.mrf.mxu2  ;;  %v7683_v0 = vpop.f32.mrf.mxu3 }
 0xdab   : > { %v7827_v28 = vadd.f32 %v7826_v36, %v7738_v10  ;;  %v7595_v3 = vadd.f32 %v7594_v9, %v14724_v51  ;;  %7776 = vmatmul.bf16.gmra.mxu0 %v14346_v19  ;;  %7865 = vmatmul.bf16.gmra.mxu1 %v14348_v27 }
 0xdad   : > { %v8461_v1 = vmax.f32 %v7827_v28, 0.0  ;;  %v7684_v24 = vadd.f32 %v7683_v0, %v7595_v3  ;;  %v10654_v0 = vld [vmem:[%s15474_s16 + $0x2f0] sm:$0xf]  ;;  %v11083_v28 = vld [vmem:[%s15474_s16 + $0x308] sm:$0xf0] }
 0xdaf   : > { %8685 = vst [vmem:[%s14323_s28 + $0xf8] sm:$0xff] %v8461_v1  ;;  %v8558_v31 = vmax.f32 %v7684_v24, 0.0  ;;  %v10655_v24 = vor.u32 %v11083_v28, %v10654_v0 }
 0xdb0   : > { %v7739_v13 = vpop.f32.mrf.mxu0  ;;  %v7828_v12 = vpop.f32.mrf.mxu1 }
 0xdb1   : > { %8782 = vst [vmem:[%s14323_s28 + $0x400] sm:$0xff] %v8558_v31  ;;  %v7740_v8 = vadd.f32 %v7739_v13, %v14868_v14  ;;  %v11023_v13 = vld [vmem:[%s15474_s16 + $0x12c] sm:$0xf]  ;;  %8343 = vmatpush.bf16.msra.mxu3 %v10655_v24 }
 0xdb2   : > { %v7596_v26 = vpop.f32.mrf.mxu2  ;;  %v7685_v25 = vpop.f32.mrf.mxu3 }
 0xdb3   : > { %v7829_v21 = vadd.f32 %v7828_v12, %v7740_v8  ;;  %v7597_v6 = vadd.f32 %v7596_v26, %v14724_v51  ;;  %v10424_v12 = vld [vmem:[%s15474_s16 + $0x144] sm:$0xf0] }
 0xdb5   : > { %v8468_v7 = vmax.f32 %v7829_v21, 0.0  ;;  %v7686_v43 = vadd.f32 %v7685_v25, %v7597_v6  ;;  %v10427_v25 = vor.u32 %v11023_v13, %v10424_v12  ;;  %v11079_v21 = vld [vmem:[%s15474_s16 + $0x2ec] sm:$0xf]  ;;  %v10648_v6 = vld [vmem:[%s15474_s16 + $0x304] sm:$0xf0] }
 0xdb7   : > { %8692 = vst [vmem:[%s14323_s28 + $0x130] sm:$0xff] %v8468_v7  ;;  %v8565_v55 = vmax.f32 %v7686_v43, 0.0  ;;  %7914 = vmatmul.bf16.gmra.mxu2 %v14107_v17  ;;  %8003 = vmatmul.bf16.gmra.mxu3 %v14109_v18 }
 0xdb8   : > { %v7742_v59 = vpop.f32.mrf.mxu0  ;;  %v7831_v30 = vpop.f32.mrf.mxu1  ;;  %8076 = vmatpush.bf16.msra.mxu0 %v10427_v25  ;;  %v10396_v25 = vld [vmem:[%s15474_s16 + $0x10c] sm:$0xf0] }
 0xdb9   : > { %8789 = vst [vmem:[%s14323_s28 + $0x438] sm:$0xff] %v8565_v55  ;;  %v7743_v20 = vadd.f32 %v7742_v59, %v14868_v14  ;;  %v10651_v55 = vor.u32 %v11079_v21, %v10648_v6  ;;  %v11072_v21 = vld [vmem:[%s15474_s16 + $0x2b4] sm:$0xf] }
 0xdba   : > { %v7599_v39 = vpop.f32.mrf.mxu2  ;;  %v7688_v47 = vpop.f32.mrf.mxu3 }
 0xdbb   : > { %v7832_v50 = vadd.f32 %v7831_v30, %v7743_v20  ;;  %v7600_v49 = vadd.f32 %v7599_v39, %v14724_v51  ;;  %7781 = vmatmul.bf16.gmra.mxu0 %v14374_v11  ;;  %7870 = vmatmul.bf16.gmra.mxu1 %v14376_v41 }
 0xdbc   : > { %8165 = vmatpush.bf16.msra.mxu1 %v10651_v55 }
 0xdbd   : > { %v8475_v36 = vmax.f32 %v7832_v50, 0.0  ;;  %v7689_v10 = vadd.f32 %v7688_v47, %v7600_v49 }
 0xdbf   : > { %8699 = vst [vmem:[%s14323_s28 + $0x168] sm:$0xff] %v8475_v36  ;;  %v8572_v9 = vmax.f32 %v7689_v10, 0.0 }
 0xdc0   : > { %v7744_v3 = vpop.f32.mrf.mxu0  ;;  %v7833_v1 = vpop.f32.mrf.mxu1 }
 0xdc1   : > { %8796 = vst [vmem:[%s14323_s28 + $0x470] sm:$0xff] %v8572_v9  ;;  %v7745_v31 = vadd.f32 %v7744_v3, %v14868_v14 }
 0xdc2   : > { %v7601_v8 = vpop.f32.mrf.mxu2  ;;  %v7690_v26 = vpop.f32.mrf.mxu3 }
 0xdc3   : > { %v7834_v7 = vadd.f32 %v7833_v1, %v7745_v31  ;;  %v7602_v43 = vadd.f32 %v7601_v8, %v14724_v51 }
 0xdc5   : > { %v8482_v59 = vmax.f32 %v7834_v7, 0.0  ;;  %v7691_v30 = vadd.f32 %v7690_v26, %v7602_v43  ;;  %v11016_v26 = vld [vmem:[%s15474_s16 + $0xf4] sm:$0xf]  ;;  %v10620_v43 = vld [vmem:[%s15474_s16 + $0x2cc] sm:$0xf0] }
 0xdc6   : > { %v10399_v7 = vor.u32 %v11016_v26, %v10396_v25  ;;  %v10626_v26 = vld [vmem:[%s15474_s16 + $0x2b8] sm:$0xf]  ;;  %v11076_v25 = vld [vmem:[%s15474_s16 + $0x2d0] sm:$0xf0] }
 0xdc7   : > { %8706 = vst [vmem:[%s14323_s28 + $0x1a0] sm:$0xff] %v8482_v59  ;;  %v8579_v20 = vmax.f32 %v7691_v30, 0.0  ;;  %7919 = vmatmul.bf16.gmra.mxu2 %v14143_v53  ;;  %8008 = vmatmul.bf16.gmra.mxu3 %v14145_v46  ;;  %v10623_v30 = vor.u32 %v11072_v21, %v10620_v43  ;;  %v10627_v43 = vor.u32 %v11076_v25, %v10626_v26 }
 0xdc8   : > { %v7747_v35 = vpop.f32.mrf.mxu0  ;;  %v7836_v32 = vpop.f32.mrf.mxu1  ;;  %8077 = vmatpush.bf16.msra.mxu0 %v10399_v7 }
 0xdc9   : > { %8803 = vst [vmem:[%s14323_s28 + $0x4a8] sm:$0xff] %v8579_v20  ;;  %v7748_v39 = vadd.f32 %v7747_v35, %v14868_v14  ;;  %v10402_v35 = vld [vmem:[%s15474_s16 + $0xf8] sm:$0xf]  ;;  %8166 = vmatpush.bf16.msra.mxu1 %v10623_v30  ;;  %8344 = vmatpush.bf16.msra.mxu3 %v10627_v43 }
 0xdca   : > { %v7604_v47 = vpop.f32.mrf.mxu2  ;;  %v7693_v33 = vpop.f32.mrf.mxu3 }
 0xdcb   : > { %v7837_v50 = vadd.f32 %v7836_v32, %v7748_v39  ;;  %v7605_v49 = vadd.f32 %v7604_v47, %v14724_v51  ;;  %7786 = vmatmul.bf16.gmra.mxu0 %v14390_v2  ;;  %7875 = vmatmul.bf16.gmra.mxu1 %v14392_v15  ;;  %v11020_v32 = vld [vmem:[%s15474_s16 + $0x110] sm:$0xf0] }
 0xdcd   : > { %v8489_v36 = vmax.f32 %v7837_v50, 0.0  ;;  %v7694_v10 = vadd.f32 %v7693_v33, %v7605_v49  ;;  %v10403_v33 = vor.u32 %v11020_v32, %v10402_v35  ;;  %v11009_v50 = vld [vmem:[%s15474_s16 + $0xbc] sm:$0xf]  ;;  %v10368_v49 = vld [vmem:[%s15474_s16 + $0xd4] sm:$0xf0] }
 0xdce   : > { %v10995_v32 = vld [vmem:[%s15474_s16 + $0x4c] sm:$0xf] }
 0xdcf   : > { %8713 = vst [vmem:[%s14323_s28 + $0x1d8] sm:$0xff] %v8489_v36  ;;  %v8586_v9 = vmax.f32 %v7694_v10, 0.0  ;;  %v11065_v36 = vld [vmem:[%s15474_s16 + $0x27c] sm:$0xf]  ;;  %8255 = vmatpush.bf16.msra.mxu2 %v10403_v33 }
 0xdd0   : > { %v7749_v0 = vpop.f32.mrf.mxu0  ;;  %v7838_v28 = vpop.f32.mrf.mxu1 }
 0xdd1   : > { %8810 = vst [vmem:[%s14323_s28 + $0x4e0] sm:$0xff] %v8586_v9  ;;  %v7750_v3 = vadd.f32 %v7749_v0, %v14868_v14  ;;  %v10371_v0 = vor.u32 %v11009_v50, %v10368_v49 }
 0xdd2   : > { %v7606_v1 = vpop.f32.mrf.mxu2  ;;  %v7695_v24 = vpop.f32.mrf.mxu3 }
 0xdd3   : > { %v7839_v31 = vadd.f32 %v7838_v28, %v7750_v3  ;;  %v7607_v13 = vadd.f32 %v7606_v1, %v14724_v51  ;;  %v10592_v28 = vld [vmem:[%s15474_s16 + $0x294] sm:$0xf0]  ;;  %8078 = vmatpush.bf16.msra.mxu0 %v10371_v0 }
 0xdd4   : > { %v10595_v3 = vor.u32 %v11065_v36, %v10592_v28  ;;  %v10536_v36 = vld [vmem:[%s15474_s16 + $0x224] sm:$0xf0]  ;;  %v10988_v28 = vld [vmem:[%s15474_s16 + $0x14] sm:$0xf] }
 0xdd5   : > { %v8496_v12 = vmax.f32 %v7839_v31, 0.0  ;;  %v7696_v8 = vadd.f32 %v7695_v24, %v7607_v13  ;;  %v11002_v31 = vld [vmem:[%s15474_s16 + $0x84] sm:$0xf]  ;;  %v10340_v13 = vld [vmem:[%s15474_s16 + $0x9c] sm:$0xf0] }
 0xdd6   : > { %8167 = vmatpush.bf16.msra.mxu1 %v10595_v3  ;;  %v10343_v21 = vor.u32 %v11002_v31, %v10340_v13  ;;  %v10284_v3 = vld [vmem:[%s15474_s16 + $0x2c] sm:$0xf0] }
 0xdd7   : > { %8720 = vst [vmem:[%s14323_s28 + $0x210] sm:$0xff] %v8496_v12  ;;  %v8593_v6 = vmax.f32 %v7696_v8, 0.0  ;;  %7924 = vmatmul.bf16.gmra.mxu2 %v14155_v62  ;;  %8013 = vmatmul.bf16.gmra.mxu3 %v14157_v22  ;;  %v11058_v12 = vld [vmem:[%s15474_s16 + $0x244] sm:$0xf]  ;;  %v10287_v31 = vor.u32 %v10988_v28, %v10284_v3  ;;  %v10508_v13 = vld [vmem:[%s15474_s16 + $0x1ec] sm:$0xf0] }
 0xdd8   : > { %v7752_v55 = vpop.f32.mrf.mxu0  ;;  %v7841_v59 = vpop.f32.mrf.mxu1  ;;  %8079 = vmatpush.bf16.msra.mxu0 %v10343_v21  ;;  %v10374_v3 = vld [vmem:[%s15474_s16 + $0xc0] sm:$0xf] }
 0xdd9   : > { %8817 = vst [vmem:[%s14323_s28 + $0x518] sm:$0xff] %v8593_v6  ;;  %v7753_v20 = vadd.f32 %v7752_v55, %v14868_v14  ;;  %v10564_v55 = vld [vmem:[%s15474_s16 + $0x25c] sm:$0xf0] }
 0xdda   : > { %v7609_v39 = vpop.f32.mrf.mxu2  ;;  %v7698_v47 = vpop.f32.mrf.mxu3  ;;  %v10567_v30 = vor.u32 %v11058_v12, %v10564_v55 }
 0xddb   : > { %v7842_v10 = vadd.f32 %v7841_v59, %v7753_v20  ;;  %v7610_v9 = vadd.f32 %v7609_v39, %v14724_v51  ;;  %7791 = vmatmul.bf16.gmra.mxu0 %v14418_v34  ;;  %7880 = vmatmul.bf16.gmra.mxu1 %v14420_v29  ;;  %v10312_v39 = vld [vmem:[%s15474_s16 + $0x64] sm:$0xf0] }
 0xddc   : > { %8168 = vmatpush.bf16.msra.mxu1 %v10567_v30  ;;  %v10315_v49 = vor.u32 %v10995_v32, %v10312_v39 }
 0xddd   : > { %v8503_v1 = vmax.f32 %v7842_v10, 0.0  ;;  %v7699_v24 = vadd.f32 %v7698_v47, %v7610_v9  ;;  %v11051_v47 = vld [vmem:[%s15474_s16 + $0x20c] sm:$0xf] }
 0xdde   : > { %v10539_v10 = vor.u32 %v11051_v47, %v10536_v36  ;;  %8080 = vmatpush.bf16.msra.mxu0 %v10315_v49 }
 0xddf   : > { %8727 = vst [vmem:[%s14323_s28 + $0x248] sm:$0xff] %v8503_v1  ;;  %v8600_v8 = vmax.f32 %v7699_v24, 0.0  ;;  %v11044_v1 = vld [vmem:[%s15474_s16 + $0x1d4] sm:$0xf] }
 0xde0   : > { %v7754_v6 = vpop.f32.mrf.mxu0  ;;  %v7843_v7 = vpop.f32.mrf.mxu1  ;;  %8169 = vmatpush.bf16.msra.mxu1 %v10539_v10  ;;  %v10511_v26 = vor.u32 %v11044_v1, %v10508_v13  ;;  %v11013_v1 = vld [vmem:[%s15474_s16 + $0xd8] sm:$0xf0] }
 0xde1   : > { %8824 = vst [vmem:[%s14323_s28 + $0x550] sm:$0xff] %v8600_v8  ;;  %v7755_v59 = vadd.f32 %v7754_v6, %v14868_v14  ;;  %v10375_v13 = vor.u32 %v11013_v1, %v10374_v3 }
 0xde2   : > { %v7611_v20 = vpop.f32.mrf.mxu2  ;;  %v7700_v35 = vpop.f32.mrf.mxu3  ;;  %8081 = vmatpush.bf16.msra.mxu0 %v10287_v31 }
 0xde3   : > { %v7844_v33 = vadd.f32 %v7843_v7, %v7755_v59  ;;  %v7612_v50 = vadd.f32 %v7611_v20, %v14724_v51  ;;  %8256 = vmatpush.bf16.msra.mxu2 %v10375_v13 }
 0xde4   : > { %8170 = vmatpush.bf16.msra.mxu1 %v10511_v26 }
 0xde5   : > { %v8510_v9 = vmax.f32 %v7844_v33, 0.0  ;;  %v7701_v0 = vadd.f32 %v7700_v35, %v7612_v50 }
 0xde7   : > { %8734 = vst [vmem:[%s14323_s28 + $0x280] sm:$0xff] %v8510_v9  ;;  %v8607_v24 = vmax.f32 %v7701_v0, 0.0  ;;  %7929 = vmatmul.bf16.gmra.mxu2 %v14227_v63  ;;  %8018 = vmatmul.bf16.gmra.mxu3 %v14229_v54 }
 0xde8   : > { %v7757_v12 = vpop.f32.mrf.mxu0  ;;  %v7846_v8 = vpop.f32.mrf.mxu1 }
 0xde9   : > { %8831 = vst [vmem:[%s14323_s28 + $0x588] sm:$0xff] %v8607_v24  ;;  %v7758_v25 = vadd.f32 %v7757_v12, %v14868_v14 }
 0xdea   : > { %v7614_v21 = vpop.f32.mrf.mxu2  ;;  %v7703_v6 = vpop.f32.mrf.mxu3 }
 0xdeb   : > { %v7847_v7 = vadd.f32 %v7846_v8, %v7758_v25  ;;  %v7615_v43 = vadd.f32 %v7614_v21, %v14724_v51  ;;  %7796 = vmatmul.bf16.gmra.mxu0 %v14434_v45  ;;  %7885 = vmatmul.bf16.gmra.mxu1 %v14436_v52 }
 0xded   : > { %v8517_v55 = vmax.f32 %v7847_v7, 0.0  ;;  %v7704_v59 = vadd.f32 %v7703_v6, %v7615_v43  ;;  %v10598_v6 = vld [vmem:[%s15474_s16 + $0x280] sm:$0xf]  ;;  %v11069_v7 = vld [vmem:[%s15474_s16 + $0x298] sm:$0xf0] }
 0xdef   : > { %8741 = vst [vmem:[%s14323_s28 + $0x2b8] sm:$0xff] %v8517_v55  ;;  %v8614_v30 = vmax.f32 %v7704_v59, 0.0  ;;  %v10599_v59 = vor.u32 %v11069_v7, %v10598_v6 }
 0xdf0   : > { %v7759_v20 = vpop.f32.mrf.mxu0  ;;  %v7848_v35 = vpop.f32.mrf.mxu1 }
 0xdf1   : > { %8838 = vst [vmem:[%s14323_s28 + $0x5c0] sm:$0xff] %v8614_v30  ;;  %v7760_v32 = vadd.f32 %v7759_v20, %v14868_v14  ;;  %8345 = vmatpush.bf16.msra.mxu3 %v10599_v59  ;;  %v15114_v59 = vperm.slane %v14292_v4, 4 }
 0xdf2   : > { %v7616_v39 = vpop.f32.mrf.mxu2  ;;  %v7705_v47 = vpop.f32.mrf.mxu3 }
 0xdf3   : > { %v7849_v33 = vadd.f32 %v7848_v35, %v7760_v32  ;;  %v7617_v50 = vadd.f32 %v7616_v39, %v14724_v51 }
 0xdf5   : > { %v8524_v49 = vmax.f32 %v7849_v33, 0.0  ;;  %v7706_v36 = vadd.f32 %v7705_v47, %v7617_v50 }
 0xdf7   : > { %8748 = vst [vmem:[%s14323_s28 + $0x2f0] sm:$0xff] %v8524_v49  ;;  %v8621_v10 = vmax.f32 %v7706_v36, 0.0  ;;  %7934 = vmatmul.bf16.gmra.mxu2 %v14251_v61  ;;  %8023 = vmatmul.bf16.gmra.mxu3 %v14253_v42 }
 0xdf8   : > { %v7762_v9 = vpop.f32.mrf.mxu0  ;;  %v7851_v0 = vpop.f32.mrf.mxu1 }
 0xdf9   : > { %8845 = vst [vmem:[%s14323_s28 + $0x5f8] sm:$0xff] %v8621_v10  ;;  %v7763_v28 = vadd.f32 %v7762_v9, %v14868_v14 }
 0xdfa   : > { %v7619_v24 = vpop.f32.mrf.mxu2  ;;  %v7708_v31 = vpop.f32.mrf.mxu3 }
 0xdfb   : > { %v7852_v12 = vadd.f32 %v7851_v0, %v7763_v28  ;;  %v7620_v8 = vadd.f32 %v7619_v24, %v14724_v51  ;;  %7801 = vmatmul.bf16.gmra.mxu0 %v14474_v37  ;;  %7890 = vmatmul.bf16.gmra.mxu1 %v14476_v5 }
 0xdfd   : > { %v8531_v26 = vmax.f32 %v7852_v12, 0.0  ;;  %v7709_v25 = vadd.f32 %v7708_v31, %v7620_v8 }
 0xdff   : > { %8755 = vst [vmem:[%s14323_s28 + $0x328] sm:$0xff] %v8531_v26  ;;  %v8628_v21 = vmax.f32 %v7709_v25, 0.0 }
 0xe00   : > { %v7764_v43 = vpop.f32.mrf.mxu0  ;;  %v7853_v55 = vpop.f32.mrf.mxu1 }
 0xe01   : > { %8852 = vst [vmem:[%s14323_s28 + $0x630] sm:$0xff] %v8628_v21  ;;  %v7765_v30 = vadd.f32 %v7764_v43, %v14868_v14 }
 0xe02   : > { %v7621_v20 = vpop.f32.mrf.mxu2  ;;  %v7710_v35 = vpop.f32.mrf.mxu3 }
 0xe03   : > { %v7854_v32 = vadd.f32 %v7853_v55, %v7765_v30  ;;  %v7622_v39 = vadd.f32 %v7621_v20, %v14724_v51 }
 0xe05   : > { %v8538_v47 = vmax.f32 %v7854_v32, 0.0  ;;  %v7711_v33 = vadd.f32 %v7710_v35, %v7622_v39  ;;  %v11006_v32 = vld [vmem:[%s15474_s16 + $0xa0] sm:$0xf0] }
 0xe07   : > { %8762 = vst [vmem:[%s14323_s28 + $0x360] sm:$0xff] %v8538_v47  ;;  %v8635_v50 = vmax.f32 %v7711_v33, 0.0  ;;  %7939 = vmatmul.bf16.gmra.mxu2 %v14274_v44  ;;  %8028 = vmatmul.bf16.gmra.mxu3 %v14276_v38 }
 0xe08   : > { %v7767_v49 = vpop.f32.mrf.mxu0  ;;  %v7856_v36 = vpop.f32.mrf.mxu1 }
 0xe09   : > { %8859 = vst [vmem:[%s14323_s28 + $0x668] sm:$0xff] %v8635_v50  ;;  %v7768_v10 = vadd.f32 %v7767_v49, %v14868_v14 }
 0xe0a   : > { %v7624_v9 = vpop.f32.mrf.mxu2  ;;  %v7713_v0 = vpop.f32.mrf.mxu3 }
 0xe0b   : > { %v7857_v28 = vadd.f32 %v7856_v36, %v7768_v10  ;;  %v7625_v3 = vadd.f32 %v7624_v9, %v14724_v51  ;;  %8082 = vmatmul.bf16.vlgmr.msra.gmra.mxu0 %v14059_v40  ;;  %8171 = vmatmul.bf16.vlgmr.msra.gmra.mxu1 %v14061_v56 }
 0xe0d   : > { %v8545_v1 = vmax.f32 %v7857_v28, 0.0  ;;  %v7714_v24 = vadd.f32 %v7713_v0, %v7625_v3  ;;  %v10570_v0 = vld [vmem:[%s15474_s16 + $0x248] sm:$0xf]  ;;  %v11062_v28 = vld [vmem:[%s15474_s16 + $0x260] sm:$0xf0] }
 0xe0f   : > { %8769 = vst [vmem:[%s14323_s28 + $0x398] sm:$0xff] %v8545_v1  ;;  %v8642_v31 = vmax.f32 %v7714_v24, 0.0  ;;  %v10571_v24 = vor.u32 %v11062_v28, %v10570_v0 }
 0xe10   : > { %v7769_v13 = vpop.f32.mrf.mxu0  ;;  %v7858_v12 = vpop.f32.mrf.mxu1 }
 0xe11   : > { %8866 = vst [vmem:[%s14323_s28 + $0x6a0] sm:$0xff] %v8642_v31  ;;  %v7770_v8 = vadd.f32 %v7769_v13, %v14868_v14  ;;  %8346 = vmatpush.bf16.msra.mxu3 %v10571_v24 }
 0xe12   : > { %v7626_v26 = vpop.f32.mrf.mxu2  ;;  %v7715_v25 = vpop.f32.mrf.mxu3 }
 0xe13   : > { %v7859_v21 = vadd.f32 %v7858_v12, %v7770_v8  ;;  %v7627_v6 = vadd.f32 %v7626_v26, %v14724_v51  ;;  %v10346_v51 = vld [vmem:[%s15474_s16 + $0x88] sm:$0xf] }
 0xe14   : > { %v10347_v33 = vor.u32 %v11006_v32, %v10346_v51 }
 0xe15   : > { %v8552_v7 = vmax.f32 %v7859_v21, 0.0  ;;  %v7716_v43 = vadd.f32 %v7715_v25, %v7627_v6 }
 0xe16   : > { %8257 = vmatpush.bf16.msra.mxu2 %v10347_v33 }
 0xe17   : > { %8776 = vst [vmem:[%s14323_s28 + $0x3d0] sm:$0xff] %v8552_v7  ;;  %v8649_v55 = vmax.f32 %v7716_v43, 0.0  ;;  %7944 = vmatmul.bf16.gmra.mxu2 %v14294_v60  ;;  %8033 = vmatmul.bf16.gmra.mxu3 %v14296_v23 }
 0xe18   : > { %v7772_v30 = vpop.f32.mrf.mxu0  ;;  %v7861_v20 = vpop.f32.mrf.mxu1 }
 0xe19   : > { %8873 = vst [vmem:[%s14323_s28 + $0x6d8] sm:$0xff] %v8649_v55  ;;  %v7773_v35 = vadd.f32 %v7772_v30, %v14868_v14 }
 0xe1a   : > { %v7905_v39 = vpop.f32.mrf.mxu2  ;;  %v7994_v47 = vpop.f32.mrf.mxu3 }
 0xe1b   : > { %v7862_v50 = vadd.f32 %v7861_v20, %v7773_v35  ;;  %v7906_v49 = vadd.f32 %v7905_v39, %v15114_v59  ;;  %8087 = vmatmul.bf16.gmra.mxu0 %v14095_v57  ;;  %8176 = vmatmul.bf16.gmra.mxu1 %v14097_v16 }
 0xe1d   : > { %v8559_v36 = vmax.f32 %v7862_v50, 0.0  ;;  %v7995_v10 = vadd.f32 %v7994_v47, %v7906_v49 }
 0xe1f   : > { %8783 = vst [vmem:[%s14323_s28 + $0x408] sm:$0xff] %v8559_v36  ;;  %v8434_v9 = vmax.f32 %v7995_v10, 0.0 }
 0xe20   : > { %v7774_v3 = vpop.f32.mrf.mxu0  ;;  %v7863_v1 = vpop.f32.mrf.mxu1 }
 0xe21   : > { %8658 = vst [vmem:[%s14323_s28 + $0x20] sm:$0xff] %v8434_v9  ;;  %v7775_v31 = vadd.f32 %v7774_v3, %v14868_v14 }
 0xe22   : > { %v7907_v13 = vpop.f32.mrf.mxu2  ;;  %v7996_v12 = vpop.f32.mrf.mxu3 }
 0xe23   : > { %v7864_v8 = vadd.f32 %v7863_v1, %v7775_v31  ;;  %v7908_v26 = vadd.f32 %v7907_v13, %v15114_v59 }
 0xe25   : > { %v8566_v25 = vmax.f32 %v7864_v8, 0.0  ;;  %v7997_v21 = vadd.f32 %v7996_v12, %v7908_v26  ;;  %v10318_v12 = vld [vmem:[%s15474_s16 + $0x50] sm:$0xf]  ;;  %v10999_v8 = vld [vmem:[%s15474_s16 + $0x68] sm:$0xf0] }
 0xe27   : > { %8790 = vst [vmem:[%s14323_s28 + $0x440] sm:$0xff] %v8566_v25  ;;  %v8441_v6 = vmax.f32 %v7997_v21, 0.0  ;;  %7949 = vmatmul.bf16.gmra.mxu2 %v14330_v58  ;;  %8038 = vmatmul.bf16.gmra.mxu3 %v14332_v48  ;;  %v10319_v21 = vor.u32 %v10999_v8, %v10318_v12 }
 0xe28   : > { %v7777_v7 = vpop.f32.mrf.mxu0  ;;  %v7866_v43 = vpop.f32.mrf.mxu1 }
 0xe29   : > { %8665 = vst [vmem:[%s14323_s28 + $0x58] sm:$0xff] %v8441_v6  ;;  %v7778_v55 = vadd.f32 %v7777_v7, %v14868_v14  ;;  %8258 = vmatpush.bf16.msra.mxu2 %v10319_v21 }
 0xe2a   : > { %v7910_v30 = vpop.f32.mrf.mxu2  ;;  %v7999_v20 = vpop.f32.mrf.mxu3 }
 0xe2b   : > { %v7867_v35 = vadd.f32 %v7866_v43, %v7778_v55  ;;  %v7911_v51 = vadd.f32 %v7910_v30, %v15114_v59  ;;  %8092 = vmatmul.bf16.gmra.mxu0 %v14107_v17  ;;  %8181 = vmatmul.bf16.gmra.mxu1 %v14109_v18 }
 0xe2d   : > { %v8573_v32 = vmax.f32 %v7867_v35, 0.0  ;;  %v8000_v39 = vadd.f32 %v7999_v20, %v7911_v51  ;;  %v10542_v20 = vld [vmem:[%s15474_s16 + $0x210] sm:$0xf]  ;;  %v11055_v35 = vld [vmem:[%s15474_s16 + $0x228] sm:$0xf0] }
 0xe2f   : > { %8797 = vst [vmem:[%s14323_s28 + $0x478] sm:$0xff] %v8573_v32  ;;  %v8448_v47 = vmax.f32 %v8000_v39, 0.0  ;;  %v10543_v39 = vor.u32 %v11055_v35, %v10542_v20 }
 0xe30   : > { %v7779_v33 = vpop.f32.mrf.mxu0  ;;  %v7868_v50 = vpop.f32.mrf.mxu1 }
 0xe31   : > { %8672 = vst [vmem:[%s14323_s28 + $0x90] sm:$0xff] %v8448_v47  ;;  %v7780_v49 = vadd.f32 %v7779_v33, %v14868_v14  ;;  %8347 = vmatpush.bf16.msra.mxu3 %v10543_v39 }
 0xe32   : > { %v7912_v36 = vpop.f32.mrf.mxu2  ;;  %v8001_v10 = vpop.f32.mrf.mxu3 }
 0xe33   : > { %v7869_v9 = vadd.f32 %v7868_v50, %v7780_v49  ;;  %v7913_v0 = vadd.f32 %v7912_v36, %v15114_v59 }
 0xe35   : > { %v8580_v28 = vmax.f32 %v7869_v9, 0.0  ;;  %v8002_v3 = vadd.f32 %v8001_v10, %v7913_v0 }
 0xe37   : > { %8804 = vst [vmem:[%s14323_s28 + $0x4b0] sm:$0xff] %v8580_v28  ;;  %v8455_v1 = vmax.f32 %v8002_v3, 0.0  ;;  %7954 = vmatmul.bf16.gmra.mxu2 %v14346_v19  ;;  %8043 = vmatmul.bf16.gmra.mxu3 %v14348_v27 }
 0xe38   : > { %v7782_v24 = vpop.f32.mrf.mxu0  ;;  %v7871_v31 = vpop.f32.mrf.mxu1 }
 0xe39   : > { %8679 = vst [vmem:[%s14323_s28 + $0xc8] sm:$0xff] %v8455_v1  ;;  %v7783_v13 = vadd.f32 %v7782_v24, %v14868_v14 }
 0xe3a   : > { %v7915_v26 = vpop.f32.mrf.mxu2  ;;  %v8004_v25 = vpop.f32.mrf.mxu3 }
 0xe3b   : > { %v7872_v6 = vadd.f32 %v7871_v31, %v7783_v13  ;;  %v7916_v7 = vadd.f32 %v7915_v26, %v15114_v59  ;;  %8097 = vmatmul.bf16.gmra.mxu0 %v14143_v53  ;;  %8186 = vmatmul.bf16.gmra.mxu1 %v14145_v46 }
 0xe3d   : > { %v8587_v43 = vmax.f32 %v7872_v6, 0.0  ;;  %v8005_v55 = vadd.f32 %v8004_v25, %v7916_v7 }
 0xe3f   : > { %8811 = vst [vmem:[%s14323_s28 + $0x4e8] sm:$0xff] %v8587_v43  ;;  %v8462_v30 = vmax.f32 %v8005_v55, 0.0 }
 0xe40   : > { %v7784_v51 = vpop.f32.mrf.mxu0  ;;  %v7873_v32 = vpop.f32.mrf.mxu1 }
 0xe41   : > { %8686 = vst [vmem:[%s14323_s28 + $0x100] sm:$0xff] %v8462_v30  ;;  %v7785_v47 = vadd.f32 %v7784_v51, %v14868_v14 }
 0xe42   : > { %v7917_v33 = vpop.f32.mrf.mxu2  ;;  %v8006_v50 = vpop.f32.mrf.mxu3 }
 0xe43   : > { %v7874_v49 = vadd.f32 %v7873_v32, %v7785_v47  ;;  %v7918_v36 = vadd.f32 %v7917_v33, %v15114_v59 }
 0xe45   : > { %v8594_v10 = vmax.f32 %v7874_v49, 0.0  ;;  %v8007_v9 = vadd.f32 %v8006_v50, %v7918_v36  ;;  %v10290_v50 = vld [vmem:[%s15474_s16 + $0x18] sm:$0xf]  ;;  %v10992_v49 = vld [vmem:[%s15474_s16 + $0x30] sm:$0xf0] }
 0xe47   : > { %8818 = vst [vmem:[%s14323_s28 + $0x520] sm:$0xff] %v8594_v10  ;;  %v8469_v0 = vmax.f32 %v8007_v9, 0.0  ;;  %7959 = vmatmul.bf16.gmra.mxu2 %v14374_v11  ;;  %8048 = vmatmul.bf16.gmra.mxu3 %v14376_v41  ;;  %v10291_v9 = vor.u32 %v10992_v49, %v10290_v50 }
 0xe48   : > { %v7787_v28 = vpop.f32.mrf.mxu0  ;;  %v7876_v3 = vpop.f32.mrf.mxu1 }
 0xe49   : > { %8693 = vst [vmem:[%s14323_s28 + $0x138] sm:$0xff] %v8469_v0  ;;  %v7788_v1 = vadd.f32 %v7787_v28, %v14868_v14  ;;  %8259 = vmatpush.bf16.msra.mxu2 %v10291_v9 }
 0xe4a   : > { %v7920_v24 = vpop.f32.mrf.mxu2  ;;  %v8009_v31 = vpop.f32.mrf.mxu3 }
 0xe4b   : > { %v7877_v13 = vadd.f32 %v7876_v3, %v7788_v1  ;;  %v7921_v12 = vadd.f32 %v7920_v24, %v15114_v59  ;;  %8102 = vmatmul.bf16.gmra.mxu0 %v14155_v62  ;;  %8191 = vmatmul.bf16.gmra.mxu1 %v14157_v22 }
 0xe4d   : > { %v8601_v8 = vmax.f32 %v7877_v13, 0.0  ;;  %v8010_v26 = vadd.f32 %v8009_v31, %v7921_v12  ;;  %v10514_v31 = vld [vmem:[%s15474_s16 + $0x1d8] sm:$0xf]  ;;  %v11048_v13 = vld [vmem:[%s15474_s16 + $0x1f0] sm:$0xf0] }
 0xe4f   : > { %8825 = vst [vmem:[%s14323_s28 + $0x558] sm:$0xff] %v8601_v8  ;;  %v8476_v25 = vmax.f32 %v8010_v26, 0.0  ;;  %v10515_v26 = vor.u32 %v11048_v13, %v10514_v31 }
 0xe50   : > { %v7789_v21 = vpop.f32.mrf.mxu0  ;;  %v7878_v6 = vpop.f32.mrf.mxu1 }
 0xe51   : > { %8700 = vst [vmem:[%s14323_s28 + $0x170] sm:$0xff] %v8476_v25  ;;  %v7790_v7 = vadd.f32 %v7789_v21, %v14868_v14  ;;  %8348 = vmatpush.bf16.msra.mxu3 %v10515_v26 }
 0xe52   : > { %v7922_v43 = vpop.f32.mrf.mxu2  ;;  %v8011_v55 = vpop.f32.mrf.mxu3 }
 0xe53   : > { %v7879_v30 = vadd.f32 %v7878_v6, %v7790_v7  ;;  %v7923_v20 = vadd.f32 %v7922_v43, %v15114_v59 }
 0xe55   : > { %v8608_v35 = vmax.f32 %v7879_v30, 0.0  ;;  %v8012_v51 = vadd.f32 %v8011_v55, %v7923_v20 }
 0xe57   : > { %8832 = vst [vmem:[%s14323_s28 + $0x590] sm:$0xff] %v8608_v35  ;;  %v8483_v32 = vmax.f32 %v8012_v51, 0.0  ;;  %7964 = vmatmul.bf16.gmra.mxu2 %v14390_v2  ;;  %8053 = vmatmul.bf16.gmra.mxu3 %v14392_v15 }
 0xe58   : > { %v7792_v39 = vpop.f32.mrf.mxu0  ;;  %v7881_v47 = vpop.f32.mrf.mxu1 }
 0xe59   : > { %8707 = vst [vmem:[%s14323_s28 + $0x1a8] sm:$0xff] %v8483_v32  ;;  %v7793_v33 = vadd.f32 %v7792_v39, %v14868_v14 }
 0xe5a   : > { %v7925_v36 = vpop.f32.mrf.mxu2  ;;  %v8014_v10 = vpop.f32.mrf.mxu3 }
 0xe5b   : > { %v7882_v0 = vadd.f32 %v7881_v47, %v7793_v33  ;;  %v7926_v28 = vadd.f32 %v7925_v36, %v15114_v59  ;;  %8107 = vmatmul.bf16.gmra.mxu0 %v14227_v63  ;;  %8196 = vmatmul.bf16.gmra.mxu1 %v14229_v54 }
 0xe5d   : > { %v8615_v3 = vmax.f32 %v7882_v0, 0.0  ;;  %v8015_v1 = vadd.f32 %v8014_v10, %v7926_v28 }
 0xe5f   : > { %8839 = vst [vmem:[%s14323_s28 + $0x5c8] sm:$0xff] %v8615_v3  ;;  %v8490_v24 = vmax.f32 %v8015_v1, 0.0 }
 0xe60   : > { %v7794_v12 = vpop.f32.mrf.mxu0  ;;  %v7883_v8 = vpop.f32.mrf.mxu1 }
 0xe61   : > { %8714 = vst [vmem:[%s14323_s28 + $0x1e0] sm:$0xff] %v8490_v24  ;;  %v7795_v25 = vadd.f32 %v7794_v12, %v14868_v14 }
 0xe62   : > { %v7927_v21 = vpop.f32.mrf.mxu2  ;;  %v8016_v6 = vpop.f32.mrf.mxu3 }
 0xe63   : > { %v7884_v7 = vadd.f32 %v7883_v8, %v7795_v25  ;;  %v7928_v43 = vadd.f32 %v7927_v21, %v15114_v59 }
 0xe65   : > { %v8622_v55 = vmax.f32 %v7884_v7, 0.0  ;;  %v8017_v30 = vadd.f32 %v8016_v6, %v7928_v43 }
 0xe67   : > { %8846 = vst [vmem:[%s14323_s28 + $0x600] sm:$0xff] %v8622_v55  ;;  %v8497_v20 = vmax.f32 %v8017_v30, 0.0  ;;  %7969 = vmatmul.bf16.gmra.mxu2 %v14418_v34  ;;  %8058 = vmatmul.bf16.gmra.mxu3 %v14420_v29 }
 0xe68   : > { %v7797_v35 = vpop.f32.mrf.mxu0  ;;  %v7886_v51 = vpop.f32.mrf.mxu1 }
 0xe69   : > { %8721 = vst [vmem:[%s14323_s28 + $0x218] sm:$0xff] %v8497_v20  ;;  %v7798_v32 = vadd.f32 %v7797_v35, %v14868_v14 }
 0xe6a   : > { %v7930_v39 = vpop.f32.mrf.mxu2  ;;  %v8019_v47 = vpop.f32.mrf.mxu3 }
 0xe6b   : > { %v7887_v33 = vadd.f32 %v7886_v51, %v7798_v32  ;;  %v7931_v50 = vadd.f32 %v7930_v39, %v15114_v59  ;;  %8112 = vmatmul.bf16.gmra.mxu0 %v14251_v61  ;;  %8201 = vmatmul.bf16.gmra.mxu1 %v14253_v42 }
 0xe6d   : > { %v8629_v49 = vmax.f32 %v7887_v33, 0.0  ;;  %v8020_v36 = vadd.f32 %v8019_v47, %v7931_v50 }
 0xe6f   : > { %8853 = vst [vmem:[%s14323_s28 + $0x638] sm:$0xff] %v8629_v49  ;;  %v8504_v10 = vmax.f32 %v8020_v36, 0.0 }
 0xe70   : > { %v7799_v9 = vpop.f32.mrf.mxu0  ;;  %v7888_v0 = vpop.f32.mrf.mxu1 }
 0xe71   : > { %8728 = vst [vmem:[%s14323_s28 + $0x250] sm:$0xff] %v8504_v10  ;;  %v7800_v28 = vadd.f32 %v7799_v9, %v14868_v14  ;;  %v15234_v9 = vperm.slane %v14292_v4, 5 }
 0xe72   : > { %v7932_v3 = vpop.f32.mrf.mxu2  ;;  %v8021_v1 = vpop.f32.mrf.mxu3 }
 0xe73   : > { %v7889_v24 = vadd.f32 %v7888_v0, %v7800_v28  ;;  %v7933_v31 = vadd.f32 %v7932_v3, %v15114_v59 }
 0xe75   : > { %v8636_v13 = vmax.f32 %v7889_v24, 0.0  ;;  %v8022_v12 = vadd.f32 %v8021_v1, %v7933_v31 }
 0xe77   : > { %8860 = vst [vmem:[%s14323_s28 + $0x670] sm:$0xff] %v8636_v13  ;;  %v8511_v8 = vmax.f32 %v8022_v12, 0.0  ;;  %7974 = vmatmul.bf16.gmra.mxu2 %v14434_v45  ;;  %8063 = vmatmul.bf16.gmra.mxu3 %v14436_v52 }
 0xe78   : > { %v7802_v26 = vpop.f32.mrf.mxu0  ;;  %v7891_v25 = vpop.f32.mrf.mxu1 }
 0xe79   : > { %8735 = vst [vmem:[%s14323_s28 + $0x288] sm:$0xff] %v8511_v8  ;;  %v7803_v21 = vadd.f32 %v7802_v26, %v14868_v14 }
 0xe7a   : > { %v7935_v6 = vpop.f32.mrf.mxu2  ;;  %v8024_v7 = vpop.f32.mrf.mxu3 }
 0xe7b   : > { %v7892_v43 = vadd.f32 %v7891_v25, %v7803_v21  ;;  %v7936_v55 = vadd.f32 %v7935_v6, %v15114_v59  ;;  %8117 = vmatmul.bf16.gmra.mxu0 %v14274_v44  ;;  %8206 = vmatmul.bf16.gmra.mxu1 %v14276_v38 }
 0xe7d   : > { %v8643_v30 = vmax.f32 %v7892_v43, 0.0  ;;  %v8025_v20 = vadd.f32 %v8024_v7, %v7936_v55 }
 0xe7f   : > { %8867 = vst [vmem:[%s14323_s28 + $0x6a8] sm:$0xff] %v8643_v30  ;;  %v8518_v35 = vmax.f32 %v8025_v20, 0.0 }
 0xe80   : > { %v7804_v51 = vpop.f32.mrf.mxu0  ;;  %v7893_v32 = vpop.f32.mrf.mxu1 }
 0xe81   : > { %8742 = vst [vmem:[%s14323_s28 + $0x2c0] sm:$0xff] %v8518_v35  ;;  %v7805_v39 = vadd.f32 %v7804_v51, %v14868_v14 }
 0xe82   : > { %v7937_v47 = vpop.f32.mrf.mxu2  ;;  %v8026_v33 = vpop.f32.mrf.mxu3 }
 0xe83   : > { %v7894_v50 = vadd.f32 %v7893_v32, %v7805_v39  ;;  %v7938_v49 = vadd.f32 %v7937_v47, %v15114_v59 }
 0xe85   : > { %v8650_v36 = vmax.f32 %v7894_v50, 0.0  ;;  %v8027_v10 = vadd.f32 %v8026_v33, %v7938_v49 }
 0xe87   : > { %8874 = vst [vmem:[%s14323_s28 + $0x6e0] sm:$0xff] %v8650_v36  ;;  %v8525_v0 = vmax.f32 %v8027_v10, 0.0  ;;  %7979 = vmatmul.bf16.gmra.mxu2 %v14474_v37  ;;  %8068 = vmatmul.bf16.gmra.mxu3 %v14476_v5 }
 0xe88   : > { %v8083_v28 = vpop.f32.mrf.mxu0  ;;  %v8172_v14 = vpop.f32.mrf.mxu1 }
 0xe89   : > { %8749 = vst [vmem:[%s14323_s28 + $0x2f8] sm:$0xff] %v8525_v0  ;;  %v8084_v3 = vadd.f32 %v8083_v28, %v15234_v9 }
 0xe8a   : > { %v7940_v1 = vpop.f32.mrf.mxu2  ;;  %v8029_v24 = vpop.f32.mrf.mxu3 }
 0xe8b   : > { %v8173_v31 = vadd.f32 %v8172_v14, %v8084_v3  ;;  %v7941_v13 = vadd.f32 %v7940_v1, %v15114_v59  ;;  %8122 = vmatmul.bf16.gmra.mxu0 %v14294_v60  ;;  %8211 = vmatmul.bf16.gmra.mxu1 %v14296_v23 }
 0xe8d   : > { %v8435_v12 = vmax.f32 %v8173_v31, 0.0  ;;  %v8030_v8 = vadd.f32 %v8029_v24, %v7941_v13 }
 0xe8f   : > { %8659 = vst [vmem:[%s14323_s28 + $0x28] sm:$0xff] %v8435_v12  ;;  %v8532_v26 = vmax.f32 %v8030_v8, 0.0 }
 0xe90   : > { %v8085_v25 = vpop.f32.mrf.mxu0  ;;  %v8174_v21 = vpop.f32.mrf.mxu1 }
 0xe91   : > { %8756 = vst [vmem:[%s14323_s28 + $0x330] sm:$0xff] %v8532_v26  ;;  %v8086_v6 = vadd.f32 %v8085_v25, %v15234_v9 }
 0xe92   : > { %v7942_v7 = vpop.f32.mrf.mxu2  ;;  %v8031_v43 = vpop.f32.mrf.mxu3 }
 0xe93   : > { %v8175_v55 = vadd.f32 %v8174_v21, %v8086_v6  ;;  %v7943_v30 = vadd.f32 %v7942_v7, %v15114_v59 }
 0xe95   : > { %v8442_v20 = vmax.f32 %v8175_v55, 0.0  ;;  %v8032_v35 = vadd.f32 %v8031_v43, %v7943_v30 }
 0xe97   : > { %8666 = vst [vmem:[%s14323_s28 + $0x60] sm:$0xff] %v8442_v20  ;;  %v8539_v51 = vmax.f32 %v8032_v35, 0.0  ;;  %8260 = vmatmul.bf16.vlgmr.msra.gmra.mxu2 %v14059_v40  ;;  %8349 = vmatmul.bf16.vlgmr.msra.gmra.mxu3 %v14061_v56 }
 0xe98   : > { %v8088_v32 = vpop.f32.mrf.mxu0  ;;  %v8177_v39 = vpop.f32.mrf.mxu1 }
 0xe99   : > { %8763 = vst [vmem:[%s14323_s28 + $0x368] sm:$0xff] %v8539_v51  ;;  %v8089_v47 = vadd.f32 %v8088_v32, %v15234_v9 }
 0xe9a   : > { %v7945_v33 = vpop.f32.mrf.mxu2  ;;  %v8034_v50 = vpop.f32.mrf.mxu3 }
 0xe9b   : > { %v8178_v49 = vadd.f32 %v8177_v39, %v8089_v47  ;;  %v7946_v36 = vadd.f32 %v7945_v33, %v15114_v59  ;;  %8127 = vmatmul.bf16.gmra.mxu0 %v14330_v58  ;;  %8216 = vmatmul.bf16.gmra.mxu1 %v14332_v48 }
 0xe9d   : > { %v8449_v10 = vmax.f32 %v8178_v49, 0.0  ;;  %v8035_v40 = vadd.f32 %v8034_v50, %v7946_v36 }
 0xe9f   : > { %8673 = vst [vmem:[%s14323_s28 + $0x98] sm:$0xff] %v8449_v10  ;;  %v8546_v56 = vmax.f32 %v8035_v40, 0.0 }
 0xea0   : > { %v8090_v0 = vpop.f32.mrf.mxu0  ;;  %v8179_v28 = vpop.f32.mrf.mxu1 }
 0xea1   : > { %8770 = vst [vmem:[%s14323_s28 + $0x3a0] sm:$0xff] %v8546_v56  ;;  %v8091_v14 = vadd.f32 %v8090_v0, %v15234_v9 }
 0xea2   : > { %v7947_v3 = vpop.f32.mrf.mxu2  ;;  %v8036_v1 = vpop.f32.mrf.mxu3 }
 0xea3   : > { %v8180_v24 = vadd.f32 %v8179_v28, %v8091_v14  ;;  %v7948_v31 = vadd.f32 %v7947_v3, %v15114_v59 }
 0xea5   : > { %v8456_v13 = vmax.f32 %v8180_v24, 0.0  ;;  %v8037_v12 = vadd.f32 %v8036_v1, %v7948_v31 }
 0xea7   : > { %8680 = vst [vmem:[%s14323_s28 + $0xd0] sm:$0xff] %v8456_v13  ;;  %v8553_v8 = vmax.f32 %v8037_v12, 0.0  ;;  %8265 = vmatmul.bf16.gmra.mxu2 %v14095_v57  ;;  %8354 = vmatmul.bf16.gmra.mxu3 %v14097_v16 }
 0xea8   : > { %v8093_v26 = vpop.f32.mrf.mxu0  ;;  %v8182_v25 = vpop.f32.mrf.mxu1 }
 0xea9   : > { %8777 = vst [vmem:[%s14323_s28 + $0x3d8] sm:$0xff] %v8553_v8  ;;  %v8094_v21 = vadd.f32 %v8093_v26, %v15234_v9 }
 0xeaa   : > { %v7950_v6 = vpop.f32.mrf.mxu2  ;;  %v8039_v7 = vpop.f32.mrf.mxu3 }
 0xeab   : > { %v8183_v43 = vadd.f32 %v8182_v25, %v8094_v21  ;;  %v7951_v55 = vadd.f32 %v7950_v6, %v15114_v59  ;;  %8132 = vmatmul.bf16.gmra.mxu0 %v14346_v19  ;;  %8221 = vmatmul.bf16.gmra.mxu1 %v14348_v27 }
 0xead   : > { %v8463_v30 = vmax.f32 %v8183_v43, 0.0  ;;  %v8040_v57 = vadd.f32 %v8039_v7, %v7951_v55 }
 0xeaf   : > { %8687 = vst [vmem:[%s14323_s28 + $0x108] sm:$0xff] %v8463_v30  ;;  %v8560_v16 = vmax.f32 %v8040_v57, 0.0 }
 0xeb0   : > { %v8095_v20 = vpop.f32.mrf.mxu0  ;;  %v8184_v35 = vpop.f32.mrf.mxu1 }
 0xeb1   : > { %8784 = vst [vmem:[%s14323_s28 + $0x410] sm:$0xff] %v8560_v16  ;;  %v8096_v51 = vadd.f32 %v8095_v20, %v15234_v9 }
 0xeb2   : > { %v7952_v32 = vpop.f32.mrf.mxu2  ;;  %v8041_v39 = vpop.f32.mrf.mxu3 }
 0xeb3   : > { %v8185_v47 = vadd.f32 %v8184_v35, %v8096_v51  ;;  %v7953_v33 = vadd.f32 %v7952_v32, %v15114_v59 }
 0xeb5   : > { %v8470_v50 = vmax.f32 %v8185_v47, 0.0  ;;  %v8042_v49 = vadd.f32 %v8041_v39, %v7953_v33 }
 0xeb7   : > { %8694 = vst [vmem:[%s14323_s28 + $0x140] sm:$0xff] %v8470_v50  ;;  %v8567_v36 = vmax.f32 %v8042_v49, 0.0  ;;  %8270 = vmatmul.bf16.gmra.mxu2 %v14107_v17  ;;  %8359 = vmatmul.bf16.gmra.mxu3 %v14109_v18 }
 0xeb8   : > { %v8098_v10 = vpop.f32.mrf.mxu0  ;;  %v8187_v40 = vpop.f32.mrf.mxu1 }
 0xeb9   : > { %8791 = vst [vmem:[%s14323_s28 + $0x448] sm:$0xff] %v8567_v36  ;;  %v8099_v56 = vadd.f32 %v8098_v10, %v15234_v9 }
 0xeba   : > { %v7955_v0 = vpop.f32.mrf.mxu2  ;;  %v8044_v28 = vpop.f32.mrf.mxu3 }
 0xebb   : > { %v8188_v14 = vadd.f32 %v8187_v40, %v8099_v56  ;;  %v7956_v3 = vadd.f32 %v7955_v0, %v15114_v59  ;;  %8137 = vmatmul.bf16.gmra.mxu0 %v14374_v11  ;;  %8226 = vmatmul.bf16.gmra.mxu1 %v14376_v41 }
 0xebd   : > { %v8477_v1 = vmax.f32 %v8188_v14, 0.0  ;;  %v8045_v17 = vadd.f32 %v8044_v28, %v7956_v3 }
 0xebf   : > { %8701 = vst [vmem:[%s14323_s28 + $0x178] sm:$0xff] %v8477_v1  ;;  %v8574_v18 = vmax.f32 %v8045_v17, 0.0 }
 0xec0   : > { %v8100_v24 = vpop.f32.mrf.mxu0  ;;  %v8189_v31 = vpop.f32.mrf.mxu1 }
 0xec1   : > { %8798 = vst [vmem:[%s14323_s28 + $0x480] sm:$0xff] %v8574_v18  ;;  %v8101_v13 = vadd.f32 %v8100_v24, %v15234_v9 }
 0xec2   : > { %v7957_v12 = vpop.f32.mrf.mxu2  ;;  %v8046_v8 = vpop.f32.mrf.mxu3 }
 0xec3   : > { %v8190_v26 = vadd.f32 %v8189_v31, %v8101_v13  ;;  %v7958_v25 = vadd.f32 %v7957_v12, %v15114_v59 }
 0xec5   : > { %v8484_v21 = vmax.f32 %v8190_v26, 0.0  ;;  %v8047_v6 = vadd.f32 %v8046_v8, %v7958_v25 }
 0xec7   : > { %8708 = vst [vmem:[%s14323_s28 + $0x1b0] sm:$0xff] %v8484_v21  ;;  %v8581_v7 = vmax.f32 %v8047_v6, 0.0  ;;  %8275 = vmatmul.bf16.gmra.mxu2 %v14143_v53  ;;  %8364 = vmatmul.bf16.gmra.mxu3 %v14145_v46 }
 0xec8   : > { %v8103_v43 = vpop.f32.mrf.mxu0  ;;  %v8192_v55 = vpop.f32.mrf.mxu1 }
 0xec9   : > { %8805 = vst [vmem:[%s14323_s28 + $0x4b8] sm:$0xff] %v8581_v7  ;;  %v8104_v30 = vadd.f32 %v8103_v43, %v15234_v9 }
 0xeca   : > { %v7960_v57 = vpop.f32.mrf.mxu2  ;;  %v8049_v16 = vpop.f32.mrf.mxu3 }
 0xecb   : > { %v8193_v20 = vadd.f32 %v8192_v55, %v8104_v30  ;;  %v7961_v35 = vadd.f32 %v7960_v57, %v15114_v59  ;;  %8142 = vmatmul.bf16.gmra.mxu0 %v14390_v2  ;;  %8231 = vmatmul.bf16.gmra.mxu1 %v14392_v15 }
 0xecd   : > { %v8491_v51 = vmax.f32 %v8193_v20, 0.0  ;;  %v8050_v53 = vadd.f32 %v8049_v16, %v7961_v35 }
 0xecf   : > { %8715 = vst [vmem:[%s14323_s28 + $0x1e8] sm:$0xff] %v8491_v51  ;;  %v8588_v46 = vmax.f32 %v8050_v53, 0.0 }
 0xed0   : > { %v8105_v32 = vpop.f32.mrf.mxu0  ;;  %v8194_v39 = vpop.f32.mrf.mxu1 }
 0xed1   : > { %8812 = vst [vmem:[%s14323_s28 + $0x4f0] sm:$0xff] %v8588_v46  ;;  %v8106_v47 = vadd.f32 %v8105_v32, %v15234_v9 }
 0xed2   : > { %v7962_v33 = vpop.f32.mrf.mxu2  ;;  %v8051_v50 = vpop.f32.mrf.mxu3 }
 0xed3   : > { %v8195_v49 = vadd.f32 %v8194_v39, %v8106_v47  ;;  %v7963_v36 = vadd.f32 %v7962_v33, %v15114_v59 }
 0xed5   : > { %v8498_v10 = vmax.f32 %v8195_v49, 0.0  ;;  %v8052_v40 = vadd.f32 %v8051_v50, %v7963_v36 }
 0xed7   : > { %8722 = vst [vmem:[%s14323_s28 + $0x220] sm:$0xff] %v8498_v10  ;;  %v8595_v56 = vmax.f32 %v8052_v40, 0.0  ;;  %8280 = vmatmul.bf16.gmra.mxu2 %v14155_v62  ;;  %8369 = vmatmul.bf16.gmra.mxu3 %v14157_v22 }
 0xed8   : > { %v8108_v0 = vpop.f32.mrf.mxu0  ;;  %v8197_v28 = vpop.f32.mrf.mxu1 }
 0xed9   : > { %8819 = vst [vmem:[%s14323_s28 + $0x528] sm:$0xff] %v8595_v56  ;;  %v8109_v14 = vadd.f32 %v8108_v0, %v15234_v9 }
 0xeda   : > { %v7965_v3 = vpop.f32.mrf.mxu2  ;;  %v8054_v1 = vpop.f32.mrf.mxu3 }
 0xedb   : > { %v8198_v17 = vadd.f32 %v8197_v28, %v8109_v14  ;;  %v7966_v18 = vadd.f32 %v7965_v3, %v15114_v59  ;;  %8147 = vmatmul.bf16.gmra.mxu0 %v14418_v34  ;;  %8236 = vmatmul.bf16.gmra.mxu1 %v14420_v29 }
 0xedd   : > { %v8505_v24 = vmax.f32 %v8198_v17, 0.0  ;;  %v8055_v62 = vadd.f32 %v8054_v1, %v7966_v18 }
 0xedf   : > { %8729 = vst [vmem:[%s14323_s28 + $0x258] sm:$0xff] %v8505_v24  ;;  %v8602_v22 = vmax.f32 %v8055_v62, 0.0 }
 0xee0   : > { %v8110_v31 = vpop.f32.mrf.mxu0  ;;  %v8199_v13 = vpop.f32.mrf.mxu1 }
 0xee1   : > { %8826 = vst [vmem:[%s14323_s28 + $0x560] sm:$0xff] %v8602_v22  ;;  %v8111_v12 = vadd.f32 %v8110_v31, %v15234_v9 }
 0xee2   : > { %v7967_v8 = vpop.f32.mrf.mxu2  ;;  %v8056_v26 = vpop.f32.mrf.mxu3 }
 0xee3   : > { %v8200_v25 = vadd.f32 %v8199_v13, %v8111_v12  ;;  %v7968_v21 = vadd.f32 %v7967_v8, %v15114_v59 }
 0xee5   : > { %v8512_v6 = vmax.f32 %v8200_v25, 0.0  ;;  %v8057_v7 = vadd.f32 %v8056_v26, %v7968_v21 }
 0xee7   : > { %8736 = vst [vmem:[%s14323_s28 + $0x290] sm:$0xff] %v8512_v6  ;;  %v8609_v43 = vmax.f32 %v8057_v7, 0.0  ;;  %8285 = vmatmul.bf16.gmra.mxu2 %v14227_v63  ;;  %8374 = vmatmul.bf16.gmra.mxu3 %v14229_v54 }
 0xee8   : > { %v8113_v55 = vpop.f32.mrf.mxu0  ;;  %v8202_v30 = vpop.f32.mrf.mxu1 }
 0xee9   : > { %8833 = vst [vmem:[%s14323_s28 + $0x598] sm:$0xff] %v8609_v43  ;;  %v8114_v57 = vadd.f32 %v8113_v55, %v15234_v9 }
 0xeea   : > { %v7970_v16 = vpop.f32.mrf.mxu2  ;;  %v8059_v20 = vpop.f32.mrf.mxu3 }
 0xeeb   : > { %v8203_v35 = vadd.f32 %v8202_v30, %v8114_v57  ;;  %v7971_v51 = vadd.f32 %v7970_v16, %v15114_v59  ;;  %8152 = vmatmul.bf16.gmra.mxu0 %v14434_v45  ;;  %8241 = vmatmul.bf16.gmra.mxu1 %v14436_v52 }
 0xeed   : > { %v8519_v53 = vmax.f32 %v8203_v35, 0.0  ;;  %v8060_v63 = vadd.f32 %v8059_v20, %v7971_v51 }
 0xeef   : > { %8743 = vst [vmem:[%s14323_s28 + $0x2c8] sm:$0xff] %v8519_v53  ;;  %v8616_v54 = vmax.f32 %v8060_v63, 0.0 }
 0xef0   : > { %v8115_v46 = vpop.f32.mrf.mxu0  ;;  %v8204_v32 = vpop.f32.mrf.mxu1 }
 0xef1   : > { %8840 = vst [vmem:[%s14323_s28 + $0x5d0] sm:$0xff] %v8616_v54  ;;  %v8116_v39 = vadd.f32 %v8115_v46, %v15234_v9 }
 0xef2   : > { %v7972_v47 = vpop.f32.mrf.mxu2  ;;  %v8061_v33 = vpop.f32.mrf.mxu3 }
 0xef3   : > { %v8205_v50 = vadd.f32 %v8204_v32, %v8116_v39  ;;  %v7973_v49 = vadd.f32 %v7972_v47, %v15114_v59 }
 0xef5   : > { %v8526_v36 = vmax.f32 %v8205_v50, 0.0  ;;  %v8062_v10 = vadd.f32 %v8061_v33, %v7973_v49  ;;  %v15346_v50 = vperm.slane %v14292_v4, 6 }
 0xef7   : > { %8750 = vst [vmem:[%s14323_s28 + $0x300] sm:$0xff] %v8526_v36  ;;  %v8623_v40 = vmax.f32 %v8062_v10, 0.0  ;;  %8290 = vmatmul.bf16.gmra.mxu2 %v14251_v61  ;;  %8379 = vmatmul.bf16.gmra.mxu3 %v14253_v42 }
 0xef8   : > { %v8118_v56 = vpop.f32.mrf.mxu0  ;;  %v8207_v0 = vpop.f32.mrf.mxu1 }
 0xef9   : > { %8847 = vst [vmem:[%s14323_s28 + $0x608] sm:$0xff] %v8623_v40  ;;  %v8119_v28 = vadd.f32 %v8118_v56, %v15234_v9 }
 0xefa   : > { %v7975_v14 = vpop.f32.mrf.mxu2  ;;  %v8064_v3 = vpop.f32.mrf.mxu3 }
 0xefb   : > { %v8208_v1 = vadd.f32 %v8207_v0, %v8119_v28  ;;  %v7976_v17 = vadd.f32 %v7975_v14, %v15114_v59  ;;  %8157 = vmatmul.bf16.gmra.mxu0 %v14474_v37  ;;  %8246 = vmatmul.bf16.gmra.mxu1 %v14476_v5 }
 0xefd   : > { %v8533_v18 = vmax.f32 %v8208_v1, 0.0  ;;  %v8065_v61 = vadd.f32 %v8064_v3, %v7976_v17 }
 0xeff   : > { %8757 = vst [vmem:[%s14323_s28 + $0x338] sm:$0xff] %v8533_v18  ;;  %v8630_v42 = vmax.f32 %v8065_v61, 0.0 }
 0xf00   : > { %v8120_v24 = vpop.f32.mrf.mxu0  ;;  %v8209_v62 = vpop.f32.mrf.mxu1 }
 0xf01   : > { %8854 = vst [vmem:[%s14323_s28 + $0x640] sm:$0xff] %v8630_v42  ;;  %v8121_v22 = vadd.f32 %v8120_v24, %v15234_v9 }
 0xf02   : > { %v7977_v31 = vpop.f32.mrf.mxu2  ;;  %v8066_v13 = vpop.f32.mrf.mxu3 }
 0xf03   : > { %v8210_v12 = vadd.f32 %v8209_v62, %v8121_v22  ;;  %v7978_v8 = vadd.f32 %v7977_v31, %v15114_v59 }
 0xf05   : > { %v8540_v26 = vmax.f32 %v8210_v12, 0.0  ;;  %v8067_v25 = vadd.f32 %v8066_v13, %v7978_v8 }
 0xf07   : > { %8764 = vst [vmem:[%s14323_s28 + $0x370] sm:$0xff] %v8540_v26  ;;  %v8637_v21 = vmax.f32 %v8067_v25, 0.0  ;;  %8295 = vmatmul.bf16.gmra.mxu2 %v14274_v44  ;;  %8384 = vmatmul.bf16.gmra.mxu3 %v14276_v38 }
 0xf08   : > { %v8123_v6 = vpop.f32.mrf.mxu0  ;;  %v8212_v7 = vpop.f32.mrf.mxu1 }
 0xf09   : > { %8861 = vst [vmem:[%s14323_s28 + $0x678] sm:$0xff] %v8637_v21  ;;  %v8124_v43 = vadd.f32 %v8123_v6, %v15234_v9 }
 0xf0a   : > { %v7980_v55 = vpop.f32.mrf.mxu2  ;;  %v8069_v30 = vpop.f32.mrf.mxu3 }
 0xf0b   : > { %v8213_v57 = vadd.f32 %v8212_v7, %v8124_v43  ;;  %v7981_v16 = vadd.f32 %v7980_v55, %v15114_v59 }
 0xf0d   : > { %v8547_v20 = vmax.f32 %v8213_v57, 0.0  ;;  %v8070_v35 = vadd.f32 %v8069_v30, %v7981_v16 }
 0xf0f   : > { %8771 = vst [vmem:[%s14323_s28 + $0x3a8] sm:$0xff] %v8547_v20  ;;  %v8644_v51 = vmax.f32 %v8070_v35, 0.0 }
 0xf10   : > { %v8125_v53 = vpop.f32.mrf.mxu0  ;;  %v8214_v44 = vpop.f32.mrf.mxu1 }
 0xf11   : > { %8868 = vst [vmem:[%s14323_s28 + $0x6b0] sm:$0xff] %v8644_v51  ;;  %v8126_v38 = vadd.f32 %v8125_v53, %v15234_v9 }
 0xf12   : > { %v7982_v63 = vpop.f32.mrf.mxu2  ;;  %v8071_v54 = vpop.f32.mrf.mxu3 }
 0xf13   : > { %v8215_v46 = vadd.f32 %v8214_v44, %v8126_v38  ;;  %v7983_v32 = vadd.f32 %v7982_v63, %v15114_v59 }
 0xf15   : > { %v8554_v39 = vmax.f32 %v8215_v46, 0.0  ;;  %v8072_v47 = vadd.f32 %v8071_v54, %v7983_v32 }
 0xf17   : > { %8778 = vst [vmem:[%s14323_s28 + $0x3e0] sm:$0xff] %v8554_v39  ;;  %v8651_v33 = vmax.f32 %v8072_v47, 0.0  ;;  %8300 = vmatmul.bf16.gmra.mxu2 %v14294_v60  ;;  %8389 = vmatmul.bf16.gmra.mxu3 %v14296_v23 }
 0xf18   : > { %v8128_v49 = vpop.f32.mrf.mxu0  ;;  %v8217_v36 = vpop.f32.mrf.mxu1 }
 0xf19   : > { %8875 = vst [vmem:[%s14323_s28 + $0x6e8] sm:$0xff] %v8651_v33  ;;  %v8129_v10 = vadd.f32 %v8128_v49, %v15234_v9 }
 0xf1a   : > { %v8261_v40 = vpop.f32.mrf.mxu2  ;;  %v8350_v59 = vpop.f32.mrf.mxu3 }
 0xf1b   : > { %v8218_v56 = vadd.f32 %v8217_v36, %v8129_v10  ;;  %v8262_v0 = vadd.f32 %v8261_v40, %v15346_v50 }
 0xf1d   : > { %v8561_v28 = vmax.f32 %v8218_v56, 0.0  ;;  %v8351_v14 = vadd.f32 %v8350_v59, %v8262_v0 }
 0xf1f   : > { %8785 = vst [vmem:[%s14323_s28 + $0x418] sm:$0xff] %v8561_v28  ;;  %v8436_v60 = vmax.f32 %v8351_v14, 0.0 }
 0xf20   : > { %v8130_v23 = vpop.f32.mrf.mxu0  ;;  %v8219_v3 = vpop.f32.mrf.mxu1 }
 0xf21   : > { %8660 = vst [vmem:[%s14323_s28 + $0x30] sm:$0xff] %v8436_v60  ;;  %v8131_v4 = vadd.f32 %v8130_v23, %v15234_v9 }
 0xf22   : > { %v8263_v1 = vpop.f32.mrf.mxu2  ;;  %v8352_v17 = vpop.f32.mrf.mxu3 }
 0xf23   : > { %v8220_v18 = vadd.f32 %v8219_v3, %v8131_v4  ;;  %v8264_v61 = vadd.f32 %v8263_v1, %v15346_v50 }
 0xf25   : > { %v8568_v42 = vmax.f32 %v8220_v18, 0.0  ;;  %v8353_v24 = vadd.f32 %v8352_v17, %v8264_v61 }
 0xf27   : > { %8792 = vst [vmem:[%s14323_s28 + $0x450] sm:$0xff] %v8568_v42  ;;  %v8443_v62 = vmax.f32 %v8353_v24, 0.0  ;;  %8305 = vmatmul.bf16.gmra.mxu2 %v14330_v58  ;;  %8394 = vmatmul.bf16.gmra.mxu3 %v14332_v48 }
 0xf28   : > { %v8133_v22 = vpop.f32.mrf.mxu0  ;;  %v8222_v31 = vpop.f32.mrf.mxu1 }
 0xf29   : > { %8667 = vst [vmem:[%s14323_s28 + $0x68] sm:$0xff] %v8443_v62  ;;  %v8134_v13 = vadd.f32 %v8133_v22, %v15234_v9 }
 0xf2a   : > { %v8266_v12 = vpop.f32.mrf.mxu2  ;;  %v8355_v8 = vpop.f32.mrf.mxu3 }
 0xf2b   : > { %v8223_v26 = vadd.f32 %v8222_v31, %v8134_v13  ;;  %v8267_v25 = vadd.f32 %v8266_v12, %v15346_v50 }
 0xf2d   : > { %v8575_v21 = vmax.f32 %v8223_v26, 0.0  ;;  %v8356_v6 = vadd.f32 %v8355_v8, %v8267_v25 }
 0xf2f   : > { %8799 = vst [vmem:[%s14323_s28 + $0x488] sm:$0xff] %v8575_v21  ;;  %v8450_v7 = vmax.f32 %v8356_v6, 0.0 }
 0xf30   : > { %v8135_v43 = vpop.f32.mrf.mxu0  ;;  %v8224_v58 = vpop.f32.mrf.mxu1 }
 0xf31   : > { %8674 = vst [vmem:[%s14323_s28 + $0xa0] sm:$0xff] %v8450_v7  ;;  %v8136_v48 = vadd.f32 %v8135_v43, %v15234_v9 }
 0xf32   : > { %v8268_v55 = vpop.f32.mrf.mxu2  ;;  %v8357_v30 = vpop.f32.mrf.mxu3 }
 0xf33   : > { %v8225_v57 = vadd.f32 %v8224_v58, %v8136_v48  ;;  %v8269_v16 = vadd.f32 %v8268_v55, %v15346_v50 }
 0xf35   : > { %v8582_v20 = vmax.f32 %v8225_v57, 0.0  ;;  %v8358_v35 = vadd.f32 %v8357_v30, %v8269_v16 }
 0xf37   : > { %8806 = vst [vmem:[%s14323_s28 + $0x4c0] sm:$0xff] %v8582_v20  ;;  %v8457_v51 = vmax.f32 %v8358_v35, 0.0  ;;  %8310 = vmatmul.bf16.gmra.mxu2 %v14346_v19  ;;  %8399 = vmatmul.bf16.gmra.mxu3 %v14348_v27 }
 0xf38   : > { %v8138_v53 = vpop.f32.mrf.mxu0  ;;  %v8227_v44 = vpop.f32.mrf.mxu1 }
 0xf39   : > { %8681 = vst [vmem:[%s14323_s28 + $0xd8] sm:$0xff] %v8457_v51  ;;  %v8139_v38 = vadd.f32 %v8138_v53, %v15234_v9 }
 0xf3a   : > { %v8271_v63 = vpop.f32.mrf.mxu2  ;;  %v8360_v54 = vpop.f32.mrf.mxu3 }
 0xf3b   : > { %v8228_v46 = vadd.f32 %v8227_v44, %v8139_v38  ;;  %v8272_v32 = vadd.f32 %v8271_v63, %v15346_v50 }
 0xf3d   : > { %v8589_v39 = vmax.f32 %v8228_v46, 0.0  ;;  %v8361_v47 = vadd.f32 %v8360_v54, %v8272_v32 }
 0xf3f   : > { %8813 = vst [vmem:[%s14323_s28 + $0x4f8] sm:$0xff] %v8589_v39  ;;  %v8464_v33 = vmax.f32 %v8361_v47, 0.0 }
 0xf40   : > { %v8140_v49 = vpop.f32.mrf.mxu0  ;;  %v8229_v19 = vpop.f32.mrf.mxu1 }
 0xf41   : > { %8688 = vst [vmem:[%s14323_s28 + $0x110] sm:$0xff] %v8464_v33  ;;  %v8141_v27 = vadd.f32 %v8140_v49, %v15234_v9 }
 0xf42   : > { %v8273_v36 = vpop.f32.mrf.mxu2  ;;  %v8362_v10 = vpop.f32.mrf.mxu3 }
 0xf43   : > { %v8230_v40 = vadd.f32 %v8229_v19, %v8141_v27  ;;  %v8274_v59 = vadd.f32 %v8273_v36, %v15346_v50 }
 0xf45   : > { %v8596_v56 = vmax.f32 %v8230_v40, 0.0  ;;  %v8363_v0 = vadd.f32 %v8362_v10, %v8274_v59 }
 0xf47   : > { %8820 = vst [vmem:[%s14323_s28 + $0x530] sm:$0xff] %v8596_v56  ;;  %v8471_v28 = vmax.f32 %v8363_v0, 0.0  ;;  %8315 = vmatmul.bf16.gmra.mxu2 %v14374_v11  ;;  %8404 = vmatmul.bf16.gmra.mxu3 %v14376_v41 }
 0xf48   : > { %v8143_v14 = vpop.f32.mrf.mxu0  ;;  %v8232_v60 = vpop.f32.mrf.mxu1 }
 0xf49   : > { %8695 = vst [vmem:[%s14323_s28 + $0x148] sm:$0xff] %v8471_v28  ;;  %v8144_v23 = vadd.f32 %v8143_v14, %v15234_v9 }
 0xf4a   : > { %v8276_v3 = vpop.f32.mrf.mxu2  ;;  %v8365_v4 = vpop.f32.mrf.mxu3 }
 0xf4b   : > { %v8233_v1 = vadd.f32 %v8232_v60, %v8144_v23  ;;  %v8277_v17 = vadd.f32 %v8276_v3, %v15346_v50 }
 0xf4d   : > { %v8603_v18 = vmax.f32 %v8233_v1, 0.0  ;;  %v8366_v61 = vadd.f32 %v8365_v4, %v8277_v17 }
 0xf4f   : > { %8827 = vst [vmem:[%s14323_s28 + $0x568] sm:$0xff] %v8603_v18  ;;  %v8478_v42 = vmax.f32 %v8366_v61, 0.0 }
 0xf50   : > { %v8145_v24 = vpop.f32.mrf.mxu0  ;;  %v8234_v11 = vpop.f32.mrf.mxu1 }
 0xf51   : > { %8702 = vst [vmem:[%s14323_s28 + $0x180] sm:$0xff] %v8478_v42  ;;  %v8146_v41 = vadd.f32 %v8145_v24, %v15234_v9 }
 0xf52   : > { %v8278_v62 = vpop.f32.mrf.mxu2  ;;  %v8367_v22 = vpop.f32.mrf.mxu3 }
 0xf53   : > { %v8235_v31 = vadd.f32 %v8234_v11, %v8146_v41  ;;  %v8279_v13 = vadd.f32 %v8278_v62, %v15346_v50 }
 0xf55   : > { %v8610_v12 = vmax.f32 %v8235_v31, 0.0  ;;  %v8368_v8 = vadd.f32 %v8367_v22, %v8279_v13 }
 0xf57   : > { %8834 = vst [vmem:[%s14323_s28 + $0x5a0] sm:$0xff] %v8610_v12  ;;  %v8485_v26 = vmax.f32 %v8368_v8, 0.0  ;;  %8320 = vmatmul.bf16.gmra.mxu2 %v14390_v2  ;;  %8409 = vmatmul.bf16.gmra.mxu3 %v14392_v15 }
 0xf58   : > { %v8148_v25 = vpop.f32.mrf.mxu0  ;;  %v8237_v21 = vpop.f32.mrf.mxu1 }
 0xf59   : > { %8709 = vst [vmem:[%s14323_s28 + $0x1b8] sm:$0xff] %v8485_v26  ;;  %v8149_v6 = vadd.f32 %v8148_v25, %v15234_v9 }
 0xf5a   : > { %v8281_v7 = vpop.f32.mrf.mxu2  ;;  %v8370_v43 = vpop.f32.mrf.mxu3 }
 0xf5b   : > { %v8238_v58 = vadd.f32 %v8237_v21, %v8149_v6  ;;  %v8282_v48 = vadd.f32 %v8281_v7, %v15346_v50 }
 0xf5d   : > { %v8617_v55 = vmax.f32 %v8238_v58, 0.0  ;;  %v8371_v30 = vadd.f32 %v8370_v43, %v8282_v48 }
 0xf5f   : > { %8841 = vst [vmem:[%s14323_s28 + $0x5d8] sm:$0xff] %v8617_v55  ;;  %v8492_v57 = vmax.f32 %v8371_v30, 0.0 }
 0xf60   : > { %v8150_v16 = vpop.f32.mrf.mxu0  ;;  %v8239_v2 = vpop.f32.mrf.mxu1 }
 0xf61   : > { %8716 = vst [vmem:[%s14323_s28 + $0x1f0] sm:$0xff] %v8492_v57  ;;  %v8151_v15 = vadd.f32 %v8150_v16, %v15234_v9 }
 0xf62   : > { %v8283_v20 = vpop.f32.mrf.mxu2  ;;  %v8372_v35 = vpop.f32.mrf.mxu3 }
 0xf63   : > { %v8240_v51 = vadd.f32 %v8239_v2, %v8151_v15  ;;  %v8284_v53 = vadd.f32 %v8283_v20, %v15346_v50 }
 0xf65   : > { %v8624_v44 = vmax.f32 %v8240_v51, 0.0  ;;  %v8373_v38 = vadd.f32 %v8372_v35, %v8284_v53 }
 0xf67   : > { %8848 = vst [vmem:[%s14323_s28 + $0x610] sm:$0xff] %v8624_v44  ;;  %v8499_v63 = vmax.f32 %v8373_v38, 0.0  ;;  %8325 = vmatmul.bf16.gmra.mxu2 %v14418_v34  ;;  %8414 = vmatmul.bf16.gmra.mxu3 %v14420_v29 }
 0xf68   : > { %v8153_v54 = vpop.f32.mrf.mxu0  ;;  %v8242_v46 = vpop.f32.mrf.mxu1 }
 0xf69   : > { %8723 = vst [vmem:[%s14323_s28 + $0x228] sm:$0xff] %v8499_v63  ;;  %v8154_v32 = vadd.f32 %v8153_v54, %v15234_v9 }
 0xf6a   : > { %v8286_v39 = vpop.f32.mrf.mxu2  ;;  %v8375_v47 = vpop.f32.mrf.mxu3 }
 0xf6b   : > { %v8243_v33 = vadd.f32 %v8242_v46, %v8154_v32  ;;  %v8287_v49 = vadd.f32 %v8286_v39, %v15346_v50 }
 0xf6d   : > { %v8631_v19 = vmax.f32 %v8243_v33, 0.0  ;;  %v8376_v27 = vadd.f32 %v8375_v47, %v8287_v49 }
 0xf6f   : > { %8855 = vst [vmem:[%s14323_s28 + $0x648] sm:$0xff] %v8631_v19  ;;  %v8506_v36 = vmax.f32 %v8376_v27, 0.0 }
 0xf70   : > { %v8155_v10 = vpop.f32.mrf.mxu0  ;;  %v8244_v34 = vpop.f32.mrf.mxu1 }
 0xf71   : > { %8730 = vst [vmem:[%s14323_s28 + $0x260] sm:$0xff] %v8506_v36  ;;  %v8156_v29 = vadd.f32 %v8155_v10, %v15234_v9 }
 0xf72   : > { %v8288_v40 = vpop.f32.mrf.mxu2  ;;  %v8377_v59 = vpop.f32.mrf.mxu3 }
 0xf73   : > { %v8245_v56 = vadd.f32 %v8244_v34, %v8156_v29  ;;  %v8289_v0 = vadd.f32 %v8288_v40, %v15346_v50 }
 0xf75   : > { %v8638_v28 = vmax.f32 %v8245_v56, 0.0  ;;  %v8378_v14 = vadd.f32 %v8377_v59, %v8289_v0 }
 0xf77   : > { %8862 = vst [vmem:[%s14323_s28 + $0x680] sm:$0xff] %v8638_v28  ;;  %v8513_v60 = vmax.f32 %v8378_v14, 0.0  ;;  %8330 = vmatmul.bf16.gmra.mxu2 %v14434_v45  ;;  %8419 = vmatmul.bf16.gmra.mxu3 %v14436_v52 }
 0xf78   : > { %v8158_v23 = vpop.f32.mrf.mxu0  ;;  %v8247_v3 = vpop.f32.mrf.mxu1 }
 0xf79   : > { %8737 = vst [vmem:[%s14323_s28 + $0x298] sm:$0xff] %v8513_v60  ;;  %v8159_v4 = vadd.f32 %v8158_v23, %v15234_v9 }
 0xf7a   : > { %v8291_v1 = vpop.f32.mrf.mxu2  ;;  %v8380_v17 = vpop.f32.mrf.mxu3 }
 0xf7b   : > { %v8248_v18 = vadd.f32 %v8247_v3, %v8159_v4  ;;  %v8292_v61 = vadd.f32 %v8291_v1, %v15346_v50 }
 0xf7d   : > { %v8645_v42 = vmax.f32 %v8248_v18, 0.0  ;;  %v8381_v24 = vadd.f32 %v8380_v17, %v8292_v61 }
 0xf7f   : > { %8869 = vst [vmem:[%s14323_s28 + $0x6b8] sm:$0xff] %v8645_v42  ;;  %v8520_v11 = vmax.f32 %v8381_v24, 0.0 }
 0xf80   : > { %v8160_v41 = vpop.f32.mrf.mxu0  ;;  %v8249_v52 = vpop.f32.mrf.mxu1 }
 0xf81   : > { %8744 = vst [vmem:[%s14323_s28 + $0x2d0] sm:$0xff] %v8520_v11  ;;  %v8161_v45 = vadd.f32 %v8160_v41, %v15234_v9 }
 0xf82   : > { %v8293_v62 = vpop.f32.mrf.mxu2  ;;  %v8382_v22 = vpop.f32.mrf.mxu3 }
 0xf83   : > { %v8250_v31 = vadd.f32 %v8249_v52, %v8161_v45  ;;  %v8294_v13 = vadd.f32 %v8293_v62, %v15346_v50 }
 0xf85   : > { %v8652_v12 = vmax.f32 %v8250_v31, 0.0  ;;  %v8383_v8 = vadd.f32 %v8382_v22, %v8294_v13 }
 0xf87   : > { %8876 = vst [vmem:[%s14323_s28 + $0x6f0] sm:$0xff] %v8652_v12  ;;  %v8527_v26 = vmax.f32 %v8383_v8, 0.0  ;;  %8335 = vmatmul.bf16.gmra.mxu2 %v14474_v37  ;;  %8424 = vmatmul.bf16.gmra.mxu3 %v14476_v5 }
 0xf89   : > { %8751 = vst [vmem:[%s14323_s28 + $0x308] sm:$0xff] %v8527_v26 }
 0xf8a   : > { %v8296_v25 = vpop.f32.mrf.mxu2  ;;  %v8385_v21 = vpop.f32.mrf.mxu3 }
 0xf8b   : > { %v8297_v9 = vadd.f32 %v8296_v25, %v15346_v50 }
 0xf8d   : > { %v8386_v6 = vadd.f32 %v8385_v21, %v8297_v9 }
 0xf8f   : > { %v8534_v7 = vmax.f32 %v8386_v6, 0.0 }
 0xf91   : > { %8758 = vst [vmem:[%s14323_s28 + $0x340] sm:$0xff] %v8534_v7 }
 0xf92   : > { %v8298_v43 = vpop.f32.mrf.mxu2  ;;  %v8387_v58 = vpop.f32.mrf.mxu3 }
 0xf93   : > { %v8299_v48 = vadd.f32 %v8298_v43, %v15346_v50 }
 0xf95   : > { %v8388_v55 = vadd.f32 %v8387_v58, %v8299_v48 }
 0xf97   : > { %v8541_v30 = vmax.f32 %v8388_v55, 0.0 }
 0xf99   : > { %8765 = vst [vmem:[%s14323_s28 + $0x378] sm:$0xff] %v8541_v30 }
 0xf9a   : > { %v8301_v37 = vpop.f32.mrf.mxu2  ;;  %v8390_v57 = vpop.f32.mrf.mxu3 }
 0xf9b   : > { %v8302_v5 = vadd.f32 %v8301_v37, %v15346_v50 }
 0xf9d   : > { %v8391_v16 = vadd.f32 %v8390_v57, %v8302_v5 }
 0xf9f   : > { %v8548_v2 = vmax.f32 %v8391_v16, 0.0 }
 0xfa1   : > { %8772 = vst [vmem:[%s14323_s28 + $0x3b0] sm:$0xff] %v8548_v2 }
 0xfa2   : > { %v8303_v15 = vpop.f32.mrf.mxu2  ;;  %v8392_v20 = vpop.f32.mrf.mxu3 }
 0xfa3   : > { %v8304_v35 = vadd.f32 %v8303_v15, %v15346_v50 }
 0xfa5   : > { %v8393_v51 = vadd.f32 %v8392_v20, %v8304_v35 }
 0xfa7   : > { %v8555_v53 = vmax.f32 %v8393_v51, 0.0 }
 0xfa9   : > { %8779 = vst [vmem:[%s14323_s28 + $0x3e8] sm:$0xff] %v8555_v53 }
 0xfaa   : > { %v8306_v44 = vpop.f32.mrf.mxu2  ;;  %v8395_v38 = vpop.f32.mrf.mxu3 }
 0xfab   : > { %v8307_v63 = vadd.f32 %v8306_v44, %v15346_v50 }
 0xfad   : > { %v8396_v54 = vadd.f32 %v8395_v38, %v8307_v63 }
 0xfaf   : > { %v8562_v46 = vmax.f32 %v8396_v54, 0.0 }
 0xfb1   : > { %8786 = vst [vmem:[%s14323_s28 + $0x420] sm:$0xff] %v8562_v46 }
 0xfb2   : > { %v8308_v32 = vpop.f32.mrf.mxu2  ;;  %v8397_v39 = vpop.f32.mrf.mxu3 }
 0xfb3   : > { %v8309_v47 = vadd.f32 %v8308_v32, %v15346_v50 }
 0xfb5   : > { %v8398_v33 = vadd.f32 %v8397_v39, %v8309_v47 }
 0xfb7   : > { %v8569_v49 = vmax.f32 %v8398_v33, 0.0 }
 0xfb9   : > { %8793 = vst [vmem:[%s14323_s28 + $0x458] sm:$0xff] %v8569_v49 }
 0xfba   : > { %v8311_v19 = vpop.f32.mrf.mxu2  ;;  %v8400_v27 = vpop.f32.mrf.mxu3 }
 0xfbb   : > { %v8312_v36 = vadd.f32 %v8311_v19, %v15346_v50 }
 0xfbd   : > { %v8401_v10 = vadd.f32 %v8400_v27, %v8312_v36 }
 0xfbf   : > { %v8576_v34 = vmax.f32 %v8401_v10, 0.0 }
 0xfc1   : > { %8800 = vst [vmem:[%s14323_s28 + $0x490] sm:$0xff] %v8576_v34 }
 0xfc2   : > { %v8313_v29 = vpop.f32.mrf.mxu2  ;;  %v8402_v40 = vpop.f32.mrf.mxu3 }
 0xfc3   : > { %v8314_v59 = vadd.f32 %v8313_v29, %v15346_v50 }
 0xfc5   : > { %v8403_v56 = vadd.f32 %v8402_v40, %v8314_v59 }
 0xfc7   : > { %v8583_v0 = vmax.f32 %v8403_v56, 0.0 }
 0xfc9   : > { %8807 = vst [vmem:[%s14323_s28 + $0x4c8] sm:$0xff] %v8583_v0 }
 0xfca   : > { %v8316_v28 = vpop.f32.mrf.mxu2  ;;  %v8405_v14 = vpop.f32.mrf.mxu3 }
 0xfcb   : > { %v8317_v60 = vadd.f32 %v8316_v28, %v15346_v50 }
 0xfcd   : > { %v8406_v23 = vadd.f32 %v8405_v14, %v8317_v60 }
 0xfcf   : > { %v8590_v3 = vmax.f32 %v8406_v23, 0.0 }
 0xfd1   : > { %8814 = vst [vmem:[%s14323_s28 + $0x500] sm:$0xff] %v8590_v3 }
 0xfd2   : > { %v8318_v4 = vpop.f32.mrf.mxu2  ;;  %v8407_v1 = vpop.f32.mrf.mxu3 }
 0xfd3   : > { %v8319_v17 = vadd.f32 %v8318_v4, %v15346_v50 }
 0xfd5   : > { %v8408_v18 = vadd.f32 %v8407_v1, %v8319_v17 }
 0xfd7   : > { %v8597_v61 = vmax.f32 %v8408_v18, 0.0 }
 0xfd9   : > { %8821 = vst [vmem:[%s14323_s28 + $0x538] sm:$0xff] %v8597_v61 }
 0xfda   : > { %v8321_v42 = vpop.f32.mrf.mxu2  ;;  %v8410_v24 = vpop.f32.mrf.mxu3 }
 0xfdb   : > { %v8322_v11 = vadd.f32 %v8321_v42, %v15346_v50 }
 0xfdd   : > { %v8411_v41 = vadd.f32 %v8410_v24, %v8322_v11 }
 0xfdf   : > { %v8604_v45 = vmax.f32 %v8411_v41, 0.0 }
 0xfe1   : > { %8828 = vst [vmem:[%s14323_s28 + $0x570] sm:$0xff] %v8604_v45 }
 0xfe2   : > { %v8323_v52 = vpop.f32.mrf.mxu2  ;;  %v8412_v62 = vpop.f32.mrf.mxu3 }
 0xfe3   : > { %v8324_v22 = vadd.f32 %v8323_v52, %v15346_v50 }
 0xfe5   : > { %v8413_v31 = vadd.f32 %v8412_v62, %v8324_v22 }
 0xfe7   : > { %v8611_v13 = vmax.f32 %v8413_v31, 0.0 }
 0xfe9   : > { %8835 = vst [vmem:[%s14323_s28 + $0x5a8] sm:$0xff] %v8611_v13 }
 0xfea   : > { %v8326_v12 = vpop.f32.mrf.mxu2  ;;  %v8415_v8 = vpop.f32.mrf.mxu3 }
 0xfeb   : > { %v8327_v26 = vadd.f32 %v8326_v12, %v15346_v50 }
 0xfed   : > { %v8416_v25 = vadd.f32 %v8415_v8, %v8327_v26 }
 0xfef   : > { %v8618_v21 = vmax.f32 %v8416_v25, 0.0 }
 0xff1   : > { %8842 = vst [vmem:[%s14323_s28 + $0x5e0] sm:$0xff] %v8618_v21 }
 0xff2   : > { %v8328_v9 = vpop.f32.mrf.mxu2  ;;  %v8417_v6 = vpop.f32.mrf.mxu3 }
 0xff3   : > { %v8329_v7 = vadd.f32 %v8328_v9, %v15346_v50 }
 0xff5   : > { %v8418_v43 = vadd.f32 %v8417_v6, %v8329_v7 }
 0xff7   : > { %v8625_v58 = vmax.f32 %v8418_v43, 0.0 }
 0xff9   : > { %8849 = vst [vmem:[%s14323_s28 + $0x618] sm:$0xff] %v8625_v58 }
 0xffa   : > { %v8331_v48 = vpop.f32.mrf.mxu2  ;;  %v8420_v55 = vpop.f32.mrf.mxu3 }
 0xffb   : > { %v8332_v30 = vadd.f32 %v8331_v48, %v15346_v50 }
 0xffd   : > { %v8421_v37 = vadd.f32 %v8420_v55, %v8332_v30 }
 0xfff   : > { %v8632_v57 = vmax.f32 %v8421_v37, 0.0 }
0x1001   : > { %8856 = vst [vmem:[%s14323_s28 + $0x650] sm:$0xff] %v8632_v57 }
0x1002   : > { %v8333_v5 = vpop.f32.mrf.mxu2  ;;  %v8422_v16 = vpop.f32.mrf.mxu3 }
0x1003   : > { %v8334_v2 = vadd.f32 %v8333_v5, %v15346_v50 }
0x1005   : > { %v8423_v15 = vadd.f32 %v8422_v16, %v8334_v2 }
0x1007   : > { %v8639_v20 = vmax.f32 %v8423_v15, 0.0 }
0x1009   : > { %8863 = vst [vmem:[%s14323_s28 + $0x688] sm:$0xff] %v8639_v20 }
0x100a   : > { %v8336_v35 = vpop.f32.mrf.mxu2  ;;  %v8425_v51 = vpop.f32.mrf.mxu3 }
0x100b   : > { %v8337_v53 = vadd.f32 %v8336_v35, %v15346_v50 }
0x100d   : > { %v8426_v44 = vadd.f32 %v8425_v51, %v8337_v53 }
0x100f   : > { %v8646_v38 = vmax.f32 %v8426_v44, 0.0 }
0x1011   : > { %8870 = vst [vmem:[%s14323_s28 + $0x6c0] sm:$0xff] %v8646_v38 }
0x1012   : > { %v8338_v63 = vpop.f32.mrf.mxu2  ;;  %v8427_v46 = vpop.f32.mrf.mxu3 }
0x1013   : > { %v8339_v54 = vadd.f32 %v8338_v63, %v15346_v50 }
0x1015   : > { %v8428_v32 = vadd.f32 %v8427_v46, %v8339_v54 }
0x1017   : > { %v8653_v39 = vmax.f32 %v8428_v32, 0.0 }
0x1019   : > { %8877 = vst [vmem:[%s14323_s28 + $0x6f8] sm:$0xff] %v8653_v39 }
0x101a PF: > { %s30_s0 = sadd.s32 1, %s11115_s0  }
0x101b   : > { %p27_p4 = scmp.ge.s32.totalorder %s30_s0, 4  }
0x101d   :  { %29 = sbr.rel (!%p27_p4) target bundleno = 5 (0x5), region = 136 }

</bundles_post_ra>
